<compile_context>
chip_gen: v7x
topology: tpu7x:2x2x1
jax: 0.10.0
libtpu: 0.0.40
codegen_flags: <defaults>
</compile_context>

<pallas_src>
import jax
import jax.numpy as jnp
from jax.experimental import pallas as pl
from jax.experimental.pallas import tpu as pltpu

LANE = 128     # last-dim alignment (lanes)
SUBLANE = 8    # second-to-last-dim alignment (sublanes)


# ------------------------------ small helpers ------------------------------

def _cdiv(a, b):
    return -(-a // b)


def _round_up(n, m):
    return _cdiv(n, m) * m


def _choose_m_tiling(M, K, n_streams=4, budget_bytes=8 << 20):
    """Pick an M tile so that n_streams double-buffered (tm, K) f32 input
    blocks stay within ~budget_bytes of VMEM (safe on v7x's 64 MiB)."""
    max_rows = max(SUBLANE,
                   min(512, (budget_bytes // (2 * n_streams * K * 4)) // SUBLANE * SUBLANE))
    gm = max(1, _cdiv(M, max_rows))
    tm = _round_up(_cdiv(M, gm), SUBLANE)
    return tm * gm, tm, gm          # padded M, tile, grid size


# ----------------------------- Pallas kernels ------------------------------

def _conv_pool_kernel(c00_ref, c01_ref, c10_ref, c11_ref, w_ref, b_ref, o_ref):
    """Fused conv(as GEMM) + bias + ReLU + 2x2 max-pool.

    c{dy}{dx}: [tm, K] im2col rows of the four pool candidates (same pooled
    output position, 4 conv positions).  max over the 4 pre-activations, then
    bias + ReLU == PyTorch conv -> ReLU -> MaxPool2d(2,2)."""
    w = w_ref[...]
    z00 = jnp.dot(c00_ref[...], w, preferred_element_type=jnp.float32)
    z01 = jnp.dot(c01_ref[...], w, preferred_element_type=jnp.float32)
    z10 = jnp.dot(c10_ref[...], w, preferred_element_type=jnp.float32)
    z11 = jnp.dot(c11_ref[...], w, preferred_element_type=jnp.float32)
    z = jnp.maximum(jnp.maximum(z00, z01), jnp.maximum(z10, z11))
    o_ref[...] = jnp.maximum(z + b_ref[...], 0.0)


def _fc_stack_kernel(x_ref, w1_ref, b1_ref, w2_ref, b2_ref, w3_ref, b3_ref, o_ref):
    """fc1 + ReLU + fc2 + ReLU + fc3, all weights/intermediates in VMEM."""
    h = jnp.dot(x_ref[...], w1_ref[...], preferred_element_type=jnp.float32)
    h = jnp.maximum(h + b1_ref[...], 0.0)
    h = jnp.dot(h, w2_ref[...], preferred_element_type=jnp.float32)
    h = jnp.maximum(h + b2_ref[...], 0.0)
    o_ref[...] = jnp.dot(h, w3_ref[...], preferred_element_type=jnp.float32) + b3_ref[...]


# ------------------------------- wrappers ----------------------------------

def conv_relu_pool(x_nhwc, w, b, KH, KW):
    """x: [B, H, W, C] NHWC; w: [K, N] (K >= C*KH*KW, zero-padded, feature
    order (c, i, j)); b: [1, N].  Returns pooled activations [B, Hp, Wp, N]."""
    B, H, W, C = x_nhwc.shape
    Ho, Wo = H - KH + 1, W - KW + 1
    Hp, Wp = Ho // 2, Wo // 2
    K, N = w.shape
    assert K >= C * KH * KW and K % LANE == 0 and N % LANE == 0

    # im2col (XLA glue, fused): patches[b, oy, ox, c*KH*KW + i*KW + j] = x[b, oy+i, ox+j, c]
    patches = jnp.stack([x_nhwc[:, i:i + Ho, j:j + Wo, :]
                         for i in range(KH) for j in range(KW)], axis=-1)
    patches = patches.reshape(B, Ho, Wo, C * KH * KW)
    if K > C * KH * KW:                                   # pad only K (zeros x zero weight rows)
        patches = jnp.pad(patches, ((0, 0), (0, 0), (0, 0), (0, K - C * KH * KW)))

    # four 2x2-pool candidates; row order (b, yp, xp) = NHWC flatten of the pooled grid
    cands = [patches[:, dy:dy + 2 * Hp:2, dx:dx + 2 * Wp:2, :].reshape(B * Hp * Wp, K)
             for dy in (0, 1) for dx in (0, 1)]

    M = B * Hp * Wp
    Mp, tm, gm = _choose_m_tiling(M, K)
    if Mp != M:
        cands = [jnp.pad(c, ((0, Mp - M), (0, 0))) for c in cands]

    out = pl.pallas_call(
        _conv_pool_kernel,
        out_shape=jax.ShapeDtypeStruct((Mp, N), jnp.float32),
        grid=(gm,),
        in_specs=[pl.BlockSpec((tm, K), lambda i: (i, 0)) for _ in range(4)]
                 + [pl.BlockSpec((K, N), lambda i: (0, 0)),
                    pl.BlockSpec((1, N), lambda i: (0, 0))],
        out_specs=pl.BlockSpec((tm, N), lambda i: (i, 0)),
        compiler_params=pltpu.CompilerParams(dimension_semantics=("parallel",)),
    )(*cands, w, b)
    return out[:M].reshape(B, Hp, Wp, N)


def fc_stack(x, w1, b1, w2, b2, w3, b3):
    """y = fc3(relu(fc2(relu(fc1(x))))) in one kernel.  x: [M, K]."""
    M = x.shape[0]
    Mp = _round_up(M, SUBLANE)
    if Mp != M:
        x = jnp.pad(x, ((0, Mp - M), (0, 0)))
    N = w3.shape[1]
    args = (x, w1, b1, w2, b2, w3, b3)
    out = pl.pallas_call(
        _fc_stack_kernel,
        out_shape=jax.ShapeDtypeStruct((Mp, N), jnp.float32),
        in_specs=[pl.BlockSpec(a.shape, lambda: (0, 0)) for a in args],
        out_specs=pl.BlockSpec((Mp, N), lambda: (0, 0)),
    )(*args)
    return out[:M]


# ------------------------------ SiameseNet ---------------------------------

def prepare_params(p):
    """One-time repack of PyTorch-layout params into padded GEMM-ready layout.
    (Applied exactly once, never per forward.)"""
    C1, C1P = 32, 128        # conv1 out-channels (real, padded)
    C2, C2P = 64, 128        # conv2 out-channels
    K1, K1P = 1 * 25, 128    # conv1 patch length (Cin*KH*KW, padded)

    # conv1: [32,1,5,5] -> [K1P, C1P]
    w1 = jnp.pad(p["conv1_w"].reshape(C1, K1).T, ((0, K1P - K1), (0, C1P - C1)))
    b1 = jnp.pad(p["conv1_b"], (0, C1P - C1)).reshape(1, C1P)

    # conv2: pad Cin 32->128 (conv1 output carries 128 channels; extras are zero)
    w2 = jnp.pad(p["conv2_w"], ((0, 0), (0, C1P - C1), (0, 0), (0, 0)))   # [64,128,5,5]
    w2 = jnp.pad(w2.reshape(C2, C1P * 25).T, ((0, 0), (0, C2P - C2)))     # [3200,128]
    b2 = jnp.pad(p["conv2_b"], (0, C2P - C2)).reshape(1, C2P)

    # fc1: PyTorch flatten order is (C=64,H=4,W=4); ours is (H,W,Cpad=128)
    fc1 = p["fc1_w"].reshape(256, C2, 4, 4).transpose(0, 2, 3, 1)          # [256,4,4,64]
    fc1 = jnp.pad(fc1, ((0, 0), (0, 0), (0, 0), (0, C2P - C2)))            # [256,4,4,128]
    w_fc1 = fc1.reshape(256, 4 * 4 * C2P).T                                # [2048,256]

    w_fc3 = jnp.pad(p["fc3_w"].T, ((0, 0), (0, LANE - 2)))                 # [256,128]
    b_fc3 = jnp.pad(p["fc3_b"], (0, LANE - 2)).reshape(1, LANE)

    return {
        "conv1_w": w1, "conv1_b": b1,
        "conv2_w": w2, "conv2_b": b2,
        "fc1_w": w_fc1, "fc1_b": p["fc1_b"].reshape(1, 256),
        "fc2_w": p["fc2_w"].T, "fc2_b": p["fc2_b"].reshape(1, 256),
        "fc3_w": w_fc3, "fc3_b": b_fc3,
    }


def siamese_forward(x, prep):
    """x: [B, 1, 28, 56] NCHW -> (out1, out2), each [B, 2]."""
    B = x.shape[0]
    # Both branches share weights -> one batched pass (halves launches / weight DMAs).
    xb = jnp.concatenate([x[:, :, :, :28], x[:, :, :, 28:]], axis=0)   # [2B,1,28,28]
    xb = xb.reshape(2 * B, 28, 28, 1)                                  # C==1: NCHW == NHWC
    h = conv_relu_pool(xb, prep["conv1_w"], prep["conv1_b"], 5, 5)     # [2B,12,12,128] (32 real ch)
    h = conv_relu_pool(h, prep["conv2_w"], prep["conv2_b"], 5, 5)      # [2B, 4, 4,128] (64 real ch)
    h = h.reshape(2 * B, -1)                                           # [2B, 2048] NHWC flatten
    y = fc_stack(h, prep["fc1_w"], prep["fc1_b"], prep["fc2_w"], prep["fc2_b"],
                 prep["fc3_w"], prep["fc3_b"])[:, :2]                  # [2B, 2]
    return y[:B], y[B:]


def init_params(key):
    """Deterministic PyTorch-style uniform(-1/sqrt(fan_in), 1/sqrt(fan_in))."""
    ks = jax.random.split(key, 10)

    def u(k, shape, fan_in):
        bound = 1.0 / (fan_in ** 0.5)
        return jax.random.uniform(k, shape, jnp.float32, -bound, bound)

    return {
        "conv1_w": u(ks[0], (32, 1, 5, 5), 1 * 5 * 5),
        "conv1_b": u(ks[1], (32,), 1 * 5 * 5),
        "conv2_w": u(ks[2], (64, 32, 5, 5), 32 * 5 * 5),
        "conv2_b": u(ks[3], (64,), 32 * 5 * 5),
        "fc1_w":   u(ks[4], (256, 64 * 4 * 4), 64 * 4 * 4),
        "fc1_b":   u(ks[5], (256,), 64 * 4 * 4),
        "fc2_w":   u(ks[6], (256, 256), 256),
        "fc2_b":   u(ks[7], (256,), 256),
        "fc3_w":   u(ks[8], (2, 256), 256),
        "fc3_b":   u(ks[9], (2,), 256),
    }


if __name__ == "__main__":
    key = jax.random.PRNGKey(0)
    pkey, xkey = jax.random.split(key)
    params = init_params(pkey)
    prep = prepare_params(params)          # one-time weight repack/pad (not per forward)

    # The conv/pool arithmetic implies 28x28 per branch -> input width 56.
    x = jax.random.normal(xkey, (2, 1, 28, 56), dtype=jnp.float32)

    out1, out2 = jax.jit(siamese_forward)(x, prep)
    jax.block_until_ready((out1, out2))

    assert out1.shape == (2, 2) and out2.shape == (2, 2)
    assert out1.dtype == jnp.float32 and out2.dtype == jnp.float32
    assert bool(jnp.all(jnp.isfinite(out1))) and bool(jnp.all(jnp.isfinite(out2)))
    print("KERNEL_OK")
</pallas_src>

<mosaic_0001>
module attributes {stable_mosaic.version = 11 : i64} {
  func.func @_conv_pool_kernel(%arg0: i32, %arg1: memref<288x128xf32, #tpu.memory_space<vmem>>, %arg2: memref<288x128xf32, #tpu.memory_space<vmem>>, %arg3: memref<288x128xf32, #tpu.memory_space<vmem>>, %arg4: memref<288x128xf32, #tpu.memory_space<vmem>>, %arg5: memref<128x128xf32, #tpu.memory_space<vmem>>, %arg6: memref<1x128xf32, #tpu.memory_space<vmem>>, %arg7: memref<288x128xf32, #tpu.memory_space<vmem>>) attributes {dimension_semantics = [#tpu.dimension_semantics<parallel>], iteration_bounds = array<i64: 2>, scalar_prefetch = 0 : i64, scratch_operands = 0 : i64, tpu.core_type = #tpu.core_type<tc>, window_params = [{transform_indices = @transform_0, window_bounds = array<i64: 288, 128>}, {transform_indices = @transform_1, window_bounds = array<i64: 288, 128>}, {transform_indices = @transform_2, window_bounds = array<i64: 288, 128>}, {transform_indices = @transform_3, window_bounds = array<i64: 288, 128>}, {pipeline_mode = #tpu.pipeline_mode<synchronous>, transform_indices = @transform_4, window_bounds = array<i64: 128, 128>}, {pipeline_mode = #tpu.pipeline_mode<synchronous>, transform_indices = @transform_5, window_bounds = array<i64: 1, 128>}, {transform_indices = @transform_6, window_bounds = array<i64: 288, 128>}]} {
    %c0 = arith.constant 0 : index
    %c0_0 = arith.constant 0 : index
    %0 = vector.load %arg5[%c0, %c0_0] : memref<128x128xf32, #tpu.memory_space<vmem>>, vector<128x128xf32>
    %c0_1 = arith.constant 0 : index
    %c0_2 = arith.constant 0 : index
    %1 = vector.load %arg1[%c0_1, %c0_2] : memref<288x128xf32, #tpu.memory_space<vmem>>, vector<288x128xf32>
    %cst = arith.constant dense<0.000000e+00> : vector<288x128xf32>
    %2 = tpu.matmul %1, %0, %cst {dimension_numbers = #tpu.dot_dimension_numbers<[1], [0], [0], [1], [0, 0, 1, 1], [], []>} : vector<288x128xf32>, vector<128x128xf32>, vector<288x128xf32> -> vector<288x128xf32>
    %c0_3 = arith.constant 0 : index
    %c0_4 = arith.constant 0 : index
    %3 = vector.load %arg2[%c0_3, %c0_4] : memref<288x128xf32, #tpu.memory_space<vmem>>, vector<288x128xf32>
    %cst_5 = arith.constant dense<0.000000e+00> : vector<288x128xf32>
    %4 = tpu.matmul %3, %0, %cst_5 {dimension_numbers = #tpu.dot_dimension_numbers<[1], [0], [0], [1], [0, 0, 1, 1], [], []>} : vector<288x128xf32>, vector<128x128xf32>, vector<288x128xf32> -> vector<288x128xf32>
    %c0_6 = arith.constant 0 : index
    %c0_7 = arith.constant 0 : index
    %5 = vector.load %arg3[%c0_6, %c0_7] : memref<288x128xf32, #tpu.memory_space<vmem>>, vector<288x128xf32>
    %cst_8 = arith.constant dense<0.000000e+00> : vector<288x128xf32>
    %6 = tpu.matmul %5, %0, %cst_8 {dimension_numbers = #tpu.dot_dimension_numbers<[1], [0], [0], [1], [0, 0, 1, 1], [], []>} : vector<288x128xf32>, vector<128x128xf32>, vector<288x128xf32> -> vector<288x128xf32>
    %c0_9 = arith.constant 0 : index
    %c0_10 = arith.constant 0 : index
    %7 = vector.load %arg4[%c0_9, %c0_10] : memref<288x128xf32, #tpu.memory_space<vmem>>, vector<288x128xf32>
    %cst_11 = arith.constant dense<0.000000e+00> : vector<288x128xf32>
    %8 = tpu.matmul %7, %0, %cst_11 {dimension_numbers = #tpu.dot_dimension_numbers<[1], [0], [0], [1], [0, 0, 1, 1], [], []>} : vector<288x128xf32>, vector<128x128xf32>, vector<288x128xf32> -> vector<288x128xf32>
    %9 = arith.maximumf %2, %4 : vector<288x128xf32>
    %10 = arith.maximumf %6, %8 : vector<288x128xf32>
    %11 = arith.maximumf %9, %10 : vector<288x128xf32>
    %c0_12 = arith.constant 0 : index
    %c0_13 = arith.constant 0 : index
    %12 = vector.load %arg6[%c0_12, %c0_13] : memref<1x128xf32, #tpu.memory_space<vmem>>, vector<1x128xf32>
    %13 = vector.broadcast %12 : vector<1x128xf32> to vector<288x128xf32>
    %14 = arith.addf %11, %13 : vector<288x128xf32>
    %cst_14 = arith.constant 0.000000e+00 : f32
    %15 = vector.broadcast %cst_14 : f32 to vector<288x128xf32>
    %16 = arith.maximumf %14, %15 : vector<288x128xf32>
    %c0_15 = arith.constant 0 : index
    %c0_16 = arith.constant 0 : index
    %17 = vector.load %arg7[%c0_15, %c0_16] : memref<288x128xf32, #tpu.memory_space<vmem>>, vector<288x128xf32>
    tpu.vector_store %arg7[%c0_15, %c0_16], %16 {strides = array<i32>} : memref<288x128xf32, #tpu.memory_space<vmem>>, vector<288x128xf32>,
    return
  }
  func.func @transform_0(%arg0: i32) -> (i32, i32) {
    %c0_i32 = arith.constant 0 : i32
    %c0_i32_0 = arith.constant 0 : i32
    return %arg0, %c0_i32 : i32, i32
  }
  func.func @transform_1(%arg0: i32) -> (i32, i32) {
    %c0_i32 = arith.constant 0 : i32
    %c0_i32_0 = arith.constant 0 : i32
    return %arg0, %c0_i32 : i32, i32
  }
  func.func @transform_2(%arg0: i32) -> (i32, i32) {
    %c0_i32 = arith.constant 0 : i32
    %c0_i32_0 = arith.constant 0 : i32
    return %arg0, %c0_i32 : i32, i32
  }
  func.func @transform_3(%arg0: i32) -> (i32, i32) {
    %c0_i32 = arith.constant 0 : i32
    %c0_i32_0 = arith.constant 0 : i32
    return %arg0, %c0_i32 : i32, i32
  }
  func.func @transform_4(%arg0: i32) -> (i32, i32) {
    %c0_i32 = arith.constant 0 : i32
    %c0_i32_0 = arith.constant 0 : i32
    %c0_i32_1 = arith.constant 0 : i32
    return %c0_i32, %c0_i32_0 : i32, i32
  }
  func.func @transform_5(%arg0: i32) -> (i32, i32) {
    %c0_i32 = arith.constant 0 : i32
    %c0_i32_0 = arith.constant 0 : i32
    %c0_i32_1 = arith.constant 0 : i32
    return %c0_i32, %c0_i32_0 : i32, i32
  }
  func.func @transform_6(%arg0: i32) -> (i32, i32) {
    %c0_i32 = arith.constant 0 : i32
    %c0_i32_0 = arith.constant 0 : i32
    return %arg0, %c0_i32 : i32, i32
  }
}

module attributes {stable_mosaic.version = 11 : i64} {
  func.func @_conv_pool_kernel(%arg0: i32, %arg1: memref<64x3200xf32, #tpu.memory_space<vmem>>, %arg2: memref<64x3200xf32, #tpu.memory_space<vmem>>, %arg3: memref<64x3200xf32, #tpu.memory_space<vmem>>, %arg4: memref<64x3200xf32, #tpu.memory_space<vmem>>, %arg5: memref<3200x128xf32, #tpu.memory_space<vmem>>, %arg6: memref<1x128xf32, #tpu.memory_space<vmem>>, %arg7: memref<64x128xf32, #tpu.memory_space<vmem>>) attributes {dimension_semantics = [#tpu.dimension_semantics<parallel>], iteration_bounds = array<i64: 1>, scalar_prefetch = 0 : i64, scratch_operands = 0 : i64, tpu.core_type = #tpu.core_type<tc>, window_params = [{transform_indices = @transform_0, window_bounds = array<i64: 64, 3200>}, {transform_indices = @transform_1, window_bounds = array<i64: 64, 3200>}, {transform_indices = @transform_2, window_bounds = array<i64: 64, 3200>}, {transform_indices = @transform_3, window_bounds = array<i64: 64, 3200>}, {pipeline_mode = #tpu.pipeline_mode<synchronous>, transform_indices = @transform_4, window_bounds = array<i64: 3200, 128>}, {pipeline_mode = #tpu.pipeline_mode<synchronous>, transform_indices = @transform_5, window_bounds = array<i64: 1, 128>}, {transform_indices = @transform_6, window_bounds = array<i64: 64, 128>}]} {
    %c0 = arith.constant 0 : index
    %c0_0 = arith.constant 0 : index
    %0 = vector.load %arg5[%c0, %c0_0] : memref<3200x128xf32, #tpu.memory_space<vmem>>, vector<3200x128xf32>
    %c0_1 = arith.constant 0 : index
    %c0_2 = arith.constant 0 : index
    %1 = vector.load %arg1[%c0_1, %c0_2] : memref<64x3200xf32, #tpu.memory_space<vmem>>, vector<64x3200xf32>
    %cst = arith.constant dense<0.000000e+00> : vector<64x128xf32>
    %2 = tpu.matmul %1, %0, %cst {dimension_numbers = #tpu.dot_dimension_numbers<[1], [0], [0], [1], [0, 0, 1, 1], [], []>} : vector<64x3200xf32>, vector<3200x128xf32>, vector<64x128xf32> -> vector<64x128xf32>
    %c0_3 = arith.constant 0 : index
    %c0_4 = arith.constant 0 : index
    %3 = vector.load %arg2[%c0_3, %c0_4] : memref<64x3200xf32, #tpu.memory_space<vmem>>, vector<64x3200xf32>
    %cst_5 = arith.constant dense<0.000000e+00> : vector<64x128xf32>
    %4 = tpu.matmul %3, %0, %cst_5 {dimension_numbers = #tpu.dot_dimension_numbers<[1], [0], [0], [1], [0, 0, 1, 1], [], []>} : vector<64x3200xf32>, vector<3200x128xf32>, vector<64x128xf32> -> vector<64x128xf32>
    %c0_6 = arith.constant 0 : index
    %c0_7 = arith.constant 0 : index
    %5 = vector.load %arg3[%c0_6, %c0_7] : memref<64x3200xf32, #tpu.memory_space<vmem>>, vector<64x3200xf32>
    %cst_8 = arith.constant dense<0.000000e+00> : vector<64x128xf32>
    %6 = tpu.matmul %5, %0, %cst_8 {dimension_numbers = #tpu.dot_dimension_numbers<[1], [0], [0], [1], [0, 0, 1, 1], [], []>} : vector<64x3200xf32>, vector<3200x128xf32>, vector<64x128xf32> -> vector<64x128xf32>
    %c0_9 = arith.constant 0 : index
    %c0_10 = arith.constant 0 : index
    %7 = vector.load %arg4[%c0_9, %c0_10] : memref<64x3200xf32, #tpu.memory_space<vmem>>, vector<64x3200xf32>
    %cst_11 = arith.constant dense<0.000000e+00> : vector<64x128xf32>
    %8 = tpu.matmul %7, %0, %cst_11 {dimension_numbers = #tpu.dot_dimension_numbers<[1], [0], [0], [1], [0, 0, 1, 1], [], []>} : vector<64x3200xf32>, vector<3200x128xf32>, vector<64x128xf32> -> vector<64x128xf32>
    %9 = arith.maximumf %2, %4 : vector<64x128xf32>
    %10 = arith.maximumf %6, %8 : vector<64x128xf32>
    %11 = arith.maximumf %9, %10 : vector<64x128xf32>
    %c0_12 = arith.constant 0 : index
    %c0_13 = arith.constant 0 : index
    %12 = vector.load %arg6[%c0_12, %c0_13] : memref<1x128xf32, #tpu.memory_space<vmem>>, vector<1x128xf32>
    %13 = vector.broadcast %12 : vector<1x128xf32> to vector<64x128xf32>
    %14 = arith.addf %11, %13 : vector<64x128xf32>
    %cst_14 = arith.constant 0.000000e+00 : f32
    %15 = vector.broadcast %cst_14 : f32 to vector<64x128xf32>
    %16 = arith.maximumf %14, %15 : vector<64x128xf32>
    %c0_15 = arith.constant 0 : index
    %c0_16 = arith.constant 0 : index
    %17 = vector.load %arg7[%c0_15, %c0_16] : memref<64x128xf32, #tpu.memory_space<vmem>>, vector<64x128xf32>
    tpu.vector_store %arg7[%c0_15, %c0_16], %16 {strides = array<i32>} : memref<64x128xf32, #tpu.memory_space<vmem>>, vector<64x128xf32>,
    return
  }
  func.func @transform_0(%arg0: i32) -> (i32, i32) {
    %c0_i32 = arith.constant 0 : i32
    %c0_i32_0 = arith.constant 0 : i32
    return %arg0, %c0_i32 : i32, i32
  }
  func.func @transform_1(%arg0: i32) -> (i32, i32) {
    %c0_i32 = arith.constant 0 : i32
    %c0_i32_0 = arith.constant 0 : i32
    return %arg0, %c0_i32 : i32, i32
  }
  func.func @transform_2(%arg0: i32) -> (i32, i32) {
    %c0_i32 = arith.constant 0 : i32
    %c0_i32_0 = arith.constant 0 : i32
    return %arg0, %c0_i32 : i32, i32
  }
  func.func @transform_3(%arg0: i32) -> (i32, i32) {
    %c0_i32 = arith.constant 0 : i32
    %c0_i32_0 = arith.constant 0 : i32
    return %arg0, %c0_i32 : i32, i32
  }
  func.func @transform_4(%arg0: i32) -> (i32, i32) {
    %c0_i32 = arith.constant 0 : i32
    %c0_i32_0 = arith.constant 0 : i32
    %c0_i32_1 = arith.constant 0 : i32
    return %c0_i32, %c0_i32_0 : i32, i32
  }
  func.func @transform_5(%arg0: i32) -> (i32, i32) {
    %c0_i32 = arith.constant 0 : i32
    %c0_i32_0 = arith.constant 0 : i32
    %c0_i32_1 = arith.constant 0 : i32
    return %c0_i32, %c0_i32_0 : i32, i32
  }
  func.func @transform_6(%arg0: i32) -> (i32, i32) {
    %c0_i32 = arith.constant 0 : i32
    %c0_i32_0 = arith.constant 0 : i32
    return %arg0, %c0_i32 : i32, i32
  }
}

module attributes {stable_mosaic.version = 11 : i64} {
  func.func @_fc_stack_kernel(%arg0: memref<8x2048xf32, #tpu.memory_space<vmem>>, %arg1: memref<2048x256xf32, #tpu.memory_space<vmem>>, %arg2: memref<1x256xf32, #tpu.memory_space<vmem>>, %arg3: memref<256x256xf32, #tpu.memory_space<vmem>>, %arg4: memref<1x256xf32, #tpu.memory_space<vmem>>, %arg5: memref<256x128xf32, #tpu.memory_space<vmem>>, %arg6: memref<1x128xf32, #tpu.memory_space<vmem>>, %arg7: memref<8x128xf32, #tpu.memory_space<vmem>>) attributes {dimension_semantics = [], scalar_prefetch = 0 : i64, scratch_operands = 0 : i64, tpu.core_type = #tpu.core_type<tc>} {
    %c0 = arith.constant 0 : index
    %c0_0 = arith.constant 0 : index
    %0 = vector.load %arg0[%c0, %c0_0] : memref<8x2048xf32, #tpu.memory_space<vmem>>, vector<8x2048xf32>
    %c0_1 = arith.constant 0 : index
    %c0_2 = arith.constant 0 : index
    %1 = vector.load %arg1[%c0_1, %c0_2] : memref<2048x256xf32, #tpu.memory_space<vmem>>, vector<2048x256xf32>
    %cst = arith.constant dense<0.000000e+00> : vector<8x256xf32>
    %2 = tpu.matmul %0, %1, %cst {dimension_numbers = #tpu.dot_dimension_numbers<[1], [0], [0], [1], [0, 0, 1, 1], [], []>} : vector<8x2048xf32>, vector<2048x256xf32>, vector<8x256xf32> -> vector<8x256xf32>
    %c0_3 = arith.constant 0 : index
    %c0_4 = arith.constant 0 : index
    %3 = vector.load %arg2[%c0_3, %c0_4] : memref<1x256xf32, #tpu.memory_space<vmem>>, vector<1x256xf32>
    %4 = vector.broadcast %3 : vector<1x256xf32> to vector<8x256xf32>
    %5 = arith.addf %2, %4 : vector<8x256xf32>
    %cst_5 = arith.constant 0.000000e+00 : f32
    %6 = vector.broadcast %cst_5 : f32 to vector<8x256xf32>
    %7 = arith.maximumf %5, %6 : vector<8x256xf32>
    %c0_6 = arith.constant 0 : index
    %c0_7 = arith.constant 0 : index
    %8 = vector.load %arg3[%c0_6, %c0_7] : memref<256x256xf32, #tpu.memory_space<vmem>>, vector<256x256xf32>
    %cst_8 = arith.constant dense<0.000000e+00> : vector<8x256xf32>
    %9 = tpu.matmul %7, %8, %cst_8 {dimension_numbers = #tpu.dot_dimension_numbers<[1], [0], [0], [1], [0, 0, 1, 1], [], []>} : vector<8x256xf32>, vector<256x256xf32>, vector<8x256xf32> -> vector<8x256xf32>
    %c0_9 = arith.constant 0 : index
    %c0_10 = arith.constant 0 : index
    %10 = vector.load %arg4[%c0_9, %c0_10] : memref<1x256xf32, #tpu.memory_space<vmem>>, vector<1x256xf32>
    %11 = vector.broadcast %10 : vector<1x256xf32> to vector<8x256xf32>
    %12 = arith.addf %9, %11 : vector<8x256xf32>
    %cst_11 = arith.constant 0.000000e+00 : f32
    %13 = vector.broadcast %cst_11 : f32 to vector<8x256xf32>
    %14 = arith.maximumf %12, %13 : vector<8x256xf32>
    %c0_12 = arith.constant 0 : index
    %c0_13 = arith.constant 0 : index
    %15 = vector.load %arg5[%c0_12, %c0_13] : memref<256x128xf32, #tpu.memory_space<vmem>>, vector<256x128xf32>
    %cst_14 = arith.constant dense<0.000000e+00> : vector<8x128xf32>
    %16 = tpu.matmul %14, %15, %cst_14 {dimension_numbers = #tpu.dot_dimension_numbers<[1], [0], [0], [1], [0, 0, 1, 1], [], []>} : vector<8x256xf32>, vector<256x128xf32>, vector<8x128xf32> -> vector<8x128xf32>
    %c0_15 = arith.constant 0 : index
    %c0_16 = arith.constant 0 : index
    %17 = vector.load %arg6[%c0_15, %c0_16] : memref<1x128xf32, #tpu.memory_space<vmem>>, vector<1x128xf32>
    %18 = vector.broadcast %17 : vector<1x128xf32> to vector<8x128xf32>
    %19 = arith.addf %16, %18 : vector<8x128xf32>
    %c0_17 = arith.constant 0 : index
    %c0_18 = arith.constant 0 : index
    %20 = vector.load %arg7[%c0_17, %c0_18] : memref<8x128xf32, #tpu.memory_space<vmem>>, vector<8x128xf32>
    tpu.vector_store %arg7[%c0_17, %c0_18], %19 {strides = array<i32>} : memref<8x128xf32, #tpu.memory_space<vmem>>, vector<8x128xf32>,
    return
  }
}

</mosaic_0001>

<bundles_post_ra>
// kernel: siamese_forward.3
= control target key start
LH: loop header
LB: loop body
LE: loop exit
PB: predicated region body
PF: predicated region fallthrough
CT: control target
= control target key end

     0   :  { %s2520_s21 = smov 0   ;;  %s3236_s0 = inlined_call_operand.vmem [shape: f32[576,128], index: 0, kind: input, shape index: {}]   ;;  %s3237_s1 = inlined_call_operand.vmem [shape: f32[576,128], index: 1, kind: input, shape index: {}]   ;;  %s3238_s2 = inlined_call_operand.vmem [shape: f32[576,128], index: 2, kind: input, shape index: {}]   ;;  %s3239_s3 = inlined_call_operand.vmem [shape: f32[576,128], index: 3, kind: input, shape index: {}]   ;;  %s3240_s4 = inlined_call_operand.vmem [shape: f32[128,128], index: 4, kind: input, shape index: {}]   ;;  %s3241_s5 = inlined_call_operand.vmem [shape: f32[1,128], index: 5, kind: input, shape index: {}]   ;;  %s3242_s6 = inlined_call_operand.vmem [shape: f32[576,128], index: 6, kind: output, shape index: {}]  }
   0x1 LB: > { %s1776_s22 = sadd.s32 4294967295, %s2483_s21   ;;  %p1780_p0 = scmp.ge.s32.totalorder %s2483_s21, 1  ;;  %s2483_s21 = sphi %s2520_s21, %s16_s21  }
   0x2   : > { %p246_p1 = scmp.lt.s32.totalorder %s2483_s21, 3 }
   0x4   : > { %p247_p2 = pnand %p1780_p0, %p246_p1 }
   0x6   : > { %250 = sbr.rel (%p247_p2) target bundleno = 410 (0x19a), region = 44 }
   0xd   : > { %v321_v0 = vld [vmem:[%s3240_s4] sm:$0xff]  ;;  %v322_v1 = vld [vmem:[%s3240_s4 + $0x8] sm:$0xff]  ;;  %v323_v2 = vld [vmem:[%s3240_s4 + $0x10] sm:$0xff]  ;;  %s291_s29 = smul.u32 36, %s1776_s22 }
   0xe   : > { %v2537_v3 = vpack.c.bf16 %v322_v1, %v321_v0  ;;  %v324_v4 = vld [vmem:[%s3240_s4 + $0x18] sm:$0xff]  ;;  %v325_v6 = vld [vmem:[%s3240_s4 + $0x20] sm:$0xff]  ;;  %v326_v7 = vld [vmem:[%s3240_s4 + $0x28] sm:$0xff] }
   0xf   : > { %v2542_v5 = vpack.c.bf16 %v324_v4, %v323_v2  ;;  %p292_p3 = scmp.lt.s32.totalorder %s291_s29, 71  ;;  %v2556_v8 = vpack.c.bf16 %v326_v7, %v325_v6  ;;  %v327_v9 = vld [vmem:[%s3240_s4 + $0x30] sm:$0xff]  ;;  %v328_v10 = vld [vmem:[%s3240_s4 + $0x38] sm:$0xff]  ;;  %v329_v14 = vld [vmem:[%s3240_s4 + $0x40] sm:$0xff] }
  0x10   : > { %2342 = vmatprep.subr.bf16.mxu0 %v2537_v3  ;;  %2374 = vmatprep.subr.bf16.mxu1 %v2537_v3  ;;  %v2584_v13 = vpack.c.bf16 %v328_v10, %v327_v9  ;;  %v330_v15 = vld [vmem:[%s3240_s4 + $0x48] sm:$0xff]  ;;  %v331_v17 = vld [vmem:[%s3240_s4 + $0x50] sm:$0xff]  ;;  %v332_v18 = vld [vmem:[%s3240_s4 + $0x58] sm:$0xff] }
  0x11   : > { %2344 = vmatpush3.bf16.msra.mxu0 %v2537_v3  ;;  %2376 = vmatpush3.bf16.msra.mxu1 %v2537_v3  ;;  %s3349_s29 = smov (!%p292_p3, %s291_s29), 71  ;;  %v2596_v16 = vpack.c.bf16 %v330_v15, %v329_v14  ;;  %v2608_v19 = vpack.c.bf16 %v332_v18, %v331_v17  ;;  %v333_v20 = vld [vmem:[%s3240_s4 + $0x60] sm:$0xff]  ;;  %v334_v21 = vld [vmem:[%s3240_s4 + $0x68] sm:$0xff]  ;;  %v335_v23 = vld [vmem:[%s3240_s4 + $0x70] sm:$0xff] }
  0x12   : > { %2346 = vmatprep.subr.bf16.mxu0 %v2542_v5  ;;  %2378 = vmatprep.subr.bf16.mxu1 %v2542_v5  ;;  %s2564_s16 = sshll.u32 %s3349_s29, 3  ;;  %v2620_v22 = vpack.c.bf16 %v334_v21, %v333_v20  ;;  %v336_v24 = vld [vmem:[%s3240_s4 + $0x78] sm:$0xff] }
  0x13   : > { %s2570_s19 = scalar_lea.vmem %s3236_s0, %s2564_s16  ;;  %s2576_s23 = scalar_lea.vmem %s3237_s1, %s2564_s16  ;;  %v2632_v25 = vpack.c.bf16 %v336_v24, %v335_v23 }
  0x14   : > { %v337_v11 = vld [vmem:[%s2570_s19] sm:$0xff]  ;;  %v338_v26 = vld [vmem:[%s2570_s19 + $0x8] sm:$0xff]  ;;  %v339_v28 = vld [vmem:[%s2570_s19 + $0x10] sm:$0xff]  ;;  %s2744_s20 = scalar_lea.vmem %s3238_s2, %s2564_s16  ;;  %s2750_s25 = scalar_lea.vmem %s3239_s3, %s2564_s16 }
  0x15   : > { %2348 = vmatpush3.bf16.msra.mxu0 %v2542_v5  ;;  %2380 = vmatpush3.bf16.msra.mxu1 %v2542_v5  ;;  %v618_v12 = vld [vmem:[%s2576_s23] sm:$0xff]  ;;  %v619_v27 = vld [vmem:[%s2576_s23 + $0x8] sm:$0xff]  ;;  %v620_v29 = vld [vmem:[%s2576_s23 + $0x10] sm:$0xff]  ;;  %s3058_s28 = scalar_lea.vmem %s3242_s6, %s2564_s16 }
  0x16   : > { %2350 = vmatprep.subr.bf16.mxu0 %v2556_v8  ;;  %2382 = vmatprep.subr.bf16.mxu1 %v2556_v8  ;;  %v340_v30 = vld [vmem:[%s2570_s19 + $0x18] sm:$0xff]  ;;  %v341_v32 = vld [vmem:[%s2570_s19 + $0x20] sm:$0xff]  ;;  %v342_v34 = vld [vmem:[%s2570_s19 + $0x28] sm:$0xff] }
  0x17   : > { %2029 = vmatprep.mubr.f32.mxu0 %v337_v11  ;;  %2115 = vmatprep.mubr.f32.mxu1 %v618_v12  ;;  %v621_v31 = vld [vmem:[%s2576_s23 + $0x18] sm:$0xff]  ;;  %v622_v33 = vld [vmem:[%s2576_s23 + $0x20] sm:$0xff]  ;;  %v623_v35 = vld [vmem:[%s2576_s23 + $0x28] sm:$0xff] }
  0x18   : > { %v343_v36 = vld [vmem:[%s2570_s19 + $0x30] sm:$0xff]  ;;  %v344_v38 = vld [vmem:[%s2570_s19 + $0x38] sm:$0xff]  ;;  %v345_v40 = vld [vmem:[%s2570_s19 + $0x40] sm:$0xff] }
  0x19   : > { %2352 = vmatpush3.bf16.msra.mxu0 %v2556_v8  ;;  %2384 = vmatpush3.bf16.msra.mxu1 %v2556_v8  ;;  %v624_v37 = vld [vmem:[%s2576_s23 + $0x30] sm:$0xff]  ;;  %v625_v39 = vld [vmem:[%s2576_s23 + $0x38] sm:$0xff]  ;;  %v626_v41 = vld [vmem:[%s2576_s23 + $0x40] sm:$0xff] }
  0x1a   : > { %2354 = vmatprep.subr.bf16.mxu0 %v2584_v13  ;;  %2386 = vmatprep.subr.bf16.mxu1 %v2584_v13  ;;  %v346_v42 = vld [vmem:[%s2570_s19 + $0x48] sm:$0xff]  ;;  %v347_v44 = vld [vmem:[%s2570_s19 + $0x50] sm:$0xff]  ;;  %v348_v46 = vld [vmem:[%s2570_s19 + $0x58] sm:$0xff] }
  0x1b   : > { %v627_v43 = vld [vmem:[%s2576_s23 + $0x48] sm:$0xff]  ;;  %v628_v45 = vld [vmem:[%s2576_s23 + $0x50] sm:$0xff]  ;;  %v629_v47 = vld [vmem:[%s2576_s23 + $0x58] sm:$0xff] }
  0x1c   : > { %v349_v48 = vld [vmem:[%s2570_s19 + $0x60] sm:$0xff]  ;;  %v350_v50 = vld [vmem:[%s2570_s19 + $0x68] sm:$0xff]  ;;  %v351_v52 = vld [vmem:[%s2570_s19 + $0x70] sm:$0xff] }
  0x1d   : > { %2356 = vmatpush3.bf16.msra.mxu0 %v2584_v13  ;;  %2388 = vmatpush3.bf16.msra.mxu1 %v2584_v13  ;;  %v630_v49 = vld [vmem:[%s2576_s23 + $0x60] sm:$0xff]  ;;  %v631_v51 = vld [vmem:[%s2576_s23 + $0x68] sm:$0xff]  ;;  %v632_v53 = vld [vmem:[%s2576_s23 + $0x70] sm:$0xff] }
  0x1e   : > { %2358 = vmatprep.subr.bf16.mxu0 %v2596_v16  ;;  %2390 = vmatprep.subr.bf16.mxu1 %v2596_v16  ;;  %v352_v54 = vld [vmem:[%s2570_s19 + $0x78] sm:$0xff]  ;;  %v353_v56 = vld [vmem:[%s2570_s19 + $0x80] sm:$0xff]  ;;  %v354_v58 = vld [vmem:[%s2570_s19 + $0x88] sm:$0xff] }
  0x1f   : > { %v633_v55 = vld [vmem:[%s2576_s23 + $0x78] sm:$0xff]  ;;  %v634_v57 = vld [vmem:[%s2576_s23 + $0x80] sm:$0xff]  ;;  %v635_v59 = vld [vmem:[%s2576_s23 + $0x88] sm:$0xff] }
  0x20   : > { %v355_v60 = vld [vmem:[%s2570_s19 + $0x90] sm:$0xff]  ;;  %v356_v62 = vld [vmem:[%s2570_s19 + $0x98] sm:$0xff]  ;;  %v357_v0 = vld [vmem:[%s2570_s19 + $0xa0] sm:$0xff] }
  0x21   : > { %2360 = vmatpush3.bf16.msra.mxu0 %v2596_v16  ;;  %2392 = vmatpush3.bf16.msra.mxu1 %v2596_v16  ;;  %v636_v61 = vld [vmem:[%s2576_s23 + $0x90] sm:$0xff]  ;;  %v637_v63 = vld [vmem:[%s2576_s23 + $0x98] sm:$0xff]  ;;  %v638_v1 = vld [vmem:[%s2576_s23 + $0xa0] sm:$0xff] }
  0x22   : > { %2362 = vmatprep.subr.bf16.mxu0 %v2608_v19  ;;  %2394 = vmatprep.subr.bf16.mxu1 %v2608_v19  ;;  %v358_v2 = vld [vmem:[%s2570_s19 + $0xa8] sm:$0xff]  ;;  %v359_v4 = vld [vmem:[%s2570_s19 + $0xb0] sm:$0xff]  ;;  %v360_v6 = vld [vmem:[%s2570_s19 + $0xb8] sm:$0xff] }
  0x23   : > { %v641_v7 = vld [vmem:[%s2576_s23 + $0xb8] sm:$0xff]  ;;  %v642_v9 = vld [vmem:[%s2576_s23 + $0xc0] sm:$0xff]  ;;  %v362_v10 = vld [vmem:[%s2570_s19 + $0xc8] sm:$0xff] }
  0x24   : > { %v643_v11 = vld [vmem:[%s2576_s23 + $0xc8] sm:$0xff]  ;;  %v363_v12 = vld [vmem:[%s2570_s19 + $0xd0] sm:$0xff]  ;;  %v364_v14 = vld [vmem:[%s2570_s19 + $0xd8] sm:$0xff] }
  0x25   : > { %2364 = vmatpush3.bf16.msra.mxu0 %v2608_v19  ;;  %2396 = vmatpush3.bf16.msra.mxu1 %v2608_v19  ;;  %v645_v15 = vld [vmem:[%s2576_s23 + $0xd8] sm:$0xff]  ;;  %v646_v17 = vld [vmem:[%s2576_s23 + $0xe0] sm:$0xff]  ;;  %v366_v18 = vld [vmem:[%s2570_s19 + $0xe8] sm:$0xff] }
  0x26   : > { %2366 = vmatprep.subr.bf16.mxu0 %v2620_v22  ;;  %2398 = vmatprep.subr.bf16.mxu1 %v2620_v22  ;;  %v367_v20 = vld [vmem:[%s2570_s19 + $0xf0] sm:$0xff]  ;;  %v649_v23 = vld [vmem:[%s2576_s23 + $0xf8] sm:$0xff]  ;;  %v369_v24 = vld [vmem:[%s2570_s19 + $0x100] sm:$0xff] }
  0x27   : > { %v648_v21 = vld [vmem:[%s2576_s23 + $0xf0] sm:$0xff] }
  0x29   : > { %2368 = vmatpush3.bf16.msra.mxu0 %v2620_v22  ;;  %2400 = vmatpush3.bf16.msra.mxu1 %v2620_v22 }
  0x2a   : > { %2370 = vmatprep.subr.bf16.mxu0 %v2632_v25  ;;  %2402 = vmatprep.subr.bf16.mxu1 %v2632_v25 }
  0x2d   : > { %2372 = vmatpush3.bf16.msra.mxu0 %v2632_v25  ;;  %2404 = vmatpush3.bf16.msra.mxu1 %v2632_v25 }
  0x2e   : > { %2406 = vmatprep.subr.bf16.mxu0 %v2537_v3  ;;  %2438 = vmatprep.subr.bf16.mxu1 %v2537_v3 }
  0x30   : > { %2030 = vmatmul.mubr.f32.vlgmr.msra.gmra.mrb[0].mxu0 %v338_v26  ;;  %2116 = vmatmul.mubr.f32.vlgmr.msra.gmra.mrb[0].mxu1 %v619_v27  ;;  %v370_v26 = vld [vmem:[%s2570_s19 + $0x108] sm:$0xff] }
  0x31   : > { %2408 = vmatpush3.bf16.msra.mxu0 %v2537_v3  ;;  %2440 = vmatpush3.bf16.msra.mxu1 %v2537_v3  ;;  %v639_v3 = vld [vmem:[%s2576_s23 + $0xa8] sm:$0xff] }
  0x32   : > { %2032 = vmatprep.mubr.f32.mxu0 %v339_v28  ;;  %2118 = vmatprep.mubr.f32.mxu1 %v620_v29  ;;  %v651_v27 = vld [vmem:[%s2576_s23 + $0x108] sm:$0xff]  ;;  %v371_v28 = vld [vmem:[%s2570_s19 + $0x110] sm:$0xff] }
  0x33   : > { %2410 = vmatprep.subr.bf16.mxu0 %v2542_v5  ;;  %2442 = vmatprep.subr.bf16.mxu1 %v2542_v5  ;;  %v652_v29 = vld [vmem:[%s2576_s23 + $0x110] sm:$0xff] }
  0x34   : > { %2033 = vmatmul.mubr.f32.gmra.mrb[2].mxu0 %v340_v30  ;;  %2119 = vmatmul.mubr.f32.gmra.mrb[2].mxu1 %v621_v31  ;;  %v372_v30 = vld [vmem:[%s2570_s19 + $0x118] sm:$0xff] }
  0x35   : > { %2035 = vmatprep.mubr.f32.mxu0 %v341_v32  ;;  %2121 = vmatprep.mubr.f32.mxu1 %v622_v33  ;;  %v653_v31 = vld [vmem:[%s2576_s23 + $0x118] sm:$0xff]  ;;  %v899_v32 = vld [vmem:[%s2744_s20] sm:$0xff] }
  0x36   : > { %2412 = vmatpush3.bf16.msra.mxu0 %v2542_v5  ;;  %2444 = vmatpush3.bf16.msra.mxu1 %v2542_v5  ;;  %v640_v5 = vld [vmem:[%s2576_s23 + $0xb0] sm:$0xff]  ;;  %v1180_v33 = vld [vmem:[%s2750_s25] sm:$0xff] }
  0x37   : > { %2414 = vmatprep.subr.bf16.mxu0 %v2556_v8  ;;  %2446 = vmatprep.subr.bf16.mxu1 %v2556_v8 }
  0x38   : > { %2036 = vmatmul.mubr.f32.gmra.mrb[4].mxu0 %v342_v34  ;;  %2122 = vmatmul.mubr.f32.gmra.mrb[4].mxu1 %v623_v35  ;;  %v900_v34 = vld [vmem:[%s2744_s20 + $0x8] sm:$0xff] }
  0x39   : > { %2038 = vmatprep.mubr.f32.mxu0 %v343_v36  ;;  %2124 = vmatprep.mubr.f32.mxu1 %v624_v37  ;;  %v1181_v35 = vld [vmem:[%s2750_s25 + $0x8] sm:$0xff]  ;;  %v901_v36 = vld [vmem:[%s2744_s20 + $0x10] sm:$0xff] }
  0x3a   : > { %2416 = vmatpush3.bf16.msra.mxu0 %v2556_v8  ;;  %2448 = vmatpush3.bf16.msra.mxu1 %v2556_v8  ;;  %v361_v8 = vld [vmem:[%s2570_s19 + $0xc0] sm:$0xff]  ;;  %v1182_v37 = vld [vmem:[%s2750_s25 + $0x10] sm:$0xff] }
  0x3b   : > { %2418 = vmatprep.subr.bf16.mxu0 %v2584_v13  ;;  %2450 = vmatprep.subr.bf16.mxu1 %v2584_v13 }
  0x3c   : > { %2039 = vmatmul.mubr.f32.gmra.mrb[6].mxu0 %v344_v38  ;;  %2125 = vmatmul.mubr.f32.gmra.mrb[6].mxu1 %v625_v39  ;;  %v902_v38 = vld [vmem:[%s2744_s20 + $0x18] sm:$0xff] }
  0x3d   : > { %2041 = vmatprep.mubr.f32.mxu0 %v345_v40  ;;  %2127 = vmatprep.mubr.f32.mxu1 %v626_v41  ;;  %v1183_v39 = vld [vmem:[%s2750_s25 + $0x18] sm:$0xff]  ;;  %v903_v40 = vld [vmem:[%s2744_s20 + $0x20] sm:$0xff] }
  0x3e   : > { %2420 = vmatpush3.bf16.msra.mxu0 %v2584_v13  ;;  %2452 = vmatpush3.bf16.msra.mxu1 %v2584_v13  ;;  %v644_v13 = vld [vmem:[%s2576_s23 + $0xd0] sm:$0xff]  ;;  %v1184_v41 = vld [vmem:[%s2750_s25 + $0x20] sm:$0xff] }
  0x3f   : > { %2422 = vmatprep.subr.bf16.mxu0 %v2596_v16  ;;  %2454 = vmatprep.subr.bf16.mxu1 %v2596_v16 }
  0x40   : > { %2042 = vmatmul.mubr.f32.gmra.mrb[8].mxu0 %v346_v42  ;;  %2128 = vmatmul.mubr.f32.gmra.mrb[8].mxu1 %v627_v43  ;;  %v904_v42 = vld [vmem:[%s2744_s20 + $0x28] sm:$0xff] }
  0x41   : > { %2044 = vmatprep.mubr.f32.mxu0 %v347_v44  ;;  %2130 = vmatprep.mubr.f32.mxu1 %v628_v45  ;;  %v1185_v43 = vld [vmem:[%s2750_s25 + $0x28] sm:$0xff]  ;;  %v905_v44 = vld [vmem:[%s2744_s20 + $0x30] sm:$0xff] }
  0x42   : > { %2424 = vmatpush3.bf16.msra.mxu0 %v2596_v16  ;;  %2456 = vmatpush3.bf16.msra.mxu1 %v2596_v16  ;;  %v365_v16 = vld [vmem:[%s2570_s19 + $0xe0] sm:$0xff]  ;;  %v1186_v45 = vld [vmem:[%s2750_s25 + $0x30] sm:$0xff] }
  0x43   : > { %2426 = vmatprep.subr.bf16.mxu0 %v2608_v19  ;;  %2458 = vmatprep.subr.bf16.mxu1 %v2608_v19 }
  0x44   : > { %2045 = vmatmul.mubr.f32.gmra.mrb[10].mxu0 %v348_v46  ;;  %2131 = vmatmul.mubr.f32.gmra.mrb[10].mxu1 %v629_v47  ;;  %v906_v46 = vld [vmem:[%s2744_s20 + $0x38] sm:$0xff] }
  0x45   : > { %2047 = vmatprep.mubr.f32.mxu0 %v349_v48  ;;  %2133 = vmatprep.mubr.f32.mxu1 %v630_v49  ;;  %v1187_v47 = vld [vmem:[%s2750_s25 + $0x38] sm:$0xff]  ;;  %v907_v48 = vld [vmem:[%s2744_s20 + $0x40] sm:$0xff] }
  0x46   : > { %2428 = vmatpush3.bf16.msra.mxu0 %v2608_v19  ;;  %2460 = vmatpush3.bf16.msra.mxu1 %v2608_v19  ;;  %v647_v19 = vld [vmem:[%s2576_s23 + $0xe8] sm:$0xff]  ;;  %v1188_v49 = vld [vmem:[%s2750_s25 + $0x40] sm:$0xff] }
  0x47   : > { %2430 = vmatprep.subr.bf16.mxu0 %v2620_v22  ;;  %2462 = vmatprep.subr.bf16.mxu1 %v2620_v22 }
  0x48   : > { %2048 = vmatmul.mubr.f32.gmra.mrb[12].mxu0 %v350_v50  ;;  %2134 = vmatmul.mubr.f32.gmra.mrb[12].mxu1 %v631_v51  ;;  %v908_v50 = vld [vmem:[%s2744_s20 + $0x48] sm:$0xff] }
  0x49   : > { %2050 = vmatprep.mubr.f32.mxu0 %v351_v52  ;;  %2136 = vmatprep.mubr.f32.mxu1 %v632_v53  ;;  %v1189_v51 = vld [vmem:[%s2750_s25 + $0x48] sm:$0xff]  ;;  %v909_v52 = vld [vmem:[%s2744_s20 + $0x50] sm:$0xff] }
  0x4a   : > { %2432 = vmatpush3.bf16.msra.mxu0 %v2620_v22  ;;  %2464 = vmatpush3.bf16.msra.mxu1 %v2620_v22  ;;  %v368_v22 = vld [vmem:[%s2570_s19 + $0xf8] sm:$0xff]  ;;  %v1190_v53 = vld [vmem:[%s2750_s25 + $0x50] sm:$0xff] }
  0x4b   : > { %2434 = vmatprep.subr.bf16.mxu0 %v2632_v25  ;;  %2466 = vmatprep.subr.bf16.mxu1 %v2632_v25 }
  0x4c   : > { %2051 = vmatmul.mubr.f32.gmra.mrb[14].mxu0 %v352_v54  ;;  %2137 = vmatmul.mubr.f32.gmra.mrb[14].mxu1 %v633_v55  ;;  %v910_v54 = vld [vmem:[%s2744_s20 + $0x58] sm:$0xff] }
  0x4d   : > { %2053 = vmatprep.mubr.f32.mxu0 %v353_v56  ;;  %2139 = vmatprep.mubr.f32.mxu1 %v634_v57  ;;  %v1191_v55 = vld [vmem:[%s2750_s25 + $0x58] sm:$0xff]  ;;  %v911_v56 = vld [vmem:[%s2744_s20 + $0x60] sm:$0xff] }
  0x4e   : > { %2436 = vmatpush3.bf16.msra.mxu0 %v2632_v25  ;;  %2468 = vmatpush3.bf16.msra.mxu1 %v2632_v25  ;;  %v650_v25 = vld [vmem:[%s2576_s23 + $0x100] sm:$0xff] }
  0x4f   : > { %v1192_v57 = vld [vmem:[%s2750_s25 + $0x60] sm:$0xff] }
  0x50   : > { %2054 = vmatmul.mubr.f32.gmra.mrb[16].mxu0 %v354_v58  ;;  %2140 = vmatmul.mubr.f32.gmra.mrb[16].mxu1 %v635_v59  ;;  %v912_v58 = vld [vmem:[%s2744_s20 + $0x68] sm:$0xff] }
  0x51   : > { %2056 = vmatprep.mubr.f32.mxu0 %v355_v60  ;;  %2142 = vmatprep.mubr.f32.mxu1 %v636_v61  ;;  %v1193_v59 = vld [vmem:[%s2750_s25 + $0x68] sm:$0xff]  ;;  %v913_v60 = vld [vmem:[%s2744_s20 + $0x70] sm:$0xff] }
  0x52   : > { %v1194_v61 = vld [vmem:[%s2750_s25 + $0x70] sm:$0xff] }
  0x54   : > { %2057 = vmatmul.mubr.f32.gmra.mrb[18].mxu0 %v356_v62  ;;  %2143 = vmatmul.mubr.f32.gmra.mrb[18].mxu1 %v637_v63  ;;  %v914_v62 = vld [vmem:[%s2744_s20 + $0x78] sm:$0xff] }
  0x55   : > { %2059 = vmatprep.mubr.f32.mxu0 %v357_v0  ;;  %2145 = vmatprep.mubr.f32.mxu1 %v638_v1  ;;  %v1195_v63 = vld [vmem:[%s2750_s25 + $0x78] sm:$0xff]  ;;  %v915_v0 = vld [vmem:[%s2744_s20 + $0x80] sm:$0xff] }
  0x56   : > { %v1196_v1 = vld [vmem:[%s2750_s25 + $0x80] sm:$0xff] }
  0x58   : > { %2060 = vmatmul.mubr.f32.gmra.mrb[20].mxu0 %v358_v2  ;;  %2146 = vmatmul.mubr.f32.gmra.mrb[20].mxu1 %v639_v3  ;;  %v916_v2 = vld [vmem:[%s2744_s20 + $0x88] sm:$0xff] }
  0x59   : > { %2062 = vmatprep.mubr.f32.mxu0 %v359_v4  ;;  %2148 = vmatprep.mubr.f32.mxu1 %v640_v5  ;;  %v1197_v3 = vld [vmem:[%s2750_s25 + $0x88] sm:$0xff]  ;;  %v917_v4 = vld [vmem:[%s2744_s20 + $0x90] sm:$0xff] }
  0x5a   : > { %v1198_v5 = vld [vmem:[%s2750_s25 + $0x90] sm:$0xff] }
  0x5c   : > { %2063 = vmatmul.mubr.f32.gmra.mrb[22].mxu0 %v360_v6  ;;  %2149 = vmatmul.mubr.f32.gmra.mrb[22].mxu1 %v641_v7  ;;  %v918_v6 = vld [vmem:[%s2744_s20 + $0x98] sm:$0xff] }
  0x5d   : > { %2065 = vmatprep.mubr.f32.mxu0 %v361_v8  ;;  %2151 = vmatprep.mubr.f32.mxu1 %v642_v9  ;;  %v1199_v7 = vld [vmem:[%s2750_s25 + $0x98] sm:$0xff]  ;;  %v919_v8 = vld [vmem:[%s2744_s20 + $0xa0] sm:$0xff] }
  0x5e   : > { %v1200_v9 = vld [vmem:[%s2750_s25 + $0xa0] sm:$0xff] }
  0x60   : > { %2066 = vmatmul.mubr.f32.gmra.mrb[24].mxu0 %v362_v10  ;;  %2152 = vmatmul.mubr.f32.gmra.mrb[24].mxu1 %v643_v11  ;;  %v920_v10 = vld [vmem:[%s2744_s20 + $0xa8] sm:$0xff] }
  0x61   : > { %2068 = vmatprep.mubr.f32.mxu0 %v363_v12  ;;  %2154 = vmatprep.mubr.f32.mxu1 %v644_v13  ;;  %v1201_v11 = vld [vmem:[%s2750_s25 + $0xa8] sm:$0xff]  ;;  %v921_v12 = vld [vmem:[%s2744_s20 + $0xb0] sm:$0xff] }
  0x62   : > { %v1202_v13 = vld [vmem:[%s2750_s25 + $0xb0] sm:$0xff] }
  0x64   : > { %2069 = vmatmul.mubr.f32.gmra.mrb[26].mxu0 %v364_v14  ;;  %2155 = vmatmul.mubr.f32.gmra.mrb[26].mxu1 %v645_v15  ;;  %v922_v14 = vld [vmem:[%s2744_s20 + $0xb8] sm:$0xff] }
  0x65   : > { %2071 = vmatprep.mubr.f32.mxu0 %v365_v16  ;;  %2157 = vmatprep.mubr.f32.mxu1 %v646_v17  ;;  %v1203_v15 = vld [vmem:[%s2750_s25 + $0xb8] sm:$0xff]  ;;  %v923_v16 = vld [vmem:[%s2744_s20 + $0xc0] sm:$0xff] }
  0x66   : > { %v1204_v17 = vld [vmem:[%s2750_s25 + $0xc0] sm:$0xff] }
  0x68   : > { %2072 = vmatmul.mubr.f32.gmra.mrb[28].mxu0 %v366_v18  ;;  %2158 = vmatmul.mubr.f32.gmra.mrb[28].mxu1 %v647_v19  ;;  %v924_v18 = vld [vmem:[%s2744_s20 + $0xc8] sm:$0xff] }
  0x69   : > { %2074 = vmatprep.mubr.f32.mxu0 %v367_v20  ;;  %2160 = vmatprep.mubr.f32.mxu1 %v648_v21  ;;  %v1205_v19 = vld [vmem:[%s2750_s25 + $0xc8] sm:$0xff]  ;;  %v925_v20 = vld [vmem:[%s2744_s20 + $0xd0] sm:$0xff] }
  0x6a   : > { %v1206_v21 = vld [vmem:[%s2750_s25 + $0xd0] sm:$0xff] }
  0x6c   : > { %2075 = vmatmul.mubr.f32.gmra.mrb[30].mxu0 %v368_v22  ;;  %2161 = vmatmul.mubr.f32.gmra.mrb[30].mxu1 %v649_v23  ;;  %v926_v22 = vld [vmem:[%s2744_s20 + $0xd8] sm:$0xff] }
  0x6d   : > { %2077 = vmatprep.mubr.f32.mxu0 %v369_v24  ;;  %2163 = vmatprep.mubr.f32.mxu1 %v650_v25  ;;  %v1207_v23 = vld [vmem:[%s2750_s25 + $0xd8] sm:$0xff]  ;;  %v927_v24 = vld [vmem:[%s2744_s20 + $0xe0] sm:$0xff] }
  0x6e   : > { %v1208_v25 = vld [vmem:[%s2750_s25 + $0xe0] sm:$0xff] }
  0x70   : > { %2078 = vmatmul.mubr.f32.gmra.mrb[32].mxu0 %v370_v26  ;;  %2164 = vmatmul.mubr.f32.gmra.mrb[32].mxu1 %v651_v27  ;;  %v928_v26 = vld [vmem:[%s2744_s20 + $0xe8] sm:$0xff] }
  0x71   : > { %2080 = vmatprep.mubr.f32.mxu0 %v371_v28  ;;  %2166 = vmatprep.mubr.f32.mxu1 %v652_v29  ;;  %v1209_v27 = vld [vmem:[%s2750_s25 + $0xe8] sm:$0xff]  ;;  %v929_v28 = vld [vmem:[%s2744_s20 + $0xf0] sm:$0xff] }
  0x72   : > { %v1210_v29 = vld [vmem:[%s2750_s25 + $0xf0] sm:$0xff] }
  0x74   : > { %2081 = vmatmul.mubr.f32.gmra.mrb[34].mxu0 %v372_v30  ;;  %2167 = vmatmul.mubr.f32.gmra.mrb[34].mxu1 %v653_v31  ;;  %v930_v30 = vld [vmem:[%s2744_s20 + $0xf8] sm:$0xff] }
  0x75   : > { %2201 = vmatprep.mubr.f32.mxu0 %v899_v32  ;;  %2287 = vmatprep.mubr.f32.mxu1 %v1180_v33  ;;  %v1211_v31 = vld [vmem:[%s2750_s25 + $0xf8] sm:$0xff]  ;;  %v931_v32 = vld [vmem:[%s2744_s20 + $0x100] sm:$0xff] }
  0x76   : > { %v1212_v33 = vld [vmem:[%s2750_s25 + $0x100] sm:$0xff] }
  0x78   : > { %2202 = vmatmul.mubr.f32.vlgmr.msra.gmra.mrb[36].mxu0 %v900_v34  ;;  %2288 = vmatmul.mubr.f32.vlgmr.msra.gmra.mrb[36].mxu1 %v1181_v35  ;;  %v932_v34 = vld [vmem:[%s2744_s20 + $0x108] sm:$0xff] }
  0x79   : > { %2204 = vmatprep.mubr.f32.mxu0 %v901_v36  ;;  %2290 = vmatprep.mubr.f32.mxu1 %v1182_v37  ;;  %v1213_v35 = vld [vmem:[%s2750_s25 + $0x108] sm:$0xff]  ;;  %v933_v36 = vld [vmem:[%s2744_s20 + $0x110] sm:$0xff] }
  0x7a   : > { %v1214_v37 = vld [vmem:[%s2750_s25 + $0x110] sm:$0xff] }
  0x7c   : > { %2205 = vmatmul.mubr.f32.gmra.mrb[38].mxu0 %v902_v38  ;;  %2291 = vmatmul.mubr.f32.gmra.mrb[38].mxu1 %v1183_v39  ;;  %v934_v38 = vld [vmem:[%s2744_s20 + $0x118] sm:$0xff] }
  0x7d   : > { %2207 = vmatprep.mubr.f32.mxu0 %v903_v40  ;;  %2293 = vmatprep.mubr.f32.mxu1 %v1184_v41  ;;  %v1215_v39 = vld [vmem:[%s2750_s25 + $0x118] sm:$0xff] }
  0x80   : > { %2208 = vmatmul.mubr.f32.gmra.mrb[40].mxu0 %v904_v42  ;;  %2294 = vmatmul.mubr.f32.gmra.mrb[40].mxu1 %v1185_v43 }
  0x81   : > { %2210 = vmatprep.mubr.f32.mxu0 %v905_v44  ;;  %2296 = vmatprep.mubr.f32.mxu1 %v1186_v45 }
  0x84   : > { %2211 = vmatmul.mubr.f32.gmra.mrb[42].mxu0 %v906_v46  ;;  %2297 = vmatmul.mubr.f32.gmra.mrb[42].mxu1 %v1187_v47 }
  0x85   : > { %2213 = vmatprep.mubr.f32.mxu0 %v907_v48  ;;  %2299 = vmatprep.mubr.f32.mxu1 %v1188_v49 }
  0x88   : > { %2214 = vmatmul.mubr.f32.gmra.mrb[44].mxu0 %v908_v50  ;;  %2300 = vmatmul.mubr.f32.gmra.mrb[44].mxu1 %v1189_v51 }
  0x89   : > { %2216 = vmatprep.mubr.f32.mxu0 %v909_v52  ;;  %2302 = vmatprep.mubr.f32.mxu1 %v1190_v53 }
  0x8c   : > { %2217 = vmatmul.mubr.f32.gmra.mrb[46].mxu0 %v910_v54  ;;  %2303 = vmatmul.mubr.f32.gmra.mrb[46].mxu1 %v1191_v55 }
  0x8d   : > { %2219 = vmatprep.mubr.f32.mxu0 %v911_v56  ;;  %2305 = vmatprep.mubr.f32.mxu1 %v1192_v57 }
  0x90   : > { %2220 = vmatmul.mubr.f32.gmra.mrb[48].mxu0 %v912_v58  ;;  %2306 = vmatmul.mubr.f32.gmra.mrb[48].mxu1 %v1193_v59 }
  0x91   : > { %2222 = vmatprep.mubr.f32.mxu0 %v913_v60  ;;  %2308 = vmatprep.mubr.f32.mxu1 %v1194_v61 }
  0x94   : > { %2223 = vmatmul.mubr.f32.gmra.mrb[50].mxu0 %v914_v62  ;;  %2309 = vmatmul.mubr.f32.gmra.mrb[50].mxu1 %v1195_v63 }
  0x95   : > { %2225 = vmatprep.mubr.f32.mxu0 %v915_v0  ;;  %2311 = vmatprep.mubr.f32.mxu1 %v1196_v1 }
  0x98   : > { %2226 = vmatmul.mubr.f32.gmra.mrb[52].mxu0 %v916_v2  ;;  %2312 = vmatmul.mubr.f32.gmra.mrb[52].mxu1 %v1197_v3 }
  0x99   : > { %2228 = vmatprep.mubr.f32.mxu0 %v917_v4  ;;  %2314 = vmatprep.mubr.f32.mxu1 %v1198_v5 }
  0x9c   : > { %2229 = vmatmul.mubr.f32.gmra.mrb[54].mxu0 %v918_v6  ;;  %2315 = vmatmul.mubr.f32.gmra.mrb[54].mxu1 %v1199_v7 }
  0x9d   : > { %2231 = vmatprep.mubr.f32.mxu0 %v919_v8  ;;  %2317 = vmatprep.mubr.f32.mxu1 %v1200_v9 }
  0xa0   : > { %2232 = vmatmul.mubr.f32.gmra.mrb[56].mxu0 %v920_v10  ;;  %2318 = vmatmul.mubr.f32.gmra.mrb[56].mxu1 %v1201_v11 }
  0xa1   : > { %2234 = vmatprep.mubr.f32.mxu0 %v921_v12  ;;  %2320 = vmatprep.mubr.f32.mxu1 %v1202_v13 }
  0xa4   : > { %2235 = vmatmul.mubr.f32.gmra.mrb[58].mxu0 %v922_v14  ;;  %2321 = vmatmul.mubr.f32.gmra.mrb[58].mxu1 %v1203_v15 }
  0xa5   : > { %2237 = vmatprep.mubr.f32.mxu0 %v923_v16  ;;  %2323 = vmatprep.mubr.f32.mxu1 %v1204_v17 }
  0xa8   : > { %2238 = vmatmul.mubr.f32.gmra.mrb[60].mxu0 %v924_v18  ;;  %2324 = vmatmul.mubr.f32.gmra.mrb[60].mxu1 %v1205_v19 }
  0xa9   : > { %2240 = vmatprep.mubr.f32.mxu0 %v925_v20  ;;  %2326 = vmatprep.mubr.f32.mxu1 %v1206_v21 }
  0xac   : > { %2241 = vmatmul.mubr.f32.gmra.mrb[62].mxu0 %v926_v22  ;;  %2327 = vmatmul.mubr.f32.gmra.mrb[62].mxu1 %v1207_v23 }
  0xad   : > { %2243 = vmatprep.mubr.f32.mxu0 %v927_v24  ;;  %2329 = vmatprep.mubr.f32.mxu1 %v1208_v25 }
  0xb0   : > { %2244 = vmatmul.mubr.f32.gmra.mrb[64].mxu0 %v928_v26  ;;  %2330 = vmatmul.mubr.f32.gmra.mrb[64].mxu1 %v1209_v27 }
  0xb1   : > { %2246 = vmatprep.mubr.f32.mxu0 %v929_v28  ;;  %2332 = vmatprep.mubr.f32.mxu1 %v1210_v29 }
  0xb4   : > { %2247 = vmatmul.mubr.f32.gmra.mrb[66].mxu0 %v930_v30  ;;  %2333 = vmatmul.mubr.f32.gmra.mrb[66].mxu1 %v1211_v31 }
  0xb5   : > { %2249 = vmatprep.mubr.f32.mxu0 %v931_v32  ;;  %2335 = vmatprep.mubr.f32.mxu1 %v1212_v33 }
  0xb8   : > { %2250 = vmatmul.mubr.f32.gmra.mrb[68].mxu0 %v932_v34  ;;  %2336 = vmatmul.mubr.f32.gmra.mrb[68].mxu1 %v1213_v35 }
  0xb9   : > { %2252 = vmatprep.mubr.f32.mxu0 %v933_v36  ;;  %2338 = vmatprep.mubr.f32.mxu1 %v1214_v37 }
  0xbc   : > { %2253 = vmatmul.mubr.f32.gmra.mrb[70].mxu0 %v934_v38  ;;  %2339 = vmatmul.mubr.f32.gmra.mrb[70].mxu1 %v1215_v39 }
 0x103   : > { %v2826_v40 = vpop.f32.mrb[0].mxu0  ;;  %v2828_v41 = vpop.f32.mrb[0].mxu1 }
 0x104   : > { %v2832_v43 = vpop.f32.mrb[1].mxu0  ;;  %v2834_v44 = vpop.f32.mrb[1].mxu1  ;;  %v3289_v35 = vmax.f32 %v2826_v40, %v2828_v41 }
 0x107   : > { %v2838_v46 = vpop.f32.mrb[2].mxu0  ;;  %v2840_v47 = vpop.f32.mrb[2].mxu1 }
 0x108   : > { %v2844_v49 = vpop.f32.mrb[3].mxu0  ;;  %v2846_v50 = vpop.f32.mrb[3].mxu1 }
 0x10b   : > { %v2850_v52 = vpop.f32.mrb[4].mxu0  ;;  %v2852_v53 = vpop.f32.mrb[4].mxu1 }
 0x10c   : > { %v2856_v55 = vpop.f32.mrb[5].mxu0  ;;  %v2858_v56 = vpop.f32.mrb[5].mxu1 }
 0x10f   : > { %v2862_v58 = vpop.f32.mrb[6].mxu0  ;;  %v2864_v59 = vpop.f32.mrb[6].mxu1 }
 0x110   : > { %v2868_v61 = vpop.f32.mrb[7].mxu0  ;;  %v2870_v62 = vpop.f32.mrb[7].mxu1 }
 0x113   : > { %v2874_v0 = vpop.f32.mrb[8].mxu0  ;;  %v2876_v1 = vpop.f32.mrb[8].mxu1 }
 0x114   : > { %v2880_v3 = vpop.f32.mrb[9].mxu0  ;;  %v2882_v4 = vpop.f32.mrb[9].mxu1 }
 0x117   : > { %v2886_v6 = vpop.f32.mrb[10].mxu0  ;;  %v2888_v7 = vpop.f32.mrb[10].mxu1 }
 0x118   : > { %v2892_v9 = vpop.f32.mrb[11].mxu0  ;;  %v2894_v10 = vpop.f32.mrb[11].mxu1 }
 0x11b   : > { %v2898_v12 = vpop.f32.mrb[12].mxu0  ;;  %v2900_v13 = vpop.f32.mrb[12].mxu1 }
 0x11c   : > { %v2904_v15 = vpop.f32.mrb[13].mxu0  ;;  %v2906_v16 = vpop.f32.mrb[13].mxu1 }
 0x11f   : > { %v2910_v18 = vpop.f32.mrb[14].mxu0  ;;  %v2912_v19 = vpop.f32.mrb[14].mxu1 }
 0x120   : > { %v2916_v21 = vpop.f32.mrb[15].mxu0  ;;  %v2918_v22 = vpop.f32.mrb[15].mxu1 }
 0x123   : > { %v2922_v24 = vpop.f32.mrb[16].mxu0  ;;  %v2924_v25 = vpop.f32.mrb[16].mxu1 }
 0x124   : > { %v2928_v27 = vpop.f32.mrb[17].mxu0  ;;  %v2930_v28 = vpop.f32.mrb[17].mxu1 }
 0x127   : > { %v2934_v30 = vpop.f32.mrb[18].mxu0  ;;  %v2936_v31 = vpop.f32.mrb[18].mxu1 }
 0x128   : > { %v2940_v33 = vpop.f32.mrb[19].mxu0  ;;  %v2942_v34 = vpop.f32.mrb[19].mxu1 }
 0x12b   : > { %v2946_v36 = vpop.f32.mrb[20].mxu0  ;;  %v2948_v37 = vpop.f32.mrb[20].mxu1 }
 0x12c   : > { %v2952_v39 = vpop.f32.mrb[21].mxu0  ;;  %v2954_v29 = vpop.f32.mrb[21].mxu1 }
 0x12f   : > { %v2958_v26 = vpop.f32.mrb[22].mxu0  ;;  %v2960_v23 = vpop.f32.mrb[22].mxu1 }
 0x130   : > { %v2964_v20 = vpop.f32.mrb[23].mxu0  ;;  %v2966_v17 = vpop.f32.mrb[23].mxu1 }
 0x133   : > { %v2970_v14 = vpop.f32.mrb[24].mxu0  ;;  %v2972_v11 = vpop.f32.mrb[24].mxu1 }
 0x134   : > { %3266 = vst [vmem:[#allocation2_spill] sm:$0xff] %v2972_v11  ;;  %v2976_v8 = vpop.f32.mrb[25].mxu0  ;;  %v2978_v5 = vpop.f32.mrb[25].mxu1 }
 0x135   : > { %3267 = vst [vmem:[#allocation3_spill] sm:$0xff] %v2976_v8  ;;  %3268 = vst [vmem:[#allocation4_spill] sm:$0xff] %v2978_v5 }
 0x137   : > { %v2982_v2 = vpop.f32.mrb[26].mxu0  ;;  %v2984_v63 = vpop.f32.mrb[26].mxu1 }
 0x138   : > { %3269 = vst [vmem:[#allocation5_spill] sm:$0xff] %v2982_v2  ;;  %3270 = vst [vmem:[#allocation6_spill] sm:$0xff] %v2984_v63  ;;  %v2988_v60 = vpop.f32.mrb[27].mxu0  ;;  %v2990_v57 = vpop.f32.mrb[27].mxu1 }
 0x139   : > { %3271 = vst [vmem:[#allocation7_spill] sm:$0xff] %v2988_v60  ;;  %3272 = vst [vmem:[#allocation8_spill] sm:$0xff] %v2990_v57 }
 0x13b   : > { %v2994_v54 = vpop.f32.mrb[28].mxu0  ;;  %v2996_v51 = vpop.f32.mrb[28].mxu1 }
 0x13c   : > { %3273 = vst [vmem:[#allocation9_spill] sm:$0xff] %v2994_v54  ;;  %3274 = vst [vmem:[#allocation10_spill] sm:$0xff] %v2996_v51  ;;  %v3000_v48 = vpop.f32.mrb[29].mxu0  ;;  %v3002_v45 = vpop.f32.mrb[29].mxu1 }
 0x13d   : > { %3275 = vst [vmem:[#allocation11_spill] sm:$0xff] %v3000_v48  ;;  %3276 = vst [vmem:[#allocation12_spill] sm:$0xff] %v3002_v45 }
 0x13f   : > { %v3006_v42 = vpop.f32.mrb[30].mxu0  ;;  %v3008_v63 = vpop.f32.mrb[30].mxu1 }
 0x140   : > { %3277 = vst [vmem:[#allocation13_spill] sm:$0xff] %v3006_v42  ;;  %3278 = vst [vmem:[#allocation14_spill] sm:$0xff] %v3008_v63  ;;  %v3012_v57 = vpop.f32.mrb[31].mxu0  ;;  %v3014_v60 = vpop.f32.mrb[31].mxu1 }
 0x141   : > { %3279 = vst [vmem:[#allocation15_spill] sm:$0xff] %v3012_v57  ;;  %3280 = vst [vmem:[#allocation16_spill] sm:$0xff] %v3014_v60 }
 0x143   : > { %v3018_v51 = vpop.f32.mrb[32].mxu0  ;;  %v3020_v54 = vpop.f32.mrb[32].mxu1 }
 0x144   : > { %3281 = vst [vmem:[#allocation17_spill] sm:$0xff] %v3018_v51  ;;  %3282 = vst [vmem:[#allocation18_spill] sm:$0xff] %v3020_v54  ;;  %v3024_v45 = vpop.f32.mrb[33].mxu0  ;;  %v3026_v48 = vpop.f32.mrb[33].mxu1 }
 0x145   : > { %3283 = vst [vmem:[#allocation19_spill] sm:$0xff] %v3024_v45  ;;  %3284 = vst [vmem:[#allocation20_spill] sm:$0xff] %v3026_v48  ;;  %v3045_v48 = vld [vmem:[%s3241_s5] ss:$0 sm:$0xff] }
 0x147   : > { %v3030_v63 = vpop.f32.mrb[34].mxu0  ;;  %v3032_v42 = vpop.f32.mrb[34].mxu1 }
 0x148   : > { %3285 = vst [vmem:[#allocation21_spill] sm:$0xff] %v3030_v63  ;;  %3286 = vst [vmem:[#allocation22_spill] sm:$0xff] %v3032_v42  ;;  %v3036_v60 = vpop.f32.mrb[35].mxu0  ;;  %v3038_v57 = vpop.f32.mrb[35].mxu1  ;;  %v3290_v63 = vmax.f32 %v2832_v43, %v2834_v44  ;;  %v3291_v43 = vmax.f32 %v2838_v46, %v2840_v47 }
 0x149   : > { %3287 = vst [vmem:[#allocation23_spill] sm:$0xff] %v3036_v60  ;;  %3288 = vst [vmem:[#allocation24_spill] sm:$0xff] %v3038_v57 }
 0x14b   : > { %v2203_v54 = vpop.f32.mrb[36].mxu0  ;;  %v2289_v51 = vpop.f32.mrb[36].mxu1 }
 0x14c   : > { %v1498_v2 = vmax.f32 %v2203_v54, %v2289_v51  ;;  %v1001_v5 = vpop.f32.mrb[37].mxu0  ;;  %v1282_v32 = vpop.f32.mrb[37].mxu1 }
 0x14d   : > { %v1497_v45 = vmax.f32 %v1001_v5, %v1282_v32 }
 0x14e   : > { %v1534_v42 = vmax.f32 %v3289_v35, %v1498_v2 }
 0x14f   : > { %v1533_v38 = vmax.f32 %v3290_v63, %v1497_v45  ;;  %v2206_v57 = vpop.f32.mrb[38].mxu0  ;;  %v2292_v60 = vpop.f32.mrb[38].mxu1 }
 0x150   : > { %v1577_v51 = vadd.f32 %v3045_v48, %v1534_v42  ;;  %v1500_v54 = vmax.f32 %v2206_v57, %v2292_v60  ;;  %v1011_v8 = vpop.f32.mrb[39].mxu0  ;;  %v1292_v11 = vpop.f32.mrb[39].mxu1  ;;  %v3292_v42 = vmax.f32 %v2844_v49, %v2846_v50 }
 0x151   : > { %v1576_v40 = vadd.f32 %v3045_v48, %v1533_v38  ;;  %v1499_v41 = vmax.f32 %v1011_v8, %v1292_v11  ;;  %v3293_v38 = vmax.f32 %v2850_v52, %v2852_v53 }
 0x152   : > { %v1613_v2 = vmax.f32 %v1577_v51, 0.0  ;;  %v1536_v44 = vmax.f32 %v3291_v43, %v1500_v54  ;;  %v3294_v51 = vmax.f32 %v2856_v55, %v2858_v56 }
 0x153   : > { %v1612_v45 = vmax.f32 %v1576_v40, 0.0  ;;  %v1535_v57 = vmax.f32 %v3292_v42, %v1499_v41  ;;  %v2209_v60 = vpop.f32.mrb[40].mxu0  ;;  %v2295_v63 = vpop.f32.mrb[40].mxu1 }
 0x154   : > { %1649 = vst [vmem:[%s3058_s28 + $0x8] sm:$0xff] %v1613_v2  ;;  %v1579_v5 = vadd.f32 %v3045_v48, %v1536_v44  ;;  %v1502_v32 = vmax.f32 %v2209_v60, %v2295_v63  ;;  %v1021_v35 = vpop.f32.mrb[41].mxu0  ;;  %v1302_v8 = vpop.f32.mrb[41].mxu1  ;;  %v3296_v60 = vmax.f32 %v2868_v61, %v2870_v62 }
 0x155   : > { %1648 = vst [vmem:[%s3058_s28] sm:$0xff] %v1612_v45  ;;  %v1578_v11 = vadd.f32 %v3045_v48, %v1535_v57  ;;  %v1501_v46 = vmax.f32 %v1021_v35, %v1302_v8  ;;  %v3295_v57 = vmax.f32 %v2862_v58, %v2864_v59 }
 0x156   : > { %v1615_v47 = vmax.f32 %v1579_v5, 0.0  ;;  %v1538_v49 = vmax.f32 %v3293_v38, %v1502_v32  ;;  %v3297_v38 = vmax.f32 %v2874_v0, %v2876_v1 }
 0x157   : > { %v1614_v50 = vmax.f32 %v1578_v11, 0.0  ;;  %v1537_v54 = vmax.f32 %v3294_v51, %v1501_v46  ;;  %v2212_v40 = vpop.f32.mrb[42].mxu0  ;;  %v2298_v41 = vpop.f32.mrb[42].mxu1 }
 0x158   : > { %1651 = vst [vmem:[%s3058_s28 + $0x18] sm:$0xff] %v1615_v47  ;;  %v1581_v2 = vadd.f32 %v3045_v48, %v1538_v49  ;;  %v1504_v43 = vmax.f32 %v2212_v40, %v2298_v41  ;;  %v1031_v44 = vpop.f32.mrb[43].mxu0  ;;  %v1312_v45 = vpop.f32.mrb[43].mxu1  ;;  %v3298_v49 = vmax.f32 %v2880_v3, %v2882_v4 }
 0x159   : > { %1650 = vst [vmem:[%s3058_s28 + $0x10] sm:$0xff] %v1614_v50  ;;  %v1580_v42 = vadd.f32 %v3045_v48, %v1537_v54  ;;  %v1503_v52 = vmax.f32 %v1031_v44, %v1312_v45  ;;  %v3299_v45 = vmax.f32 %v2886_v6, %v2888_v7 }
 0x15a   : > { %v1617_v53 = vmax.f32 %v1581_v2, 0.0  ;;  %v1540_v55 = vmax.f32 %v3295_v57, %v1504_v43 }
 0x15b   : > { %v1616_v56 = vmax.f32 %v1580_v42, 0.0  ;;  %v1539_v63 = vmax.f32 %v3296_v60, %v1503_v52  ;;  %v2215_v5 = vpop.f32.mrb[44].mxu0  ;;  %v2301_v32 = vpop.f32.mrb[44].mxu1  ;;  %v3300_v42 = vmax.f32 %v2892_v9, %v2894_v10 }
 0x15c   : > { %1653 = vst [vmem:[%s3058_s28 + $0x28] sm:$0xff] %v1617_v53  ;;  %v1583_v35 = vadd.f32 %v3045_v48, %v1540_v55  ;;  %v1506_v8 = vmax.f32 %v2215_v5, %v2301_v32  ;;  %v1041_v11 = vpop.f32.mrb[45].mxu0  ;;  %v1322_v46 = vpop.f32.mrb[45].mxu1  ;;  %v3301_v32 = vmax.f32 %v2898_v12, %v2900_v13 }
 0x15d   : > { %1652 = vst [vmem:[%s3058_s28 + $0x20] sm:$0xff] %v1616_v56  ;;  %v1582_v47 = vadd.f32 %v3045_v48, %v1539_v63  ;;  %v1505_v58 = vmax.f32 %v1041_v11, %v1322_v46 }
 0x15e   : > { %v1619_v59 = vmax.f32 %v1583_v35, 0.0  ;;  %v1542_v61 = vmax.f32 %v3297_v38, %v1506_v8  ;;  %v3302_v35 = vmax.f32 %v2904_v15, %v2906_v16 }
 0x15f   : > { %v1618_v62 = vmax.f32 %v1582_v47, 0.0  ;;  %v1541_v50 = vmax.f32 %v3298_v49, %v1505_v58  ;;  %v2218_v51 = vpop.f32.mrb[46].mxu0  ;;  %v2304_v54 = vpop.f32.mrb[46].mxu1  ;;  %v3304_v49 = vmax.f32 %v2916_v21, %v2918_v22 }
 0x160   : > { %1655 = vst [vmem:[%s3058_s28 + $0x38] sm:$0xff] %v1619_v59  ;;  %v1585_v40 = vadd.f32 %v3045_v48, %v1542_v61  ;;  %v1508_v41 = vmax.f32 %v2218_v51, %v2304_v54  ;;  %v1051_v2 = vpop.f32.mrb[47].mxu0  ;;  %v1332_v43 = vpop.f32.mrb[47].mxu1 }
 0x161   : > { %1654 = vst [vmem:[%s3058_s28 + $0x30] sm:$0xff] %v1618_v62  ;;  %v1584_v44 = vadd.f32 %v3045_v48, %v1541_v50  ;;  %v1507_v0 = vmax.f32 %v1051_v2, %v1332_v43  ;;  %v3303_v62 = vmax.f32 %v2910_v18, %v2912_v19 }
 0x162   : > { %v1621_v1 = vmax.f32 %v1585_v40, 0.0  ;;  %v1544_v3 = vmax.f32 %v3299_v45, %v1508_v41 }
 0x163   : > { %v1620_v4 = vmax.f32 %v1584_v44, 0.0  ;;  %v1543_v52 = vmax.f32 %v3300_v42, %v1507_v0  ;;  %v2221_v53 = vpop.f32.mrb[48].mxu0  ;;  %v2307_v57 = vpop.f32.mrb[48].mxu1  ;;  %v3305_v0 = vmax.f32 %v2922_v24, %v2924_v25 }
 0x164   : > { %1657 = vst [vmem:[%s3058_s28 + $0x48] sm:$0xff] %v1621_v1  ;;  %v1587_v55 = vadd.f32 %v3045_v48, %v1544_v3  ;;  %v1510_v56 = vmax.f32 %v2221_v53, %v2307_v57  ;;  %v1061_v60 = vpop.f32.mrb[49].mxu0  ;;  %v1342_v63 = vpop.f32.mrb[49].mxu1  ;;  %v3306_v1 = vmax.f32 %v2928_v27, %v2930_v28 }
 0x165   : > { %1656 = vst [vmem:[%s3058_s28 + $0x40] sm:$0xff] %v1620_v4  ;;  %v1586_v5 = vadd.f32 %v3045_v48, %v1543_v52  ;;  %v1509_v6 = vmax.f32 %v1061_v60, %v1342_v63  ;;  %v3308_v60 = vmax.f32 %v2940_v33, %v2942_v34 }
 0x166   : > { %v1623_v7 = vmax.f32 %v1587_v55, 0.0  ;;  %v1546_v9 = vmax.f32 %v3301_v32, %v1510_v56  ;;  %v3307_v56 = vmax.f32 %v2934_v30, %v2936_v31 }
 0x167   : > { %v1622_v10 = vmax.f32 %v1586_v5, 0.0  ;;  %v1545_v8 = vmax.f32 %v3302_v35, %v1509_v6  ;;  %v2224_v11 = vpop.f32.mrb[50].mxu0  ;;  %v2310_v46 = vpop.f32.mrb[50].mxu1 }
 0x168   : > { %1659 = vst [vmem:[%s3058_s28 + $0x58] sm:$0xff] %v1623_v7  ;;  %v1589_v47 = vadd.f32 %v3045_v48, %v1546_v9  ;;  %v1512_v58 = vmax.f32 %v2224_v11, %v2310_v46  ;;  %v1071_v59 = vpop.f32.mrb[51].mxu0  ;;  %v1352_v38 = vpop.f32.mrb[51].mxu1  ;;  %v3310_v11 = vmax.f32 %v2952_v39, %v2954_v29 }
 0x169   : > { %1658 = vst [vmem:[%s3058_s28 + $0x50] sm:$0xff] %v1622_v10  ;;  %v1588_v61 = vadd.f32 %v3045_v48, %v1545_v8  ;;  %v1511_v12 = vmax.f32 %v1071_v59, %v1352_v38  ;;  %v3309_v8 = vmax.f32 %v2946_v36, %v2948_v37 }
 0x16a   : > { %v1625_v13 = vmax.f32 %v1589_v47, 0.0  ;;  %v1548_v15 = vmax.f32 %v3303_v62, %v1512_v58  ;;  %v3311_v62 = vmax.f32 %v2958_v26, %v2960_v23 }
 0x16b   : > { %v1624_v16 = vmax.f32 %v1588_v61, 0.0  ;;  %v1547_v50 = vmax.f32 %v3304_v49, %v1511_v12  ;;  %v2227_v51 = vpop.f32.mrb[52].mxu0  ;;  %v2313_v54 = vpop.f32.mrb[52].mxu1 }
 0x16c   : > { %1661 = vst [vmem:[%s3058_s28 + $0x68] sm:$0xff] %v1625_v13  ;;  %v1591_v40 = vadd.f32 %v3045_v48, %v1548_v15  ;;  %v1514_v41 = vmax.f32 %v2227_v51, %v2313_v54  ;;  %v1081_v2 = vpop.f32.mrb[53].mxu0  ;;  %v1362_v43 = vpop.f32.mrb[53].mxu1  ;;  %v3312_v15 = vmax.f32 %v2964_v20, %v2966_v17 }
 0x16d   : > { %1660 = vst [vmem:[%s3058_s28 + $0x60] sm:$0xff] %v1624_v16  ;;  %v1590_v44 = vadd.f32 %v3045_v48, %v1547_v50  ;;  %v1513_v18 = vmax.f32 %v1081_v2, %v1362_v43  ;;  %v3313_v43 = vld [vmem:[#allocation2_spill] sm:$0xff] }
 0x16e   : > { %v1627_v19 = vmax.f32 %v1591_v40, 0.0  ;;  %v1550_v21 = vmax.f32 %v3305_v0, %v1514_v41 }
 0x16f   : > { %v1626_v22 = vmax.f32 %v1590_v44, 0.0  ;;  %v1549_v45 = vmax.f32 %v3306_v1, %v1513_v18  ;;  %v2230_v3 = vpop.f32.mrb[54].mxu0  ;;  %v2316_v4 = vpop.f32.mrb[54].mxu1  ;;  %v3314_v44 = vmax.f32 %v2970_v14, %v3313_v43  ;;  %v3315_v18 = vld [vmem:[#allocation3_spill] sm:$0xff] }
 0x170   : > { %1663 = vst [vmem:[%s3058_s28 + $0x78] sm:$0xff] %v1627_v19  ;;  %v1593_v42 = vadd.f32 %v3045_v48, %v1550_v21  ;;  %v1516_v52 = vmax.f32 %v2230_v3, %v2316_v4  ;;  %v1091_v53 = vpop.f32.mrb[55].mxu0  ;;  %v1372_v57 = vpop.f32.mrb[55].mxu1  ;;  %v3316_v19 = vld [vmem:[#allocation4_spill] sm:$0xff] }
 0x171   : > { %1662 = vst [vmem:[%s3058_s28 + $0x70] sm:$0xff] %v1626_v22  ;;  %v1592_v55 = vadd.f32 %v3045_v48, %v1549_v45  ;;  %v1515_v24 = vmax.f32 %v1091_v53, %v1372_v57  ;;  %v3317_v0 = vmax.f32 %v3315_v18, %v3316_v19  ;;  %v3318_v57 = vld [vmem:[#allocation5_spill] sm:$0xff] }
 0x172   : > { %v1629_v25 = vmax.f32 %v1593_v42, 0.0  ;;  %v1552_v27 = vmax.f32 %v3307_v56, %v1516_v52 }
 0x173   : > { %v1628_v28 = vmax.f32 %v1592_v55, 0.0  ;;  %v1551_v63 = vmax.f32 %v3308_v60, %v1515_v24  ;;  %v2233_v5 = vpop.f32.mrb[56].mxu0  ;;  %v2319_v6 = vpop.f32.mrb[56].mxu1  ;;  %v3319_v55 = vld [vmem:[#allocation6_spill] sm:$0xff] }
 0x174   : > { %1665 = vst [vmem:[%s3058_s28 + $0x88] sm:$0xff] %v1629_v25  ;;  %v1595_v7 = vadd.f32 %v3045_v48, %v1552_v27  ;;  %v1518_v32 = vmax.f32 %v2233_v5, %v2319_v6  ;;  %v1101_v9 = vpop.f32.mrb[57].mxu0  ;;  %v1382_v10 = vpop.f32.mrb[57].mxu1  ;;  %v3320_v24 = vmax.f32 %v3318_v57, %v3319_v55  ;;  %v3321_v27 = vld [vmem:[#allocation7_spill] sm:$0xff] }
 0x175   : > { %1664 = vst [vmem:[%s3058_s28 + $0x80] sm:$0xff] %v1628_v28  ;;  %v1594_v35 = vadd.f32 %v3045_v48, %v1551_v63  ;;  %v1517_v30 = vmax.f32 %v1101_v9, %v1382_v10  ;;  %v3322_v28 = vld [vmem:[#allocation8_spill] sm:$0xff] }
 0x176   : > { %v1631_v31 = vmax.f32 %v1595_v7, 0.0  ;;  %v1554_v33 = vmax.f32 %v3309_v8, %v1518_v32  ;;  %v3323_v60 = vmax.f32 %v3321_v27, %v3322_v28  ;;  %v3324_v8 = vld [vmem:[#allocation9_spill] sm:$0xff] }
 0x177   : > { %v1630_v34 = vmax.f32 %v1594_v35, 0.0  ;;  %v1553_v46 = vmax.f32 %v3310_v11, %v1517_v30  ;;  %v2236_v47 = vpop.f32.mrb[58].mxu0  ;;  %v2322_v58 = vpop.f32.mrb[58].mxu1 }
 0x178   : > { %1667 = vst [vmem:[%s3058_s28 + $0x98] sm:$0xff] %v1631_v31  ;;  %v1597_v59 = vadd.f32 %v3045_v48, %v1554_v33  ;;  %v1520_v38 = vmax.f32 %v2236_v47, %v2322_v58  ;;  %v1111_v61 = vpop.f32.mrb[59].mxu0  ;;  %v1392_v12 = vpop.f32.mrb[59].mxu1  ;;  %v3325_v33 = vld [vmem:[#allocation10_spill] sm:$0xff]  ;;  %v3327_v47 = vld [vmem:[#allocation11_spill] sm:$0xff]  ;;  %v3328_v58 = vld [vmem:[#allocation12_spill] sm:$0xff] }
 0x179   : > { %1666 = vst [vmem:[%s3058_s28 + $0x90] sm:$0xff] %v1630_v34  ;;  %v1596_v13 = vadd.f32 %v3045_v48, %v1553_v46  ;;  %v1519_v36 = vmax.f32 %v1111_v61, %v1392_v12  ;;  %v3326_v34 = vmax.f32 %v3324_v8, %v3325_v33 }
 0x17a   : > { %v1633_v37 = vmax.f32 %v1597_v59, 0.0  ;;  %v1556_v29 = vmax.f32 %v3311_v62, %v1520_v38  ;;  %v3329_v59 = vmax.f32 %v3327_v47, %v3328_v58 }
 0x17b   : > { %v1632_v39 = vmax.f32 %v1596_v13, 0.0  ;;  %v1555_v16 = vmax.f32 %v3312_v15, %v1519_v36  ;;  %v2239_v49 = vpop.f32.mrb[60].mxu0  ;;  %v2325_v50 = vpop.f32.mrb[60].mxu1 }
 0x17c   : > { %1669 = vst [vmem:[%s3058_s28 + $0xa8] sm:$0xff] %v1633_v37  ;;  %v1599_v51 = vadd.f32 %v3045_v48, %v1556_v29  ;;  %v1522_v54 = vmax.f32 %v2239_v49, %v2325_v50  ;;  %v1121_v40 = vpop.f32.mrb[61].mxu0  ;;  %v1402_v41 = vpop.f32.mrb[61].mxu1  ;;  %v3331_v49 = vld [vmem:[#allocation14_spill] sm:$0xff] }
 0x17d   : > { %1668 = vst [vmem:[%s3058_s28 + $0xa0] sm:$0xff] %v1632_v39  ;;  %v1598_v2 = vadd.f32 %v3045_v48, %v1555_v16  ;;  %v1521_v23 = vmax.f32 %v1121_v40, %v1402_v41  ;;  %v3330_v16 = vld [vmem:[#allocation13_spill] sm:$0xff]  ;;  %v3333_v40 = vld [vmem:[#allocation15_spill] sm:$0xff]  ;;  %v3334_v41 = vld [vmem:[#allocation16_spill] sm:$0xff] }
 0x17e   : > { %v1635_v26 = vmax.f32 %v1599_v51, 0.0  ;;  %v1558_v17 = vmax.f32 %v3314_v44, %v1522_v54  ;;  %v3332_v50 = vmax.f32 %v3330_v16, %v3331_v49 }
 0x17f   : > { %v1634_v20 = vmax.f32 %v1598_v2, 0.0  ;;  %v1557_v21 = vmax.f32 %v3317_v0, %v1521_v23  ;;  %v2242_v22 = vpop.f32.mrb[62].mxu0  ;;  %v2328_v1 = vpop.f32.mrb[62].mxu1  ;;  %v3335_v2 = vmax.f32 %v3333_v40, %v3334_v41 }
 0x180   : > { %1671 = vst [vmem:[%s3058_s28 + $0xb8] sm:$0xff] %v1635_v26  ;;  %v1601_v45 = vadd.f32 %v3045_v48, %v1558_v17  ;;  %v1524_v3 = vmax.f32 %v2242_v22, %v2328_v1  ;;  %v1131_v4 = vpop.f32.mrb[63].mxu0  ;;  %v1412_v42 = vpop.f32.mrb[63].mxu1  ;;  %v3336_v22 = vld [vmem:[#allocation17_spill] sm:$0xff]  ;;  %v3337_v1 = vld [vmem:[#allocation18_spill] sm:$0xff] }
 0x181   : > { %1670 = vst [vmem:[%s3058_s28 + $0xb0] sm:$0xff] %v1634_v20  ;;  %v1600_v52 = vadd.f32 %v3045_v48, %v1557_v21  ;;  %v1523_v14 = vmax.f32 %v1131_v4, %v1412_v42  ;;  %v3339_v42 = vld [vmem:[#allocation19_spill] sm:$0xff] }
 0x182   : > { %v1637_v53 = vmax.f32 %v1601_v45, 0.0  ;;  %v1560_v25 = vmax.f32 %v3320_v24, %v1524_v3  ;;  %v3338_v45 = vmax.f32 %v3336_v22, %v3337_v1 }
 0x183   : > { %v1636_v56 = vmax.f32 %v1600_v52, 0.0  ;;  %v1559_v63 = vmax.f32 %v3323_v60, %v1523_v14  ;;  %v2245_v5 = vpop.f32.mrb[64].mxu0  ;;  %v2331_v6 = vpop.f32.mrb[64].mxu1  ;;  %v3340_v52 = vld [vmem:[#allocation20_spill] sm:$0xff] }
 0x184   : > { %1673 = vst [vmem:[%s3058_s28 + $0xc8] sm:$0xff] %v1637_v53  ;;  %v1603_v7 = vadd.f32 %v3045_v48, %v1560_v25  ;;  %v1526_v32 = vmax.f32 %v2245_v5, %v2331_v6  ;;  %v1141_v9 = vpop.f32.mrb[65].mxu0  ;;  %v1422_v10 = vpop.f32.mrb[65].mxu1  ;;  %v3341_v14 = vmax.f32 %v3339_v42, %v3340_v52  ;;  %v3342_v5 = vld [vmem:[#allocation21_spill] sm:$0xff]  ;;  %v3343_v6 = vld [vmem:[#allocation22_spill] sm:$0xff] }
 0x185   : > { %1672 = vst [vmem:[%s3058_s28 + $0xc0] sm:$0xff] %v1636_v56  ;;  %v1602_v35 = vadd.f32 %v3045_v48, %v1559_v63  ;;  %v1525_v30 = vmax.f32 %v1141_v9, %v1422_v10  ;;  %v3345_v10 = vld [vmem:[#allocation23_spill] sm:$0xff] }
 0x186   : > { %v1639_v31 = vmax.f32 %v1603_v7, 0.0  ;;  %v1562_v11 = vmax.f32 %v3326_v34, %v1526_v32  ;;  %v3344_v7 = vmax.f32 %v3342_v5, %v3343_v6 }
 0x187   : > { %v1638_v46 = vmax.f32 %v1602_v35, 0.0  ;;  %v1561_v38 = vmax.f32 %v3329_v59, %v1525_v30  ;;  %v2248_v61 = vpop.f32.mrb[66].mxu0  ;;  %v2334_v12 = vpop.f32.mrb[66].mxu1  ;;  %v3346_v35 = vld [vmem:[#allocation24_spill] sm:$0xff] }
 0x188   : > { %1675 = vst [vmem:[%s3058_s28 + $0xd8] sm:$0xff] %v1639_v31  ;;  %v1605_v13 = vadd.f32 %v3045_v48, %v1562_v11  ;;  %v1528_v36 = vmax.f32 %v2248_v61, %v2334_v12  ;;  %v1151_v37 = vpop.f32.mrb[67].mxu0  ;;  %v1432_v62 = vpop.f32.mrb[67].mxu1  ;;  %v3347_v30 = vmax.f32 %v3345_v10, %v3346_v35 }
 0x189   : > { %1674 = vst [vmem:[%s3058_s28 + $0xd0] sm:$0xff] %v1638_v46  ;;  %v1604_v29 = vadd.f32 %v3045_v48, %v1561_v38  ;;  %v1527_v39 = vmax.f32 %v1151_v37, %v1432_v62 }
 0x18a   : > { %v1641_v15 = vmax.f32 %v1605_v13, 0.0  ;;  %v1564_v51 = vmax.f32 %v3332_v50, %v1528_v36 }
 0x18b   : > { %v1640_v54 = vmax.f32 %v1604_v29, 0.0  ;;  %v1563_v23 = vmax.f32 %v3335_v2, %v1527_v39  ;;  %v2251_v26 = vpop.f32.mrb[68].mxu0  ;;  %v2337_v43 = vpop.f32.mrb[68].mxu1 }
 0x18c   : > { %1677 = vst [vmem:[%s3058_s28 + $0xe8] sm:$0xff] %v1641_v15  ;;  %v1607_v44 = vadd.f32 %v3045_v48, %v1564_v51  ;;  %v1530_v17 = vmax.f32 %v2251_v26, %v2337_v43  ;;  %v1161_v20 = vpop.f32.mrb[69].mxu0  ;;  %v1442_v18 = vpop.f32.mrb[69].mxu1 }
 0x18d   : > { %1676 = vst [vmem:[%s3058_s28 + $0xe0] sm:$0xff] %v1640_v54  ;;  %v1606_v19 = vadd.f32 %v3045_v48, %v1563_v23  ;;  %v1529_v0 = vmax.f32 %v1161_v20, %v1442_v18 }
 0x18e   : > { %v1643_v21 = vmax.f32 %v1607_v44, 0.0  ;;  %v1566_v3 = vmax.f32 %v3338_v45, %v1530_v17 }
 0x18f   : > { %v1642_v4 = vmax.f32 %v1606_v19, 0.0  ;;  %v1565_v53 = vmax.f32 %v3341_v14, %v1529_v0  ;;  %v2254_v57 = vpop.f32.mrb[70].mxu0  ;;  %v2340_v55 = vpop.f32.mrb[70].mxu1 }
 0x190   : > { %1679 = vst [vmem:[%s3058_s28 + $0xf8] sm:$0xff] %v1643_v21  ;;  %v1609_v24 = vadd.f32 %v3045_v48, %v1566_v3  ;;  %v1532_v25 = vmax.f32 %v2254_v57, %v2340_v55  ;;  %v1171_v56 = vpop.f32.mrb[71].mxu0  ;;  %v1452_v27 = vpop.f32.mrb[71].mxu1 }
 0x191   : > { %1678 = vst [vmem:[%s3058_s28 + $0xf0] sm:$0xff] %v1642_v4  ;;  %v1608_v28 = vadd.f32 %v3045_v48, %v1565_v53  ;;  %v1531_v60 = vmax.f32 %v1171_v56, %v1452_v27 }
 0x192   : > { %v1645_v63 = vmax.f32 %v1609_v24, 0.0  ;;  %v1568_v32 = vmax.f32 %v3344_v7, %v1532_v25 }
 0x193   : > { %v1644_v9 = vmax.f32 %v1608_v28, 0.0  ;;  %v1567_v31 = vmax.f32 %v3347_v30, %v1531_v60 }
 0x194   : > { %1681 = vst [vmem:[%s3058_s28 + $0x108] sm:$0xff] %v1645_v63  ;;  %v1611_v8 = vadd.f32 %v3045_v48, %v1568_v32 }
 0x195   : > { %1680 = vst [vmem:[%s3058_s28 + $0x100] sm:$0xff] %v1644_v9  ;;  %v1610_v33 = vadd.f32 %v3045_v48, %v1567_v31 }
 0x196   : > { %v1647_v34 = vmax.f32 %v1611_v8, 0.0 }
 0x197   : > { %v1646_v11 = vmax.f32 %v1610_v33, 0.0 }
 0x198   : > { %1683 = vst [vmem:[%s3058_s28 + $0x118] sm:$0xff] %v1647_v34 }
 0x199   : > { %1682 = vst [vmem:[%s3058_s28 + $0x110] sm:$0xff] %v1646_v11 }
 0x19a PF: > { %s16_s21 = sadd.s32 1, %s2483_s21  }
 0x19b   : > { %p13_p4 = scmp.ge.s32.totalorder %s16_s21, 4  }
 0x19d   :  { %15 = sbr.rel (!%p13_p4) target bundleno = 1 (0x1), region = 83 }

// kernel: siamese_forward.5
= control target key start
LH: loop header
LB: loop body
LE: loop exit
PB: predicated region body
PF: predicated region fallthrough
CT: control target
= control target key end

     0   :  { %s3995_s1 = inlined_call_operand.vmem [shape: f32[2048,256], index: 1, kind: input, shape index: {}]   ;;  %s3996_s0 = inlined_call_operand.vmem [shape: f32[8,2048], index: 0, kind: input, shape index: {}]   ;;  %s3997_s3 = inlined_call_operand.vmem [shape: f32[256,256], index: 3, kind: input, shape index: {}]   ;;  %s3998_s5 = inlined_call_operand.vmem [shape: f32[256,128], index: 5, kind: input, shape index: {}]   ;;  %s3999_s2 = inlined_call_operand.vmem [shape: f32[1,256], index: 2, kind: input, shape index: {}]   ;;  %s4000_s4 = inlined_call_operand.vmem [shape: f32[1,256], index: 4, kind: input, shape index: {}]   ;;  %s4001_s6 = inlined_call_operand.vmem [shape: f32[1,128], index: 6, kind: input, shape index: {}]   ;;  %s4002_s7 = inlined_call_operand.vmem [shape: f32[8,128], index: 7, kind: output, shape index: {}]  }
   0x1   :  { %v43_v0 = vld [vmem:[%s3995_s1 + $0x8] sm:$0xff]  ;;  %v45_v1 = vld [vmem:[%s3995_s1 + $0x18] sm:$0xff]  ;;  %v42_v5 = vld [vmem:[%s3995_s1] sm:$0xff] }
   0x2   :  { %v235_v2 = vld [vmem:[%s3995_s1 + $0x608] sm:$0xff]  ;;  %v1435_v3 = vpack.c.bf16 %v45_v1, %v43_v0  ;;  %v237_v4 = vld [vmem:[%s3995_s1 + $0x618] sm:$0xff]  ;;  %v44_v6 = vld [vmem:[%s3995_s1 + $0x10] sm:$0xff] }
   0x3   :  { %v1627_v7 = vpack.c.bf16 %v237_v4, %v235_v2  ;;  %v1437_v8 = vpack.c.bf16 %v44_v6, %v42_v5  ;;  %v234_v9 = vld [vmem:[%s3995_s1 + $0x600] sm:$0xff]  ;;  %v236_v10 = vld [vmem:[%s3995_s1 + $0x610] sm:$0xff]  ;;  %v47_v11 = vld [vmem:[%s3995_s1 + $0x28] sm:$0xff] }
   0x4   :  { %1436 = vmatprep.subr.bf16.mxu1 %v1435_v3  ;;  %v1629_v12 = vpack.c.bf16 %v236_v10, %v234_v9  ;;  %v49_v13 = vld [vmem:[%s3995_s1 + $0x38] sm:$0xff]  ;;  %v239_v14 = vld [vmem:[%s3995_s1 + $0x628] sm:$0xff]  ;;  %v46_v18 = vld [vmem:[%s3995_s1 + $0x20] sm:$0xff] }
   0x5   :  { %v241_v15 = vld [vmem:[%s3995_s1 + $0x638] sm:$0xff]  ;;  %1628 = vmatprep.subr.bf16.mxu0 %v1627_v7  ;;  %1438 = vmatpush1.bf16.msra.mxu1 %v1437_v8  ;;  %v1439_v16 = vpack.c.bf16 %v49_v13, %v47_v11  ;;  %v48_v19 = vld [vmem:[%s3995_s1 + $0x30] sm:$0xff]  ;;  %v238_v20 = vld [vmem:[%s3995_s1 + $0x620] sm:$0xff] }
   0x6   :  { %v1631_v17 = vpack.c.bf16 %v241_v15, %v239_v14  ;;  %1630 = vmatpush1.bf16.msra.mxu0 %v1629_v12  ;;  %v1441_v21 = vpack.c.bf16 %v48_v19, %v46_v18  ;;  %v240_v22 = vld [vmem:[%s3995_s1 + $0x630] sm:$0xff]  ;;  %v51_v23 = vld [vmem:[%s3995_s1 + $0x48] sm:$0xff]  ;;  %v53_v24 = vld [vmem:[%s3995_s1 + $0x58] sm:$0xff] }
   0x7   :  { %1440 = vmatprep.subr.bf16.mxu1 %v1439_v16  ;;  %v1633_v25 = vpack.c.bf16 %v240_v22, %v238_v20  ;;  %v1443_v26 = vpack.c.bf16 %v53_v24, %v51_v23  ;;  %v243_v27 = vld [vmem:[%s3995_s1 + $0x648] sm:$0xff]  ;;  %v245_v28 = vld [vmem:[%s3995_s1 + $0x658] sm:$0xff]  ;;  %v50_v29 = vld [vmem:[%s3995_s1 + $0x40] sm:$0xff] }
   0x8   :  { %1632 = vmatprep.subr.bf16.mxu0 %v1631_v17  ;;  %v1635_v30 = vpack.c.bf16 %v245_v28, %v243_v27  ;;  %v52_v31 = vld [vmem:[%s3995_s1 + $0x50] sm:$0xff]  ;;  %v242_v32 = vld [vmem:[%s3995_s1 + $0x640] sm:$0xff]  ;;  %v55_v35 = vld [vmem:[%s3995_s1 + $0x68] sm:$0xff] }
   0x9   :  { %v244_v33 = vld [vmem:[%s3995_s1 + $0x650] sm:$0xff]  ;;  %1442 = vmatpush1.bf16.msra.mxu1 %v1441_v21  ;;  %v1445_v34 = vpack.c.bf16 %v52_v31, %v50_v29  ;;  %v57_v36 = vld [vmem:[%s3995_s1 + $0x78] sm:$0xff]  ;;  %v247_v37 = vld [vmem:[%s3995_s1 + $0x668] sm:$0xff] }
   0xa   :  { %1634 = vmatpush1.bf16.msra.mxu0 %v1633_v25  ;;  %1444 = vmatprep.subr.bf16.mxu1 %v1443_v26  ;;  %v1637_v38 = vpack.c.bf16 %v244_v33, %v242_v32  ;;  %v1447_v39 = vpack.c.bf16 %v57_v36, %v55_v35  ;;  %v249_v40 = vld [vmem:[%s3995_s1 + $0x678] sm:$0xff]  ;;  %v54_v41 = vld [vmem:[%s3995_s1 + $0x60] sm:$0xff]  ;;  %v56_v42 = vld [vmem:[%s3995_s1 + $0x70] sm:$0xff] }
   0xb   :  { %1636 = vmatprep.subr.bf16.mxu0 %v1635_v30  ;;  %v1639_v43 = vpack.c.bf16 %v249_v40, %v247_v37  ;;  %v246_v44 = vld [vmem:[%s3995_s1 + $0x660] sm:$0xff]  ;;  %v248_v45 = vld [vmem:[%s3995_s1 + $0x670] sm:$0xff]  ;;  %v59_v46 = vld [vmem:[%s3995_s1 + $0x88] sm:$0xff]  ;;  %v1449_v50 = vpack.c.bf16 %v56_v42, %v54_v41 }
   0xc   :  { %v61_v47 = vld [vmem:[%s3995_s1 + $0x98] sm:$0xff]  ;;  %v251_v48 = vld [vmem:[%s3995_s1 + $0x688] sm:$0xff]  ;;  %v1641_v51 = vpack.c.bf16 %v248_v45, %v246_v44  ;;  %v58_v53 = vld [vmem:[%s3995_s1 + $0x80] sm:$0xff] }
   0xd   :  { %v253_v49 = vld [vmem:[%s3995_s1 + $0x698] sm:$0xff]  ;;  %1446 = vmatpush1.bf16.msra.mxu1 %v1445_v34  ;;  %v1451_v52 = vpack.c.bf16 %v61_v47, %v59_v46  ;;  %v60_v54 = vld [vmem:[%s3995_s1 + $0x90] sm:$0xff]  ;;  %v250_v55 = vld [vmem:[%s3995_s1 + $0x680] sm:$0xff] }
   0xe   :  { %1638 = vmatpush1.bf16.msra.mxu0 %v1637_v38  ;;  %1448 = vmatprep.subr.bf16.mxu1 %v1447_v39  ;;  %v1643_v56 = vpack.c.bf16 %v253_v49, %v251_v48  ;;  %v252_v57 = vld [vmem:[%s3995_s1 + $0x690] sm:$0xff]  ;;  %v63_v58 = vld [vmem:[%s3995_s1 + $0xa8] sm:$0xff]  ;;  %v65_v59 = vld [vmem:[%s3995_s1 + $0xb8] sm:$0xff]  ;;  %v1453_v62 = vpack.c.bf16 %v60_v54, %v58_v53 }
   0xf   :  { %1640 = vmatprep.subr.bf16.mxu0 %v1639_v43  ;;  %v255_v60 = vld [vmem:[%s3995_s1 + $0x6a8] sm:$0xff]  ;;  %v257_v61 = vld [vmem:[%s3995_s1 + $0x6b8] sm:$0xff]  ;;  %v1645_v63 = vpack.c.bf16 %v252_v57, %v250_v55  ;;  %v1455_v0 = vpack.c.bf16 %v65_v59, %v63_v58  ;;  %v62_v1 = vld [vmem:[%s3995_s1 + $0xa0] sm:$0xff] }
  0x10   :  { %v64_v2 = vld [vmem:[%s3995_s1 + $0xb0] sm:$0xff]  ;;  %v254_v3 = vld [vmem:[%s3995_s1 + $0x6a0] sm:$0xff]  ;;  %v1647_v4 = vpack.c.bf16 %v257_v61, %v255_v60  ;;  %v67_v6 = vld [vmem:[%s3995_s1 + $0xc8] sm:$0xff] }
  0x11   :  { %1450 = vmatpush1.bf16.msra.mxu1 %v1449_v50  ;;  %v256_v5 = vld [vmem:[%s3995_s1 + $0x6b0] sm:$0xff]  ;;  %v69_v7 = vld [vmem:[%s3995_s1 + $0xd8] sm:$0xff]  ;;  %v259_v8 = vld [vmem:[%s3995_s1 + $0x6c8] sm:$0xff]  ;;  %v1457_v10 = vpack.c.bf16 %v64_v2, %v62_v1 }
  0x12   :  { %1642 = vmatpush1.bf16.msra.mxu0 %v1641_v51  ;;  %1452 = vmatprep.subr.bf16.mxu1 %v1451_v52  ;;  %v261_v9 = vld [vmem:[%s3995_s1 + $0x6d8] sm:$0xff]  ;;  %v1649_v11 = vpack.c.bf16 %v256_v5, %v254_v3  ;;  %v1459_v12 = vpack.c.bf16 %v69_v7, %v67_v6  ;;  %v66_v13 = vld [vmem:[%s3995_s1 + $0xc0] sm:$0xff]  ;;  %v68_v14 = vld [vmem:[%s3995_s1 + $0xd0] sm:$0xff] }
  0x13   :  { %1644 = vmatprep.subr.bf16.mxu0 %v1643_v56  ;;  %v258_v15 = vld [vmem:[%s3995_s1 + $0x6c0] sm:$0xff]  ;;  %v1651_v16 = vpack.c.bf16 %v261_v9, %v259_v8  ;;  %v260_v17 = vld [vmem:[%s3995_s1 + $0x6d0] sm:$0xff]  ;;  %v71_v18 = vld [vmem:[%s3995_s1 + $0xe8] sm:$0xff]  ;;  %v1461_v22 = vpack.c.bf16 %v68_v14, %v66_v13 }
  0x14   :  { %v73_v19 = vld [vmem:[%s3995_s1 + $0xf8] sm:$0xff]  ;;  %v263_v20 = vld [vmem:[%s3995_s1 + $0x6e8] sm:$0xff]  ;;  %v1653_v23 = vpack.c.bf16 %v260_v17, %v258_v15  ;;  %v70_v25 = vld [vmem:[%s3995_s1 + $0xe0] sm:$0xff] }
  0x15   :  { %1454 = vmatpush1.bf16.msra.mxu1 %v1453_v62  ;;  %v265_v21 = vld [vmem:[%s3995_s1 + $0x6f8] sm:$0xff]  ;;  %v1463_v24 = vpack.c.bf16 %v73_v19, %v71_v18  ;;  %v72_v26 = vld [vmem:[%s3995_s1 + $0xf0] sm:$0xff]  ;;  %v262_v27 = vld [vmem:[%s3995_s1 + $0x6e0] sm:$0xff] }
  0x16   :  { %1646 = vmatpush1.bf16.msra.mxu0 %v1645_v63  ;;  %1456 = vmatprep.subr.bf16.mxu1 %v1455_v0  ;;  %v1655_v28 = vpack.c.bf16 %v265_v21, %v263_v20  ;;  %v264_v29 = vld [vmem:[%s3995_s1 + $0x6f0] sm:$0xff]  ;;  %v75_v30 = vld [vmem:[%s3995_s1 + $0x108] sm:$0xff]  ;;  %v77_v31 = vld [vmem:[%s3995_s1 + $0x118] sm:$0xff]  ;;  %v1465_v34 = vpack.c.bf16 %v72_v26, %v70_v25 }
  0x17   :  { %1648 = vmatprep.subr.bf16.mxu0 %v1647_v4  ;;  %v267_v32 = vld [vmem:[%s3995_s1 + $0x708] sm:$0xff]  ;;  %v269_v33 = vld [vmem:[%s3995_s1 + $0x718] sm:$0xff]  ;;  %v1657_v35 = vpack.c.bf16 %v264_v29, %v262_v27  ;;  %v1467_v36 = vpack.c.bf16 %v77_v31, %v75_v30  ;;  %v74_v37 = vld [vmem:[%s3995_s1 + $0x100] sm:$0xff] }
  0x18   :  { %v76_v38 = vld [vmem:[%s3995_s1 + $0x110] sm:$0xff]  ;;  %v266_v39 = vld [vmem:[%s3995_s1 + $0x700] sm:$0xff]  ;;  %v1659_v40 = vpack.c.bf16 %v269_v33, %v267_v32  ;;  %v79_v42 = vld [vmem:[%s3995_s1 + $0x128] sm:$0xff] }
  0x19   :  { %1458 = vmatpush1.bf16.msra.mxu1 %v1457_v10  ;;  %v268_v41 = vld [vmem:[%s3995_s1 + $0x710] sm:$0xff]  ;;  %v81_v43 = vld [vmem:[%s3995_s1 + $0x138] sm:$0xff]  ;;  %v271_v44 = vld [vmem:[%s3995_s1 + $0x728] sm:$0xff]  ;;  %v1469_v46 = vpack.c.bf16 %v76_v38, %v74_v37 }
  0x1a   :  { %1650 = vmatpush1.bf16.msra.mxu0 %v1649_v11  ;;  %1460 = vmatprep.subr.bf16.mxu1 %v1459_v12  ;;  %v273_v45 = vld [vmem:[%s3995_s1 + $0x738] sm:$0xff]  ;;  %v1661_v47 = vpack.c.bf16 %v268_v41, %v266_v39  ;;  %v1471_v48 = vpack.c.bf16 %v81_v43, %v79_v42  ;;  %v78_v49 = vld [vmem:[%s3995_s1 + $0x120] sm:$0xff]  ;;  %v80_v50 = vld [vmem:[%s3995_s1 + $0x130] sm:$0xff] }
  0x1b   :  { %1652 = vmatprep.subr.bf16.mxu0 %v1651_v16  ;;  %v270_v51 = vld [vmem:[%s3995_s1 + $0x720] sm:$0xff]  ;;  %v1663_v52 = vpack.c.bf16 %v273_v45, %v271_v44  ;;  %v272_v53 = vld [vmem:[%s3995_s1 + $0x730] sm:$0xff]  ;;  %v83_v54 = vld [vmem:[%s3995_s1 + $0x148] sm:$0xff]  ;;  %v1473_v58 = vpack.c.bf16 %v80_v50, %v78_v49 }
  0x1c   :  { %v85_v55 = vld [vmem:[%s3995_s1 + $0x158] sm:$0xff]  ;;  %v275_v56 = vld [vmem:[%s3995_s1 + $0x748] sm:$0xff]  ;;  %v1665_v59 = vpack.c.bf16 %v272_v53, %v270_v51  ;;  %v82_v61 = vld [vmem:[%s3995_s1 + $0x140] sm:$0xff] }
  0x1d   :  { %1462 = vmatpush1.bf16.msra.mxu1 %v1461_v22  ;;  %v277_v57 = vld [vmem:[%s3995_s1 + $0x758] sm:$0xff]  ;;  %v1475_v60 = vpack.c.bf16 %v85_v55, %v83_v54  ;;  %v84_v62 = vld [vmem:[%s3995_s1 + $0x150] sm:$0xff]  ;;  %v274_v63 = vld [vmem:[%s3995_s1 + $0x740] sm:$0xff] }
  0x1e   :  { %1654 = vmatpush1.bf16.msra.mxu0 %v1653_v23  ;;  %1464 = vmatprep.subr.bf16.mxu1 %v1463_v24  ;;  %v1667_v0 = vpack.c.bf16 %v277_v57, %v275_v56  ;;  %v276_v1 = vld [vmem:[%s3995_s1 + $0x750] sm:$0xff]  ;;  %v87_v2 = vld [vmem:[%s3995_s1 + $0x168] sm:$0xff]  ;;  %v89_v3 = vld [vmem:[%s3995_s1 + $0x178] sm:$0xff]  ;;  %v1477_v6 = vpack.c.bf16 %v84_v62, %v82_v61 }
  0x1f   :  { %1656 = vmatprep.subr.bf16.mxu0 %v1655_v28  ;;  %v279_v4 = vld [vmem:[%s3995_s1 + $0x768] sm:$0xff]  ;;  %v281_v5 = vld [vmem:[%s3995_s1 + $0x778] sm:$0xff]  ;;  %v86_v7 = vld [vmem:[%s3995_s1 + $0x160] sm:$0xff]  ;;  %v1669_v8 = vpack.c.bf16 %v276_v1, %v274_v63  ;;  %v1479_v9 = vpack.c.bf16 %v89_v3, %v87_v2 }
  0x20   :  { %v88_v10 = vld [vmem:[%s3995_s1 + $0x170] sm:$0xff]  ;;  %v278_v11 = vld [vmem:[%s3995_s1 + $0x760] sm:$0xff]  ;;  %v1671_v13 = vpack.c.bf16 %v281_v5, %v279_v4  ;;  %v91_v14 = vld [vmem:[%s3995_s1 + $0x188] sm:$0xff] }
  0x21   :  { %1466 = vmatpush1.bf16.msra.mxu1 %v1465_v34  ;;  %v280_v12 = vld [vmem:[%s3995_s1 + $0x770] sm:$0xff]  ;;  %v93_v15 = vld [vmem:[%s3995_s1 + $0x198] sm:$0xff]  ;;  %v27_v16 = vld [vmem:[%s3996_s0 + $0x8] sm:$0xff]  ;;  %v1481_v20 = vpack.c.bf16 %v88_v10, %v86_v7 }
  0x22   :  { %1658 = vmatpush1.bf16.msra.mxu0 %v1657_v35  ;;  %1468 = vmatprep.subr.bf16.mxu1 %v1467_v36  ;;  %v283_v17 = vld [vmem:[%s3995_s1 + $0x788] sm:$0xff]  ;;  %v285_v18 = vld [vmem:[%s3995_s1 + $0x798] sm:$0xff]  ;;  %v1673_v21 = vpack.c.bf16 %v280_v12, %v278_v11  ;;  %v1483_v22 = vpack.c.bf16 %v93_v15, %v91_v14  ;;  %v90_v23 = vld [vmem:[%s3995_s1 + $0x180] sm:$0xff] }
  0x23   :  { %1660 = vmatprep.subr.bf16.mxu0 %v1659_v40  ;;  %630 = vmatprep.mubr.f32.mxu1 %v27_v16  ;;  %v33_v19 = vld [vmem:[%s3996_s0 + $0x38] sm:$0xff]  ;;  %v92_v24 = vld [vmem:[%s3995_s1 + $0x190] sm:$0xff]  ;;  %v282_v25 = vld [vmem:[%s3995_s1 + $0x780] sm:$0xff]  ;;  %v1675_v26 = vpack.c.bf16 %v285_v18, %v283_v17 }
  0x24   :  { %843 = vmatprep.mubr.f32.mxu0 %v33_v19  ;;  %v284_v27 = vld [vmem:[%s3995_s1 + $0x790] sm:$0xff]  ;;  %v95_v28 = vld [vmem:[%s3995_s1 + $0x1a8] sm:$0xff]  ;;  %v97_v29 = vld [vmem:[%s3995_s1 + $0x1b8] sm:$0xff]  ;;  %v1485_v32 = vpack.c.bf16 %v92_v24, %v90_v23 }
  0x25   :  { %1470 = vmatpush1.bf16.msra.mxu1 %v1469_v46  ;;  %v287_v30 = vld [vmem:[%s3995_s1 + $0x7a8] sm:$0xff]  ;;  %v289_v31 = vld [vmem:[%s3995_s1 + $0x7b8] sm:$0xff]  ;;  %v1677_v33 = vpack.c.bf16 %v284_v27, %v282_v25  ;;  %v1487_v34 = vpack.c.bf16 %v97_v29, %v95_v28  ;;  %v94_v35 = vld [vmem:[%s3995_s1 + $0x1a0] sm:$0xff] }
  0x26   :  { %1662 = vmatpush1.bf16.msra.mxu0 %v1661_v47  ;;  %1472 = vmatprep.subr.bf16.mxu1 %v1471_v48  ;;  %v96_v36 = vld [vmem:[%s3995_s1 + $0x1b0] sm:$0xff]  ;;  %v286_v37 = vld [vmem:[%s3995_s1 + $0x7a0] sm:$0xff]  ;;  %v1679_v38 = vpack.c.bf16 %v289_v31, %v287_v30  ;;  %v99_v40 = vld [vmem:[%s3995_s1 + $0x1c8] sm:$0xff] }
  0x27   :  { %1664 = vmatprep.subr.bf16.mxu0 %v1663_v52  ;;  %v288_v39 = vld [vmem:[%s3995_s1 + $0x7b0] sm:$0xff]  ;;  %v101_v41 = vld [vmem:[%s3995_s1 + $0x1d8] sm:$0xff]  ;;  %v291_v42 = vld [vmem:[%s3995_s1 + $0x7c8] sm:$0xff]  ;;  %v1489_v44 = vpack.c.bf16 %v96_v36, %v94_v35 }
  0x28   :  { %v293_v43 = vld [vmem:[%s3995_s1 + $0x7d8] sm:$0xff]  ;;  %v1681_v45 = vpack.c.bf16 %v288_v39, %v286_v37  ;;  %v1491_v46 = vpack.c.bf16 %v101_v41, %v99_v40  ;;  %v98_v47 = vld [vmem:[%s3995_s1 + $0x1c0] sm:$0xff]  ;;  %v100_v48 = vld [vmem:[%s3995_s1 + $0x1d0] sm:$0xff] }
  0x29   :  { %1474 = vmatpush1.bf16.msra.mxu1 %v1473_v58  ;;  %v290_v49 = vld [vmem:[%s3995_s1 + $0x7c0] sm:$0xff]  ;;  %v1683_v50 = vpack.c.bf16 %v293_v43, %v291_v42  ;;  %v292_v51 = vld [vmem:[%s3995_s1 + $0x7d0] sm:$0xff]  ;;  %v103_v52 = vld [vmem:[%s3995_s1 + $0x1e8] sm:$0xff]  ;;  %v1493_v56 = vpack.c.bf16 %v100_v48, %v98_v47 }
  0x2a   :  { %1666 = vmatpush1.bf16.msra.mxu0 %v1665_v59  ;;  %1476 = vmatprep.subr.bf16.mxu1 %v1475_v60  ;;  %v105_v53 = vld [vmem:[%s3995_s1 + $0x1f8] sm:$0xff]  ;;  %v295_v54 = vld [vmem:[%s3995_s1 + $0x7e8] sm:$0xff]  ;;  %v1685_v57 = vpack.c.bf16 %v292_v51, %v290_v49  ;;  %v102_v59 = vld [vmem:[%s3995_s1 + $0x1e0] sm:$0xff] }
  0x2b   :  { %1668 = vmatprep.subr.bf16.mxu0 %v1667_v0  ;;  %v297_v55 = vld [vmem:[%s3995_s1 + $0x7f8] sm:$0xff]  ;;  %v1495_v58 = vpack.c.bf16 %v105_v53, %v103_v52  ;;  %v104_v60 = vld [vmem:[%s3995_s1 + $0x1f0] sm:$0xff]  ;;  %v294_v61 = vld [vmem:[%s3995_s1 + $0x7e0] sm:$0xff] }
  0x2c   :  { %v1687_v62 = vpack.c.bf16 %v297_v55, %v295_v54  ;;  %v296_v63 = vld [vmem:[%s3995_s1 + $0x7f0] sm:$0xff]  ;;  %v107_v0 = vld [vmem:[%s3995_s1 + $0x208] sm:$0xff]  ;;  %v109_v1 = vld [vmem:[%s3995_s1 + $0x218] sm:$0xff]  ;;  %v1497_v4 = vpack.c.bf16 %v104_v60, %v102_v59 }
  0x2d   :  { %1478 = vmatpush1.bf16.msra.mxu1 %v1477_v6  ;;  %v299_v2 = vld [vmem:[%s3995_s1 + $0x808] sm:$0xff]  ;;  %v301_v3 = vld [vmem:[%s3995_s1 + $0x818] sm:$0xff]  ;;  %v1689_v5 = vpack.c.bf16 %v296_v63, %v294_v61  ;;  %v1499_v6 = vpack.c.bf16 %v109_v1, %v107_v0  ;;  %v106_v7 = vld [vmem:[%s3995_s1 + $0x200] sm:$0xff] }
  0x2e   :  { %1670 = vmatpush1.bf16.msra.mxu0 %v1669_v8  ;;  %1480 = vmatprep.subr.bf16.mxu1 %v1479_v9  ;;  %v108_v8 = vld [vmem:[%s3995_s1 + $0x210] sm:$0xff]  ;;  %v298_v9 = vld [vmem:[%s3995_s1 + $0x800] sm:$0xff]  ;;  %v1691_v10 = vpack.c.bf16 %v301_v3, %v299_v2  ;;  %v111_v12 = vld [vmem:[%s3995_s1 + $0x228] sm:$0xff] }
  0x2f   :  { %1672 = vmatprep.subr.bf16.mxu0 %v1671_v13  ;;  %v300_v11 = vld [vmem:[%s3995_s1 + $0x810] sm:$0xff]  ;;  %v113_v13 = vld [vmem:[%s3995_s1 + $0x238] sm:$0xff]  ;;  %v303_v14 = vld [vmem:[%s3995_s1 + $0x828] sm:$0xff]  ;;  %v1501_v17 = vpack.c.bf16 %v108_v8, %v106_v7 }
  0x30   :  { %v305_v15 = vld [vmem:[%s3995_s1 + $0x838] sm:$0xff]  ;;  %v26_v16 = vld [vmem:[%s3996_s0] sm:$0xff]  ;;  %v32_v18 = vld [vmem:[%s3996_s0 + $0x30] sm:$0xff]  ;;  %v1693_v19 = vpack.c.bf16 %v300_v11, %v298_v9 }
  0x31   :  { %1482 = vmatpush1.bf16.msra.mxu1 %v1481_v20  ;;  %v1503_v20 = vpack.c.bf16 %v113_v13, %v111_v12  ;;  %v302_v23 = vld [vmem:[%s3995_s1 + $0x820] sm:$0xff]  ;;  %v1695_v24 = vpack.c.bf16 %v305_v15, %v303_v14  ;;  %v304_v25 = vld [vmem:[%s3995_s1 + $0x830] sm:$0xff]  ;;  %v117_v27 = vld [vmem:[%s3995_s1 + $0x258] sm:$0xff] }
  0x32   :  { %1674 = vmatpush1.bf16.msra.mxu0 %v1673_v21  ;;  %1484 = vmatprep.subr.bf16.mxu1 %v1483_v22  ;;  %v110_v21 = vld [vmem:[%s3995_s1 + $0x220] sm:$0xff]  ;;  %v112_v22 = vld [vmem:[%s3995_s1 + $0x230] sm:$0xff]  ;;  %v307_v28 = vld [vmem:[%s3995_s1 + $0x848] sm:$0xff]  ;;  %v1697_v31 = vpack.c.bf16 %v304_v25, %v302_v23 }
  0x33   :  { %1676 = vmatprep.subr.bf16.mxu0 %v1675_v26  ;;  %v115_v26 = vld [vmem:[%s3995_s1 + $0x248] sm:$0xff]  ;;  %v309_v29 = vld [vmem:[%s3995_s1 + $0x858] sm:$0xff]  ;;  %v1505_v30 = vpack.c.bf16 %v112_v22, %v110_v21  ;;  %v306_v35 = vld [vmem:[%s3995_s1 + $0x840] sm:$0xff] }
  0x34   :  { %v1699_v36 = vpack.c.bf16 %v309_v29, %v307_v28  ;;  %v308_v37 = vld [vmem:[%s3995_s1 + $0x850] sm:$0xff]  ;;  %v121_v39 = vld [vmem:[%s3995_s1 + $0x278] sm:$0xff]  ;;  %v311_v40 = vld [vmem:[%s3995_s1 + $0x868] sm:$0xff] }
  0x35   :  { %1486 = vmatpush1.bf16.msra.mxu1 %v1485_v32  ;;  %v1507_v32 = vpack.c.bf16 %v117_v27, %v115_v26  ;;  %v313_v41 = vld [vmem:[%s3995_s1 + $0x878] sm:$0xff]  ;;  %v1701_v43 = vpack.c.bf16 %v308_v37, %v306_v35  ;;  %v310_v47 = vld [vmem:[%s3995_s1 + $0x860] sm:$0xff]  ;;  %v312_v49 = vld [vmem:[%s3995_s1 + $0x870] sm:$0xff] }
  0x36   :  { %1678 = vmatpush1.bf16.msra.mxu0 %v1677_v33  ;;  %1488 = vmatprep.subr.bf16.mxu1 %v1487_v34  ;;  %v114_v33 = vld [vmem:[%s3995_s1 + $0x240] sm:$0xff]  ;;  %v116_v34 = vld [vmem:[%s3995_s1 + $0x250] sm:$0xff]  ;;  %v1703_v48 = vpack.c.bf16 %v313_v41, %v311_v40  ;;  %v125_v51 = vld [vmem:[%s3995_s1 + $0x298] sm:$0xff]  ;;  %v1705_v55 = vpack.c.bf16 %v312_v49, %v310_v47 }
  0x37   :  { %1680 = vmatprep.subr.bf16.mxu0 %v1679_v38  ;;  %v119_v38 = vld [vmem:[%s3995_s1 + $0x268] sm:$0xff]  ;;  %v1509_v42 = vpack.c.bf16 %v116_v34, %v114_v33  ;;  %v317_v53 = vld [vmem:[%s3995_s1 + $0x898] sm:$0xff]  ;;  %v314_v59 = vld [vmem:[%s3995_s1 + $0x880] sm:$0xff] }
  0x38   :  { %v315_v52 = vld [vmem:[%s3995_s1 + $0x888] sm:$0xff]  ;;  %v316_v61 = vld [vmem:[%s3995_s1 + $0x890] sm:$0xff]  ;;  %v129_v63 = vld [vmem:[%s3995_s1 + $0x2b8] sm:$0xff] }
  0x39   :  { %1490 = vmatpush1.bf16.msra.mxu1 %v1489_v44  ;;  %v1511_v44 = vpack.c.bf16 %v121_v39, %v119_v38  ;;  %v1707_v60 = vpack.c.bf16 %v317_v53, %v315_v52  ;;  %v319_v0 = vld [vmem:[%s3995_s1 + $0x8a8] sm:$0xff]  ;;  %v321_v1 = vld [vmem:[%s3995_s1 + $0x8b8] sm:$0xff]  ;;  %v1709_v3 = vpack.c.bf16 %v316_v61, %v314_v59  ;;  %v318_v7 = vld [vmem:[%s3995_s1 + $0x8a0] sm:$0xff] }
  0x3a   :  { %1682 = vmatpush1.bf16.msra.mxu0 %v1681_v45  ;;  %1492 = vmatprep.subr.bf16.mxu1 %v1491_v46  ;;  %v118_v45 = vld [vmem:[%s3995_s1 + $0x260] sm:$0xff]  ;;  %v120_v46 = vld [vmem:[%s3995_s1 + $0x270] sm:$0xff]  ;;  %v1711_v8 = vpack.c.bf16 %v321_v1, %v319_v0  ;;  %v133_v11 = vld [vmem:[%s3995_s1 + $0x2d8] sm:$0xff] }
  0x3b   :  { %1684 = vmatprep.subr.bf16.mxu0 %v1683_v50  ;;  %v123_v50 = vld [vmem:[%s3995_s1 + $0x288] sm:$0xff]  ;;  %v1513_v54 = vpack.c.bf16 %v120_v46, %v118_v45  ;;  %v320_v9 = vld [vmem:[%s3995_s1 + $0x8b0] sm:$0xff]  ;;  %v325_v13 = vld [vmem:[%s3995_s1 + $0x8d8] sm:$0xff] }
  0x3c   :  { %v323_v12 = vld [vmem:[%s3995_s1 + $0x8c8] sm:$0xff]  ;;  %v130_v15 = vld [vmem:[%s3995_s1 + $0x2c0] sm:$0xff]  ;;  %v137_v23 = vld [vmem:[%s3995_s1 + $0x2f8] sm:$0xff] }
  0x3d   :  { %1494 = vmatpush1.bf16.msra.mxu1 %v1493_v56  ;;  %v1515_v56 = vpack.c.bf16 %v125_v51, %v123_v50  ;;  %v1715_v21 = vpack.c.bf16 %v325_v13, %v323_v12  ;;  %v135_v22 = vld [vmem:[%s3995_s1 + $0x2e8] sm:$0xff]  ;;  %v329_v26 = vld [vmem:[%s3995_s1 + $0x8f8] sm:$0xff]  ;;  %v326_v33 = vld [vmem:[%s3995_s1 + $0x8e0] sm:$0xff] }
  0x3e   :  { %1686 = vmatpush1.bf16.msra.mxu0 %v1685_v57  ;;  %1496 = vmatprep.subr.bf16.mxu1 %v1495_v58  ;;  %v122_v57 = vld [vmem:[%s3995_s1 + $0x280] sm:$0xff]  ;;  %v124_v58 = vld [vmem:[%s3995_s1 + $0x290] sm:$0xff]  ;;  %v327_v25 = vld [vmem:[%s3995_s1 + $0x8e8] sm:$0xff] }
  0x3f   :  { %1688 = vmatprep.subr.bf16.mxu0 %v1687_v62  ;;  %v127_v62 = vld [vmem:[%s3995_s1 + $0x2a8] sm:$0xff]  ;;  %v1517_v2 = vpack.c.bf16 %v124_v58, %v122_v57  ;;  %v1719_v34 = vpack.c.bf16 %v329_v26, %v327_v25  ;;  %v328_v35 = vld [vmem:[%s3995_s1 + $0x8f0] sm:$0xff]  ;;  %v141_v37 = vld [vmem:[%s3995_s1 + $0x318] sm:$0xff] }
  0x40   :  { %v35_v27 = vld [vmem:[%s3996_s0 + $0x48] sm:$0xff]  ;;  %v333_v39 = vld [vmem:[%s3995_s1 + $0x918] sm:$0xff]  ;;  %v1721_v41 = vpack.c.bf16 %v328_v35, %v326_v33  ;;  %v330_v45 = vld [vmem:[%s3995_s1 + $0x900] sm:$0xff] }
  0x41   :  { %1498 = vmatpush1.bf16.msra.mxu1 %v1497_v4  ;;  %v1519_v4 = vpack.c.bf16 %v129_v63, %v127_v62  ;;  %v331_v38 = vld [vmem:[%s3995_s1 + $0x908] sm:$0xff]  ;;  %v332_v47 = vld [vmem:[%s3995_s1 + $0x910] sm:$0xff]  ;;  %v145_v49 = vld [vmem:[%s3995_s1 + $0x338] sm:$0xff] }
  0x42   :  { %1690 = vmatpush1.bf16.msra.mxu0 %v1689_v5  ;;  %1500 = vmatprep.subr.bf16.mxu1 %v1499_v6  ;;  %v126_v5 = vld [vmem:[%s3995_s1 + $0x2a0] sm:$0xff]  ;;  %v128_v6 = vld [vmem:[%s3995_s1 + $0x2b0] sm:$0xff]  ;;  %v1723_v46 = vpack.c.bf16 %v333_v39, %v331_v38  ;;  %v335_v50 = vld [vmem:[%s3995_s1 + $0x928] sm:$0xff]  ;;  %v1725_v53 = vpack.c.bf16 %v332_v47, %v330_v45 }
  0x43   :  { %1692 = vmatprep.subr.bf16.mxu0 %v1691_v10  ;;  %v131_v10 = vld [vmem:[%s3995_s1 + $0x2c8] sm:$0xff]  ;;  %v1521_v14 = vpack.c.bf16 %v128_v6, %v126_v5  ;;  %v337_v51 = vld [vmem:[%s3995_s1 + $0x938] sm:$0xff]  ;;  %v334_v57 = vld [vmem:[%s3995_s1 + $0x920] sm:$0xff] }
  0x44   :  { %631 = vmatmul.mubr.f32.vlgmr.msra.gmra.mrb[0].mxu1 %v26_v16  ;;  %v1713_v16 = vpack.c.bf16 %v320_v9, %v318_v7  ;;  %v1727_v58 = vpack.c.bf16 %v337_v51, %v335_v50  ;;  %v336_v59 = vld [vmem:[%s3995_s1 + $0x930] sm:$0xff]  ;;  %v149_v61 = vld [vmem:[%s3995_s1 + $0x358] sm:$0xff]  ;;  %v339_v62 = vld [vmem:[%s3995_s1 + $0x948] sm:$0xff] }
  0x45   :  { %1502 = vmatpush1.bf16.msra.mxu1 %v1501_v17  ;;  %844 = vmatmul.mubr.f32.vlgmr.msra.gmra.mrb[0].mxu0 %v32_v18  ;;  %v1523_v17 = vpack.c.bf16 %v133_v11, %v131_v10  ;;  %v132_v18 = vld [vmem:[%s3995_s1 + $0x2d0] sm:$0xff]  ;;  %v341_v63 = vld [vmem:[%s3995_s1 + $0x958] sm:$0xff]  ;;  %v1729_v1 = vpack.c.bf16 %v336_v59, %v334_v57  ;;  %v338_v5 = vld [vmem:[%s3995_s1 + $0x940] sm:$0xff] }
  0x46   :  { %1694 = vmatpush1.bf16.msra.mxu0 %v1693_v19  ;;  %1504 = vmatprep.subr.bf16.mxu1 %v1503_v20  ;;  %v322_v19 = vld [vmem:[%s3995_s1 + $0x8c0] sm:$0xff]  ;;  %v324_v20 = vld [vmem:[%s3995_s1 + $0x8d0] sm:$0xff]  ;;  %v1525_v28 = vpack.c.bf16 %v132_v18, %v130_v15  ;;  %v1731_v6 = vpack.c.bf16 %v341_v63, %v339_v62  ;;  %v153_v9 = vld [vmem:[%s3995_s1 + $0x378] sm:$0xff] }
  0x47   :  { %1696 = vmatprep.subr.bf16.mxu0 %v1695_v24  ;;  %v29_v24 = vld [vmem:[%s3996_s0 + $0x18] sm:$0xff]  ;;  %914 = vmatprep.mubr.f32.mxu0 %v35_v27  ;;  %v1717_v29 = vpack.c.bf16 %v324_v20, %v322_v19  ;;  %v340_v7 = vld [vmem:[%s3995_s1 + $0x950] sm:$0xff]  ;;  %v343_v10 = vld [vmem:[%s3995_s1 + $0x968] sm:$0xff] }
  0x48   :  { %701 = vmatprep.mubr.f32.mxu1 %v29_v24  ;;  %v345_v11 = vld [vmem:[%s3995_s1 + $0x978] sm:$0xff]  ;;  %v1733_v13 = vpack.c.bf16 %v340_v7, %v338_v5  ;;  %v150_v15 = vld [vmem:[%s3995_s1 + $0x360] sm:$0xff]  ;;  %v344_v19 = vld [vmem:[%s3995_s1 + $0x970] sm:$0xff] }
  0x49   :  { %1506 = vmatpush1.bf16.msra.mxu1 %v1505_v30  ;;  %v1527_v30 = vpack.c.bf16 %v137_v23, %v135_v22  ;;  %v1735_v18 = vpack.c.bf16 %v345_v11, %v343_v10  ;;  %v155_v20 = vld [vmem:[%s3995_s1 + $0x388] sm:$0xff]  ;;  %v349_v23 = vld [vmem:[%s3995_s1 + $0x998] sm:$0xff]  ;;  %v154_v27 = vld [vmem:[%s3995_s1 + $0x380] sm:$0xff] }
  0x4a   :  { %1698 = vmatpush1.bf16.msra.mxu0 %v1697_v31  ;;  %1508 = vmatprep.subr.bf16.mxu1 %v1507_v32  ;;  %v134_v31 = vld [vmem:[%s3995_s1 + $0x2e0] sm:$0xff]  ;;  %v136_v32 = vld [vmem:[%s3995_s1 + $0x2f0] sm:$0xff]  ;;  %v347_v22 = vld [vmem:[%s3995_s1 + $0x988] sm:$0xff] }
  0x4b   :  { %1700 = vmatprep.subr.bf16.mxu0 %v1699_v36  ;;  %v139_v36 = vld [vmem:[%s3995_s1 + $0x308] sm:$0xff]  ;;  %v1529_v40 = vpack.c.bf16 %v136_v32, %v134_v31  ;;  %v348_v31 = vld [vmem:[%s3995_s1 + $0x990] sm:$0xff]  ;;  %v161_v33 = vld [vmem:[%s3995_s1 + $0x3b8] sm:$0xff] }
  0x4c   :  { %v159_v32 = vld [vmem:[%s3995_s1 + $0x3a8] sm:$0xff]  ;;  %v353_v35 = vld [vmem:[%s3995_s1 + $0x9b8] sm:$0xff]  ;;  %v158_v39 = vld [vmem:[%s3995_s1 + $0x3a0] sm:$0xff] }
  0x4d   :  { %1510 = vmatpush1.bf16.msra.mxu1 %v1509_v42  ;;  %v1531_v42 = vpack.c.bf16 %v141_v37, %v139_v36  ;;  %v1551_v38 = vpack.c.bf16 %v161_v33, %v159_v32  ;;  %v165_v45 = vld [vmem:[%s3995_s1 + $0x3d8] sm:$0xff]  ;;  %v162_v51 = vld [vmem:[%s3995_s1 + $0x3c0] sm:$0xff]  ;;  %v371_v32 = vld [vmem:[%s3995_s1 + $0xa48] sm:$0xff] }
  0x4e   :  { %1702 = vmatpush1.bf16.msra.mxu0 %v1701_v43  ;;  %1512 = vmatprep.subr.bf16.mxu1 %v1511_v44  ;;  %v138_v43 = vld [vmem:[%s3995_s1 + $0x300] sm:$0xff]  ;;  %v140_v44 = vld [vmem:[%s3995_s1 + $0x310] sm:$0xff]  ;;  %v357_v47 = vld [vmem:[%s3995_s1 + $0x9d8] sm:$0xff] }
  0x4f   :  { %1704 = vmatprep.subr.bf16.mxu0 %v1703_v48  ;;  %v143_v48 = vld [vmem:[%s3995_s1 + $0x328] sm:$0xff]  ;;  %v1533_v52 = vpack.c.bf16 %v140_v44, %v138_v43  ;;  %v352_v43 = vld [vmem:[%s3995_s1 + $0x9b0] sm:$0xff]  ;;  %v169_v57 = vld [vmem:[%s3995_s1 + $0x3f8] sm:$0xff] }
  0x50   :  { %v163_v44 = vld [vmem:[%s3995_s1 + $0x3c8] sm:$0xff]  ;;  %v361_v59 = vld [vmem:[%s3995_s1 + $0x9f8] sm:$0xff]  ;;  %v166_v63 = vld [vmem:[%s3995_s1 + $0x3e0] sm:$0xff] }
  0x51   :  { %1514 = vmatpush1.bf16.msra.mxu1 %v1513_v54  ;;  %v1535_v54 = vpack.c.bf16 %v145_v49, %v143_v48  ;;  %v1555_v50 = vpack.c.bf16 %v165_v45, %v163_v44  ;;  %v173_v5 = vld [vmem:[%s3995_s1 + $0x418] sm:$0xff]  ;;  %v170_v11 = vld [vmem:[%s3995_s1 + $0x400] sm:$0xff]  ;;  %v183_v44 = vld [vmem:[%s3995_s1 + $0x468] sm:$0xff] }
  0x52   :  { %1706 = vmatpush1.bf16.msra.mxu0 %v1705_v55  ;;  %1516 = vmatprep.subr.bf16.mxu1 %v1515_v56  ;;  %v142_v55 = vld [vmem:[%s3995_s1 + $0x320] sm:$0xff]  ;;  %v144_v56 = vld [vmem:[%s3995_s1 + $0x330] sm:$0xff]  ;;  %v365_v7 = vld [vmem:[%s3995_s1 + $0xa18] sm:$0xff] }
  0x53   :  { %1708 = vmatprep.subr.bf16.mxu0 %v1707_v60  ;;  %v147_v60 = vld [vmem:[%s3995_s1 + $0x348] sm:$0xff]  ;;  %v1537_v0 = vpack.c.bf16 %v144_v56, %v142_v55  ;;  %v356_v55 = vld [vmem:[%s3995_s1 + $0x9d0] sm:$0xff]  ;;  %v373_v33 = vld [vmem:[%s3995_s1 + $0xa58] sm:$0xff] }
  0x54   :  { %v167_v56 = vld [vmem:[%s3995_s1 + $0x3e8] sm:$0xff]  ;;  %v185_v45 = vld [vmem:[%s3995_s1 + $0x478] sm:$0xff] }
  0x55   :  { %1518 = vmatpush1.bf16.msra.mxu1 %v1517_v2  ;;  %v1539_v2 = vpack.c.bf16 %v149_v61, %v147_v60  ;;  %v1559_v62 = vpack.c.bf16 %v169_v57, %v167_v56  ;;  %v187_v56 = vld [vmem:[%s3995_s1 + $0x488] sm:$0xff]  ;;  %v189_v57 = vld [vmem:[%s3995_s1 + $0x498] sm:$0xff] }
  0x56   :  { %1710 = vmatpush1.bf16.msra.mxu0 %v1709_v3  ;;  %1520 = vmatprep.subr.bf16.mxu1 %v1519_v4  ;;  %v146_v3 = vld [vmem:[%s3995_s1 + $0x340] sm:$0xff]  ;;  %v148_v4 = vld [vmem:[%s3995_s1 + $0x350] sm:$0xff] }
  0x57   :  { %1712 = vmatprep.subr.bf16.mxu0 %v1711_v8  ;;  %v151_v8 = vld [vmem:[%s3995_s1 + $0x368] sm:$0xff]  ;;  %v1541_v12 = vpack.c.bf16 %v148_v4, %v146_v3  ;;  %v360_v3 = vld [vmem:[%s3995_s1 + $0x9f0] sm:$0xff] }
  0x58   :  { %v171_v4 = vld [vmem:[%s3995_s1 + $0x408] sm:$0xff] }
  0x59   :  { %1522 = vmatpush1.bf16.msra.mxu1 %v1521_v14  ;;  %v1543_v14 = vpack.c.bf16 %v153_v9, %v151_v8  ;;  %v1563_v10 = vpack.c.bf16 %v173_v5, %v171_v4  ;;  %v191_v4 = vld [vmem:[%s3995_s1 + $0x4a8] sm:$0xff]  ;;  %v193_v5 = vld [vmem:[%s3995_s1 + $0x4b8] sm:$0xff] }
  0x5a   :  { %1714 = vmatpush1.bf16.msra.mxu0 %v1713_v16  ;;  %1524 = vmatprep.subr.bf16.mxu1 %v1523_v17  ;;  %v152_v16 = vld [vmem:[%s3995_s1 + $0x370] sm:$0xff]  ;;  %v342_v17 = vld [vmem:[%s3995_s1 + $0x960] sm:$0xff] }
  0x5b   :  { %1716 = vmatprep.subr.bf16.mxu0 %v1715_v21  ;;  %v157_v21 = vld [vmem:[%s3995_s1 + $0x398] sm:$0xff]  ;;  %v1545_v24 = vpack.c.bf16 %v152_v16, %v150_v15  ;;  %v1737_v25 = vpack.c.bf16 %v344_v19, %v342_v17  ;;  %v364_v15 = vld [vmem:[%s3995_s1 + $0xa10] sm:$0xff]  ;;  %v175_v16 = vld [vmem:[%s3995_s1 + $0x428] sm:$0xff] }
  0x5c   :  { %v1547_v26 = vpack.c.bf16 %v157_v21, %v155_v20  ;;  %v177_v17 = vld [vmem:[%s3995_s1 + $0x438] sm:$0xff]  ;;  %v28_v20 = vld [vmem:[%s3996_s0 + $0x10] sm:$0xff] }
  0x5d   :  { %1526 = vmatpush1.bf16.msra.mxu1 %v1525_v28  ;;  %v156_v28 = vld [vmem:[%s3995_s1 + $0x390] sm:$0xff]  ;;  %v369_v19 = vld [vmem:[%s3995_s1 + $0xa38] sm:$0xff] }
  0x5e   :  { %1718 = vmatpush1.bf16.msra.mxu0 %v1717_v29  ;;  %1528 = vmatprep.subr.bf16.mxu1 %v1527_v30  ;;  %v346_v29 = vld [vmem:[%s3995_s1 + $0x980] sm:$0xff]  ;;  %v1739_v30 = vpack.c.bf16 %v349_v23, %v347_v22  ;;  %v1549_v36 = vpack.c.bf16 %v156_v28, %v154_v27 }
  0x5f   :  { %1720 = vmatprep.subr.bf16.mxu0 %v1719_v34  ;;  %v351_v34 = vld [vmem:[%s3995_s1 + $0x9a8] sm:$0xff]  ;;  %v1741_v37 = vpack.c.bf16 %v348_v31, %v346_v29  ;;  %v34_v22 = vld [vmem:[%s3996_s0 + $0x40] sm:$0xff]  ;;  %v368_v29 = vld [vmem:[%s3995_s1 + $0xa30] sm:$0xff] }
  0x60   :  { %v366_v27 = vld [vmem:[%s3995_s1 + $0xa20] sm:$0xff]  ;;  %v181_v31 = vld [vmem:[%s3995_s1 + $0x458] sm:$0xff] }
  0x61   :  { %1530 = vmatpush1.bf16.msra.mxu1 %v1529_v40  ;;  %v160_v40 = vld [vmem:[%s3995_s1 + $0x3b0] sm:$0xff] }
  0x62   :  { %1722 = vmatpush1.bf16.msra.mxu0 %v1721_v41  ;;  %1532 = vmatprep.subr.bf16.mxu1 %v1531_v42  ;;  %v350_v41 = vld [vmem:[%s3995_s1 + $0x9a0] sm:$0xff]  ;;  %v1743_v42 = vpack.c.bf16 %v353_v35, %v351_v34  ;;  %v1553_v48 = vpack.c.bf16 %v160_v40, %v158_v39  ;;  %v31_v34 = vld [vmem:[%s3996_s0 + $0x28] sm:$0xff]  ;;  %v180_v40 = vld [vmem:[%s3995_s1 + $0x450] sm:$0xff] }
  0x63   :  { %1724 = vmatprep.subr.bf16.mxu0 %v1723_v46  ;;  %v355_v46 = vld [vmem:[%s3995_s1 + $0x9c8] sm:$0xff]  ;;  %v1745_v49 = vpack.c.bf16 %v352_v43, %v350_v41  ;;  %v178_v39 = vld [vmem:[%s3995_s1 + $0x440] sm:$0xff]  ;;  %v372_v43 = vld [vmem:[%s3995_s1 + $0xa50] sm:$0xff] }
  0x64   :  { %v370_v41 = vld [vmem:[%s3995_s1 + $0xa40] sm:$0xff] }
  0x65   :  { %1534 = vmatpush1.bf16.msra.mxu1 %v1533_v52  ;;  %v164_v52 = vld [vmem:[%s3995_s1 + $0x3d0] sm:$0xff] }
  0x66   :  { %1726 = vmatpush1.bf16.msra.mxu0 %v1725_v53  ;;  %1536 = vmatprep.subr.bf16.mxu1 %v1535_v54  ;;  %v354_v53 = vld [vmem:[%s3995_s1 + $0x9c0] sm:$0xff]  ;;  %v1747_v54 = vpack.c.bf16 %v357_v47, %v355_v46  ;;  %v1557_v60 = vpack.c.bf16 %v164_v52, %v162_v51  ;;  %v375_v46 = vld [vmem:[%s3995_s1 + $0xa68] sm:$0xff]  ;;  %v377_v47 = vld [vmem:[%s3995_s1 + $0xa78] sm:$0xff] }
  0x67   :  { %1728 = vmatprep.subr.bf16.mxu0 %v1727_v58  ;;  %v359_v58 = vld [vmem:[%s3995_s1 + $0x9e8] sm:$0xff]  ;;  %v1749_v61 = vpack.c.bf16 %v356_v55, %v354_v53  ;;  %v182_v51 = vld [vmem:[%s3995_s1 + $0x460] sm:$0xff]  ;;  %v184_v52 = vld [vmem:[%s3995_s1 + $0x470] sm:$0xff] }
  0x68   :  { %v374_v53 = vld [vmem:[%s3995_s1 + $0xa60] sm:$0xff]  ;;  %v376_v55 = vld [vmem:[%s3995_s1 + $0xa70] sm:$0xff] }
  0x69   :  { %1538 = vmatpush1.bf16.msra.mxu1 %v1537_v0  ;;  %v168_v0 = vld [vmem:[%s3995_s1 + $0x3f0] sm:$0xff] }
  0x6a   :  { %1730 = vmatpush1.bf16.msra.mxu0 %v1729_v1  ;;  %1540 = vmatprep.subr.bf16.mxu1 %v1539_v2  ;;  %v358_v1 = vld [vmem:[%s3995_s1 + $0x9e0] sm:$0xff]  ;;  %v1751_v2 = vpack.c.bf16 %v361_v59, %v359_v58  ;;  %v1561_v8 = vpack.c.bf16 %v168_v0, %v166_v63  ;;  %v379_v58 = vld [vmem:[%s3995_s1 + $0xa88] sm:$0xff]  ;;  %v381_v59 = vld [vmem:[%s3995_s1 + $0xa98] sm:$0xff] }
  0x6b   :  { %1732 = vmatprep.subr.bf16.mxu0 %v1731_v6  ;;  %v363_v6 = vld [vmem:[%s3995_s1 + $0xa08] sm:$0xff]  ;;  %v1753_v9 = vpack.c.bf16 %v360_v3, %v358_v1  ;;  %v186_v63 = vld [vmem:[%s3995_s1 + $0x480] sm:$0xff]  ;;  %v188_v0 = vld [vmem:[%s3995_s1 + $0x490] sm:$0xff] }
  0x6c   :  { %v378_v1 = vld [vmem:[%s3995_s1 + $0xa80] sm:$0xff]  ;;  %v380_v3 = vld [vmem:[%s3995_s1 + $0xa90] sm:$0xff] }
  0x6d   :  { %1542 = vmatpush1.bf16.msra.mxu1 %v1541_v12  ;;  %v172_v12 = vld [vmem:[%s3995_s1 + $0x410] sm:$0xff] }
  0x6e   :  { %1734 = vmatpush1.bf16.msra.mxu0 %v1733_v13  ;;  %1544 = vmatprep.subr.bf16.mxu1 %v1543_v14  ;;  %v362_v13 = vld [vmem:[%s3995_s1 + $0xa00] sm:$0xff]  ;;  %v1755_v14 = vpack.c.bf16 %v365_v7, %v363_v6  ;;  %v1565_v21 = vpack.c.bf16 %v172_v12, %v170_v11  ;;  %v383_v6 = vld [vmem:[%s3995_s1 + $0xaa8] sm:$0xff]  ;;  %v385_v7 = vld [vmem:[%s3995_s1 + $0xab8] sm:$0xff] }
  0x6f   :  { %1736 = vmatprep.subr.bf16.mxu0 %v1735_v18  ;;  %v367_v18 = vld [vmem:[%s3995_s1 + $0xa28] sm:$0xff]  ;;  %v1757_v23 = vpack.c.bf16 %v364_v15, %v362_v13  ;;  %v190_v11 = vld [vmem:[%s3995_s1 + $0x4a0] sm:$0xff]  ;;  %v192_v12 = vld [vmem:[%s3995_s1 + $0x4b0] sm:$0xff] }
  0x70   :  { %v1759_v28 = vpack.c.bf16 %v369_v19, %v367_v18  ;;  %v382_v13 = vld [vmem:[%s3995_s1 + $0xaa0] sm:$0xff]  ;;  %v384_v15 = vld [vmem:[%s3995_s1 + $0xab0] sm:$0xff]  ;;  %v387_v18 = vld [vmem:[%s3995_s1 + $0xac8] sm:$0xff] }
  0x71   :  { %1546 = vmatpush1.bf16.msra.mxu1 %v1545_v24  ;;  %v1567_v24 = vpack.c.bf16 %v177_v17, %v175_v16  ;;  %v195_v16 = vld [vmem:[%s3995_s1 + $0x4c8] sm:$0xff]  ;;  %v197_v17 = vld [vmem:[%s3995_s1 + $0x4d8] sm:$0xff] }
  0x72   :  { %1738 = vmatpush1.bf16.msra.mxu0 %v1737_v25  ;;  %1548 = vmatprep.subr.bf16.mxu1 %v1547_v26  ;;  %v174_v25 = vld [vmem:[%s3995_s1 + $0x420] sm:$0xff]  ;;  %v176_v26 = vld [vmem:[%s3995_s1 + $0x430] sm:$0xff]  ;;  %v389_v19 = vld [vmem:[%s3995_s1 + $0xad8] sm:$0xff] }
  0x73   :  { %1740 = vmatprep.subr.bf16.mxu0 %v1739_v30  ;;  %v179_v30 = vld [vmem:[%s3995_s1 + $0x448] sm:$0xff]  ;;  %v1569_v35 = vpack.c.bf16 %v176_v26, %v174_v25  ;;  %v386_v25 = vld [vmem:[%s3995_s1 + $0xac0] sm:$0xff]  ;;  %v1779_v26 = vpack.c.bf16 %v389_v19, %v387_v18 }
  0x74   :  { %v214_v19 = vld [vmem:[%s3995_s1 + $0x560] sm:$0xff] }
  0x75   :  { %1550 = vmatpush1.bf16.msra.mxu1 %v1549_v36  ;;  %v37_v36 = vld [vmem:[%s3996_s0 + $0x58] sm:$0xff] }
  0x76   :  { %1742 = vmatpush1.bf16.msra.mxu0 %v1741_v37  ;;  %1552 = vmatprep.subr.bf16.mxu1 %v1551_v38  ;;  %v1761_v37 = vpack.c.bf16 %v368_v29, %v366_v27  ;;  %v1571_v38 = vpack.c.bf16 %v181_v31, %v179_v30  ;;  %v388_v27 = vld [vmem:[%s3995_s1 + $0xad0] sm:$0xff]  ;;  %v201_v29 = vld [vmem:[%s3995_s1 + $0x4f8] sm:$0xff]  ;;  %v391_v30 = vld [vmem:[%s3995_s1 + $0xae8] sm:$0xff] }
  0x77   :  { %1744 = vmatprep.subr.bf16.mxu0 %v1743_v42  ;;  %v1763_v42 = vpack.c.bf16 %v373_v33, %v371_v32  ;;  %v393_v31 = vld [vmem:[%s3995_s1 + $0xaf8] sm:$0xff]  ;;  %v1781_v33 = vpack.c.bf16 %v388_v27, %v386_v25 }
  0x78   :  { %v221_v25 = vld [vmem:[%s3995_s1 + $0x598] sm:$0xff] }
  0x79   :  { %1554 = vmatpush1.bf16.msra.mxu1 %v1553_v48  ;;  %v1573_v48 = vpack.c.bf16 %v180_v40, %v178_v39  ;;  %v392_v39 = vld [vmem:[%s3995_s1 + $0xaf0] sm:$0xff]  ;;  %v203_v40 = vld [vmem:[%s3995_s1 + $0x508] sm:$0xff]  ;;  %v413_v27 = vld [vmem:[%s3995_s1 + $0xb98] sm:$0xff] }
  0x7a   :  { %1746 = vmatpush1.bf16.msra.mxu0 %v1745_v49  ;;  %1556 = vmatprep.subr.bf16.mxu1 %v1555_v50  ;;  %v1765_v49 = vpack.c.bf16 %v372_v43, %v370_v41  ;;  %v1575_v50 = vpack.c.bf16 %v185_v45, %v183_v44  ;;  %v205_v41 = vld [vmem:[%s3995_s1 + $0x518] sm:$0xff] }
  0x7b   :  { %1748 = vmatprep.subr.bf16.mxu0 %v1747_v54  ;;  %v1767_v54 = vpack.c.bf16 %v377_v47, %v375_v46  ;;  %v397_v43 = vld [vmem:[%s3995_s1 + $0xb18] sm:$0xff]  ;;  %v1595_v46 = vpack.c.bf16 %v205_v41, %v203_v40  ;;  %v202_v47 = vld [vmem:[%s3995_s1 + $0x500] sm:$0xff] }
  0x7d   :  { %1558 = vmatpush1.bf16.msra.mxu1 %v1557_v60  ;;  %v1577_v60 = vpack.c.bf16 %v184_v52, %v182_v51  ;;  %v396_v51 = vld [vmem:[%s3995_s1 + $0xb10] sm:$0xff]  ;;  %v207_v52 = vld [vmem:[%s3995_s1 + $0x528] sm:$0xff] }
  0x7e   :  { %1750 = vmatpush1.bf16.msra.mxu0 %v1749_v61  ;;  %1560 = vmatprep.subr.bf16.mxu1 %v1559_v62  ;;  %v1769_v61 = vpack.c.bf16 %v376_v55, %v374_v53  ;;  %v1579_v62 = vpack.c.bf16 %v189_v57, %v187_v56  ;;  %v209_v53 = vld [vmem:[%s3995_s1 + $0x538] sm:$0xff] }
  0x7f   :  { %1752 = vmatprep.subr.bf16.mxu0 %v1751_v2  ;;  %v1771_v2 = vpack.c.bf16 %v381_v59, %v379_v58  ;;  %v401_v55 = vld [vmem:[%s3995_s1 + $0xb38] sm:$0xff]  ;;  %v1599_v58 = vpack.c.bf16 %v209_v53, %v207_v52  ;;  %v206_v59 = vld [vmem:[%s3995_s1 + $0x520] sm:$0xff] }
  0x81   :  { %1562 = vmatpush1.bf16.msra.mxu1 %v1561_v8  ;;  %v1581_v8 = vpack.c.bf16 %v188_v0, %v186_v63  ;;  %v400_v63 = vld [vmem:[%s3995_s1 + $0xb30] sm:$0xff]  ;;  %v211_v0 = vld [vmem:[%s3995_s1 + $0x548] sm:$0xff] }
  0x82   :  { %1754 = vmatpush1.bf16.msra.mxu0 %v1753_v9  ;;  %1564 = vmatprep.subr.bf16.mxu1 %v1563_v10  ;;  %v1773_v9 = vpack.c.bf16 %v380_v3, %v378_v1  ;;  %v1583_v10 = vpack.c.bf16 %v193_v5, %v191_v4  ;;  %v213_v1 = vld [vmem:[%s3995_s1 + $0x558] sm:$0xff] }
  0x83   :  { %1756 = vmatprep.subr.bf16.mxu0 %v1755_v14  ;;  %v1775_v14 = vpack.c.bf16 %v385_v7, %v383_v6  ;;  %v405_v3 = vld [vmem:[%s3995_s1 + $0xb58] sm:$0xff]  ;;  %v1603_v6 = vpack.c.bf16 %v213_v1, %v211_v0  ;;  %v210_v7 = vld [vmem:[%s3995_s1 + $0x540] sm:$0xff] }
  0x84   :  { %702 = vmatmul.mubr.f32.vlgmr.msra.gmra.mrb[0].mxu1 %v28_v20  ;;  %v1585_v20 = vpack.c.bf16 %v192_v12, %v190_v11  ;;  %v404_v11 = vld [vmem:[%s3995_s1 + $0xb50] sm:$0xff]  ;;  %v215_v12 = vld [vmem:[%s3995_s1 + $0x568] sm:$0xff] }
  0x85   :  { %1566 = vmatpush1.bf16.msra.mxu1 %v1565_v21  ;;  %915 = vmatmul.mubr.f32.vlgmr.msra.gmra.mrb[0].mxu0 %v34_v22  ;;  %v1777_v21 = vpack.c.bf16 %v384_v15, %v382_v13  ;;  %v1587_v22 = vpack.c.bf16 %v197_v17, %v195_v16  ;;  %v217_v13 = vld [vmem:[%s3995_s1 + $0x578] sm:$0xff] }
  0x86   :  { %1758 = vmatpush1.bf16.msra.mxu0 %v1757_v23  ;;  %1568 = vmatprep.subr.bf16.mxu1 %v1567_v24  ;;  %v194_v23 = vld [vmem:[%s3995_s1 + $0x4c0] sm:$0xff]  ;;  %v196_v24 = vld [vmem:[%s3995_s1 + $0x4d0] sm:$0xff]  ;;  %v409_v15 = vld [vmem:[%s3995_s1 + $0xb78] sm:$0xff]  ;;  %v1607_v18 = vpack.c.bf16 %v217_v13, %v215_v12 }
  0x87   :  { %1760 = vmatprep.subr.bf16.mxu0 %v1759_v28  ;;  %772 = vmatprep.mubr.f32.mxu1 %v31_v34  ;;  %v199_v28 = vld [vmem:[%s3995_s1 + $0x4e8] sm:$0xff]  ;;  %v1589_v32 = vpack.c.bf16 %v196_v24, %v194_v23  ;;  %v408_v23 = vld [vmem:[%s3995_s1 + $0xb70] sm:$0xff]  ;;  %v426_v13 = vld [vmem:[%s3995_s1 + $0xc00] sm:$0xff] }
  0x88   :  { %985 = vmatprep.mubr.f32.mxu0 %v37_v36  ;;  %v1591_v34 = vpack.c.bf16 %v201_v29, %v199_v28  ;;  %v200_v36 = vld [vmem:[%s3995_s1 + $0x4f0] sm:$0xff]  ;;  %v219_v24 = vld [vmem:[%s3995_s1 + $0x588] sm:$0xff] }
  0x89   :  { %1570 = vmatpush1.bf16.msra.mxu1 %v1569_v35  ;;  %v198_v35 = vld [vmem:[%s3995_s1 + $0x4e0] sm:$0xff] }
  0x8a   :  { %1762 = vmatpush1.bf16.msra.mxu0 %v1761_v37  ;;  %1572 = vmatprep.subr.bf16.mxu1 %v1571_v38  ;;  %v390_v37 = vld [vmem:[%s3995_s1 + $0xae0] sm:$0xff]  ;;  %v1783_v38 = vpack.c.bf16 %v393_v31, %v391_v30  ;;  %v1593_v44 = vpack.c.bf16 %v200_v36, %v198_v35  ;;  %v1611_v30 = vpack.c.bf16 %v221_v25, %v219_v24  ;;  %v412_v35 = vld [vmem:[%s3995_s1 + $0xb90] sm:$0xff]  ;;  %v223_v36 = vld [vmem:[%s3995_s1 + $0x5a8] sm:$0xff] }
  0x8b   :  { %1764 = vmatprep.subr.bf16.mxu0 %v1763_v42  ;;  %v395_v42 = vld [vmem:[%s3995_s1 + $0xb08] sm:$0xff]  ;;  %v1785_v45 = vpack.c.bf16 %v392_v39, %v390_v37  ;;  %v218_v31 = vld [vmem:[%s3995_s1 + $0x580] sm:$0xff]  ;;  %v225_v37 = vld [vmem:[%s3995_s1 + $0x5b8] sm:$0xff] }
  0x8c   :  { %v417_v39 = vld [vmem:[%s3995_s1 + $0xbb8] sm:$0xff]  ;;  %v435_v24 = vld [vmem:[%s3995_s1 + $0xc48] sm:$0xff] }
  0x8d   :  { %1574 = vmatpush1.bf16.msra.mxu1 %v1573_v48  ;;  %v204_v48 = vld [vmem:[%s3995_s1 + $0x510] sm:$0xff]  ;;  %v437_v25 = vld [vmem:[%s3995_s1 + $0xc58] sm:$0xff] }
  0x8e   :  { %1766 = vmatpush1.bf16.msra.mxu0 %v1765_v49  ;;  %1576 = vmatprep.subr.bf16.mxu1 %v1575_v50  ;;  %v394_v49 = vld [vmem:[%s3995_s1 + $0xb00] sm:$0xff]  ;;  %v1787_v50 = vpack.c.bf16 %v397_v43, %v395_v42  ;;  %v1597_v56 = vpack.c.bf16 %v204_v48, %v202_v47  ;;  %v1615_v42 = vpack.c.bf16 %v225_v37, %v223_v36  ;;  %v416_v47 = vld [vmem:[%s3995_s1 + $0xbb0] sm:$0xff]  ;;  %v227_v48 = vld [vmem:[%s3995_s1 + $0x5c8] sm:$0xff] }
  0x8f   :  { %1768 = vmatprep.subr.bf16.mxu0 %v1767_v54  ;;  %v399_v54 = vld [vmem:[%s3995_s1 + $0xb28] sm:$0xff]  ;;  %v1789_v57 = vpack.c.bf16 %v396_v51, %v394_v49  ;;  %v222_v43 = vld [vmem:[%s3995_s1 + $0x5a0] sm:$0xff]  ;;  %v229_v49 = vld [vmem:[%s3995_s1 + $0x5d8] sm:$0xff] }
  0x90   :  { %v421_v51 = vld [vmem:[%s3995_s1 + $0xbd8] sm:$0xff]  ;;  %v443_v36 = vld [vmem:[%s3995_s1 + $0xc88] sm:$0xff] }
  0x91   :  { %1578 = vmatpush1.bf16.msra.mxu1 %v1577_v60  ;;  %v208_v60 = vld [vmem:[%s3995_s1 + $0x530] sm:$0xff]  ;;  %v445_v37 = vld [vmem:[%s3995_s1 + $0xc98] sm:$0xff] }
  0x92   :  { %1770 = vmatpush1.bf16.msra.mxu0 %v1769_v61  ;;  %1580 = vmatprep.subr.bf16.mxu1 %v1579_v62  ;;  %v398_v61 = vld [vmem:[%s3995_s1 + $0xb20] sm:$0xff]  ;;  %v1791_v62 = vpack.c.bf16 %v401_v55, %v399_v54  ;;  %v1601_v4 = vpack.c.bf16 %v208_v60, %v206_v59  ;;  %v1619_v54 = vpack.c.bf16 %v229_v49, %v227_v48  ;;  %v420_v59 = vld [vmem:[%s3995_s1 + $0xbd0] sm:$0xff]  ;;  %v231_v60 = vld [vmem:[%s3995_s1 + $0x5e8] sm:$0xff] }
  0x93   :  { %1772 = vmatprep.subr.bf16.mxu0 %v1771_v2  ;;  %v403_v2 = vld [vmem:[%s3995_s1 + $0xb48] sm:$0xff]  ;;  %v1793_v5 = vpack.c.bf16 %v400_v63, %v398_v61  ;;  %v226_v55 = vld [vmem:[%s3995_s1 + $0x5c0] sm:$0xff]  ;;  %v233_v61 = vld [vmem:[%s3995_s1 + $0x5f8] sm:$0xff] }
  0x94   :  { %v425_v63 = vld [vmem:[%s3995_s1 + $0xbf8] sm:$0xff]  ;;  %v451_v48 = vld [vmem:[%s3995_s1 + $0xcc8] sm:$0xff] }
  0x95   :  { %1582 = vmatpush1.bf16.msra.mxu1 %v1581_v8  ;;  %v212_v8 = vld [vmem:[%s3995_s1 + $0x550] sm:$0xff]  ;;  %v453_v49 = vld [vmem:[%s3995_s1 + $0xcd8] sm:$0xff] }
  0x96   :  { %1774 = vmatpush1.bf16.msra.mxu0 %v1773_v9  ;;  %1584 = vmatprep.subr.bf16.mxu1 %v1583_v10  ;;  %v402_v9 = vld [vmem:[%s3995_s1 + $0xb40] sm:$0xff]  ;;  %v1795_v10 = vpack.c.bf16 %v405_v3, %v403_v2  ;;  %v1605_v16 = vpack.c.bf16 %v212_v8, %v210_v7  ;;  %v1623_v2 = vpack.c.bf16 %v233_v61, %v231_v60  ;;  %v424_v7 = vld [vmem:[%s3995_s1 + $0xbf0] sm:$0xff]  ;;  %v427_v8 = vld [vmem:[%s3995_s1 + $0xc08] sm:$0xff] }
  0x97   :  { %1776 = vmatprep.subr.bf16.mxu0 %v1775_v14  ;;  %v407_v14 = vld [vmem:[%s3995_s1 + $0xb68] sm:$0xff]  ;;  %v1797_v17 = vpack.c.bf16 %v404_v11, %v402_v9  ;;  %v230_v3 = vld [vmem:[%s3995_s1 + $0x5e0] sm:$0xff]  ;;  %v429_v9 = vld [vmem:[%s3995_s1 + $0xc18] sm:$0xff] }
  0x98   :  { %v1819_v12 = vpack.c.bf16 %v429_v9, %v427_v8  ;;  %v459_v60 = vld [vmem:[%s3995_s1 + $0xd08] sm:$0xff]  ;;  %v461_v61 = vld [vmem:[%s3995_s1 + $0xd18] sm:$0xff] }
  0x99   :  { %1586 = vmatpush1.bf16.msra.mxu1 %v1585_v20  ;;  %v216_v20 = vld [vmem:[%s3995_s1 + $0x570] sm:$0xff]  ;;  %v467_v8 = vld [vmem:[%s3995_s1 + $0xd48] sm:$0xff]  ;;  %v469_v9 = vld [vmem:[%s3995_s1 + $0xd58] sm:$0xff] }
  0x9a   :  { %1778 = vmatpush1.bf16.msra.mxu0 %v1777_v21  ;;  %1588 = vmatprep.subr.bf16.mxu1 %v1587_v22  ;;  %v406_v21 = vld [vmem:[%s3995_s1 + $0xb60] sm:$0xff]  ;;  %v1799_v22 = vpack.c.bf16 %v409_v15, %v407_v14  ;;  %v1609_v28 = vpack.c.bf16 %v216_v20, %v214_v19  ;;  %v428_v14 = vld [vmem:[%s3995_s1 + $0xc10] sm:$0xff]  ;;  %v431_v15 = vld [vmem:[%s3995_s1 + $0xc28] sm:$0xff] }
  0x9b   :  { %1780 = vmatprep.subr.bf16.mxu0 %v1779_v26  ;;  %v411_v26 = vld [vmem:[%s3995_s1 + $0xb88] sm:$0xff]  ;;  %v1801_v29 = vpack.c.bf16 %v408_v23, %v406_v21  ;;  %v1821_v19 = vpack.c.bf16 %v428_v14, %v426_v13  ;;  %v430_v21 = vld [vmem:[%s3995_s1 + $0xc20] sm:$0xff]  ;;  %v468_v13 = vld [vmem:[%s3995_s1 + $0xd50] sm:$0xff] }
  0x9c   :  { %v39_v23 = vld [vmem:[%s3996_s0 + $0x68] sm:$0xff] }
  0x9d   :  { %1590 = vmatpush1.bf16.msra.mxu1 %v1589_v32  ;;  %v220_v32 = vld [vmem:[%s3995_s1 + $0x590] sm:$0xff]  ;;  %v471_v14 = vld [vmem:[%s3995_s1 + $0xd68] sm:$0xff] }
  0x9e   :  { %1782 = vmatpush1.bf16.msra.mxu0 %v1781_v33  ;;  %1592 = vmatprep.subr.bf16.mxu1 %v1591_v34  ;;  %v410_v33 = vld [vmem:[%s3995_s1 + $0xb80] sm:$0xff]  ;;  %v1803_v34 = vpack.c.bf16 %v413_v27, %v411_v26  ;;  %v1613_v40 = vpack.c.bf16 %v220_v32, %v218_v31  ;;  %v1827_v27 = vpack.c.bf16 %v437_v25, %v435_v24  ;;  %v441_v31 = vld [vmem:[%s3995_s1 + $0xc78] sm:$0xff]  ;;  %v476_v25 = vld [vmem:[%s3995_s1 + $0xd90] sm:$0xff] }
  0x9f   :  { %1784 = vmatprep.subr.bf16.mxu0 %v1783_v38  ;;  %v415_v38 = vld [vmem:[%s3995_s1 + $0xba8] sm:$0xff]  ;;  %v1805_v41 = vpack.c.bf16 %v412_v35, %v410_v33  ;;  %v440_v35 = vld [vmem:[%s3995_s1 + $0xc70] sm:$0xff]  ;;  %v474_v24 = vld [vmem:[%s3995_s1 + $0xd80] sm:$0xff] }
  0xa1   :  { %1594 = vmatpush1.bf16.msra.mxu1 %v1593_v44  ;;  %v224_v44 = vld [vmem:[%s3995_s1 + $0x5b0] sm:$0xff] }
  0xa2   :  { %1786 = vmatpush1.bf16.msra.mxu0 %v1785_v45  ;;  %1596 = vmatprep.subr.bf16.mxu1 %v1595_v46  ;;  %v414_v45 = vld [vmem:[%s3995_s1 + $0xba0] sm:$0xff]  ;;  %v1807_v46 = vpack.c.bf16 %v417_v39, %v415_v38  ;;  %v1617_v52 = vpack.c.bf16 %v224_v44, %v222_v43  ;;  %v1835_v39 = vpack.c.bf16 %v445_v37, %v443_v36  ;;  %v449_v43 = vld [vmem:[%s3995_s1 + $0xcb8] sm:$0xff]  ;;  %v484_v37 = vld [vmem:[%s3995_s1 + $0xdd0] sm:$0xff] }
  0xa3   :  { %1788 = vmatprep.subr.bf16.mxu0 %v1787_v50  ;;  %v419_v50 = vld [vmem:[%s3995_s1 + $0xbc8] sm:$0xff]  ;;  %v1809_v53 = vpack.c.bf16 %v416_v47, %v414_v45  ;;  %v448_v47 = vld [vmem:[%s3995_s1 + $0xcb0] sm:$0xff]  ;;  %v482_v36 = vld [vmem:[%s3995_s1 + $0xdc0] sm:$0xff] }
  0xa5   :  { %1598 = vmatpush1.bf16.msra.mxu1 %v1597_v56  ;;  %v228_v56 = vld [vmem:[%s3995_s1 + $0x5d0] sm:$0xff] }
  0xa6   :  { %1790 = vmatpush1.bf16.msra.mxu0 %v1789_v57  ;;  %1600 = vmatprep.subr.bf16.mxu1 %v1599_v58  ;;  %v418_v57 = vld [vmem:[%s3995_s1 + $0xbc0] sm:$0xff]  ;;  %v1811_v58 = vpack.c.bf16 %v421_v51, %v419_v50  ;;  %v1621_v0 = vpack.c.bf16 %v228_v56, %v226_v55  ;;  %v1843_v51 = vpack.c.bf16 %v453_v49, %v451_v48  ;;  %v457_v55 = vld [vmem:[%s3995_s1 + $0xcf8] sm:$0xff]  ;;  %v492_v49 = vld [vmem:[%s3995_s1 + $0xe10] sm:$0xff] }
  0xa7   :  { %1792 = vmatprep.subr.bf16.mxu0 %v1791_v62  ;;  %v423_v62 = vld [vmem:[%s3995_s1 + $0xbe8] sm:$0xff]  ;;  %v1813_v1 = vpack.c.bf16 %v420_v59, %v418_v57  ;;  %v456_v59 = vld [vmem:[%s3995_s1 + $0xcf0] sm:$0xff]  ;;  %v490_v48 = vld [vmem:[%s3995_s1 + $0xe00] sm:$0xff] }
  0xa9   :  { %1602 = vmatpush1.bf16.msra.mxu1 %v1601_v4  ;;  %v232_v4 = vld [vmem:[%s3995_s1 + $0x5f0] sm:$0xff] }
  0xaa   :  { %1794 = vmatpush1.bf16.msra.mxu0 %v1793_v5  ;;  %1604 = vmatprep.subr.bf16.mxu1 %v1603_v6  ;;  %v1815_v5 = vpack.c.bf16 %v425_v63, %v423_v62  ;;  %v422_v6 = vld [vmem:[%s3995_s1 + $0xbe0] sm:$0xff]  ;;  %v1851_v63 = vpack.c.bf16 %v461_v61, %v459_v60 }
  0xab   :  { %1796 = vmatprep.subr.bf16.mxu0 %v1795_v10  ;;  %v1625_v10 = vpack.c.bf16 %v232_v4, %v230_v3  ;;  %v1817_v11 = vpack.c.bf16 %v424_v7, %v422_v6  ;;  %v465_v3 = vld [vmem:[%s3995_s1 + $0xd38] sm:$0xff]  ;;  %v462_v6 = vld [vmem:[%s3995_s1 + $0xd20] sm:$0xff]  ;;  %v464_v7 = vld [vmem:[%s3995_s1 + $0xd30] sm:$0xff] }
  0xad   :  { %1606 = vmatpush1.bf16.msra.mxu1 %v1605_v16  ;;  %v433_v16 = vld [vmem:[%s3995_s1 + $0xc38] sm:$0xff] }
  0xae   :  { %1798 = vmatpush1.bf16.msra.mxu0 %v1797_v17  ;;  %1608 = vmatprep.subr.bf16.mxu1 %v1607_v18  ;;  %v30_v17 = vld [vmem:[%s3996_s0 + $0x20] sm:$0xff]  ;;  %v36_v18 = vld [vmem:[%s3996_s0 + $0x50] sm:$0xff]  ;;  %v1823_v20 = vpack.c.bf16 %v433_v16, %v431_v15  ;;  %v473_v15 = vld [vmem:[%s3995_s1 + $0xd78] sm:$0xff] }
  0xaf   :  { %1800 = vmatprep.subr.bf16.mxu0 %v1799_v22  ;;  %v432_v22 = vld [vmem:[%s3995_s1 + $0xc30] sm:$0xff] }
  0xb0   :  { %v1825_v26 = vpack.c.bf16 %v432_v22, %v430_v21  ;;  %v477_v21 = vld [vmem:[%s3995_s1 + $0xd98] sm:$0xff] }
  0xb1   :  { %1610 = vmatpush1.bf16.msra.mxu1 %v1609_v28  ;;  %v434_v28 = vld [vmem:[%s3995_s1 + $0xc40] sm:$0xff] }
  0xb2   :  { %1802 = vmatpush1.bf16.msra.mxu0 %v1801_v29  ;;  %1612 = vmatprep.subr.bf16.mxu1 %v1611_v30  ;;  %v436_v29 = vld [vmem:[%s3995_s1 + $0xc50] sm:$0xff]  ;;  %v439_v30 = vld [vmem:[%s3995_s1 + $0xc68] sm:$0xff] }
  0xb3   :  { %1804 = vmatprep.subr.bf16.mxu0 %v1803_v34  ;;  %v1829_v32 = vpack.c.bf16 %v436_v29, %v434_v28  ;;  %v1831_v33 = vpack.c.bf16 %v441_v31, %v439_v30  ;;  %v438_v34 = vld [vmem:[%s3995_s1 + $0xc60] sm:$0xff]  ;;  %v1869_v28 = vpack.c.bf16 %v476_v25, %v474_v24  ;;  %v480_v31 = vld [vmem:[%s3995_s1 + $0xdb0] sm:$0xff]  ;;  %v519_v24 = vld [vmem:[%s3995_s1 + $0xee8] sm:$0xff] }
  0xb4   :  { %v1833_v38 = vpack.c.bf16 %v440_v35, %v438_v34  ;;  %v478_v30 = vld [vmem:[%s3995_s1 + $0xda0] sm:$0xff]  ;;  %v521_v25 = vld [vmem:[%s3995_s1 + $0xef8] sm:$0xff] }
  0xb5   :  { %1614 = vmatpush1.bf16.msra.mxu1 %v1613_v40  ;;  %v442_v40 = vld [vmem:[%s3995_s1 + $0xc80] sm:$0xff]  ;;  %v1873_v34 = vpack.c.bf16 %v480_v31, %v478_v30  ;;  %v525_v30 = vld [vmem:[%s3995_s1 + $0xf18] sm:$0xff]  ;;  %v1137_v31 = vld [vmem:[%s3997_s3 + $0x8] sm:$0xff] }
  0xb6   :  { %1806 = vmatpush1.bf16.msra.mxu0 %v1805_v41  ;;  %1616 = vmatprep.subr.bf16.mxu1 %v1615_v42  ;;  %v444_v41 = vld [vmem:[%s3995_s1 + $0xc90] sm:$0xff]  ;;  %v447_v42 = vld [vmem:[%s3995_s1 + $0xca8] sm:$0xff] }
  0xb7   :  { %1808 = vmatprep.subr.bf16.mxu0 %v1807_v46  ;;  %v1837_v44 = vpack.c.bf16 %v444_v41, %v442_v40  ;;  %v1839_v45 = vpack.c.bf16 %v449_v43, %v447_v42  ;;  %v446_v46 = vld [vmem:[%s3995_s1 + $0xca0] sm:$0xff]  ;;  %v1877_v40 = vpack.c.bf16 %v484_v37, %v482_v36  ;;  %v488_v43 = vld [vmem:[%s3995_s1 + $0xdf0] sm:$0xff]  ;;  %v1141_v37 = vld [vmem:[%s3997_s3 + $0x28] sm:$0xff] }
  0xb8   :  { %v1841_v50 = vpack.c.bf16 %v448_v47, %v446_v46  ;;  %v486_v42 = vld [vmem:[%s3995_s1 + $0xde0] sm:$0xff]  ;;  %v1138_v36 = vld [vmem:[%s3997_s3 + $0x10] sm:$0xff] }
  0xb9   :  { %1618 = vmatpush1.bf16.msra.mxu1 %v1617_v52  ;;  %v450_v52 = vld [vmem:[%s3995_s1 + $0xcc0] sm:$0xff]  ;;  %v1881_v46 = vpack.c.bf16 %v488_v43, %v486_v42  ;;  %v1142_v42 = vld [vmem:[%s3997_s3 + $0x30] sm:$0xff]  ;;  %v1145_v43 = vld [vmem:[%s3997_s3 + $0x48] sm:$0xff] }
  0xba   :  { %1810 = vmatpush1.bf16.msra.mxu0 %v1809_v53  ;;  %1620 = vmatprep.subr.bf16.mxu1 %v1619_v54  ;;  %v452_v53 = vld [vmem:[%s3995_s1 + $0xcd0] sm:$0xff]  ;;  %v455_v54 = vld [vmem:[%s3995_s1 + $0xce8] sm:$0xff] }
  0xbb   :  { %1812 = vmatprep.subr.bf16.mxu0 %v1811_v58  ;;  %v1845_v56 = vpack.c.bf16 %v452_v53, %v450_v52  ;;  %v1847_v57 = vpack.c.bf16 %v457_v55, %v455_v54  ;;  %v454_v58 = vld [vmem:[%s3995_s1 + $0xce0] sm:$0xff]  ;;  %v1885_v53 = vpack.c.bf16 %v492_v49, %v490_v48 }
  0xbc   :  { %v1849_v62 = vpack.c.bf16 %v456_v59, %v454_v58  ;;  %v38_v52 = vld [vmem:[%s3996_s0 + $0x60] sm:$0xff]  ;;  %v499_v58 = vld [vmem:[%s3995_s1 + $0xe48] sm:$0xff]  ;;  %v501_v59 = vld [vmem:[%s3995_s1 + $0xe58] sm:$0xff] }
  0xbd   :  { %1622 = vmatpush1.bf16.msra.mxu1 %v1621_v0  ;;  %v458_v0 = vld [vmem:[%s3995_s1 + $0xd00] sm:$0xff]  ;;  %v1891_v61 = vpack.c.bf16 %v501_v59, %v499_v58  ;;  %v528_v59 = vld [vmem:[%s3995_s1 + $0xf30] sm:$0xff] }
  0xbe   :  { %1814 = vmatpush1.bf16.msra.mxu0 %v1813_v1  ;;  %1624 = vmatprep.subr.bf16.mxu1 %v1623_v2  ;;  %v460_v1 = vld [vmem:[%s3995_s1 + $0xd10] sm:$0xff]  ;;  %v463_v2 = vld [vmem:[%s3995_s1 + $0xd28] sm:$0xff]  ;;  %v494_v55 = vld [vmem:[%s3995_s1 + $0xe20] sm:$0xff] }
  0xbf   :  { %1816 = vmatprep.subr.bf16.mxu0 %v1815_v5  ;;  %v1853_v4 = vpack.c.bf16 %v460_v1, %v458_v0  ;;  %v1855_v5 = vpack.c.bf16 %v465_v3, %v463_v2  ;;  %v503_v0 = vld [vmem:[%s3995_s1 + $0xe68] sm:$0xff]  ;;  %v505_v1 = vld [vmem:[%s3995_s1 + $0xe78] sm:$0xff]  ;;  %v526_v58 = vld [vmem:[%s3995_s1 + $0xf20] sm:$0xff] }
  0xc0   :  { %v1895_v3 = vpack.c.bf16 %v505_v1, %v503_v0  ;;  %v1148_v0 = vld [vmem:[%s3997_s3 + $0x60] sm:$0xff]  ;;  %v1150_v1 = vld [vmem:[%s3997_s3 + $0x70] sm:$0xff] }
  0xc1   :  { %1626 = vmatpush1.bf16.msra.mxu1 %v1625_v10  ;;  %v1857_v10 = vpack.c.bf16 %v464_v7, %v462_v6  ;;  %v507_v6 = vld [vmem:[%s3995_s1 + $0xe88] sm:$0xff]  ;;  %v509_v7 = vld [vmem:[%s3995_s1 + $0xe98] sm:$0xff] }
  0xc2   :  { %1818 = vmatpush1.bf16.msra.mxu0 %v1817_v11  ;;  %v1859_v11 = vpack.c.bf16 %v469_v9, %v467_v8  ;;  %v1899_v9 = vpack.c.bf16 %v509_v7, %v507_v6  ;;  %v530_v6 = vld [vmem:[%s3995_s1 + $0xf40] sm:$0xff]  ;;  %v532_v7 = vld [vmem:[%s3995_s1 + $0xf50] sm:$0xff] }
  0xc3   :  { %1820 = vmatprep.subr.bf16.mxu0 %v1819_v12  ;;  %v466_v12 = vld [vmem:[%s3995_s1 + $0xd40] sm:$0xff] }
  0xc4   :  { %773 = vmatmul.mubr.f32.vlgmr.msra.gmra.mrb[0].mxu1 %v30_v17  ;;  %v1861_v16 = vpack.c.bf16 %v468_v13, %v466_v12  ;;  %v1863_v17 = vpack.c.bf16 %v473_v15, %v471_v14  ;;  %v511_v12 = vld [vmem:[%s3995_s1 + $0xea8] sm:$0xff]  ;;  %v513_v13 = vld [vmem:[%s3995_s1 + $0xeb8] sm:$0xff] }
  0xc5   :  { %986 = vmatmul.mubr.f32.vlgmr.msra.gmra.mrb[0].mxu0 %v36_v18  ;;  %v470_v18 = vld [vmem:[%s3995_s1 + $0xd60] sm:$0xff]  ;;  %v1903_v15 = vpack.c.bf16 %v513_v13, %v511_v12  ;;  %v1154_v13 = vld [vmem:[%s3997_s3 + $0x90] sm:$0xff] }
  0xc6   :  { %1822 = vmatpush1.bf16.msra.mxu0 %v1821_v19  ;;  %1056 = vmatprep.mubr.f32.mxu0 %v39_v23  ;;  %v472_v19 = vld [vmem:[%s3995_s1 + $0xd70] sm:$0xff]  ;;  %v1152_v12 = vld [vmem:[%s3997_s3 + $0x80] sm:$0xff] }
  0xc7   :  { %1824 = vmatprep.subr.bf16.mxu0 %v1823_v20  ;;  %v475_v20 = vld [vmem:[%s3995_s1 + $0xd88] sm:$0xff]  ;;  %v1865_v22 = vpack.c.bf16 %v472_v19, %v470_v18  ;;  %v517_v19 = vld [vmem:[%s3995_s1 + $0xed8] sm:$0xff] }
  0xc8   :  { %v1867_v23 = vpack.c.bf16 %v477_v21, %v475_v20  ;;  %v515_v18 = vld [vmem:[%s3995_s1 + $0xec8] sm:$0xff] }
  0xc9   :  { %v1907_v21 = vpack.c.bf16 %v517_v19, %v515_v18  ;;  %v534_v18 = vld [vmem:[%s3995_s1 + $0xf60] sm:$0xff]  ;;  %v536_v19 = vld [vmem:[%s3995_s1 + $0xf70] sm:$0xff] }
  0xca   :  { %1826 = vmatpush1.bf16.msra.mxu0 %v1825_v26  ;;  %v479_v26 = vld [vmem:[%s3995_s1 + $0xda8] sm:$0xff] }
  0xcb   :  { %1828 = vmatprep.subr.bf16.mxu0 %v1827_v27  ;;  %v481_v27 = vld [vmem:[%s3995_s1 + $0xdb8] sm:$0xff] }
  0xcc   :  { %v1871_v29 = vpack.c.bf16 %v481_v27, %v479_v26  ;;  %v518_v26 = vld [vmem:[%s3995_s1 + $0xee0] sm:$0xff]  ;;  %v520_v27 = vld [vmem:[%s3995_s1 + $0xef0] sm:$0xff] }
  0xce   :  { %1830 = vmatpush1.bf16.msra.mxu0 %v1829_v32  ;;  %v483_v32 = vld [vmem:[%s3995_s1 + $0xdc8] sm:$0xff] }
  0xcf   :  { %1832 = vmatprep.subr.bf16.mxu0 %v1831_v33  ;;  %v485_v33 = vld [vmem:[%s3995_s1 + $0xdd8] sm:$0xff] }
  0xd0   :  { %v1875_v35 = vpack.c.bf16 %v485_v33, %v483_v32  ;;  %v1139_v32 = vld [vmem:[%s3997_s3 + $0x18] sm:$0xff]  ;;  %v1136_v33 = vld [vmem:[%s3997_s3] sm:$0xff] }
  0xd2   :  { %1834 = vmatpush1.bf16.msra.mxu0 %v1833_v38  ;;  %v487_v38 = vld [vmem:[%s3995_s1 + $0xde8] sm:$0xff] }
  0xd3   :  { %1836 = vmatprep.subr.bf16.mxu0 %v1835_v39  ;;  %v489_v39 = vld [vmem:[%s3995_s1 + $0xdf8] sm:$0xff] }
  0xd4   :  { %v1879_v41 = vpack.c.bf16 %v489_v39, %v487_v38  ;;  %v1143_v38 = vld [vmem:[%s3997_s3 + $0x38] sm:$0xff]  ;;  %v1949_v39 = vpack.c.bf16 %v1138_v36, %v1136_v33  ;;  %v1160_v36 = vld [vmem:[%s3997_s3 + $0xc0] sm:$0xff] }
  0xd6   :  { %1838 = vmatpush1.bf16.msra.mxu0 %v1837_v44  ;;  %v491_v44 = vld [vmem:[%s3995_s1 + $0xe08] sm:$0xff] }
  0xd7   :  { %1840 = vmatprep.subr.bf16.mxu0 %v1839_v45  ;;  %v493_v45 = vld [vmem:[%s3995_s1 + $0xe18] sm:$0xff] }
  0xd8   :  { %v1883_v47 = vpack.c.bf16 %v493_v45, %v491_v44  ;;  %v1147_v44 = vld [vmem:[%s3997_s3 + $0x58] sm:$0xff]  ;;  %v1913_v45 = vpack.c.bf16 %v520_v27, %v518_v26  ;;  %v1161_v27 = vld [vmem:[%s3997_s3 + $0xc8] sm:$0xff] }
  0xd9   :  { %v541_v26 = vld [vmem:[%s3995_s1 + $0xf98] sm:$0xff] }
  0xda   :  { %1842 = vmatpush1.bf16.msra.mxu0 %v1841_v50  ;;  %v495_v50 = vld [vmem:[%s3995_s1 + $0xe28] sm:$0xff] }
  0xdb   :  { %1844 = vmatprep.subr.bf16.mxu0 %v1843_v51  ;;  %v497_v51 = vld [vmem:[%s3995_s1 + $0xe38] sm:$0xff] }
  0xdc   :  { %v1887_v54 = vpack.c.bf16 %v497_v51, %v495_v50  ;;  %v527_v50 = vld [vmem:[%s3995_s1 + $0xf28] sm:$0xff]  ;;  %v1955_v51 = vpack.c.bf16 %v1147_v44, %v1145_v43  ;;  %v544_v43 = vld [vmem:[%s3995_s1 + $0xfb0] sm:$0xff] }
  0xde   :  { %1846 = vmatpush1.bf16.msra.mxu0 %v1845_v56  ;;  %v496_v56 = vld [vmem:[%s3995_s1 + $0xe30] sm:$0xff] }
  0xdf   :  { %1848 = vmatprep.subr.bf16.mxu0 %v1847_v57  ;;  %v41_v57 = vld [vmem:[%s3996_s0 + $0x78] sm:$0xff]  ;;  %v1889_v60 = vpack.c.bf16 %v496_v56, %v494_v55  ;;  %v1149_v55 = vld [vmem:[%s3997_s3 + $0x68] sm:$0xff] }
  0xe0   :  { %v1151_v56 = vld [vmem:[%s3997_s3 + $0x78] sm:$0xff] }
  0xe2   :  { %1850 = vmatpush1.bf16.msra.mxu0 %v1849_v62  ;;  %v498_v62 = vld [vmem:[%s3995_s1 + $0xe40] sm:$0xff] }
  0xe3   :  { %1852 = vmatprep.subr.bf16.mxu0 %v1851_v63  ;;  %v500_v63 = vld [vmem:[%s3995_s1 + $0xe50] sm:$0xff] }
  0xe4   :  { %v1893_v2 = vpack.c.bf16 %v500_v63, %v498_v62  ;;  %v531_v62 = vld [vmem:[%s3995_s1 + $0xf48] sm:$0xff]  ;;  %v1959_v63 = vpack.c.bf16 %v1151_v56, %v1149_v55  ;;  %v548_v55 = vld [vmem:[%s3995_s1 + $0xfd0] sm:$0xff] }
  0xe6   :  { %1854 = vmatpush1.bf16.msra.mxu0 %v1853_v4  ;;  %v502_v4 = vld [vmem:[%s3995_s1 + $0xe60] sm:$0xff] }
  0xe7   :  { %1856 = vmatprep.subr.bf16.mxu0 %v1855_v5  ;;  %v504_v5 = vld [vmem:[%s3995_s1 + $0xe70] sm:$0xff] }
  0xe8   :  { %v1897_v8 = vpack.c.bf16 %v504_v5, %v502_v4  ;;  %v1155_v4 = vld [vmem:[%s3997_s3 + $0x98] sm:$0xff]  ;;  %v1921_v5 = vpack.c.bf16 %v528_v59, %v526_v58  ;;  %v551_v58 = vld [vmem:[%s3995_s1 + $0xfe8] sm:$0xff] }
  0xea   :  { %1858 = vmatpush1.bf16.msra.mxu0 %v1857_v10  ;;  %v506_v10 = vld [vmem:[%s3995_s1 + $0xe80] sm:$0xff] }
  0xeb   :  { %1860 = vmatprep.subr.bf16.mxu0 %v1859_v11  ;;  %v508_v11 = vld [vmem:[%s3995_s1 + $0xe90] sm:$0xff] }
  0xec   :  { %v1901_v14 = vpack.c.bf16 %v508_v11, %v506_v10  ;;  %v535_v10 = vld [vmem:[%s3995_s1 + $0xf68] sm:$0xff] }
  0xee   :  { %1862 = vmatpush1.bf16.msra.mxu0 %v1861_v16  ;;  %v510_v16 = vld [vmem:[%s3995_s1 + $0xea0] sm:$0xff] }
  0xef   :  { %1864 = vmatprep.subr.bf16.mxu0 %v1863_v17  ;;  %v512_v17 = vld [vmem:[%s3995_s1 + $0xeb0] sm:$0xff] }
  0xf0   :  { %v1905_v20 = vpack.c.bf16 %v512_v17, %v510_v16  ;;  %v1159_v16 = vld [vmem:[%s3997_s3 + $0xb8] sm:$0xff]  ;;  %v1925_v17 = vpack.c.bf16 %v532_v7, %v530_v6  ;;  %v1172_v7 = vld [vmem:[%s3997_s3 + $0x120] sm:$0xff] }
  0xf2   :  { %1866 = vmatpush1.bf16.msra.mxu0 %v1865_v22  ;;  %v514_v22 = vld [vmem:[%s3995_s1 + $0xec0] sm:$0xff] }
  0xf3   :  { %1868 = vmatprep.subr.bf16.mxu0 %v1867_v23  ;;  %v516_v23 = vld [vmem:[%s3995_s1 + $0xed0] sm:$0xff] }
  0xf6   :  { %1870 = vmatpush1.bf16.msra.mxu0 %v1869_v28  ;;  %v1909_v28 = vpack.c.bf16 %v516_v23, %v514_v22  ;;  %v539_v22 = vld [vmem:[%s3995_s1 + $0xf88] sm:$0xff] }
  0xf7   :  { %1872 = vmatprep.subr.bf16.mxu0 %v1871_v29  ;;  %v523_v29 = vld [vmem:[%s3995_s1 + $0xf08] sm:$0xff]  ;;  %v1931_v33 = vpack.c.bf16 %v541_v26, %v539_v22  ;;  %v1182_v22 = vld [vmem:[%s3997_s3 + $0x170] sm:$0xff] }
  0xf8   :  { %v1915_v49 = vpack.c.bf16 %v525_v30, %v523_v29  ;;  %v1929_v29 = vpack.c.bf16 %v536_v19, %v534_v18  ;;  %v538_v30 = vld [vmem:[%s3995_s1 + $0xf80] sm:$0xff]  ;;  %v40_v18 = vld [vmem:[%s3996_s0 + $0x70] sm:$0xff] }
  0xfa   :  { %1874 = vmatpush1.bf16.msra.mxu0 %v1873_v34  ;;  %v1911_v34 = vpack.c.bf16 %v521_v25, %v519_v24  ;;  %v1156_v24 = vld [vmem:[%s3997_s3 + $0xa0] sm:$0xff]  ;;  %v1158_v25 = vld [vmem:[%s3997_s3 + $0xb0] sm:$0xff] }
  0xfb   :  { %1876 = vmatprep.subr.bf16.mxu0 %v1875_v35  ;;  %v1947_v35 = vpack.c.bf16 %v1139_v32, %v1137_v31  ;;  %v540_v31 = vld [vmem:[%s3995_s1 + $0xf90] sm:$0xff]  ;;  %v1969_v32 = vpack.c.bf16 %v1158_v25, %v1156_v24  ;;  %v1187_v24 = vld [vmem:[%s3997_s3 + $0x198] sm:$0xff] }
  0xfd   :  { %1948 = vmatprep.subr.bf16.mxu1 %v1947_v35 }
  0xfe   :  { %1878 = vmatpush1.bf16.msra.mxu0 %v1877_v40  ;;  %v1951_v40 = vpack.c.bf16 %v1143_v38, %v1141_v37  ;;  %1950 = vmatpush1.bf16.msra.mxu1 %v1949_v39  ;;  %v1162_v37 = vld [vmem:[%s3997_s3 + $0xd0] sm:$0xff]  ;;  %v545_v38 = vld [vmem:[%s3995_s1 + $0xfb8] sm:$0xff]  ;;  %v1165_v39 = vld [vmem:[%s3997_s3 + $0xe8] sm:$0xff] }
  0xff   :  { %1880 = vmatprep.subr.bf16.mxu0 %v1879_v41  ;;  %v1140_v41 = vld [vmem:[%s3997_s3 + $0x20] sm:$0xff]  ;;  %v1973_v44 = vpack.c.bf16 %v1162_v37, %v1160_v36  ;;  %v1195_v36 = vld [vmem:[%s3997_s3 + $0x1d8] sm:$0xff] }
 0x100   :  { %v1953_v48 = vpack.c.bf16 %v1142_v42, %v1140_v41  ;;  %1952 = vmatprep.subr.bf16.mxu1 %v1951_v40  ;;  %v1167_v40 = vld [vmem:[%s3997_s3 + $0xf8] sm:$0xff]  ;;  %v1933_v41 = vpack.c.bf16 %v540_v31, %v538_v30  ;;  %v542_v42 = vld [vmem:[%s3995_s1 + $0xfa0] sm:$0xff] }
 0x101   :  { %v1191_v30 = vld [vmem:[%s3997_s3 + $0x1b8] sm:$0xff] }
 0x102   :  { %1882 = vmatpush1.bf16.msra.mxu0 %v1881_v46  ;;  %v522_v46 = vld [vmem:[%s3995_s1 + $0xf00] sm:$0xff]  ;;  %1954 = vmatpush1.bf16.msra.mxu1 %v1953_v48 }
 0x103   :  { %1884 = vmatprep.subr.bf16.mxu0 %v1883_v47  ;;  %v524_v47 = vld [vmem:[%s3995_s1 + $0xf10] sm:$0xff]  ;;  %1956 = vmatprep.subr.bf16.mxu1 %v1955_v51  ;;  %v1164_v48 = vld [vmem:[%s3997_s3 + $0xe0] sm:$0xff]  ;;  %v1169_v51 = vld [vmem:[%s3997_s3 + $0x108] sm:$0xff] }
 0x105   :  { %1057 = vmatmul.mubr.f32.vlgmr.msra.gmra.mrb[0].mxu0 %v38_v52  ;;  %v1144_v52 = vld [vmem:[%s3997_s3 + $0x40] sm:$0xff] }
 0x106   :  { %1886 = vmatpush1.bf16.msra.mxu0 %v1885_v53  ;;  %1127 = vmatprep.mubr.f32.mxu0 %v41_v57  ;;  %v1146_v53 = vld [vmem:[%s3997_s3 + $0x50] sm:$0xff]  ;;  %v1917_v57 = vpack.c.bf16 %v524_v47, %v522_v46  ;;  %v547_v46 = vld [vmem:[%s3995_s1 + $0xfc8] sm:$0xff]  ;;  %v1975_v47 = vpack.c.bf16 %v1167_v40, %v1165_v39  ;;  %v1192_v39 = vld [vmem:[%s3997_s3 + $0x1c0] sm:$0xff] }
 0x107   :  { %1888 = vmatprep.subr.bf16.mxu0 %v1887_v54  ;;  %v529_v54 = vld [vmem:[%s3995_s1 + $0xf38] sm:$0xff]  ;;  %v1194_v40 = vld [vmem:[%s3997_s3 + $0x1d0] sm:$0xff] }
 0x10a   :  { %1890 = vmatpush1.bf16.msra.mxu0 %v1889_v60  ;;  %v1957_v60 = vpack.c.bf16 %v1146_v53, %v1144_v52  ;;  %v1171_v52 = vld [vmem:[%s3997_s3 + $0x118] sm:$0xff]  ;;  %v1937_v53 = vpack.c.bf16 %v544_v43, %v542_v42 }
 0x10b   :  { %1892 = vmatprep.subr.bf16.mxu0 %v1891_v61  ;;  %v1919_v61 = vpack.c.bf16 %v529_v54, %v527_v50  ;;  %v549_v50 = vld [vmem:[%s3995_s1 + $0xfd8] sm:$0xff]  ;;  %v546_v54 = vld [vmem:[%s3995_s1 + $0xfc0] sm:$0xff]  ;;  %v1979_v59 = vpack.c.bf16 %v1171_v52, %v1169_v51  ;;  %v1302_v51 = vld [vmem:[%s3998_s5 + $0x88] sm:$0xff] }
 0x10c   :  { %1958 = vmatpush1.bf16.msra.mxu1 %v1957_v60  ;;  %v1168_v60 = vld [vmem:[%s3997_s3 + $0x100] sm:$0xff] }
 0x10d   :  { %1960 = vmatprep.subr.bf16.mxu1 %v1959_v63  ;;  %v1173_v63 = vld [vmem:[%s3997_s3 + $0x128] sm:$0xff] }
 0x10e   :  { %1894 = vmatpush1.bf16.msra.mxu0 %v1893_v2  ;;  %v533_v2 = vld [vmem:[%s3995_s1 + $0xf58] sm:$0xff] }
 0x10f   :  { %1896 = vmatprep.subr.bf16.mxu0 %v1895_v3  ;;  %v1153_v3 = vld [vmem:[%s3997_s3 + $0x88] sm:$0xff] }
 0x110   :  { %v1963_v11 = vpack.c.bf16 %v1155_v4, %v1153_v3 }
 0x112   :  { %1898 = vmatpush1.bf16.msra.mxu0 %v1897_v8  ;;  %v1961_v8 = vpack.c.bf16 %v1150_v1, %v1148_v0  ;;  %v1175_v0 = vld [vmem:[%s3997_s3 + $0x138] sm:$0xff]  ;;  %v1941_v1 = vpack.c.bf16 %v548_v55, %v546_v54 }
 0x113   :  { %1900 = vmatprep.subr.bf16.mxu0 %v1899_v9  ;;  %v1923_v9 = vpack.c.bf16 %v533_v2, %v531_v62  ;;  %v553_v62 = vld [vmem:[%s3995_s1 + $0xff8] sm:$0xff]  ;;  %v550_v2 = vld [vmem:[%s3995_s1 + $0xfe0] sm:$0xff]  ;;  %v1983_v6 = vpack.c.bf16 %v1175_v0, %v1173_v63 }
 0x114   :  { %1962 = vmatpush1.bf16.msra.mxu1 %v1961_v8  ;;  %v1943_v4 = vpack.c.bf16 %v553_v62, %v551_v58  ;;  %v1174_v8 = vld [vmem:[%s3997_s3 + $0x130] sm:$0xff] }
 0x115   :  { %1964 = vmatprep.subr.bf16.mxu1 %v1963_v11 }
 0x116   :  { %1902 = vmatpush1.bf16.msra.mxu0 %v1901_v14  ;;  %v537_v14 = vld [vmem:[%s3995_s1 + $0xf78] sm:$0xff] }
 0x117   :  { %1904 = vmatprep.subr.bf16.mxu0 %v1903_v15  ;;  %v1157_v15 = vld [vmem:[%s3997_s3 + $0xa8] sm:$0xff] }
 0x118   :  { %v1967_v23 = vpack.c.bf16 %v1159_v16, %v1157_v15  ;;  %v1178_v15 = vld [vmem:[%s3997_s3 + $0x150] sm:$0xff]  ;;  %v1181_v16 = vld [vmem:[%s3997_s3 + $0x168] sm:$0xff] }
 0x11a   :  { %1906 = vmatpush1.bf16.msra.mxu0 %v1905_v20  ;;  %v1965_v20 = vpack.c.bf16 %v1154_v13, %v1152_v12  ;;  %v1985_v12 = vpack.c.bf16 %v1174_v8, %v1172_v7 }
 0x11b   :  { %1908 = vmatprep.subr.bf16.mxu0 %v1907_v21  ;;  %v1927_v21 = vpack.c.bf16 %v537_v14, %v535_v10  ;;  %v1179_v10 = vld [vmem:[%s3997_s3 + $0x158] sm:$0xff]  ;;  %v1176_v14 = vld [vmem:[%s3997_s3 + $0x140] sm:$0xff] }
 0x11c   :  { %1966 = vmatpush1.bf16.msra.mxu1 %v1965_v20  ;;  %v1989_v19 = vpack.c.bf16 %v1178_v15, %v1176_v14 }
 0x11d   :  { %1968 = vmatprep.subr.bf16.mxu1 %v1967_v23  ;;  %v1185_v23 = vld [vmem:[%s3997_s3 + $0x188] sm:$0xff] }
 0x11e   :  { %1910 = vmatpush1.bf16.msra.mxu0 %v1909_v28  ;;  %v1163_v28 = vld [vmem:[%s3997_s3 + $0xd8] sm:$0xff]  ;;  %v1995_v26 = vpack.c.bf16 %v1187_v24, %v1185_v23  ;;  %v1309_v24 = vld [vmem:[%s3998_s5 + $0xc0] sm:$0xff] }
 0x11f   :  { %1912 = vmatprep.subr.bf16.mxu0 %v1911_v34  ;;  %v543_v34 = vld [vmem:[%s3995_s1 + $0xfa8] sm:$0xff]  ;;  %v1971_v35 = vpack.c.bf16 %v1163_v28, %v1161_v27  ;;  %v1184_v27 = vld [vmem:[%s3997_s3 + $0x180] sm:$0xff]  ;;  %v1186_v28 = vld [vmem:[%s3997_s3 + $0x190] sm:$0xff] }
 0x120   :  { %1970 = vmatpush1.bf16.msra.mxu1 %v1969_v32  ;;  %v1997_v31 = vpack.c.bf16 %v1186_v28, %v1184_v27  ;;  %v1292_v23 = vld [vmem:[%s3998_s5 + $0x38] sm:$0xff]  ;;  %v1293_v28 = vld [vmem:[%s3998_s5 + $0x40] sm:$0xff] }
 0x121   :  { %1972 = vmatprep.subr.bf16.mxu1 %v1971_v35  ;;  %v1193_v35 = vld [vmem:[%s3997_s3 + $0x1c8] sm:$0xff] }
 0x122   :  { %1914 = vmatpush1.bf16.msra.mxu0 %v1913_v45  ;;  %v1935_v45 = vpack.c.bf16 %v545_v38, %v543_v34  ;;  %v1190_v34 = vld [vmem:[%s3997_s3 + $0x1b0] sm:$0xff]  ;;  %v2003_v38 = vpack.c.bf16 %v1195_v36, %v1193_v35  ;;  %v1296_v35 = vld [vmem:[%s3998_s5 + $0x58] sm:$0xff]  ;;  %v1313_v36 = vld [vmem:[%s3998_s5 + $0xe0] sm:$0xff] }
 0x123   :  { %1916 = vmatprep.subr.bf16.mxu0 %v1915_v49  ;;  %v1166_v49 = vld [vmem:[%s3997_s3 + $0xf0] sm:$0xff] }
 0x124   :  { %1974 = vmatpush1.bf16.msra.mxu1 %v1973_v44  ;;  %v1977_v56 = vpack.c.bf16 %v1166_v49, %v1164_v48  ;;  %v1197_v44 = vld [vmem:[%s3997_s3 + $0x1e8] sm:$0xff]  ;;  %v1198_v48 = vld [vmem:[%s3997_s3 + $0x1f0] sm:$0xff] }
 0x125   :  { %1976 = vmatprep.subr.bf16.mxu1 %v1975_v47  ;;  %v1196_v47 = vld [vmem:[%s3997_s3 + $0x1e0] sm:$0xff] }
 0x126   :  { %1918 = vmatpush1.bf16.msra.mxu0 %v1917_v57  ;;  %v1939_v57 = vpack.c.bf16 %v549_v50, %v547_v46  ;;  %v2009_v49 = vpack.c.bf16 %v1198_v48, %v1196_v47  ;;  %v1301_v50 = vld [vmem:[%s3998_s5 + $0x80] sm:$0xff]  ;;  %v1300_v47 = vld [vmem:[%s3998_s5 + $0x78] sm:$0xff] }
 0x127   :  { %1920 = vmatprep.subr.bf16.mxu0 %v1919_v61  ;;  %v1170_v61 = vld [vmem:[%s3997_s3 + $0x110] sm:$0xff]  ;;  %v2011_v52 = vpack.c.bf16 %v1302_v51, %v1301_v50 }
 0x128   :  { %1978 = vmatpush1.bf16.msra.mxu1 %v1977_v56  ;;  %v1981_v3 = vpack.c.bf16 %v1170_v61, %v1168_v60  ;;  %v554_v56 = vld [vmem:[%s3999_s2] sm:$0x3] }
 0x129   :  { %1980 = vmatprep.subr.bf16.mxu1 %v1979_v59 }
 0x12a   :  { %1922 = vmatpush1.bf16.msra.mxu0 %v1921_v5  ;;  %v552_v5 = vld [vmem:[%s3995_s1 + $0xff0] sm:$0xff] }
 0x12b   :  { %1924 = vmatprep.subr.bf16.mxu0 %v1923_v9  ;;  %v1177_v9 = vld [vmem:[%s3997_s3 + $0x148] sm:$0xff]  ;;  %v1945_v11 = vpack.c.bf16 %v552_v5, %v550_v2  ;;  %v1304_v5 = vld [vmem:[%s3998_s5 + $0x98] sm:$0xff] }
 0x12c   :  { %1982 = vmatpush1.bf16.msra.mxu1 %v1981_v3  ;;  %v1987_v13 = vpack.c.bf16 %v1179_v10, %v1177_v9  ;;  %v1286_v2 = vld [vmem:[%s3998_s5 + $0x8] sm:$0xff]  ;;  %v1287_v10 = vld [vmem:[%s3998_s5 + $0x10] sm:$0xff] }
 0x12d   :  { %1984 = vmatprep.subr.bf16.mxu1 %v1983_v6 }
 0x12e   :  { %1926 = vmatpush1.bf16.msra.mxu0 %v1925_v17  ;;  %v1183_v17 = vld [vmem:[%s3997_s3 + $0x178] sm:$0xff] }
 0x12f   :  { %1928 = vmatprep.subr.bf16.mxu0 %v1927_v21  ;;  %v1991_v20 = vpack.c.bf16 %v1183_v17, %v1181_v16  ;;  %v1180_v21 = vld [vmem:[%s3997_s3 + $0x160] sm:$0xff]  ;;  %v1290_v17 = vld [vmem:[%s3998_s5 + $0x28] sm:$0xff] }
 0x130   :  { %1986 = vmatpush1.bf16.msra.mxu1 %v1985_v12  ;;  %v1993_v25 = vpack.c.bf16 %v1182_v22, %v1180_v21  ;;  %v1305_v12 = vld [vmem:[%s3998_s5 + $0xa0] sm:$0xff]  ;;  %v1291_v22 = vld [vmem:[%s3998_s5 + $0x30] sm:$0xff] }
 0x131   :  { %1988 = vmatprep.subr.bf16.mxu1 %v1987_v13  ;;  %v1306_v13 = vld [vmem:[%s3998_s5 + $0xa8] sm:$0xff]  ;;  %v1289_v16 = vld [vmem:[%s3998_s5 + $0x20] sm:$0xff] }
 0x132   :  { %1930 = vmatpush1.bf16.msra.mxu0 %v1929_v29  ;;  %v1189_v29 = vld [vmem:[%s3997_s3 + $0x1a8] sm:$0xff]  ;;  %v2019_v15 = vpack.c.bf16 %v1306_v13, %v1305_v12 }
 0x133   :  { %1932 = vmatprep.subr.bf16.mxu0 %v1931_v33  ;;  %v1999_v32 = vpack.c.bf16 %v1191_v30, %v1189_v29  ;;  %v1188_v33 = vld [vmem:[%s3997_s3 + $0x1a0] sm:$0xff]  ;;  %v1294_v29 = vld [vmem:[%s3998_s5 + $0x48] sm:$0xff]  ;;  %v1311_v30 = vld [vmem:[%s3998_s5 + $0xd0] sm:$0xff] }
 0x134   :  { %1990 = vmatpush1.bf16.msra.mxu1 %v1989_v19  ;;  %v2001_v37 = vpack.c.bf16 %v1190_v34, %v1188_v33  ;;  %v1308_v19 = vld [vmem:[%s3998_s5 + $0xb8] sm:$0xff]  ;;  %v1295_v34 = vld [vmem:[%s3998_s5 + $0x50] sm:$0xff] }
 0x135   :  { %1992 = vmatprep.subr.bf16.mxu1 %v1991_v20  ;;  %v2021_v20 = vpack.c.bf16 %v1290_v17, %v1289_v16 }
 0x136   :  { %1934 = vmatpush1.bf16.msra.mxu0 %v1933_v41  ;;  %v2005_v41 = vpack.c.bf16 %v1194_v40, %v1192_v39  ;;  %v1297_v40 = vld [vmem:[%s3998_s5 + $0x60] sm:$0xff] }
 0x137   :  { %1936 = vmatprep.subr.bf16.mxu0 %v1935_v45  ;;  %v1199_v45 = vld [vmem:[%s3997_s3 + $0x1f8] sm:$0xff] }
 0x138   :  { %1994 = vmatpush1.bf16.msra.mxu1 %v1993_v25  ;;  %v2007_v46 = vpack.c.bf16 %v1199_v45, %v1197_v44  ;;  %v1310_v25 = vld [vmem:[%s3998_s5 + $0xc8] sm:$0xff]  ;;  %v1316_v44 = vld [vmem:[%s3998_s5 + $0xf8] sm:$0xff] }
 0x139   :  { %1996 = vmatprep.subr.bf16.mxu1 %v1995_v26  ;;  %v2025_v26 = vpack.c.bf16 %v1292_v23, %v1291_v22  ;;  %v2027_v27 = vpack.c.bf16 %v1310_v25, %v1309_v24 }
 0x13a   :  { %1938 = vmatpush1.bf16.msra.mxu0 %v1937_v53  ;;  %v556_v53 = vlaneseq }
 0x13b   :  { %1940 = vmatprep.subr.bf16.mxu0 %v1939_v57 }
 0x13c   :  { %1998 = vmatpush1.bf16.msra.mxu1 %v1997_v31  ;;  %v3881_v54 = vshrl.u32 %v556_v53, 7  ;;  %v1312_v31 = vld [vmem:[%s3998_s5 + $0xd8] sm:$0xff] }
 0x13d   :  { %2000 = vmatprep.subr.bf16.mxu1 %v1999_v32  ;;  %v2029_v32 = vpack.c.bf16 %v1294_v29, %v1293_v28  ;;  %v2031_v33 = vpack.c.bf16 %v1312_v31, %v1311_v30 }
 0x13e   :  { %1942 = vmatpush1.bf16.msra.mxu0 %v1941_v1  ;;  %v558_v55 = vsub.s32 0, %v3881_v54  ;;  %v562_v57 = vsub.s32 1, %v3881_v54  ;;  %v1285_v1 = vld [vmem:[%s3998_s5] sm:$0xff] }
 0x13f   :  { %1944 = vmatprep.subr.bf16.mxu0 %v1943_v4  ;;  %v1303_v4 = vld [vmem:[%s3998_s5 + $0x90] sm:$0xff]  ;;  %v2013_v7 = vpack.c.bf16 %v1286_v2, %v1285_v1 }
 0x140   :  { %2002 = vmatpush1.bf16.msra.mxu1 %v2001_v37  ;;  %v559_v58 = vrot.slane %v554_v56, %v558_v55  ;;  %v563_v59 = vrot.slane %v554_v56, %v562_v57  ;;  %v2015_v9 = vpack.c.bf16 %v1304_v5, %v1303_v4  ;;  %v1314_v37 = vld [vmem:[%s3998_s5 + $0xe8] sm:$0xff] }
 0x141   :  { %2004 = vmatprep.subr.bf16.mxu1 %v2003_v38  ;;  %v2033_v38 = vpack.c.bf16 %v1296_v35, %v1295_v34  ;;  %v2035_v39 = vpack.c.bf16 %v1314_v37, %v1313_v36 }
 0x142   :  { %1946 = vmatpush1.bf16.msra.mxu0 %v1945_v11  ;;  %v1288_v11 = vld [vmem:[%s3998_s5 + $0x18] sm:$0xff] }
 0x143   :  { %v2017_v14 = vpack.c.bf16 %v1288_v11, %v1287_v10 }
 0x144   :  { %2006 = vmatpush1.bf16.msra.mxu1 %v2005_v41  ;;  %v1298_v41 = vld [vmem:[%s3998_s5 + $0x68] sm:$0xff] }
 0x145   :  { %1128 = vmatmul.mubr.f32.vlgmr.msra.gmra.mrb[0].mxu0 %v40_v18  ;;  %2008 = vmatprep.subr.bf16.mxu1 %v2007_v46  ;;  %v1307_v18 = vld [vmem:[%s3998_s5 + $0xb0] sm:$0xff] }
 0x146   :  { %v2023_v21 = vpack.c.bf16 %v1308_v19, %v1307_v18  ;;  %v1299_v46 = vld [vmem:[%s3998_s5 + $0x70] sm:$0xff] }
 0x147   :  { %v2041_v48 = vpack.c.bf16 %v1300_v47, %v1299_v46 }
 0x148   :  { %2010 = vmatpush1.bf16.msra.mxu1 %v2009_v49  ;;  %v1200_v49 = vld [vmem:[%s4000_s4] sm:$0x3] }
 0x149   :  { %2012 = vmatprep.subr.bf16.mxu1 %v2011_v52  ;;  %v1205_v50 = vrot.slane %v1200_v49, %v558_v55  ;;  %v1209_v51 = vrot.slane %v1200_v49, %v562_v57 }
 0x197   :  { %v774_v42 = vpop.f32.mrb[0].mxu1 }
 0x198   :  { %v776_v43 = vpop.f32.mrb[1].mxu1  ;;  %v2043_v60 = vadd.f32 %v774_v42, %v559_v58  ;;  %v2037_v42 = vpack.c.bf16 %v1298_v41, %v1297_v40 }
 0x199   :  { %v2045_v61 = vadd.f32 %v776_v43, %v563_v59  ;;  %v1315_v43 = vld [vmem:[%s3998_s5 + $0xf0] sm:$0xff] }
 0x19a   :  { %v2039_v45 = vpack.c.bf16 %v1316_v44, %v1315_v43 }
 0x218   :  { %v1129_v62 = vpop.f32.mrb[0].mxu0 }
 0x219   :  { %v2044_v63 = vadd.f32 %v2043_v60, %v1129_v62  ;;  %v1131_v0 = vpop.f32.mrb[1].mxu0  ;;  %v1399_v62 = vld [vmem:[%s4001_s6] ss:$0 sm:$0xff] }
 0x21a   :  { %v2046_v3 = vadd.f32 %v2045_v61, %v1131_v0 }
 0x21b   :  { %v1134_v8 = vmax.f32 %v2044_v63, 0.0 }
 0x21c   :  { %v1135_v6 = vmax.f32 %v2046_v3, 0.0 }
 0x21e   :  { %1276 = vmatprep.mubr.f32.mxu1 %v1135_v6 }
 0x21f   :  { %1277 = vmatmul.mubr.f32.vlgmr.msra.gmra.mrb[2].mxu1 %v1134_v8 }
 0x220   :  { %2014 = vmatpush3.bf16.msra.mxu1 %v2013_v7 }
 0x221   :  { %2016 = vmatprep.subr.bf16.mxu1 %v2015_v9 }
 0x224   :  { %2018 = vmatpush3.bf16.msra.mxu1 %v2017_v14 }
 0x225   :  { %2020 = vmatprep.subr.bf16.mxu1 %v2019_v15 }
 0x228   :  { %2022 = vmatpush3.bf16.msra.mxu1 %v2021_v20 }
 0x229   :  { %2024 = vmatprep.subr.bf16.mxu1 %v2023_v21 }
 0x22c   :  { %2026 = vmatpush3.bf16.msra.mxu1 %v2025_v26 }
 0x22d   :  { %2028 = vmatprep.subr.bf16.mxu1 %v2027_v27 }
 0x230   :  { %2030 = vmatpush3.bf16.msra.mxu1 %v2029_v32 }
 0x231   :  { %2032 = vmatprep.subr.bf16.mxu1 %v2031_v33 }
 0x234   :  { %2034 = vmatpush3.bf16.msra.mxu1 %v2033_v38 }
 0x235   :  { %2036 = vmatprep.subr.bf16.mxu1 %v2035_v39 }
 0x238   :  { %2038 = vmatpush3.bf16.msra.mxu1 %v2037_v42 }
 0x239   :  { %2040 = vmatprep.subr.bf16.mxu1 %v2039_v45 }
 0x23c   :  { %2042 = vmatpush3.bf16.msra.mxu1 %v2041_v48 }
 0x2f2   :  { %v1278_v52 = vpop.f32.mrb[2].mxu1 }
 0x2f3   :  { %v1279_v53 = vadd.f32 %v1278_v52, %v1205_v50  ;;  %v1280_v56 = vpop.f32.mrb[3].mxu1 }
 0x2f4   :  { %v1281_v58 = vadd.f32 %v1280_v56, %v1209_v51 }
 0x2f5   :  { %v1283_v60 = vmax.f32 %v1279_v53, 0.0 }
 0x2f6   :  { %v1284_v59 = vmax.f32 %v1281_v58, 0.0 }
 0x2f8   :  { %1388 = vmatprep.mubr.f32.mxu1 %v1284_v59 }
 0x2f9   :  { %1389 = vmatmul.mubr.f32.vlgmr.msra.gmra.mrb[4].mxu1 %v1283_v60 }
 0x3cc   :  { %v1432_v61 = vpop.f32.mrb[4].mxu1 }
 0x3cd   :  { %v1433_v63 = vpop.f32.mrb[5].mxu1 }
 0x3ce   :  { %v1434_v0 = vadd.f32 %v1433_v63, %v1432_v61 }
 0x3d0   :  { %v1391_v1 = vadd.f32 %v1434_v0, %v1399_v62 }
 0x3d2   :  { %1394 = vst [vmem:[%s4002_s7] sm:$0xff] %v1391_v1 }

// kernel: siamese_forward.4
= control target key start
LH: loop header
LB: loop body
LE: loop exit
PB: predicated region body
PF: predicated region fallthrough
CT: control target
= control target key end

     0   :  { %s16799_s4 = inlined_call_operand.vmem [shape: f32[3200,128], index: 4, kind: input, shape index: {}]   ;;  %s16800_s0 = inlined_call_operand.vmem [shape: f32[64,3200], index: 0, kind: input, shape index: {}]   ;;  %s16801_s1 = inlined_call_operand.vmem [shape: f32[64,3200], index: 1, kind: input, shape index: {}]   ;;  %s16802_s2 = inlined_call_operand.vmem [shape: f32[64,3200], index: 2, kind: input, shape index: {}]   ;;  %s16803_s3 = inlined_call_operand.vmem [shape: f32[64,3200], index: 3, kind: input, shape index: {}]   ;;  %s16804_s5 = inlined_call_operand.vmem [shape: f32[1,128], index: 5, kind: input, shape index: {}]   ;;  %s16805_s6 = inlined_call_operand.vmem [shape: f32[64,128], index: 6, kind: output, shape index: {}]  }
   0x1   :  { %v39_v0 = vld [vmem:[%s16799_s4 + $0x80] sm:$0xff]  ;;  %v40_v1 = vld [vmem:[%s16799_s4 + $0x88] sm:$0xff]  ;;  %v41_v11 = vld [vmem:[%s16799_s4 + $0x90] sm:$0xff] }
   0x2   :  { %v71_v2 = vld [vmem:[%s16799_s4 + $0x180] sm:$0xff]  ;;  %v11411_v3 = vpack.c.bf16 %v40_v1, %v39_v0  ;;  %v72_v4 = vld [vmem:[%s16799_s4 + $0x188] sm:$0xff]  ;;  %v42_v13 = vld [vmem:[%s16799_s4 + $0x98] sm:$0xff] }
   0x3   :  { %v23_v5 = vld [vmem:[%s16799_s4] sm:$0xff]  ;;  %v24_v6 = vld [vmem:[%s16799_s4 + $0x8] sm:$0xff]  ;;  %v11422_v7 = vpack.c.bf16 %v72_v4, %v71_v2  ;;  %v73_v14 = vld [vmem:[%s16799_s4 + $0x190] sm:$0xff]  ;;  %v11449_v16 = vpack.c.bf16 %v42_v13, %v41_v11 }
   0x4   :  { %v11424_v8 = vpack.c.bf16 %v24_v6, %v23_v5  ;;  %v55_v9 = vld [vmem:[%s16799_s4 + $0x100] sm:$0xff]  ;;  %v56_v10 = vld [vmem:[%s16799_s4 + $0x108] sm:$0xff]  ;;  %9704 = vmatprep.subr.bf16.mxu0 %v11411_v3  ;;  %v74_v15 = vld [vmem:[%s16799_s4 + $0x198] sm:$0xff] }
   0x5   :  { %17168 = vst [vmem:[#allocation2_spill] sm:$0xff] %v11422_v7  ;;  %v11436_v12 = vpack.c.bf16 %v56_v10, %v55_v9  ;;  %9736 = vmatprep.subr.bf16.mxu1 %v11422_v7  ;;  %v11451_v17 = vpack.c.bf16 %v74_v15, %v73_v14  ;;  %v25_v18 = vld [vmem:[%s16799_s4 + $0x10] sm:$0xff]  ;;  %v26_v19 = vld [vmem:[%s16799_s4 + $0x18] sm:$0xff]  ;;  %v43_v23 = vld [vmem:[%s16799_s4 + $0xa0] sm:$0xff] }
   0x6   :  { %9706 = vmatpush3.bf16.msra.mxu0 %v11424_v8  ;;  %v57_v20 = vld [vmem:[%s16799_s4 + $0x110] sm:$0xff]  ;;  %v11463_v21 = vpack.c.bf16 %v26_v19, %v25_v18  ;;  %v58_v22 = vld [vmem:[%s16799_s4 + $0x118] sm:$0xff]  ;;  %v44_v24 = vld [vmem:[%s16799_s4 + $0xa8] sm:$0xff] }
   0x7   :  { %9738 = vmatpush3.bf16.msra.mxu1 %v11436_v12  ;;  %9708 = vmatprep.subr.bf16.mxu0 %v11449_v16  ;;  %v11476_v25 = vpack.c.bf16 %v58_v22, %v57_v20  ;;  %v11478_v26 = vpack.c.bf16 %v44_v24, %v43_v23  ;;  %v75_v27 = vld [vmem:[%s16799_s4 + $0x1a0] sm:$0xff]  ;;  %v76_v28 = vld [vmem:[%s16799_s4 + $0x1a8] sm:$0xff]  ;;  %v45_v35 = vld [vmem:[%s16799_s4 + $0xb0] sm:$0xff] }
   0x8   :  { %9740 = vmatprep.subr.bf16.mxu1 %v11451_v17  ;;  %v27_v29 = vld [vmem:[%s16799_s4 + $0x20] sm:$0xff]  ;;  %v11489_v30 = vpack.c.bf16 %v76_v28, %v75_v27  ;;  %v28_v31 = vld [vmem:[%s16799_s4 + $0x28] sm:$0xff]  ;;  %v46_v36 = vld [vmem:[%s16799_s4 + $0xb8] sm:$0xff] }
   0x9   :  { %v59_v32 = vld [vmem:[%s16799_s4 + $0x120] sm:$0xff]  ;;  %v60_v33 = vld [vmem:[%s16799_s4 + $0x128] sm:$0xff]  ;;  %v11501_v34 = vpack.c.bf16 %v28_v31, %v27_v29  ;;  %v77_v37 = vld [vmem:[%s16799_s4 + $0x1b0] sm:$0xff]  ;;  %v11516_v39 = vpack.c.bf16 %v46_v36, %v45_v35 }
   0xa   :  { %17169 = vst [vmem:[#allocation3_spill] sm:$0xff] %v11489_v30  ;;  %9710 = vmatpush3.bf16.msra.mxu0 %v11463_v21  ;;  %v11514_v38 = vpack.c.bf16 %v60_v33, %v59_v32  ;;  %v78_v40 = vld [vmem:[%s16799_s4 + $0x1b8] sm:$0xff]  ;;  %v29_v41 = vld [vmem:[%s16799_s4 + $0x30] sm:$0xff]  ;;  %v47_v46 = vld [vmem:[%s16799_s4 + $0xc0] sm:$0xff] }
   0xb   :  { %17170 = vst [vmem:[#allocation4_spill] sm:$0xff] %v11501_v34  ;;  %9742 = vmatpush3.bf16.msra.mxu1 %v11476_v25  ;;  %9712 = vmatprep.subr.bf16.mxu0 %v11478_v26  ;;  %v30_v42 = vld [vmem:[%s16799_s4 + $0x38] sm:$0xff]  ;;  %v11528_v43 = vpack.c.bf16 %v78_v40, %v77_v37  ;;  %v61_v44 = vld [vmem:[%s16799_s4 + $0x130] sm:$0xff]  ;;  %v48_v47 = vld [vmem:[%s16799_s4 + $0xc8] sm:$0xff] }
   0xc   :  { %17171 = vst [vmem:[#allocation5_spill] sm:$0xff] %v11514_v38  ;;  %9744 = vmatprep.subr.bf16.mxu1 %v11489_v30  ;;  %v62_v45 = vld [vmem:[%s16799_s4 + $0x138] sm:$0xff]  ;;  %v79_v48 = vld [vmem:[%s16799_s4 + $0x1c0] sm:$0xff]  ;;  %v80_v49 = vld [vmem:[%s16799_s4 + $0x1c8] sm:$0xff]  ;;  %v11549_v50 = vpack.c.bf16 %v30_v42, %v29_v41  ;;  %v11555_v52 = vpack.c.bf16 %v48_v47, %v47_v46 }
   0xd   :  { %17172 = vst [vmem:[#allocation6_spill] sm:$0xff] %v11528_v43  ;;  %v11553_v51 = vpack.c.bf16 %v62_v45, %v61_v44  ;;  %v31_v53 = vld [vmem:[%s16799_s4 + $0x40] sm:$0xff]  ;;  %v32_v54 = vld [vmem:[%s16799_s4 + $0x48] sm:$0xff]  ;;  %v11567_v56 = vpack.c.bf16 %v80_v49, %v79_v48  ;;  %v49_v58 = vld [vmem:[%s16799_s4 + $0xd0] sm:$0xff] }
   0xe   :  { %9714 = vmatpush3.bf16.msra.mxu0 %v11501_v34  ;;  %17173 = vst [vmem:[#allocation7_spill] sm:$0xff] %v11549_v50  ;;  %v63_v55 = vld [vmem:[%s16799_s4 + $0x140] sm:$0xff]  ;;  %v64_v57 = vld [vmem:[%s16799_s4 + $0x148] sm:$0xff]  ;;  %v50_v59 = vld [vmem:[%s16799_s4 + $0xd8] sm:$0xff]  ;;  %v11585_v62 = vpack.c.bf16 %v32_v54, %v31_v53 }
   0xf   :  { %9746 = vmatpush3.bf16.msra.mxu1 %v11514_v38  ;;  %9716 = vmatprep.subr.bf16.mxu0 %v11516_v39  ;;  %17174 = vst [vmem:[#allocation8_spill] sm:$0xff] %v11553_v51  ;;  %17175 = vst [vmem:[#allocation9_spill] sm:$0xff] %v11567_v56  ;;  %v81_v60 = vld [vmem:[%s16799_s4 + $0x1d0] sm:$0xff]  ;;  %v82_v61 = vld [vmem:[%s16799_s4 + $0x1d8] sm:$0xff]  ;;  %v11589_v63 = vpack.c.bf16 %v64_v57, %v63_v55  ;;  %v11591_v0 = vpack.c.bf16 %v50_v59, %v49_v58 }
  0x10   :  { %9748 = vmatprep.subr.bf16.mxu1 %v11528_v43  ;;  %17176 = vst [vmem:[#allocation10_spill] sm:$0xff] %v11585_v62  ;;  %v33_v1 = vld [vmem:[%s16799_s4 + $0x50] sm:$0xff]  ;;  %v34_v2 = vld [vmem:[%s16799_s4 + $0x58] sm:$0xff]  ;;  %v11603_v5 = vpack.c.bf16 %v82_v61, %v81_v60  ;;  %v51_v9 = vld [vmem:[%s16799_s4 + $0xe0] sm:$0xff] }
  0x11   :  { %17177 = vst [vmem:[#allocation11_spill] sm:$0xff] %v11589_v63  ;;  %v65_v4 = vld [vmem:[%s16799_s4 + $0x150] sm:$0xff]  ;;  %v66_v6 = vld [vmem:[%s16799_s4 + $0x158] sm:$0xff]  ;;  %v52_v10 = vld [vmem:[%s16799_s4 + $0xe8] sm:$0xff]  ;;  %v11621_v14 = vpack.c.bf16 %v34_v2, %v33_v1 }
  0x12   :  { %9718 = vmatpush3.bf16.msra.mxu0 %v11549_v50  ;;  %17178 = vst [vmem:[#allocation12_spill] sm:$0xff] %v11603_v5  ;;  %v83_v11 = vld [vmem:[%s16799_s4 + $0x1e0] sm:$0xff]  ;;  %v84_v13 = vld [vmem:[%s16799_s4 + $0x1e8] sm:$0xff]  ;;  %v11631_v19 = vpack.c.bf16 %v66_v6, %v65_v4  ;;  %v11633_v20 = vpack.c.bf16 %v52_v10, %v51_v9  ;;  %v426_v24 = vld [vmem:[%s16800_s0 + $0x18] sm:$0xff] }
  0x13   :  { %9750 = vmatpush3.bf16.msra.mxu1 %v11553_v51  ;;  %9720 = vmatprep.subr.bf16.mxu0 %v11555_v52  ;;  %v35_v15 = vld [vmem:[%s16799_s4 + $0x60] sm:$0xff]  ;;  %v36_v18 = vld [vmem:[%s16799_s4 + $0x68] sm:$0xff]  ;;  %v11645_v27 = vpack.c.bf16 %v84_v13, %v83_v11  ;;  %v53_v29 = vld [vmem:[%s16799_s4 + $0xf0] sm:$0xff] }
  0x14   :  { %9752 = vmatprep.subr.bf16.mxu1 %v11567_v56  ;;  %17179 = vst [vmem:[#allocation13_spill] sm:$0xff] %v11631_v19  ;;  %v67_v22 = vld [vmem:[%s16799_s4 + $0x160] sm:$0xff]  ;;  %v424_v23 = vld [vmem:[%s16800_s0 + $0x8] sm:$0xff]  ;;  %v54_v31 = vld [vmem:[%s16799_s4 + $0xf8] sm:$0xff]  ;;  %792 = vmatprep.mubr.f32.mxu1 %v426_v24  ;;  %v11663_v35 = vpack.c.bf16 %v36_v18, %v35_v15 }
  0x15   :  { %17180 = vst [vmem:[#allocation14_spill] sm:$0xff] %v11645_v27  ;;  %v68_v28 = vld [vmem:[%s16799_s4 + $0x168] sm:$0xff]  ;;  %687 = vmatprep.mubr.f32.mxu0 %v424_v23  ;;  %v85_v32 = vld [vmem:[%s16799_s4 + $0x1f0] sm:$0xff]  ;;  %v86_v33 = vld [vmem:[%s16799_s4 + $0x1f8] sm:$0xff]  ;;  %v11669_v37 = vpack.c.bf16 %v54_v31, %v53_v29 }
  0x16   :  { %9722 = vmatpush3.bf16.msra.mxu0 %v11585_v62  ;;  %v11667_v36 = vpack.c.bf16 %v68_v28, %v67_v22  ;;  %v37_v40 = vld [vmem:[%s16799_s4 + $0x70] sm:$0xff]  ;;  %v38_v41 = vld [vmem:[%s16799_s4 + $0x78] sm:$0xff]  ;;  %v11681_v44 = vpack.c.bf16 %v86_v33, %v85_v32  ;;  %v103_v46 = vld [vmem:[%s16799_s4 + $0x280] sm:$0xff] }
  0x17   :  { %9754 = vmatpush3.bf16.msra.mxu1 %v11589_v63  ;;  %9724 = vmatprep.subr.bf16.mxu0 %v11591_v0  ;;  %v69_v42 = vld [vmem:[%s16799_s4 + $0x170] sm:$0xff]  ;;  %v70_v45 = vld [vmem:[%s16799_s4 + $0x178] sm:$0xff]  ;;  %v104_v47 = vld [vmem:[%s16799_s4 + $0x288] sm:$0xff]  ;;  %v11699_v53 = vpack.c.bf16 %v38_v41, %v37_v40 }
  0x18   :  { %9756 = vmatprep.subr.bf16.mxu1 %v11603_v5  ;;  %17181 = vst [vmem:[#allocation15_spill] sm:$0xff] %v11667_v36  ;;  %17182 = vst [vmem:[#allocation16_spill] sm:$0xff] %v11681_v44  ;;  %v135_v48 = vld [vmem:[%s16799_s4 + $0x380] sm:$0xff]  ;;  %v136_v49 = vld [vmem:[%s16799_s4 + $0x388] sm:$0xff]  ;;  %v11703_v54 = vpack.c.bf16 %v70_v45, %v69_v42  ;;  %v11705_v55 = vpack.c.bf16 %v104_v47, %v103_v46 }
  0x19   :  { %v87_v57 = vld [vmem:[%s16799_s4 + $0x200] sm:$0xff]  ;;  %v88_v58 = vld [vmem:[%s16799_s4 + $0x208] sm:$0xff]  ;;  %v11714_v59 = vpack.c.bf16 %v136_v49, %v135_v48  ;;  %v105_v1 = vld [vmem:[%s16799_s4 + $0x290] sm:$0xff] }
  0x1a   :  { %9726 = vmatpush3.bf16.msra.mxu0 %v11621_v14  ;;  %17183 = vst [vmem:[#allocation17_spill] sm:$0xff] %v11703_v54  ;;  %17184 = vst [vmem:[#allocation18_spill] sm:$0xff] %v11705_v55  ;;  %v119_v60 = vld [vmem:[%s16799_s4 + $0x300] sm:$0xff]  ;;  %v120_v61 = vld [vmem:[%s16799_s4 + $0x308] sm:$0xff]  ;;  %v11732_v6 = vpack.c.bf16 %v88_v58, %v87_v57 }
  0x1b   :  { %9758 = vmatpush3.bf16.msra.mxu1 %v11631_v19  ;;  %9728 = vmatprep.subr.bf16.mxu0 %v11633_v20  ;;  %17185 = vst [vmem:[#allocation19_spill] sm:$0xff] %v11714_v59  ;;  %v106_v2 = vld [vmem:[%s16799_s4 + $0x298] sm:$0xff]  ;;  %v423_v4 = vld [vmem:[%s16800_s0] sm:$0xff]  ;;  %v137_v9 = vld [vmem:[%s16799_s4 + $0x390] sm:$0xff]  ;;  %v11745_v13 = vpack.c.bf16 %v120_v61, %v119_v60 }
  0x1c   :  { %9760 = vmatprep.subr.bf16.mxu1 %v11645_v27  ;;  %17186 = vst [vmem:[#allocation20_spill] sm:$0xff] %v11732_v6  ;;  %v138_v10 = vld [vmem:[%s16799_s4 + $0x398] sm:$0xff]  ;;  %v425_v11 = vld [vmem:[%s16800_s0 + $0x10] sm:$0xff]  ;;  %v11757_v23 = vpack.c.bf16 %v106_v2, %v105_v1  ;;  %v451_v29 = vld [vmem:[%s16800_s0 + $0xe0] sm:$0xff] }
  0x1d   :  { %17187 = vst [vmem:[#allocation21_spill] sm:$0xff] %v11745_v13  ;;  %v89_v15 = vld [vmem:[%s16799_s4 + $0x210] sm:$0xff]  ;;  %v90_v18 = vld [vmem:[%s16799_s4 + $0x218] sm:$0xff]  ;;  %v11768_v31 = vpack.c.bf16 %v138_v10, %v137_v9  ;;  %v107_v32 = vld [vmem:[%s16799_s4 + $0x2a0] sm:$0xff] }
  0x1e   :  { %9730 = vmatpush3.bf16.msra.mxu0 %v11663_v35  ;;  %v449_v22 = vld [vmem:[%s16800_s0 + $0xd0] sm:$0xff]  ;;  %17188 = vst [vmem:[#allocation22_spill] sm:$0xff] %v11757_v23  ;;  %v122_v28 = vld [vmem:[%s16799_s4 + $0x318] sm:$0xff]  ;;  %v108_v33 = vld [vmem:[%s16799_s4 + $0x2a8] sm:$0xff]  ;;  %v11780_v41 = vpack.c.bf16 %v90_v18, %v89_v15 }
  0x1f   :  { %9762 = vmatpush3.bf16.msra.mxu1 %v11667_v36  ;;  %9732 = vmatprep.subr.bf16.mxu0 %v11669_v37  ;;  %v121_v24 = vld [vmem:[%s16799_s4 + $0x310] sm:$0xff]  ;;  %17189 = vst [vmem:[#allocation23_spill] sm:$0xff] %v11768_v31  ;;  %v448_v40 = vld [vmem:[%s16800_s0 + $0xc8] sm:$0xff]  ;;  %v139_v42 = vld [vmem:[%s16799_s4 + $0x3a0] sm:$0xff]  ;;  %v11804_v58 = vpack.c.bf16 %v108_v33, %v107_v32 }
  0x20   :  { %9764 = vmatprep.subr.bf16.mxu1 %v11681_v44  ;;  %17190 = vst [vmem:[#allocation24_spill] sm:$0xff] %v11780_v41  ;;  %v140_v45 = vld [vmem:[%s16799_s4 + $0x3a8] sm:$0xff]  ;;  %v450_v46 = vld [vmem:[%s16800_s0 + $0xd8] sm:$0xff]  ;;  %v11792_v47 = vpack.c.bf16 %v122_v28, %v121_v24  ;;  %v91_v48 = vld [vmem:[%s16799_s4 + $0x220] sm:$0xff] }
  0x21   :  { %v92_v49 = vld [vmem:[%s16799_s4 + $0x228] sm:$0xff]  ;;  %v474_v57 = vld [vmem:[%s16800_s0 + $0x198] sm:$0xff]  ;;  %17192 = vst [vmem:[#allocation26_spill] sm:$0xff] %v11804_v58  ;;  %v123_v60 = vld [vmem:[%s16799_s4 + $0x320] sm:$0xff]  ;;  %v11816_v2 = vpack.c.bf16 %v140_v45, %v139_v42 }
  0x22   :  { %9734 = vmatpush3.bf16.msra.mxu0 %v11699_v53  ;;  %17191 = vst [vmem:[#allocation25_spill] sm:$0xff] %v11792_v47  ;;  %v124_v61 = vld [vmem:[%s16799_s4 + $0x328] sm:$0xff]  ;;  %v110_v9 = vld [vmem:[%s16799_s4 + $0x2b8] sm:$0xff]  ;;  %v473_v10 = vld [vmem:[%s16800_s0 + $0x190] sm:$0xff] }
  0x23   :  { %9766 = vmatpush3.bf16.msra.mxu1 %v11703_v54  ;;  %9768 = vmatprep.subr.bf16.mxu0 %v11705_v55  ;;  %v476_v1 = vld [vmem:[%s16800_s0 + $0x1a8] sm:$0xff]  ;;  %17193 = vst [vmem:[#allocation27_spill] sm:$0xff] %v11816_v2  ;;  %v141_v15 = vld [vmem:[%s16799_s4 + $0x3b0] sm:$0xff]  ;;  %v142_v18 = vld [vmem:[%s16799_s4 + $0x3b8] sm:$0xff]  ;;  %v11840_v24 = vpack.c.bf16 %v124_v61, %v123_v60 }
  0x24   :  { %9800 = vmatprep.subr.bf16.mxu1 %v11714_v59  ;;  %v93_v28 = vld [vmem:[%s16799_s4 + $0x230] sm:$0xff]  ;;  %v499_v32 = vld [vmem:[%s16800_s0 + $0x260] sm:$0xff]  ;;  %v126_v42 = vld [vmem:[%s16799_s4 + $0x338] sm:$0xff] }
  0x25   :  { %688 = vmatmul.mubr.f32.vlgmr.msra.gmra.mrb[0].mxu0 %v423_v4  ;;  %v109_v4 = vld [vmem:[%s16799_s4 + $0x2b0] sm:$0xff]  ;;  %17195 = vst [vmem:[#allocation29_spill] sm:$0xff] %v11840_v24  ;;  %v143_v61 = vld [vmem:[%s16799_s4 + $0x3c0] sm:$0xff] }
  0x26   :  { %793 = vmatmul.mubr.f32.vlgmr.msra.gmra.mrb[0].mxu1 %v425_v11  ;;  %9770 = vmatpush3.bf16.msra.mxu0 %v11732_v6  ;;  %v11828_v11 = vpack.c.bf16 %v92_v49, %v91_v48  ;;  %v11852_v33 = vpack.c.bf16 %v110_v9, %v109_v4  ;;  %v501_v45 = vld [vmem:[%s16800_s0 + $0x270] sm:$0xff]  ;;  %v111_v48 = vld [vmem:[%s16799_s4 + $0x2c0] sm:$0xff]  ;;  %v112_v49 = vld [vmem:[%s16799_s4 + $0x2c8] sm:$0xff] }
  0x27   :  { %9802 = vmatpush3.bf16.msra.mxu1 %v11745_v13  ;;  %692 = vmatprep.mubr.f32.mxu0 %v449_v22  ;;  %v475_v22 = vld [vmem:[%s16800_s0 + $0x1a0] sm:$0xff]  ;;  %v500_v4 = vld [vmem:[%s16800_s0 + $0x268] sm:$0xff] }
  0x28   :  { %797 = vmatprep.mubr.f32.mxu1 %v451_v29  ;;  %9772 = vmatprep.subr.bf16.mxu0 %v11757_v23  ;;  %17194 = vst [vmem:[#allocation28_spill] sm:$0xff] %v11828_v11  ;;  %v94_v29 = vld [vmem:[%s16799_s4 + $0x238] sm:$0xff]  ;;  %17196 = vst [vmem:[#allocation30_spill] sm:$0xff] %v11852_v33 }
  0x29   :  { %693 = vmatmul.mubr.f32.gmra.mrb[2].mxu0 %v448_v40  ;;  %9804 = vmatprep.subr.bf16.mxu1 %v11768_v31  ;;  %v125_v40 = vld [vmem:[%s16799_s4 + $0x330] sm:$0xff]  ;;  %v11876_v60 = vpack.c.bf16 %v94_v29, %v93_v28  ;;  %v127_v28 = vld [vmem:[%s16799_s4 + $0x340] sm:$0xff]  ;;  %v128_v29 = vld [vmem:[%s16799_s4 + $0x348] sm:$0xff] }
  0x2a   :  { %798 = vmatmul.mubr.f32.gmra.mrb[2].mxu1 %v450_v46  ;;  %9774 = vmatpush3.bf16.msra.mxu0 %v11780_v41  ;;  %v11864_v46 = vpack.c.bf16 %v142_v18, %v141_v15  ;;  %v11888_v9 = vpack.c.bf16 %v126_v42, %v125_v40  ;;  %v96_v15 = vld [vmem:[%s16799_s4 + $0x248] sm:$0xff]  ;;  %v113_v42 = vld [vmem:[%s16799_s4 + $0x2d0] sm:$0xff] }
  0x2b   :  { %9806 = vmatpush3.bf16.msra.mxu1 %v11792_v47  ;;  %697 = vmatprep.mubr.f32.mxu0 %v474_v57  ;;  %v498_v57 = vld [vmem:[%s16800_s0 + $0x258] sm:$0xff]  ;;  %17198 = vst [vmem:[#allocation32_spill] sm:$0xff] %v11876_v60  ;;  %v524_v18 = vld [vmem:[%s16800_s0 + $0x328] sm:$0xff] }
  0x2c   :  { %802 = vmatprep.mubr.f32.mxu1 %v476_v1  ;;  %9776 = vmatprep.subr.bf16.mxu0 %v11804_v58  ;;  %17197 = vst [vmem:[#allocation31_spill] sm:$0xff] %v11864_v46  ;;  %v144_v1 = vld [vmem:[%s16799_s4 + $0x3c8] sm:$0xff]  ;;  %17199 = vst [vmem:[#allocation33_spill] sm:$0xff] %v11888_v9 }
  0x2d   :  { %698 = vmatmul.mubr.f32.gmra.mrb[4].mxu0 %v473_v10  ;;  %9808 = vmatprep.subr.bf16.mxu1 %v11816_v2  ;;  %v95_v10 = vld [vmem:[%s16799_s4 + $0x240] sm:$0xff]  ;;  %v11912_v40 = vpack.c.bf16 %v144_v1, %v143_v61  ;;  %v146_v61 = vld [vmem:[%s16799_s4 + $0x3d8] sm:$0xff]  ;;  %v525_v1 = vld [vmem:[%s16800_s0 + $0x330] sm:$0xff] }
  0x2e   :  { %803 = vmatmul.mubr.f32.gmra.mrb[4].mxu1 %v475_v22  ;;  %9778 = vmatpush3.bf16.msra.mxu0 %v11828_v11  ;;  %v11900_v22 = vpack.c.bf16 %v112_v49, %v111_v48  ;;  %v523_v48 = vld [vmem:[%s16800_s0 + $0x320] sm:$0xff]  ;;  %v11924_v49 = vpack.c.bf16 %v96_v15, %v95_v10  ;;  %v97_v10 = vld [vmem:[%s16799_s4 + $0x250] sm:$0xff]  ;;  %v98_v15 = vld [vmem:[%s16799_s4 + $0x258] sm:$0xff] }
  0x2f   :  { %9810 = vmatpush3.bf16.msra.mxu1 %v11840_v24  ;;  %702 = vmatprep.mubr.f32.mxu0 %v499_v32  ;;  %v526_v32 = vld [vmem:[%s16800_s0 + $0x338] sm:$0xff]  ;;  %17201 = vst [vmem:[#allocation35_spill] sm:$0xff] %v11912_v40 }
  0x30   :  { %807 = vmatprep.mubr.f32.mxu1 %v501_v45  ;;  %9780 = vmatprep.subr.bf16.mxu0 %v11852_v33  ;;  %17200 = vst [vmem:[#allocation34_spill] sm:$0xff] %v11900_v22  ;;  %v114_v45 = vld [vmem:[%s16799_s4 + $0x2d8] sm:$0xff]  ;;  %17202 = vst [vmem:[#allocation36_spill] sm:$0xff] %v11924_v49 }
  0x31   :  { %703 = vmatmul.mubr.f32.gmra.mrb[6].mxu0 %v498_v57  ;;  %9812 = vmatprep.subr.bf16.mxu1 %v11864_v46  ;;  %v145_v57 = vld [vmem:[%s16799_s4 + $0x3d0] sm:$0xff] }
  0x32   :  { %808 = vmatmul.mubr.f32.gmra.mrb[6].mxu1 %v500_v4  ;;  %9782 = vmatpush3.bf16.msra.mxu0 %v11876_v60  ;;  %v11936_v4 = vpack.c.bf16 %v128_v29, %v127_v28  ;;  %v129_v28 = vld [vmem:[%s16799_s4 + $0x350] sm:$0xff]  ;;  %v130_v29 = vld [vmem:[%s16799_s4 + $0x358] sm:$0xff]  ;;  %v11960_v46 = vpack.c.bf16 %v146_v61, %v145_v57  ;;  %v147_v57 = vld [vmem:[%s16799_s4 + $0x3e0] sm:$0xff] }
  0x33   :  { %9814 = vmatpush3.bf16.msra.mxu1 %v11888_v9  ;;  %707 = vmatprep.mubr.f32.mxu0 %v524_v18  ;;  %v549_v18 = vld [vmem:[%s16800_s0 + $0x3f0] sm:$0xff]  ;;  %v11948_v9 = vpack.c.bf16 %v114_v45, %v113_v42  ;;  %v115_v42 = vld [vmem:[%s16799_s4 + $0x2e0] sm:$0xff]  ;;  %v116_v45 = vld [vmem:[%s16799_s4 + $0x2e8] sm:$0xff]  ;;  %v11984_v24 = vpack.c.bf16 %v130_v29, %v129_v28 }
  0x34   :  { %17203 = vst [vmem:[#allocation37_spill] sm:$0xff] %v11936_v4  ;;  %812 = vmatprep.mubr.f32.mxu1 %v526_v32  ;;  %9784 = vmatprep.subr.bf16.mxu0 %v11900_v22  ;;  %v551_v32 = vld [vmem:[%s16800_s0 + $0x400] sm:$0xff]  ;;  %17205 = vst [vmem:[#allocation39_spill] sm:$0xff] %v11960_v46  ;;  %v148_v61 = vld [vmem:[%s16799_s4 + $0x3e8] sm:$0xff] }
  0x35   :  { %17204 = vst [vmem:[#allocation38_spill] sm:$0xff] %v11948_v9  ;;  %708 = vmatmul.mubr.f32.gmra.mrb[8].mxu0 %v523_v48  ;;  %9816 = vmatprep.subr.bf16.mxu1 %v11912_v40  ;;  %v548_v48 = vld [vmem:[%s16800_s0 + $0x3e8] sm:$0xff]  ;;  %v11972_v40 = vpack.c.bf16 %v98_v15, %v97_v10  ;;  %17207 = vst [vmem:[#allocation41_spill] sm:$0xff] %v11984_v24  ;;  %v99_v10 = vld [vmem:[%s16799_s4 + $0x260] sm:$0xff]  ;;  %v12008_v2 = vpack.c.bf16 %v148_v61, %v147_v57 }
  0x36   :  { %813 = vmatmul.mubr.f32.gmra.mrb[8].mxu1 %v525_v1  ;;  %9786 = vmatpush3.bf16.msra.mxu0 %v11924_v49  ;;  %v550_v1 = vld [vmem:[%s16800_s0 + $0x3f8] sm:$0xff]  ;;  %v100_v15 = vld [vmem:[%s16799_s4 + $0x268] sm:$0xff]  ;;  %v131_v28 = vld [vmem:[%s16799_s4 + $0x360] sm:$0xff] }
  0x37   :  { %17206 = vst [vmem:[#allocation40_spill] sm:$0xff] %v11972_v40  ;;  %9818 = vmatpush3.bf16.msra.mxu1 %v11936_v4  ;;  %712 = vmatprep.mubr.f32.mxu0 %v549_v18  ;;  %v574_v18 = vld [vmem:[%s16800_s0 + $0x4b8] sm:$0xff]  ;;  %v11996_v4 = vpack.c.bf16 %v116_v45, %v115_v42  ;;  %v132_v29 = vld [vmem:[%s16799_s4 + $0x368] sm:$0xff]  ;;  %17209 = vst [vmem:[#allocation43_spill] sm:$0xff] %v12008_v2 }
  0x38   :  { %817 = vmatprep.mubr.f32.mxu1 %v551_v32  ;;  %9788 = vmatprep.subr.bf16.mxu0 %v11948_v9  ;;  %v576_v32 = vld [vmem:[%s16800_s0 + $0x4c8] sm:$0xff]  ;;  %v117_v42 = vld [vmem:[%s16799_s4 + $0x2f0] sm:$0xff]  ;;  %v118_v45 = vld [vmem:[%s16799_s4 + $0x2f8] sm:$0xff]  ;;  %v12032_v47 = vpack.c.bf16 %v132_v29, %v131_v28 }
  0x39   :  { %17208 = vst [vmem:[#allocation42_spill] sm:$0xff] %v11996_v4  ;;  %713 = vmatmul.mubr.f32.gmra.mrb[10].mxu0 %v548_v48  ;;  %9820 = vmatprep.subr.bf16.mxu1 %v11960_v46  ;;  %v573_v48 = vld [vmem:[%s16800_s0 + $0x4b0] sm:$0xff]  ;;  %v12020_v46 = vpack.c.bf16 %v100_v15, %v99_v10  ;;  %v150_v61 = vld [vmem:[%s16799_s4 + $0x3f8] sm:$0xff] }
  0x3a   :  { %818 = vmatmul.mubr.f32.gmra.mrb[10].mxu1 %v550_v1  ;;  %9790 = vmatpush3.bf16.msra.mxu0 %v11972_v40  ;;  %v149_v57 = vld [vmem:[%s16799_s4 + $0x3f0] sm:$0xff]  ;;  %v575_v1 = vld [vmem:[%s16800_s0 + $0x4c0] sm:$0xff]  ;;  %17211 = vst [vmem:[#allocation45_spill] sm:$0xff] %v12032_v47  ;;  %v102_v15 = vld [vmem:[%s16799_s4 + $0x278] sm:$0xff] }
  0x3b   :  { %17210 = vst [vmem:[#allocation44_spill] sm:$0xff] %v12020_v46  ;;  %9822 = vmatpush3.bf16.msra.mxu1 %v11984_v24  ;;  %717 = vmatprep.mubr.f32.mxu0 %v574_v18  ;;  %v101_v10 = vld [vmem:[%s16799_s4 + $0x270] sm:$0xff]  ;;  %v599_v18 = vld [vmem:[%s16800_s0 + $0x580] sm:$0xff]  ;;  %v12044_v24 = vpack.c.bf16 %v118_v45, %v117_v42  ;;  %v134_v29 = vld [vmem:[%s16799_s4 + $0x378] sm:$0xff]  ;;  %v12056_v31 = vpack.c.bf16 %v150_v61, %v149_v57 }
  0x3c   :  { %822 = vmatprep.mubr.f32.mxu1 %v576_v32  ;;  %9792 = vmatprep.subr.bf16.mxu0 %v11996_v4  ;;  %v133_v28 = vld [vmem:[%s16799_s4 + $0x370] sm:$0xff]  ;;  %v167_v42 = vld [vmem:[%s16799_s4 + $0x480] sm:$0xff]  ;;  %v168_v45 = vld [vmem:[%s16799_s4 + $0x488] sm:$0xff] }
  0x3d   :  { %17212 = vst [vmem:[#allocation46_spill] sm:$0xff] %v12044_v24  ;;  %718 = vmatmul.mubr.f32.gmra.mrb[12].mxu0 %v573_v48  ;;  %9824 = vmatprep.subr.bf16.mxu1 %v12008_v2  ;;  %v601_v32 = vld [vmem:[%s16800_s0 + $0x590] sm:$0xff]  ;;  %17213 = vst [vmem:[#allocation47_spill] sm:$0xff] %v12056_v31  ;;  %v598_v48 = vld [vmem:[%s16800_s0 + $0x578] sm:$0xff]  ;;  %v12068_v2 = vpack.c.bf16 %v102_v15, %v101_v10  ;;  %v12080_v13 = vpack.c.bf16 %v134_v29, %v133_v28 }
  0x3e   :  { %823 = vmatmul.mubr.f32.gmra.mrb[12].mxu1 %v575_v1  ;;  %9794 = vmatpush3.bf16.msra.mxu0 %v12020_v46  ;;  %v199_v57 = vld [vmem:[%s16799_s4 + $0x580] sm:$0xff]  ;;  %v200_v61 = vld [vmem:[%s16799_s4 + $0x588] sm:$0xff] }
  0x3f   :  { %17214 = vst [vmem:[#allocation48_spill] sm:$0xff] %v12068_v2  ;;  %9826 = vmatpush3.bf16.msra.mxu1 %v12032_v47  ;;  %722 = vmatprep.mubr.f32.mxu0 %v599_v18  ;;  %v600_v1 = vld [vmem:[%s16800_s0 + $0x588] sm:$0xff]  ;;  %17215 = vst [vmem:[#allocation49_spill] sm:$0xff] %v12080_v13  ;;  %v151_v10 = vld [vmem:[%s16799_s4 + $0x400] sm:$0xff]  ;;  %v12092_v47 = vpack.c.bf16 %v168_v45, %v167_v42  ;;  %v12104_v59 = vpack.c.bf16 %v200_v61, %v199_v57 }
  0x40   :  { %v152_v15 = vld [vmem:[%s16799_s4 + $0x408] sm:$0xff]  ;;  %827 = vmatprep.mubr.f32.mxu1 %v601_v32  ;;  %9796 = vmatprep.subr.bf16.mxu0 %v12044_v24  ;;  %v183_v28 = vld [vmem:[%s16799_s4 + $0x500] sm:$0xff]  ;;  %v430_v32 = vld [vmem:[%s16800_s0 + $0x38] sm:$0xff] }
  0x41   :  { %v428_v18 = vld [vmem:[%s16800_s0 + $0x28] sm:$0xff]  ;;  %17216 = vst [vmem:[#allocation50_spill] sm:$0xff] %v12092_v47  ;;  %723 = vmatmul.mubr.f32.gmra.mrb[14].mxu0 %v598_v48  ;;  %9828 = vmatprep.subr.bf16.mxu1 %v12056_v31  ;;  %17217 = vst [vmem:[#allocation51_spill] sm:$0xff] %v12104_v59  ;;  %v169_v42 = vld [vmem:[%s16799_s4 + $0x490] sm:$0xff]  ;;  %v12116_v31 = vpack.c.bf16 %v152_v15, %v151_v10 }
  0x42   :  { %v184_v29 = vld [vmem:[%s16799_s4 + $0x508] sm:$0xff]  ;;  %v170_v45 = vld [vmem:[%s16799_s4 + $0x498] sm:$0xff]  ;;  %828 = vmatmul.mubr.f32.gmra.mrb[14].mxu1 %v600_v1  ;;  %9798 = vmatpush3.bf16.msra.mxu0 %v12068_v2  ;;  %v427_v48 = vld [vmem:[%s16800_s0 + $0x20] sm:$0xff] }
  0x43   :  { %17218 = vst [vmem:[#allocation52_spill] sm:$0xff] %v12116_v31  ;;  %v201_v57 = vld [vmem:[%s16799_s4 + $0x590] sm:$0xff]  ;;  %v202_v61 = vld [vmem:[%s16799_s4 + $0x598] sm:$0xff]  ;;  %9830 = vmatpush3.bf16.msra.mxu1 %v12080_v13  ;;  %897 = vmatprep.mubr.f32.mxu0 %v428_v18  ;;  %v12128_v2 = vpack.c.bf16 %v184_v29, %v183_v28  ;;  %v12140_v13 = vpack.c.bf16 %v170_v45, %v169_v42  ;;  %v171_v42 = vld [vmem:[%s16799_s4 + $0x4a0] sm:$0xff] }
  0x44   :  { %v429_v1 = vld [vmem:[%s16800_s0 + $0x30] sm:$0xff]  ;;  %v154_v15 = vld [vmem:[%s16799_s4 + $0x418] sm:$0xff]  ;;  %1002 = vmatprep.mubr.f32.mxu1 %v430_v32  ;;  %9832 = vmatprep.subr.bf16.mxu0 %v12092_v47  ;;  %v455_v32 = vld [vmem:[%s16800_s0 + $0x100] sm:$0xff]  ;;  %v12152_v47 = vpack.c.bf16 %v202_v61, %v201_v57 }
  0x45   :  { %17219 = vst [vmem:[#allocation53_spill] sm:$0xff] %v12128_v2  ;;  %v153_v10 = vld [vmem:[%s16799_s4 + $0x410] sm:$0xff]  ;;  %17220 = vst [vmem:[#allocation54_spill] sm:$0xff] %v12140_v13  ;;  %v186_v29 = vld [vmem:[%s16799_s4 + $0x518] sm:$0xff]  ;;  %898 = vmatmul.mubr.f32.vlgmr.msra.gmra.mrb[16].mxu0 %v427_v48  ;;  %9864 = vmatprep.subr.bf16.mxu1 %v12104_v59 }
  0x46   :  { %v453_v18 = vld [vmem:[%s16800_s0 + $0xf0] sm:$0xff]  ;;  %17221 = vst [vmem:[#allocation55_spill] sm:$0xff] %v12152_v47  ;;  %v172_v45 = vld [vmem:[%s16799_s4 + $0x4a8] sm:$0xff]  ;;  %1003 = vmatmul.mubr.f32.vlgmr.msra.gmra.mrb[16].mxu1 %v429_v1  ;;  %9834 = vmatpush3.bf16.msra.mxu0 %v12116_v31  ;;  %v12164_v59 = vpack.c.bf16 %v154_v15, %v153_v10  ;;  %v203_v57 = vld [vmem:[%s16799_s4 + $0x5a0] sm:$0xff] }
  0x47   :  { %v185_v28 = vld [vmem:[%s16799_s4 + $0x510] sm:$0xff]  ;;  %v452_v48 = vld [vmem:[%s16800_s0 + $0xe8] sm:$0xff]  ;;  %9866 = vmatpush3.bf16.msra.mxu1 %v12128_v2  ;;  %902 = vmatprep.mubr.f32.mxu0 %v453_v18  ;;  %v454_v1 = vld [vmem:[%s16800_s0 + $0xf8] sm:$0xff]  ;;  %v12188_v2 = vpack.c.bf16 %v172_v45, %v171_v42 }
  0x48   :  { %17222 = vst [vmem:[#allocation56_spill] sm:$0xff] %v12164_v59  ;;  %v204_v61 = vld [vmem:[%s16799_s4 + $0x5a8] sm:$0xff]  ;;  %v12176_v31 = vpack.c.bf16 %v186_v29, %v185_v28  ;;  %v155_v10 = vld [vmem:[%s16799_s4 + $0x420] sm:$0xff]  ;;  %1007 = vmatprep.mubr.f32.mxu1 %v455_v32  ;;  %9836 = vmatprep.subr.bf16.mxu0 %v12140_v13  ;;  %v478_v18 = vld [vmem:[%s16800_s0 + $0x1b8] sm:$0xff] }
  0x49   :  { %v156_v15 = vld [vmem:[%s16799_s4 + $0x428] sm:$0xff]  ;;  %17224 = vst [vmem:[#allocation58_spill] sm:$0xff] %v12188_v2  ;;  %v187_v28 = vld [vmem:[%s16799_s4 + $0x520] sm:$0xff]  ;;  %903 = vmatmul.mubr.f32.gmra.mrb[18].mxu0 %v452_v48  ;;  %9868 = vmatprep.subr.bf16.mxu1 %v12152_v47  ;;  %v12200_v13 = vpack.c.bf16 %v204_v61, %v203_v57  ;;  %v173_v42 = vld [vmem:[%s16799_s4 + $0x4b0] sm:$0xff] }
  0x4a   :  { %17223 = vst [vmem:[#allocation57_spill] sm:$0xff] %v12176_v31  ;;  %v188_v29 = vld [vmem:[%s16799_s4 + $0x528] sm:$0xff]  ;;  %v174_v45 = vld [vmem:[%s16799_s4 + $0x4b8] sm:$0xff]  ;;  %1008 = vmatmul.mubr.f32.gmra.mrb[18].mxu1 %v454_v1  ;;  %9838 = vmatpush3.bf16.msra.mxu0 %v12164_v59  ;;  %v477_v48 = vld [vmem:[%s16800_s0 + $0x1b0] sm:$0xff]  ;;  %v12212_v47 = vpack.c.bf16 %v156_v15, %v155_v10 }
  0x4b   :  { %v480_v32 = vld [vmem:[%s16800_s0 + $0x1c8] sm:$0xff]  ;;  %17225 = vst [vmem:[#allocation59_spill] sm:$0xff] %v12200_v13  ;;  %v205_v57 = vld [vmem:[%s16799_s4 + $0x5b0] sm:$0xff]  ;;  %v206_v61 = vld [vmem:[%s16799_s4 + $0x5b8] sm:$0xff]  ;;  %9870 = vmatpush3.bf16.msra.mxu1 %v12176_v31  ;;  %907 = vmatprep.mubr.f32.mxu0 %v478_v18  ;;  %v12224_v59 = vpack.c.bf16 %v188_v29, %v187_v28  ;;  %v12236_v31 = vpack.c.bf16 %v174_v45, %v173_v42 }
  0x4c   :  { %17226 = vst [vmem:[#allocation60_spill] sm:$0xff] %v12212_v47  ;;  %v479_v1 = vld [vmem:[%s16800_s0 + $0x1c0] sm:$0xff]  ;;  %v157_v10 = vld [vmem:[%s16799_s4 + $0x430] sm:$0xff]  ;;  %v158_v15 = vld [vmem:[%s16799_s4 + $0x438] sm:$0xff]  ;;  %1012 = vmatprep.mubr.f32.mxu1 %v480_v32  ;;  %9840 = vmatprep.subr.bf16.mxu0 %v12188_v2  ;;  %v12248_v2 = vpack.c.bf16 %v206_v61, %v205_v57 }
  0x4d   :  { %17227 = vst [vmem:[#allocation61_spill] sm:$0xff] %v12224_v59  ;;  %v503_v18 = vld [vmem:[%s16800_s0 + $0x280] sm:$0xff]  ;;  %17228 = vst [vmem:[#allocation62_spill] sm:$0xff] %v12236_v31  ;;  %v189_v28 = vld [vmem:[%s16799_s4 + $0x530] sm:$0xff]  ;;  %908 = vmatmul.mubr.f32.gmra.mrb[20].mxu0 %v477_v48  ;;  %9872 = vmatprep.subr.bf16.mxu1 %v12200_v13  ;;  %v12260_v13 = vpack.c.bf16 %v158_v15, %v157_v10 }
  0x4e   :  { %v190_v29 = vld [vmem:[%s16799_s4 + $0x538] sm:$0xff]  ;;  %v505_v32 = vld [vmem:[%s16800_s0 + $0x290] sm:$0xff]  ;;  %17229 = vst [vmem:[#allocation63_spill] sm:$0xff] %v12248_v2  ;;  %v175_v42 = vld [vmem:[%s16799_s4 + $0x4c0] sm:$0xff]  ;;  %1013 = vmatmul.mubr.f32.gmra.mrb[20].mxu1 %v479_v1  ;;  %9842 = vmatpush3.bf16.msra.mxu0 %v12212_v47 }
  0x4f   :  { %v176_v45 = vld [vmem:[%s16799_s4 + $0x4c8] sm:$0xff]  ;;  %v502_v48 = vld [vmem:[%s16800_s0 + $0x278] sm:$0xff]  ;;  %17230 = vst [vmem:[#allocation64_spill] sm:$0xff] %v12260_v13  ;;  %v207_v57 = vld [vmem:[%s16799_s4 + $0x5c0] sm:$0xff]  ;;  %9874 = vmatpush3.bf16.msra.mxu1 %v12224_v59  ;;  %912 = vmatprep.mubr.f32.mxu0 %v503_v18  ;;  %v12272_v47 = vpack.c.bf16 %v190_v29, %v189_v28 }
  0x50   :  { %v208_v61 = vld [vmem:[%s16799_s4 + $0x5c8] sm:$0xff]  ;;  %v159_v10 = vld [vmem:[%s16799_s4 + $0x440] sm:$0xff]  ;;  %1017 = vmatprep.mubr.f32.mxu1 %v505_v32  ;;  %9844 = vmatprep.subr.bf16.mxu0 %v12236_v31  ;;  %v12284_v59 = vpack.c.bf16 %v176_v45, %v175_v42  ;;  %v530_v32 = vld [vmem:[%s16800_s0 + $0x358] sm:$0xff] }
  0x51   :  { %v504_v1 = vld [vmem:[%s16800_s0 + $0x288] sm:$0xff]  ;;  %17231 = vst [vmem:[#allocation65_spill] sm:$0xff] %v12272_v47  ;;  %v191_v28 = vld [vmem:[%s16799_s4 + $0x540] sm:$0xff]  ;;  %913 = vmatmul.mubr.f32.gmra.mrb[22].mxu0 %v502_v48  ;;  %9876 = vmatprep.subr.bf16.mxu1 %v12248_v2  ;;  %v12296_v31 = vpack.c.bf16 %v208_v61, %v207_v57  ;;  %v177_v42 = vld [vmem:[%s16799_s4 + $0x4d0] sm:$0xff] }
  0x52   :  { %v160_v15 = vld [vmem:[%s16799_s4 + $0x448] sm:$0xff]  ;;  %17232 = vst [vmem:[#allocation66_spill] sm:$0xff] %v12284_v59  ;;  %v178_v45 = vld [vmem:[%s16799_s4 + $0x4d8] sm:$0xff]  ;;  %1018 = vmatmul.mubr.f32.gmra.mrb[22].mxu1 %v504_v1  ;;  %9846 = vmatpush3.bf16.msra.mxu0 %v12260_v13  ;;  %v527_v48 = vld [vmem:[%s16800_s0 + $0x340] sm:$0xff] }
  0x53   :  { %v528_v18 = vld [vmem:[%s16800_s0 + $0x348] sm:$0xff]  ;;  %17233 = vst [vmem:[#allocation67_spill] sm:$0xff] %v12296_v31  ;;  %v12308_v2 = vpack.c.bf16 %v160_v15, %v159_v10  ;;  %v209_v57 = vld [vmem:[%s16799_s4 + $0x5d0] sm:$0xff]  ;;  %v210_v61 = vld [vmem:[%s16799_s4 + $0x5d8] sm:$0xff]  ;;  %9878 = vmatpush3.bf16.msra.mxu1 %v12272_v47  ;;  %1022 = vmatprep.mubr.f32.mxu1 %v530_v32  ;;  %v12332_v47 = vpack.c.bf16 %v178_v45, %v177_v42 }
  0x54   :  { %v192_v29 = vld [vmem:[%s16799_s4 + $0x548] sm:$0xff]  ;;  %917 = vmatprep.mubr.f32.mxu0 %v528_v18  ;;  %v529_v1 = vld [vmem:[%s16800_s0 + $0x350] sm:$0xff]  ;;  %v162_v15 = vld [vmem:[%s16799_s4 + $0x458] sm:$0xff]  ;;  %9848 = vmatprep.subr.bf16.mxu0 %v12284_v59  ;;  %v12344_v59 = vpack.c.bf16 %v210_v61, %v209_v57 }
  0x55   :  { %17234 = vst [vmem:[#allocation68_spill] sm:$0xff] %v12308_v2  ;;  %v12320_v13 = vpack.c.bf16 %v192_v29, %v191_v28  ;;  %v161_v10 = vld [vmem:[%s16799_s4 + $0x450] sm:$0xff]  ;;  %17236 = vst [vmem:[#allocation70_spill] sm:$0xff] %v12332_v47  ;;  %v194_v29 = vld [vmem:[%s16799_s4 + $0x558] sm:$0xff]  ;;  %918 = vmatmul.mubr.f32.gmra.mrb[24].mxu0 %v527_v48  ;;  %9880 = vmatprep.subr.bf16.mxu1 %v12296_v31 }
  0x56   :  { %v553_v18 = vld [vmem:[%s16800_s0 + $0x410] sm:$0xff]  ;;  %v555_v32 = vld [vmem:[%s16800_s0 + $0x420] sm:$0xff]  ;;  %17237 = vst [vmem:[#allocation71_spill] sm:$0xff] %v12344_v59  ;;  %v180_v45 = vld [vmem:[%s16799_s4 + $0x4e8] sm:$0xff]  ;;  %1023 = vmatmul.mubr.f32.gmra.mrb[24].mxu1 %v529_v1  ;;  %9850 = vmatpush3.bf16.msra.mxu0 %v12308_v2  ;;  %v12356_v31 = vpack.c.bf16 %v162_v15, %v161_v10 }
  0x57   :  { %17235 = vst [vmem:[#allocation69_spill] sm:$0xff] %v12320_v13  ;;  %v193_v28 = vld [vmem:[%s16799_s4 + $0x550] sm:$0xff]  ;;  %v179_v42 = vld [vmem:[%s16799_s4 + $0x4e0] sm:$0xff]  ;;  %v552_v48 = vld [vmem:[%s16800_s0 + $0x408] sm:$0xff]  ;;  %9882 = vmatpush3.bf16.msra.mxu1 %v12320_v13  ;;  %922 = vmatprep.mubr.f32.mxu0 %v553_v18 }
  0x58   :  { %17238 = vst [vmem:[#allocation72_spill] sm:$0xff] %v12356_v31  ;;  %v211_v57 = vld [vmem:[%s16799_s4 + $0x5e0] sm:$0xff]  ;;  %v212_v61 = vld [vmem:[%s16799_s4 + $0x5e8] sm:$0xff]  ;;  %v554_v1 = vld [vmem:[%s16800_s0 + $0x418] sm:$0xff]  ;;  %v12368_v2 = vpack.c.bf16 %v194_v29, %v193_v28  ;;  %1027 = vmatprep.mubr.f32.mxu1 %v555_v32  ;;  %9852 = vmatprep.subr.bf16.mxu0 %v12332_v47  ;;  %v12380_v13 = vpack.c.bf16 %v180_v45, %v179_v42 }
  0x59   :  { %v163_v10 = vld [vmem:[%s16799_s4 + $0x460] sm:$0xff]  ;;  %v164_v15 = vld [vmem:[%s16799_s4 + $0x468] sm:$0xff]  ;;  %v578_v18 = vld [vmem:[%s16800_s0 + $0x4d8] sm:$0xff]  ;;  %923 = vmatmul.mubr.f32.gmra.mrb[26].mxu0 %v552_v48  ;;  %9884 = vmatprep.subr.bf16.mxu1 %v12344_v59  ;;  %v12392_v47 = vpack.c.bf16 %v212_v61, %v211_v57 }
  0x5a   :  { %17239 = vst [vmem:[#allocation73_spill] sm:$0xff] %v12368_v2  ;;  %17240 = vst [vmem:[#allocation74_spill] sm:$0xff] %v12380_v13  ;;  %v195_v28 = vld [vmem:[%s16799_s4 + $0x560] sm:$0xff]  ;;  %v196_v29 = vld [vmem:[%s16799_s4 + $0x568] sm:$0xff]  ;;  %1028 = vmatmul.mubr.f32.gmra.mrb[26].mxu1 %v554_v1  ;;  %9854 = vmatpush3.bf16.msra.mxu0 %v12356_v31  ;;  %v12404_v59 = vpack.c.bf16 %v164_v15, %v163_v10 }
  0x5b   :  { %v580_v32 = vld [vmem:[%s16800_s0 + $0x4e8] sm:$0xff]  ;;  %17241 = vst [vmem:[#allocation75_spill] sm:$0xff] %v12392_v47  ;;  %v181_v42 = vld [vmem:[%s16799_s4 + $0x4f0] sm:$0xff]  ;;  %v182_v45 = vld [vmem:[%s16799_s4 + $0x4f8] sm:$0xff]  ;;  %9886 = vmatpush3.bf16.msra.mxu1 %v12368_v2  ;;  %927 = vmatprep.mubr.f32.mxu0 %v578_v18  ;;  %v12416_v31 = vpack.c.bf16 %v196_v29, %v195_v28 }
  0x5c   :  { %v577_v48 = vld [vmem:[%s16800_s0 + $0x4d0] sm:$0xff]  ;;  %17242 = vst [vmem:[#allocation76_spill] sm:$0xff] %v12404_v59  ;;  %v214_v61 = vld [vmem:[%s16799_s4 + $0x5f8] sm:$0xff]  ;;  %v579_v1 = vld [vmem:[%s16800_s0 + $0x4e0] sm:$0xff]  ;;  %1032 = vmatprep.mubr.f32.mxu1 %v580_v32  ;;  %9856 = vmatprep.subr.bf16.mxu0 %v12380_v13  ;;  %v12428_v2 = vpack.c.bf16 %v182_v45, %v181_v42 }
  0x5d   :  { %v213_v57 = vld [vmem:[%s16799_s4 + $0x5f0] sm:$0xff]  ;;  %17243 = vst [vmem:[#allocation77_spill] sm:$0xff] %v12416_v31  ;;  %v166_v15 = vld [vmem:[%s16799_s4 + $0x478] sm:$0xff]  ;;  %v603_v18 = vld [vmem:[%s16800_s0 + $0x5a0] sm:$0xff]  ;;  %928 = vmatmul.mubr.f32.gmra.mrb[28].mxu0 %v577_v48  ;;  %9888 = vmatprep.subr.bf16.mxu1 %v12392_v47 }
  0x5e   :  { %v165_v10 = vld [vmem:[%s16799_s4 + $0x470] sm:$0xff]  ;;  %17244 = vst [vmem:[#allocation78_spill] sm:$0xff] %v12428_v2  ;;  %v198_v29 = vld [vmem:[%s16799_s4 + $0x578] sm:$0xff]  ;;  %v12440_v13 = vpack.c.bf16 %v214_v61, %v213_v57  ;;  %v231_v42 = vld [vmem:[%s16799_s4 + $0x680] sm:$0xff]  ;;  %1033 = vmatmul.mubr.f32.gmra.mrb[28].mxu1 %v579_v1  ;;  %9858 = vmatpush3.bf16.msra.mxu0 %v12404_v59 }
  0x5f   :  { %v197_v28 = vld [vmem:[%s16799_s4 + $0x570] sm:$0xff]  ;;  %v232_v45 = vld [vmem:[%s16799_s4 + $0x688] sm:$0xff]  ;;  %v602_v48 = vld [vmem:[%s16800_s0 + $0x598] sm:$0xff]  ;;  %v12452_v47 = vpack.c.bf16 %v166_v15, %v165_v10  ;;  %9890 = vmatpush3.bf16.msra.mxu1 %v12416_v31  ;;  %932 = vmatprep.mubr.f32.mxu0 %v603_v18 }
  0x60   :  { %v605_v32 = vld [vmem:[%s16800_s0 + $0x5b0] sm:$0xff]  ;;  %17245 = vst [vmem:[#allocation79_spill] sm:$0xff] %v12440_v13  ;;  %v263_v57 = vld [vmem:[%s16799_s4 + $0x780] sm:$0xff]  ;;  %v264_v61 = vld [vmem:[%s16799_s4 + $0x788] sm:$0xff]  ;;  %v12464_v59 = vpack.c.bf16 %v198_v29, %v197_v28  ;;  %9860 = vmatprep.subr.bf16.mxu0 %v12428_v2  ;;  %v12476_v31 = vpack.c.bf16 %v232_v45, %v231_v42  ;;  %9892 = vmatprep.subr.bf16.mxu1 %v12440_v13 }
  0x61   :  { %17246 = vst [vmem:[#allocation80_spill] sm:$0xff] %v12452_v47  ;;  %v604_v1 = vld [vmem:[%s16800_s0 + $0x5a8] sm:$0xff]  ;;  %v215_v10 = vld [vmem:[%s16799_s4 + $0x600] sm:$0xff]  ;;  %1037 = vmatprep.mubr.f32.mxu1 %v605_v32  ;;  %933 = vmatmul.mubr.f32.gmra.mrb[30].mxu0 %v602_v48  ;;  %v434_v32 = vld [vmem:[%s16800_s0 + $0x58] sm:$0xff]  ;;  %v12488_v2 = vpack.c.bf16 %v264_v61, %v263_v57 }
  0x62   :  { %17247 = vst [vmem:[#allocation81_spill] sm:$0xff] %v12464_v59  ;;  %v216_v15 = vld [vmem:[%s16799_s4 + $0x608] sm:$0xff]  ;;  %17248 = vst [vmem:[#allocation82_spill] sm:$0xff] %v12476_v31  ;;  %v247_v28 = vld [vmem:[%s16799_s4 + $0x700] sm:$0xff]  ;;  %1038 = vmatmul.mubr.f32.gmra.mrb[30].mxu1 %v604_v1  ;;  %9862 = vmatpush3.bf16.msra.mxu0 %v12452_v47 }
  0x63   :  { %v432_v18 = vld [vmem:[%s16800_s0 + $0x48] sm:$0xff]  ;;  %17249 = vst [vmem:[#allocation83_spill] sm:$0xff] %v12488_v2  ;;  %v233_v42 = vld [vmem:[%s16799_s4 + $0x690] sm:$0xff]  ;;  %v234_v45 = vld [vmem:[%s16799_s4 + $0x698] sm:$0xff]  ;;  %v12500_v13 = vpack.c.bf16 %v216_v15, %v215_v10  ;;  %9894 = vmatpush3.bf16.msra.mxu1 %v12464_v59  ;;  %1212 = vmatprep.mubr.f32.mxu1 %v434_v32 }
  0x64   :  { %v248_v29 = vld [vmem:[%s16799_s4 + $0x708] sm:$0xff]  ;;  %v431_v48 = vld [vmem:[%s16800_s0 + $0x40] sm:$0xff]  ;;  %v265_v57 = vld [vmem:[%s16799_s4 + $0x790] sm:$0xff]  ;;  %1107 = vmatprep.mubr.f32.mxu0 %v432_v18  ;;  %9896 = vmatprep.subr.bf16.mxu0 %v12476_v31  ;;  %v12524_v59 = vpack.c.bf16 %v234_v45, %v233_v42 }
  0x65   :  { %17250 = vst [vmem:[#allocation84_spill] sm:$0xff] %v12500_v13  ;;  %v266_v61 = vld [vmem:[%s16799_s4 + $0x798] sm:$0xff]  ;;  %v433_v1 = vld [vmem:[%s16800_s0 + $0x50] sm:$0xff]  ;;  %v12512_v47 = vpack.c.bf16 %v248_v29, %v247_v28  ;;  %1108 = vmatmul.mubr.f32.vlgmr.msra.gmra.mrb[32].mxu0 %v431_v48  ;;  %9928 = vmatprep.subr.bf16.mxu1 %v12488_v2  ;;  %v459_v32 = vld [vmem:[%s16800_s0 + $0x120] sm:$0xff] }
  0x66   :  { %v217_v10 = vld [vmem:[%s16799_s4 + $0x610] sm:$0xff]  ;;  %v218_v15 = vld [vmem:[%s16799_s4 + $0x618] sm:$0xff]  ;;  %17252 = vst [vmem:[#allocation86_spill] sm:$0xff] %v12524_v59  ;;  %v12536_v31 = vpack.c.bf16 %v266_v61, %v265_v57  ;;  %v235_v42 = vld [vmem:[%s16799_s4 + $0x6a0] sm:$0xff]  ;;  %1213 = vmatmul.mubr.f32.vlgmr.msra.gmra.mrb[32].mxu1 %v433_v1  ;;  %9898 = vmatpush3.bf16.msra.mxu0 %v12500_v13 }
  0x67   :  { %17251 = vst [vmem:[#allocation85_spill] sm:$0xff] %v12512_v47  ;;  %v457_v18 = vld [vmem:[%s16800_s0 + $0x110] sm:$0xff]  ;;  %v250_v29 = vld [vmem:[%s16799_s4 + $0x718] sm:$0xff]  ;;  %v236_v45 = vld [vmem:[%s16799_s4 + $0x6a8] sm:$0xff]  ;;  %v12548_v2 = vpack.c.bf16 %v218_v15, %v217_v10  ;;  %9930 = vmatpush3.bf16.msra.mxu1 %v12512_v47  ;;  %1217 = vmatprep.mubr.f32.mxu1 %v459_v32 }
  0x68   :  { %v249_v28 = vld [vmem:[%s16799_s4 + $0x710] sm:$0xff]  ;;  %17253 = vst [vmem:[#allocation87_spill] sm:$0xff] %v12536_v31  ;;  %v456_v48 = vld [vmem:[%s16800_s0 + $0x108] sm:$0xff]  ;;  %v267_v57 = vld [vmem:[%s16799_s4 + $0x7a0] sm:$0xff]  ;;  %1112 = vmatprep.mubr.f32.mxu0 %v457_v18  ;;  %9900 = vmatprep.subr.bf16.mxu0 %v12524_v59  ;;  %v12572_v47 = vpack.c.bf16 %v236_v45, %v235_v42 }
  0x69   :  { %17254 = vst [vmem:[#allocation88_spill] sm:$0xff] %v12548_v2  ;;  %v268_v61 = vld [vmem:[%s16799_s4 + $0x7a8] sm:$0xff]  ;;  %v458_v1 = vld [vmem:[%s16800_s0 + $0x118] sm:$0xff]  ;;  %v12560_v13 = vpack.c.bf16 %v250_v29, %v249_v28  ;;  %v219_v10 = vld [vmem:[%s16799_s4 + $0x620] sm:$0xff]  ;;  %1113 = vmatmul.mubr.f32.gmra.mrb[34].mxu0 %v456_v48  ;;  %9932 = vmatprep.subr.bf16.mxu1 %v12536_v31 }
  0x6a   :  { %v220_v15 = vld [vmem:[%s16799_s4 + $0x628] sm:$0xff]  ;;  %v482_v18 = vld [vmem:[%s16800_s0 + $0x1d8] sm:$0xff]  ;;  %17256 = vst [vmem:[#allocation90_spill] sm:$0xff] %v12572_v47  ;;  %v251_v28 = vld [vmem:[%s16799_s4 + $0x720] sm:$0xff]  ;;  %v12584_v59 = vpack.c.bf16 %v268_v61, %v267_v57  ;;  %1218 = vmatmul.mubr.f32.gmra.mrb[34].mxu1 %v458_v1  ;;  %9902 = vmatpush3.bf16.msra.mxu0 %v12548_v2 }
  0x6b   :  { %17255 = vst [vmem:[#allocation89_spill] sm:$0xff] %v12560_v13  ;;  %v252_v29 = vld [vmem:[%s16799_s4 + $0x728] sm:$0xff]  ;;  %v237_v42 = vld [vmem:[%s16799_s4 + $0x6b0] sm:$0xff]  ;;  %v238_v45 = vld [vmem:[%s16799_s4 + $0x6b8] sm:$0xff]  ;;  %v12596_v31 = vpack.c.bf16 %v220_v15, %v219_v10  ;;  %9934 = vmatpush3.bf16.msra.mxu1 %v12560_v13  ;;  %1117 = vmatprep.mubr.f32.mxu0 %v482_v18 }
  0x6c   :  { %v484_v32 = vld [vmem:[%s16800_s0 + $0x1e8] sm:$0xff]  ;;  %17257 = vst [vmem:[#allocation91_spill] sm:$0xff] %v12584_v59  ;;  %v481_v48 = vld [vmem:[%s16800_s0 + $0x1d0] sm:$0xff]  ;;  %v270_v61 = vld [vmem:[%s16799_s4 + $0x7b8] sm:$0xff]  ;;  %v12608_v2 = vpack.c.bf16 %v252_v29, %v251_v28  ;;  %9904 = vmatprep.subr.bf16.mxu0 %v12572_v47  ;;  %v12620_v13 = vpack.c.bf16 %v238_v45, %v237_v42  ;;  %9936 = vmatprep.subr.bf16.mxu1 %v12584_v59 }
  0x6d   :  { %17258 = vst [vmem:[#allocation92_spill] sm:$0xff] %v12596_v31  ;;  %v269_v57 = vld [vmem:[%s16799_s4 + $0x7b0] sm:$0xff]  ;;  %v483_v1 = vld [vmem:[%s16800_s0 + $0x1e0] sm:$0xff]  ;;  %v222_v15 = vld [vmem:[%s16799_s4 + $0x638] sm:$0xff]  ;;  %1222 = vmatprep.mubr.f32.mxu1 %v484_v32  ;;  %1118 = vmatmul.mubr.f32.gmra.mrb[36].mxu0 %v481_v48 }
  0x6e   :  { %17259 = vst [vmem:[#allocation93_spill] sm:$0xff] %v12608_v2  ;;  %v221_v10 = vld [vmem:[%s16799_s4 + $0x630] sm:$0xff]  ;;  %v507_v18 = vld [vmem:[%s16800_s0 + $0x2a0] sm:$0xff]  ;;  %17260 = vst [vmem:[#allocation94_spill] sm:$0xff] %v12620_v13  ;;  %v12632_v47 = vpack.c.bf16 %v270_v61, %v269_v57  ;;  %1223 = vmatmul.mubr.f32.gmra.mrb[36].mxu1 %v483_v1  ;;  %9906 = vmatpush3.bf16.msra.mxu0 %v12596_v31 }
  0x6f   :  { %v253_v28 = vld [vmem:[%s16799_s4 + $0x730] sm:$0xff]  ;;  %v254_v29 = vld [vmem:[%s16799_s4 + $0x738] sm:$0xff]  ;;  %v239_v42 = vld [vmem:[%s16799_s4 + $0x6c0] sm:$0xff]  ;;  %v12644_v59 = vpack.c.bf16 %v222_v15, %v221_v10  ;;  %9938 = vmatpush3.bf16.msra.mxu1 %v12608_v2  ;;  %1122 = vmatprep.mubr.f32.mxu0 %v507_v18 }
  0x70   :  { %v509_v32 = vld [vmem:[%s16800_s0 + $0x2b0] sm:$0xff]  ;;  %17261 = vst [vmem:[#allocation95_spill] sm:$0xff] %v12632_v47  ;;  %v240_v45 = vld [vmem:[%s16799_s4 + $0x6c8] sm:$0xff]  ;;  %v506_v48 = vld [vmem:[%s16800_s0 + $0x298] sm:$0xff]  ;;  %v12656_v31 = vpack.c.bf16 %v254_v29, %v253_v28  ;;  %9908 = vmatprep.subr.bf16.mxu0 %v12620_v13  ;;  %9940 = vmatprep.subr.bf16.mxu1 %v12632_v47 }
  0x71   :  { %17262 = vst [vmem:[#allocation96_spill] sm:$0xff] %v12644_v59  ;;  %v271_v57 = vld [vmem:[%s16799_s4 + $0x7c0] sm:$0xff]  ;;  %v272_v61 = vld [vmem:[%s16799_s4 + $0x7c8] sm:$0xff]  ;;  %1227 = vmatprep.mubr.f32.mxu1 %v509_v32  ;;  %v12668_v2 = vpack.c.bf16 %v240_v45, %v239_v42  ;;  %1123 = vmatmul.mubr.f32.gmra.mrb[38].mxu0 %v506_v48  ;;  %v534_v32 = vld [vmem:[%s16800_s0 + $0x378] sm:$0xff] }
  0x72   :  { %v508_v1 = vld [vmem:[%s16800_s0 + $0x2a8] sm:$0xff]  ;;  %17263 = vst [vmem:[#allocation97_spill] sm:$0xff] %v12656_v31  ;;  %v223_v10 = vld [vmem:[%s16799_s4 + $0x640] sm:$0xff]  ;;  %v12680_v13 = vpack.c.bf16 %v272_v61, %v271_v57  ;;  %v241_v42 = vld [vmem:[%s16799_s4 + $0x6d0] sm:$0xff]  ;;  %9910 = vmatpush3.bf16.msra.mxu0 %v12644_v59 }
  0x73   :  { %v224_v15 = vld [vmem:[%s16799_s4 + $0x648] sm:$0xff]  ;;  %17264 = vst [vmem:[#allocation98_spill] sm:$0xff] %v12668_v2  ;;  %v255_v28 = vld [vmem:[%s16799_s4 + $0x740] sm:$0xff]  ;;  %v242_v45 = vld [vmem:[%s16799_s4 + $0x6d8] sm:$0xff]  ;;  %1228 = vmatmul.mubr.f32.gmra.mrb[38].mxu1 %v508_v1  ;;  %9912 = vmatprep.subr.bf16.mxu0 %v12668_v2 }
  0x74   :  { %v532_v18 = vld [vmem:[%s16800_s0 + $0x368] sm:$0xff]  ;;  %17265 = vst [vmem:[#allocation99_spill] sm:$0xff] %v12680_v13  ;;  %v531_v48 = vld [vmem:[%s16800_s0 + $0x360] sm:$0xff]  ;;  %v12692_v47 = vpack.c.bf16 %v224_v15, %v223_v10  ;;  %v273_v57 = vld [vmem:[%s16799_s4 + $0x7d0] sm:$0xff]  ;;  %9942 = vmatpush3.bf16.msra.mxu1 %v12656_v31  ;;  %1232 = vmatprep.mubr.f32.mxu1 %v534_v32  ;;  %v12716_v31 = vpack.c.bf16 %v242_v45, %v241_v42 }
  0x75   :  { %v256_v29 = vld [vmem:[%s16799_s4 + $0x748] sm:$0xff]  ;;  %v274_v61 = vld [vmem:[%s16799_s4 + $0x7d8] sm:$0xff]  ;;  %1127 = vmatprep.mubr.f32.mxu0 %v532_v18  ;;  %v533_v1 = vld [vmem:[%s16800_s0 + $0x370] sm:$0xff]  ;;  %9944 = vmatprep.subr.bf16.mxu1 %v12680_v13 }
  0x76   :  { %17266 = vst [vmem:[#allocation100_spill] sm:$0xff] %v12692_v47  ;;  %v12704_v59 = vpack.c.bf16 %v256_v29, %v255_v28  ;;  %v225_v10 = vld [vmem:[%s16799_s4 + $0x650] sm:$0xff]  ;;  %v226_v15 = vld [vmem:[%s16799_s4 + $0x658] sm:$0xff]  ;;  %17268 = vst [vmem:[#allocation102_spill] sm:$0xff] %v12716_v31  ;;  %1128 = vmatmul.mubr.f32.gmra.mrb[40].mxu0 %v531_v48  ;;  %v12728_v2 = vpack.c.bf16 %v274_v61, %v273_v57 }
  0x77   :  { %v557_v18 = vld [vmem:[%s16800_s0 + $0x430] sm:$0xff]  ;;  %v258_v29 = vld [vmem:[%s16799_s4 + $0x758] sm:$0xff]  ;;  %v559_v32 = vld [vmem:[%s16800_s0 + $0x440] sm:$0xff]  ;;  %1233 = vmatmul.mubr.f32.gmra.mrb[40].mxu1 %v533_v1  ;;  %9914 = vmatpush3.bf16.msra.mxu0 %v12692_v47  ;;  %v12740_v13 = vpack.c.bf16 %v226_v15, %v225_v10 }
  0x78   :  { %17267 = vst [vmem:[#allocation101_spill] sm:$0xff] %v12704_v59  ;;  %v257_v28 = vld [vmem:[%s16799_s4 + $0x750] sm:$0xff]  ;;  %17269 = vst [vmem:[#allocation103_spill] sm:$0xff] %v12728_v2  ;;  %v243_v42 = vld [vmem:[%s16799_s4 + $0x6e0] sm:$0xff]  ;;  %9946 = vmatpush3.bf16.msra.mxu1 %v12704_v59  ;;  %1132 = vmatprep.mubr.f32.mxu0 %v557_v18 }
  0x79   :  { %v244_v45 = vld [vmem:[%s16799_s4 + $0x6e8] sm:$0xff]  ;;  %17270 = vst [vmem:[#allocation104_spill] sm:$0xff] %v12740_v13  ;;  %v275_v57 = vld [vmem:[%s16799_s4 + $0x7e0] sm:$0xff]  ;;  %v558_v1 = vld [vmem:[%s16800_s0 + $0x438] sm:$0xff]  ;;  %v12752_v47 = vpack.c.bf16 %v258_v29, %v257_v28  ;;  %1237 = vmatprep.mubr.f32.mxu1 %v559_v32  ;;  %9916 = vmatprep.subr.bf16.mxu0 %v12716_v31 }
  0x7a   :  { %v556_v48 = vld [vmem:[%s16800_s0 + $0x428] sm:$0xff]  ;;  %v227_v10 = vld [vmem:[%s16799_s4 + $0x660] sm:$0xff]  ;;  %v582_v18 = vld [vmem:[%s16800_s0 + $0x4f8] sm:$0xff]  ;;  %v12764_v59 = vpack.c.bf16 %v244_v45, %v243_v42  ;;  %9948 = vmatprep.subr.bf16.mxu1 %v12728_v2 }
  0x7b   :  { %v276_v61 = vld [vmem:[%s16799_s4 + $0x7e8] sm:$0xff]  ;;  %17271 = vst [vmem:[#allocation105_spill] sm:$0xff] %v12752_v47  ;;  %v259_v28 = vld [vmem:[%s16799_s4 + $0x760] sm:$0xff]  ;;  %1133 = vmatmul.mubr.f32.gmra.mrb[42].mxu0 %v556_v48  ;;  %v245_v42 = vld [vmem:[%s16799_s4 + $0x6f0] sm:$0xff]  ;;  %1238 = vmatmul.mubr.f32.gmra.mrb[42].mxu1 %v558_v1 }
  0x7c   :  { %v228_v15 = vld [vmem:[%s16799_s4 + $0x668] sm:$0xff]  ;;  %17272 = vst [vmem:[#allocation106_spill] sm:$0xff] %v12764_v59  ;;  %v12776_v31 = vpack.c.bf16 %v276_v61, %v275_v57  ;;  %v246_v45 = vld [vmem:[%s16799_s4 + $0x6f8] sm:$0xff]  ;;  %9918 = vmatpush3.bf16.msra.mxu0 %v12740_v13  ;;  %v581_v48 = vld [vmem:[%s16800_s0 + $0x4f0] sm:$0xff]  ;;  %9950 = vmatpush3.bf16.msra.mxu1 %v12752_v47 }
  0x7d   :  { %v260_v29 = vld [vmem:[%s16799_s4 + $0x768] sm:$0xff]  ;;  %v12788_v2 = vpack.c.bf16 %v228_v15, %v227_v10  ;;  %v277_v57 = vld [vmem:[%s16799_s4 + $0x7f0] sm:$0xff]  ;;  %v278_v61 = vld [vmem:[%s16799_s4 + $0x7f8] sm:$0xff]  ;;  %1137 = vmatprep.mubr.f32.mxu0 %v582_v18  ;;  %9920 = vmatprep.subr.bf16.mxu0 %v12764_v59  ;;  %v12812_v47 = vpack.c.bf16 %v246_v45, %v245_v42 }
  0x7e   :  { %v584_v32 = vld [vmem:[%s16800_s0 + $0x508] sm:$0xff]  ;;  %17273 = vst [vmem:[#allocation107_spill] sm:$0xff] %v12776_v31  ;;  %v583_v1 = vld [vmem:[%s16800_s0 + $0x500] sm:$0xff]  ;;  %v12800_v13 = vpack.c.bf16 %v260_v29, %v259_v28  ;;  %v229_v10 = vld [vmem:[%s16799_s4 + $0x670] sm:$0xff]  ;;  %9952 = vmatprep.subr.bf16.mxu1 %v12776_v31  ;;  %v12824_v59 = vpack.c.bf16 %v278_v61, %v277_v57 }
  0x7f   :  { %17274 = vst [vmem:[#allocation108_spill] sm:$0xff] %v12788_v2  ;;  %v230_v15 = vld [vmem:[%s16799_s4 + $0x678] sm:$0xff]  ;;  %1242 = vmatprep.mubr.f32.mxu1 %v584_v32  ;;  %v607_v18 = vld [vmem:[%s16800_s0 + $0x5c0] sm:$0xff]  ;;  %17276 = vst [vmem:[#allocation110_spill] sm:$0xff] %v12812_v47  ;;  %1138 = vmatmul.mubr.f32.gmra.mrb[44].mxu0 %v581_v48 }
  0x80   :  { %17275 = vst [vmem:[#allocation109_spill] sm:$0xff] %v12800_v13  ;;  %v261_v28 = vld [vmem:[%s16799_s4 + $0x770] sm:$0xff]  ;;  %v262_v29 = vld [vmem:[%s16799_s4 + $0x778] sm:$0xff]  ;;  %17277 = vst [vmem:[#allocation111_spill] sm:$0xff] %v12824_v59  ;;  %1243 = vmatmul.mubr.f32.gmra.mrb[44].mxu1 %v583_v1  ;;  %9922 = vmatpush3.bf16.msra.mxu0 %v12788_v2  ;;  %v12836_v31 = vpack.c.bf16 %v230_v15, %v229_v10 }
  0x81   :  { %v609_v32 = vld [vmem:[%s16800_s0 + $0x5d0] sm:$0xff]  ;;  %v295_v42 = vld [vmem:[%s16799_s4 + $0x880] sm:$0xff]  ;;  %v296_v45 = vld [vmem:[%s16799_s4 + $0x888] sm:$0xff]  ;;  %9954 = vmatpush3.bf16.msra.mxu1 %v12800_v13  ;;  %1142 = vmatprep.mubr.f32.mxu0 %v607_v18  ;;  %v12848_v2 = vpack.c.bf16 %v262_v29, %v261_v28 }
  0x82   :  { %v606_v48 = vld [vmem:[%s16800_s0 + $0x5b8] sm:$0xff]  ;;  %17278 = vst [vmem:[#allocation112_spill] sm:$0xff] %v12836_v31  ;;  %v327_v57 = vld [vmem:[%s16799_s4 + $0x980] sm:$0xff]  ;;  %v328_v61 = vld [vmem:[%s16799_s4 + $0x988] sm:$0xff]  ;;  %1247 = vmatprep.mubr.f32.mxu1 %v609_v32  ;;  %9924 = vmatprep.subr.bf16.mxu0 %v12812_v47  ;;  %v12860_v13 = vpack.c.bf16 %v296_v45, %v295_v42 }
  0x83   :  { %v608_v1 = vld [vmem:[%s16800_s0 + $0x5c8] sm:$0xff]  ;;  %17279 = vst [vmem:[#allocation113_spill] sm:$0xff] %v12848_v2  ;;  %v279_v10 = vld [vmem:[%s16799_s4 + $0x800] sm:$0xff]  ;;  %1143 = vmatmul.mubr.f32.gmra.mrb[46].mxu0 %v606_v48  ;;  %9956 = vmatprep.subr.bf16.mxu1 %v12824_v59  ;;  %v438_v32 = vld [vmem:[%s16800_s0 + $0x78] sm:$0xff]  ;;  %v12872_v47 = vpack.c.bf16 %v328_v61, %v327_v57 }
  0x84   :  { %v280_v15 = vld [vmem:[%s16799_s4 + $0x808] sm:$0xff]  ;;  %17280 = vst [vmem:[#allocation114_spill] sm:$0xff] %v12860_v13  ;;  %v311_v28 = vld [vmem:[%s16799_s4 + $0x900] sm:$0xff]  ;;  %v297_v42 = vld [vmem:[%s16799_s4 + $0x890] sm:$0xff]  ;;  %1248 = vmatmul.mubr.f32.gmra.mrb[46].mxu1 %v608_v1  ;;  %9926 = vmatpush3.bf16.msra.mxu0 %v12836_v31 }
  0x85   :  { %v436_v18 = vld [vmem:[%s16800_s0 + $0x68] sm:$0xff]  ;;  %17281 = vst [vmem:[#allocation115_spill] sm:$0xff] %v12872_v47  ;;  %v298_v45 = vld [vmem:[%s16799_s4 + $0x898] sm:$0xff]  ;;  %v435_v48 = vld [vmem:[%s16800_s0 + $0x60] sm:$0xff]  ;;  %v12884_v59 = vpack.c.bf16 %v280_v15, %v279_v10  ;;  %9958 = vmatpush3.bf16.msra.mxu1 %v12848_v2  ;;  %1422 = vmatprep.mubr.f32.mxu1 %v438_v32 }
  0x86   :  { %v312_v29 = vld [vmem:[%s16799_s4 + $0x908] sm:$0xff]  ;;  %v329_v57 = vld [vmem:[%s16799_s4 + $0x990] sm:$0xff]  ;;  %v330_v61 = vld [vmem:[%s16799_s4 + $0x998] sm:$0xff]  ;;  %1317 = vmatprep.mubr.f32.mxu0 %v436_v18  ;;  %9960 = vmatprep.subr.bf16.mxu0 %v12860_v13  ;;  %v12908_v2 = vpack.c.bf16 %v298_v45, %v297_v42 }
  0x87   :  { %17282 = vst [vmem:[#allocation116_spill] sm:$0xff] %v12884_v59  ;;  %v437_v1 = vld [vmem:[%s16800_s0 + $0x70] sm:$0xff]  ;;  %v12896_v31 = vpack.c.bf16 %v312_v29, %v311_v28  ;;  %v282_v15 = vld [vmem:[%s16799_s4 + $0x818] sm:$0xff]  ;;  %1318 = vmatmul.mubr.f32.vlgmr.msra.gmra.mrb[48].mxu0 %v435_v48  ;;  %9992 = vmatprep.subr.bf16.mxu1 %v12872_v47  ;;  %v463_v32 = vld [vmem:[%s16800_s0 + $0x140] sm:$0xff]  ;;  %v12920_v13 = vpack.c.bf16 %v330_v61, %v329_v57 }
  0x88   :  { %v281_v10 = vld [vmem:[%s16799_s4 + $0x810] sm:$0xff]  ;;  %17284 = vst [vmem:[#allocation118_spill] sm:$0xff] %v12908_v2  ;;  %v314_v29 = vld [vmem:[%s16799_s4 + $0x918] sm:$0xff]  ;;  %v299_v42 = vld [vmem:[%s16799_s4 + $0x8a0] sm:$0xff]  ;;  %1423 = vmatmul.mubr.f32.vlgmr.msra.gmra.mrb[48].mxu1 %v437_v1  ;;  %9962 = vmatpush3.bf16.msra.mxu0 %v12884_v59 }
  0x89   :  { %17283 = vst [vmem:[#allocation117_spill] sm:$0xff] %v12896_v31  ;;  %v461_v18 = vld [vmem:[%s16800_s0 + $0x130] sm:$0xff]  ;;  %17285 = vst [vmem:[#allocation119_spill] sm:$0xff] %v12920_v13  ;;  %v300_v45 = vld [vmem:[%s16799_s4 + $0x8a8] sm:$0xff]  ;;  %v12932_v47 = vpack.c.bf16 %v282_v15, %v281_v10  ;;  %9994 = vmatpush3.bf16.msra.mxu1 %v12896_v31  ;;  %1427 = vmatprep.mubr.f32.mxu1 %v463_v32 }
  0x8a   :  { %v313_v28 = vld [vmem:[%s16799_s4 + $0x910] sm:$0xff]  ;;  %v460_v48 = vld [vmem:[%s16800_s0 + $0x128] sm:$0xff]  ;;  %v331_v57 = vld [vmem:[%s16799_s4 + $0x9a0] sm:$0xff]  ;;  %1322 = vmatprep.mubr.f32.mxu0 %v461_v18  ;;  %9964 = vmatprep.subr.bf16.mxu0 %v12908_v2  ;;  %v12956_v31 = vpack.c.bf16 %v300_v45, %v299_v42 }
  0x8b   :  { %17286 = vst [vmem:[#allocation120_spill] sm:$0xff] %v12932_v47  ;;  %v332_v61 = vld [vmem:[%s16799_s4 + $0x9a8] sm:$0xff]  ;;  %v462_v1 = vld [vmem:[%s16800_s0 + $0x138] sm:$0xff]  ;;  %v12944_v59 = vpack.c.bf16 %v314_v29, %v313_v28  ;;  %v283_v10 = vld [vmem:[%s16799_s4 + $0x820] sm:$0xff]  ;;  %1323 = vmatmul.mubr.f32.gmra.mrb[50].mxu0 %v460_v48  ;;  %9996 = vmatprep.subr.bf16.mxu1 %v12920_v13 }
  0x8c   :  { %v284_v15 = vld [vmem:[%s16799_s4 + $0x828] sm:$0xff]  ;;  %v486_v18 = vld [vmem:[%s16800_s0 + $0x1f8] sm:$0xff]  ;;  %17288 = vst [vmem:[#allocation122_spill] sm:$0xff] %v12956_v31  ;;  %v315_v28 = vld [vmem:[%s16799_s4 + $0x920] sm:$0xff]  ;;  %v12968_v2 = vpack.c.bf16 %v332_v61, %v331_v57  ;;  %1428 = vmatmul.mubr.f32.gmra.mrb[50].mxu1 %v462_v1  ;;  %9966 = vmatpush3.bf16.msra.mxu0 %v12932_v47 }
  0x8d   :  { %17287 = vst [vmem:[#allocation121_spill] sm:$0xff] %v12944_v59  ;;  %v316_v29 = vld [vmem:[%s16799_s4 + $0x928] sm:$0xff]  ;;  %v301_v42 = vld [vmem:[%s16799_s4 + $0x8b0] sm:$0xff]  ;;  %v302_v45 = vld [vmem:[%s16799_s4 + $0x8b8] sm:$0xff]  ;;  %v12980_v13 = vpack.c.bf16 %v284_v15, %v283_v10  ;;  %9998 = vmatpush3.bf16.msra.mxu1 %v12944_v59  ;;  %1327 = vmatprep.mubr.f32.mxu0 %v486_v18 }
  0x8e   :  { %v488_v32 = vld [vmem:[%s16800_s0 + $0x208] sm:$0xff]  ;;  %17289 = vst [vmem:[#allocation123_spill] sm:$0xff] %v12968_v2  ;;  %v485_v48 = vld [vmem:[%s16800_s0 + $0x1f0] sm:$0xff]  ;;  %v334_v61 = vld [vmem:[%s16799_s4 + $0x9b8] sm:$0xff]  ;;  %v12992_v47 = vpack.c.bf16 %v316_v29, %v315_v28  ;;  %9968 = vmatprep.subr.bf16.mxu0 %v12956_v31  ;;  %v13004_v59 = vpack.c.bf16 %v302_v45, %v301_v42  ;;  %10000 = vmatprep.subr.bf16.mxu1 %v12968_v2 }
  0x8f   :  { %17290 = vst [vmem:[#allocation124_spill] sm:$0xff] %v12980_v13  ;;  %v333_v57 = vld [vmem:[%s16799_s4 + $0x9b0] sm:$0xff]  ;;  %v487_v1 = vld [vmem:[%s16800_s0 + $0x200] sm:$0xff]  ;;  %v286_v15 = vld [vmem:[%s16799_s4 + $0x838] sm:$0xff]  ;;  %1432 = vmatprep.mubr.f32.mxu1 %v488_v32  ;;  %1328 = vmatmul.mubr.f32.gmra.mrb[52].mxu0 %v485_v48 }
  0x90   :  { %17291 = vst [vmem:[#allocation125_spill] sm:$0xff] %v12992_v47  ;;  %v285_v10 = vld [vmem:[%s16799_s4 + $0x830] sm:$0xff]  ;;  %v511_v18 = vld [vmem:[%s16800_s0 + $0x2c0] sm:$0xff]  ;;  %17292 = vst [vmem:[#allocation126_spill] sm:$0xff] %v13004_v59  ;;  %v13016_v31 = vpack.c.bf16 %v334_v61, %v333_v57  ;;  %1433 = vmatmul.mubr.f32.gmra.mrb[52].mxu1 %v487_v1  ;;  %9970 = vmatpush3.bf16.msra.mxu0 %v12980_v13 }
  0x91   :  { %v317_v28 = vld [vmem:[%s16799_s4 + $0x930] sm:$0xff]  ;;  %v318_v29 = vld [vmem:[%s16799_s4 + $0x938] sm:$0xff]  ;;  %v303_v42 = vld [vmem:[%s16799_s4 + $0x8c0] sm:$0xff]  ;;  %v13028_v2 = vpack.c.bf16 %v286_v15, %v285_v10  ;;  %10002 = vmatpush3.bf16.msra.mxu1 %v12992_v47  ;;  %1332 = vmatprep.mubr.f32.mxu0 %v511_v18 }
  0x92   :  { %v513_v32 = vld [vmem:[%s16800_s0 + $0x2d0] sm:$0xff]  ;;  %17293 = vst [vmem:[#allocation127_spill] sm:$0xff] %v13016_v31  ;;  %v304_v45 = vld [vmem:[%s16799_s4 + $0x8c8] sm:$0xff]  ;;  %v510_v48 = vld [vmem:[%s16800_s0 + $0x2b8] sm:$0xff]  ;;  %v13040_v13 = vpack.c.bf16 %v318_v29, %v317_v28  ;;  %9972 = vmatprep.subr.bf16.mxu0 %v13004_v59  ;;  %10004 = vmatprep.subr.bf16.mxu1 %v13016_v31 }
  0x93   :  { %17294 = vst [vmem:[#allocation128_spill] sm:$0xff] %v13028_v2  ;;  %v335_v57 = vld [vmem:[%s16799_s4 + $0x9c0] sm:$0xff]  ;;  %v336_v61 = vld [vmem:[%s16799_s4 + $0x9c8] sm:$0xff]  ;;  %1437 = vmatprep.mubr.f32.mxu1 %v513_v32  ;;  %v13052_v47 = vpack.c.bf16 %v304_v45, %v303_v42  ;;  %1333 = vmatmul.mubr.f32.gmra.mrb[54].mxu0 %v510_v48  ;;  %v538_v32 = vld [vmem:[%s16800_s0 + $0x398] sm:$0xff] }
  0x94   :  { %v512_v1 = vld [vmem:[%s16800_s0 + $0x2c8] sm:$0xff]  ;;  %17295 = vst [vmem:[#allocation129_spill] sm:$0xff] %v13040_v13  ;;  %v287_v10 = vld [vmem:[%s16799_s4 + $0x840] sm:$0xff]  ;;  %v13064_v59 = vpack.c.bf16 %v336_v61, %v335_v57  ;;  %v305_v42 = vld [vmem:[%s16799_s4 + $0x8d0] sm:$0xff]  ;;  %9974 = vmatpush3.bf16.msra.mxu0 %v13028_v2 }
  0x95   :  { %v288_v15 = vld [vmem:[%s16799_s4 + $0x848] sm:$0xff]  ;;  %17296 = vst [vmem:[#allocation130_spill] sm:$0xff] %v13052_v47  ;;  %v319_v28 = vld [vmem:[%s16799_s4 + $0x940] sm:$0xff]  ;;  %v306_v45 = vld [vmem:[%s16799_s4 + $0x8d8] sm:$0xff]  ;;  %1438 = vmatmul.mubr.f32.gmra.mrb[54].mxu1 %v512_v1  ;;  %9976 = vmatprep.subr.bf16.mxu0 %v13052_v47 }
  0x96   :  { %v536_v18 = vld [vmem:[%s16800_s0 + $0x388] sm:$0xff]  ;;  %17297 = vst [vmem:[#allocation131_spill] sm:$0xff] %v13064_v59  ;;  %v535_v48 = vld [vmem:[%s16800_s0 + $0x380] sm:$0xff]  ;;  %v13076_v31 = vpack.c.bf16 %v288_v15, %v287_v10  ;;  %v337_v57 = vld [vmem:[%s16799_s4 + $0x9d0] sm:$0xff]  ;;  %10006 = vmatpush3.bf16.msra.mxu1 %v13040_v13  ;;  %1442 = vmatprep.mubr.f32.mxu1 %v538_v32  ;;  %v13100_v13 = vpack.c.bf16 %v306_v45, %v305_v42 }
  0x97   :  { %v320_v29 = vld [vmem:[%s16799_s4 + $0x948] sm:$0xff]  ;;  %v338_v61 = vld [vmem:[%s16799_s4 + $0x9d8] sm:$0xff]  ;;  %1337 = vmatprep.mubr.f32.mxu0 %v536_v18  ;;  %v537_v1 = vld [vmem:[%s16800_s0 + $0x390] sm:$0xff]  ;;  %10008 = vmatprep.subr.bf16.mxu1 %v13064_v59 }
  0x98   :  { %17298 = vst [vmem:[#allocation132_spill] sm:$0xff] %v13076_v31  ;;  %v13088_v2 = vpack.c.bf16 %v320_v29, %v319_v28  ;;  %v289_v10 = vld [vmem:[%s16799_s4 + $0x850] sm:$0xff]  ;;  %v290_v15 = vld [vmem:[%s16799_s4 + $0x858] sm:$0xff]  ;;  %17300 = vst [vmem:[#allocation134_spill] sm:$0xff] %v13100_v13  ;;  %1338 = vmatmul.mubr.f32.gmra.mrb[56].mxu0 %v535_v48  ;;  %v13112_v47 = vpack.c.bf16 %v338_v61, %v337_v57 }
  0x99   :  { %v561_v18 = vld [vmem:[%s16800_s0 + $0x450] sm:$0xff]  ;;  %v322_v29 = vld [vmem:[%s16799_s4 + $0x958] sm:$0xff]  ;;  %v563_v32 = vld [vmem:[%s16800_s0 + $0x460] sm:$0xff]  ;;  %1443 = vmatmul.mubr.f32.gmra.mrb[56].mxu1 %v537_v1  ;;  %9978 = vmatpush3.bf16.msra.mxu0 %v13076_v31  ;;  %v13124_v59 = vpack.c.bf16 %v290_v15, %v289_v10 }
  0x9a   :  { %17299 = vst [vmem:[#allocation133_spill] sm:$0xff] %v13088_v2  ;;  %v321_v28 = vld [vmem:[%s16799_s4 + $0x950] sm:$0xff]  ;;  %17301 = vst [vmem:[#allocation135_spill] sm:$0xff] %v13112_v47  ;;  %v307_v42 = vld [vmem:[%s16799_s4 + $0x8e0] sm:$0xff]  ;;  %10010 = vmatpush3.bf16.msra.mxu1 %v13088_v2  ;;  %1342 = vmatprep.mubr.f32.mxu0 %v561_v18 }
  0x9b   :  { %v308_v45 = vld [vmem:[%s16799_s4 + $0x8e8] sm:$0xff]  ;;  %17302 = vst [vmem:[#allocation136_spill] sm:$0xff] %v13124_v59  ;;  %v339_v57 = vld [vmem:[%s16799_s4 + $0x9e0] sm:$0xff]  ;;  %v562_v1 = vld [vmem:[%s16800_s0 + $0x458] sm:$0xff]  ;;  %v13136_v31 = vpack.c.bf16 %v322_v29, %v321_v28  ;;  %1447 = vmatprep.mubr.f32.mxu1 %v563_v32  ;;  %9980 = vmatprep.subr.bf16.mxu0 %v13100_v13 }
  0x9c   :  { %v560_v48 = vld [vmem:[%s16800_s0 + $0x448] sm:$0xff]  ;;  %v291_v10 = vld [vmem:[%s16799_s4 + $0x860] sm:$0xff]  ;;  %v586_v18 = vld [vmem:[%s16800_s0 + $0x518] sm:$0xff]  ;;  %v13148_v2 = vpack.c.bf16 %v308_v45, %v307_v42  ;;  %10012 = vmatprep.subr.bf16.mxu1 %v13112_v47 }
  0x9d   :  { %v340_v61 = vld [vmem:[%s16799_s4 + $0x9e8] sm:$0xff]  ;;  %17303 = vst [vmem:[#allocation137_spill] sm:$0xff] %v13136_v31  ;;  %v323_v28 = vld [vmem:[%s16799_s4 + $0x960] sm:$0xff]  ;;  %1343 = vmatmul.mubr.f32.gmra.mrb[58].mxu0 %v560_v48  ;;  %v309_v42 = vld [vmem:[%s16799_s4 + $0x8f0] sm:$0xff]  ;;  %1448 = vmatmul.mubr.f32.gmra.mrb[58].mxu1 %v562_v1 }
  0x9e   :  { %v292_v15 = vld [vmem:[%s16799_s4 + $0x868] sm:$0xff]  ;;  %17304 = vst [vmem:[#allocation138_spill] sm:$0xff] %v13148_v2  ;;  %v13160_v13 = vpack.c.bf16 %v340_v61, %v339_v57  ;;  %v310_v45 = vld [vmem:[%s16799_s4 + $0x8f8] sm:$0xff]  ;;  %9982 = vmatpush3.bf16.msra.mxu0 %v13124_v59  ;;  %v585_v48 = vld [vmem:[%s16800_s0 + $0x510] sm:$0xff]  ;;  %10014 = vmatpush3.bf16.msra.mxu1 %v13136_v31 }
  0x9f   :  { %v324_v29 = vld [vmem:[%s16799_s4 + $0x968] sm:$0xff]  ;;  %v13172_v47 = vpack.c.bf16 %v292_v15, %v291_v10  ;;  %v341_v57 = vld [vmem:[%s16799_s4 + $0x9f0] sm:$0xff]  ;;  %v342_v61 = vld [vmem:[%s16799_s4 + $0x9f8] sm:$0xff]  ;;  %1347 = vmatprep.mubr.f32.mxu0 %v586_v18  ;;  %9984 = vmatprep.subr.bf16.mxu0 %v13148_v2  ;;  %v13196_v31 = vpack.c.bf16 %v310_v45, %v309_v42 }
  0xa0   :  { %v588_v32 = vld [vmem:[%s16800_s0 + $0x528] sm:$0xff]  ;;  %17305 = vst [vmem:[#allocation139_spill] sm:$0xff] %v13160_v13  ;;  %v587_v1 = vld [vmem:[%s16800_s0 + $0x520] sm:$0xff]  ;;  %v13184_v59 = vpack.c.bf16 %v324_v29, %v323_v28  ;;  %v293_v10 = vld [vmem:[%s16799_s4 + $0x870] sm:$0xff]  ;;  %10016 = vmatprep.subr.bf16.mxu1 %v13160_v13  ;;  %v13208_v2 = vpack.c.bf16 %v342_v61, %v341_v57 }
  0xa1   :  { %17306 = vst [vmem:[#allocation140_spill] sm:$0xff] %v13172_v47  ;;  %v294_v15 = vld [vmem:[%s16799_s4 + $0x878] sm:$0xff]  ;;  %1452 = vmatprep.mubr.f32.mxu1 %v588_v32  ;;  %v611_v18 = vld [vmem:[%s16800_s0 + $0x5e0] sm:$0xff]  ;;  %17308 = vst [vmem:[#allocation142_spill] sm:$0xff] %v13196_v31  ;;  %1348 = vmatmul.mubr.f32.gmra.mrb[60].mxu0 %v585_v48 }
  0xa2   :  { %17307 = vst [vmem:[#allocation141_spill] sm:$0xff] %v13184_v59  ;;  %v325_v28 = vld [vmem:[%s16799_s4 + $0x970] sm:$0xff]  ;;  %v326_v29 = vld [vmem:[%s16799_s4 + $0x978] sm:$0xff]  ;;  %17309 = vst [vmem:[#allocation143_spill] sm:$0xff] %v13208_v2  ;;  %1453 = vmatmul.mubr.f32.gmra.mrb[60].mxu1 %v587_v1  ;;  %9986 = vmatpush3.bf16.msra.mxu0 %v13172_v47  ;;  %v13220_v13 = vpack.c.bf16 %v294_v15, %v293_v10 }
  0xa3   :  { %v613_v32 = vld [vmem:[%s16800_s0 + $0x5f0] sm:$0xff]  ;;  %v359_v42 = vld [vmem:[%s16799_s4 + $0xa80] sm:$0xff]  ;;  %v360_v45 = vld [vmem:[%s16799_s4 + $0xa88] sm:$0xff]  ;;  %10018 = vmatpush3.bf16.msra.mxu1 %v13184_v59  ;;  %1352 = vmatprep.mubr.f32.mxu0 %v611_v18  ;;  %v13232_v47 = vpack.c.bf16 %v326_v29, %v325_v28 }
  0xa4   :  { %v610_v48 = vld [vmem:[%s16800_s0 + $0x5d8] sm:$0xff]  ;;  %17310 = vst [vmem:[#allocation144_spill] sm:$0xff] %v13220_v13  ;;  %v391_v57 = vld [vmem:[%s16799_s4 + $0xb80] sm:$0xff]  ;;  %v392_v61 = vld [vmem:[%s16799_s4 + $0xb88] sm:$0xff]  ;;  %1457 = vmatprep.mubr.f32.mxu1 %v613_v32  ;;  %9988 = vmatprep.subr.bf16.mxu0 %v13196_v31  ;;  %v13244_v59 = vpack.c.bf16 %v360_v45, %v359_v42 }
  0xa5   :  { %v612_v1 = vld [vmem:[%s16800_s0 + $0x5e8] sm:$0xff]  ;;  %17311 = vst [vmem:[#allocation145_spill] sm:$0xff] %v13232_v47  ;;  %v343_v10 = vld [vmem:[%s16799_s4 + $0xa00] sm:$0xff]  ;;  %1353 = vmatmul.mubr.f32.gmra.mrb[62].mxu0 %v610_v48  ;;  %10020 = vmatprep.subr.bf16.mxu1 %v13208_v2  ;;  %v442_v32 = vld [vmem:[%s16800_s0 + $0x98] sm:$0xff]  ;;  %v13256_v31 = vpack.c.bf16 %v392_v61, %v391_v57 }
  0xa6   :  { %v344_v15 = vld [vmem:[%s16799_s4 + $0xa08] sm:$0xff]  ;;  %17312 = vst [vmem:[#allocation146_spill] sm:$0xff] %v13244_v59  ;;  %v375_v28 = vld [vmem:[%s16799_s4 + $0xb00] sm:$0xff]  ;;  %v361_v42 = vld [vmem:[%s16799_s4 + $0xa90] sm:$0xff]  ;;  %1458 = vmatmul.mubr.f32.gmra.mrb[62].mxu1 %v612_v1  ;;  %9990 = vmatpush3.bf16.msra.mxu0 %v13220_v13 }
  0xa7   :  { %v440_v18 = vld [vmem:[%s16800_s0 + $0x88] sm:$0xff]  ;;  %17313 = vst [vmem:[#allocation147_spill] sm:$0xff] %v13256_v31  ;;  %v362_v45 = vld [vmem:[%s16799_s4 + $0xa98] sm:$0xff]  ;;  %v439_v48 = vld [vmem:[%s16800_s0 + $0x80] sm:$0xff]  ;;  %v13268_v2 = vpack.c.bf16 %v344_v15, %v343_v10  ;;  %10022 = vmatpush3.bf16.msra.mxu1 %v13232_v47  ;;  %1632 = vmatprep.mubr.f32.mxu1 %v442_v32 }
  0xa8   :  { %v376_v29 = vld [vmem:[%s16799_s4 + $0xb08] sm:$0xff]  ;;  %v393_v57 = vld [vmem:[%s16799_s4 + $0xb90] sm:$0xff]  ;;  %v394_v61 = vld [vmem:[%s16799_s4 + $0xb98] sm:$0xff]  ;;  %1527 = vmatprep.mubr.f32.mxu0 %v440_v18  ;;  %10024 = vmatprep.subr.bf16.mxu0 %v13244_v59  ;;  %v13292_v47 = vpack.c.bf16 %v362_v45, %v361_v42 }
  0xa9   :  { %17314 = vst [vmem:[#allocation148_spill] sm:$0xff] %v13268_v2  ;;  %v441_v1 = vld [vmem:[%s16800_s0 + $0x90] sm:$0xff]  ;;  %v13280_v13 = vpack.c.bf16 %v376_v29, %v375_v28  ;;  %v346_v15 = vld [vmem:[%s16799_s4 + $0xa18] sm:$0xff]  ;;  %1528 = vmatmul.mubr.f32.vlgmr.msra.gmra.mrb[64].mxu0 %v439_v48  ;;  %10056 = vmatprep.subr.bf16.mxu1 %v13256_v31  ;;  %v467_v32 = vld [vmem:[%s16800_s0 + $0x160] sm:$0xff]  ;;  %v13304_v59 = vpack.c.bf16 %v394_v61, %v393_v57 }
  0xaa   :  { %v345_v10 = vld [vmem:[%s16799_s4 + $0xa10] sm:$0xff]  ;;  %17316 = vst [vmem:[#allocation150_spill] sm:$0xff] %v13292_v47  ;;  %v378_v29 = vld [vmem:[%s16799_s4 + $0xb18] sm:$0xff]  ;;  %v363_v42 = vld [vmem:[%s16799_s4 + $0xaa0] sm:$0xff]  ;;  %1633 = vmatmul.mubr.f32.vlgmr.msra.gmra.mrb[64].mxu1 %v441_v1  ;;  %10026 = vmatpush3.bf16.msra.mxu0 %v13268_v2 }
  0xab   :  { %17315 = vst [vmem:[#allocation149_spill] sm:$0xff] %v13280_v13  ;;  %v465_v18 = vld [vmem:[%s16800_s0 + $0x150] sm:$0xff]  ;;  %17317 = vst [vmem:[#allocation151_spill] sm:$0xff] %v13304_v59  ;;  %v364_v45 = vld [vmem:[%s16799_s4 + $0xaa8] sm:$0xff]  ;;  %v13316_v31 = vpack.c.bf16 %v346_v15, %v345_v10  ;;  %10058 = vmatpush3.bf16.msra.mxu1 %v13280_v13  ;;  %1637 = vmatprep.mubr.f32.mxu1 %v467_v32 }
  0xac   :  { %v377_v28 = vld [vmem:[%s16799_s4 + $0xb10] sm:$0xff]  ;;  %v464_v48 = vld [vmem:[%s16800_s0 + $0x148] sm:$0xff]  ;;  %v395_v57 = vld [vmem:[%s16799_s4 + $0xba0] sm:$0xff]  ;;  %1532 = vmatprep.mubr.f32.mxu0 %v465_v18  ;;  %10028 = vmatprep.subr.bf16.mxu0 %v13292_v47  ;;  %v13340_v13 = vpack.c.bf16 %v364_v45, %v363_v42 }
  0xad   :  { %17318 = vst [vmem:[#allocation152_spill] sm:$0xff] %v13316_v31  ;;  %v396_v61 = vld [vmem:[%s16799_s4 + $0xba8] sm:$0xff]  ;;  %v466_v1 = vld [vmem:[%s16800_s0 + $0x158] sm:$0xff]  ;;  %v13328_v2 = vpack.c.bf16 %v378_v29, %v377_v28  ;;  %v347_v10 = vld [vmem:[%s16799_s4 + $0xa20] sm:$0xff]  ;;  %1533 = vmatmul.mubr.f32.gmra.mrb[66].mxu0 %v464_v48  ;;  %10060 = vmatprep.subr.bf16.mxu1 %v13304_v59 }
  0xae   :  { %v348_v15 = vld [vmem:[%s16799_s4 + $0xa28] sm:$0xff]  ;;  %v490_v18 = vld [vmem:[%s16800_s0 + $0x218] sm:$0xff]  ;;  %17320 = vst [vmem:[#allocation154_spill] sm:$0xff] %v13340_v13  ;;  %v379_v28 = vld [vmem:[%s16799_s4 + $0xb20] sm:$0xff]  ;;  %v13352_v47 = vpack.c.bf16 %v396_v61, %v395_v57  ;;  %1638 = vmatmul.mubr.f32.gmra.mrb[66].mxu1 %v466_v1  ;;  %10030 = vmatpush3.bf16.msra.mxu0 %v13316_v31 }
  0xaf   :  { %17319 = vst [vmem:[#allocation153_spill] sm:$0xff] %v13328_v2  ;;  %v380_v29 = vld [vmem:[%s16799_s4 + $0xb28] sm:$0xff]  ;;  %v365_v42 = vld [vmem:[%s16799_s4 + $0xab0] sm:$0xff]  ;;  %v366_v45 = vld [vmem:[%s16799_s4 + $0xab8] sm:$0xff]  ;;  %v13364_v59 = vpack.c.bf16 %v348_v15, %v347_v10  ;;  %10062 = vmatpush3.bf16.msra.mxu1 %v13328_v2  ;;  %1537 = vmatprep.mubr.f32.mxu0 %v490_v18 }
  0xb0   :  { %v492_v32 = vld [vmem:[%s16800_s0 + $0x228] sm:$0xff]  ;;  %17321 = vst [vmem:[#allocation155_spill] sm:$0xff] %v13352_v47  ;;  %v489_v48 = vld [vmem:[%s16800_s0 + $0x210] sm:$0xff]  ;;  %v398_v61 = vld [vmem:[%s16799_s4 + $0xbb8] sm:$0xff]  ;;  %v13376_v31 = vpack.c.bf16 %v380_v29, %v379_v28  ;;  %10032 = vmatprep.subr.bf16.mxu0 %v13340_v13  ;;  %v13388_v2 = vpack.c.bf16 %v366_v45, %v365_v42  ;;  %10064 = vmatprep.subr.bf16.mxu1 %v13352_v47 }
  0xb1   :  { %17322 = vst [vmem:[#allocation156_spill] sm:$0xff] %v13364_v59  ;;  %v397_v57 = vld [vmem:[%s16799_s4 + $0xbb0] sm:$0xff]  ;;  %v491_v1 = vld [vmem:[%s16800_s0 + $0x220] sm:$0xff]  ;;  %v350_v15 = vld [vmem:[%s16799_s4 + $0xa38] sm:$0xff]  ;;  %1642 = vmatprep.mubr.f32.mxu1 %v492_v32  ;;  %1538 = vmatmul.mubr.f32.gmra.mrb[68].mxu0 %v489_v48 }
  0xb2   :  { %17323 = vst [vmem:[#allocation157_spill] sm:$0xff] %v13376_v31  ;;  %v349_v10 = vld [vmem:[%s16799_s4 + $0xa30] sm:$0xff]  ;;  %v515_v18 = vld [vmem:[%s16800_s0 + $0x2e0] sm:$0xff]  ;;  %17324 = vst [vmem:[#allocation158_spill] sm:$0xff] %v13388_v2  ;;  %v13400_v13 = vpack.c.bf16 %v398_v61, %v397_v57  ;;  %1643 = vmatmul.mubr.f32.gmra.mrb[68].mxu1 %v491_v1  ;;  %10034 = vmatpush3.bf16.msra.mxu0 %v13364_v59 }
  0xb3   :  { %v381_v28 = vld [vmem:[%s16799_s4 + $0xb30] sm:$0xff]  ;;  %v382_v29 = vld [vmem:[%s16799_s4 + $0xb38] sm:$0xff]  ;;  %v367_v42 = vld [vmem:[%s16799_s4 + $0xac0] sm:$0xff]  ;;  %v13412_v47 = vpack.c.bf16 %v350_v15, %v349_v10  ;;  %10066 = vmatpush3.bf16.msra.mxu1 %v13376_v31  ;;  %1542 = vmatprep.mubr.f32.mxu0 %v515_v18 }
  0xb4   :  { %v517_v32 = vld [vmem:[%s16800_s0 + $0x2f0] sm:$0xff]  ;;  %17325 = vst [vmem:[#allocation159_spill] sm:$0xff] %v13400_v13  ;;  %v368_v45 = vld [vmem:[%s16799_s4 + $0xac8] sm:$0xff]  ;;  %v514_v48 = vld [vmem:[%s16800_s0 + $0x2d8] sm:$0xff]  ;;  %v13424_v59 = vpack.c.bf16 %v382_v29, %v381_v28  ;;  %10036 = vmatprep.subr.bf16.mxu0 %v13388_v2  ;;  %10068 = vmatprep.subr.bf16.mxu1 %v13400_v13 }
  0xb5   :  { %17326 = vst [vmem:[#allocation160_spill] sm:$0xff] %v13412_v47  ;;  %v399_v57 = vld [vmem:[%s16799_s4 + $0xbc0] sm:$0xff]  ;;  %v400_v61 = vld [vmem:[%s16799_s4 + $0xbc8] sm:$0xff]  ;;  %1647 = vmatprep.mubr.f32.mxu1 %v517_v32  ;;  %v13436_v31 = vpack.c.bf16 %v368_v45, %v367_v42  ;;  %1543 = vmatmul.mubr.f32.gmra.mrb[70].mxu0 %v514_v48  ;;  %v542_v32 = vld [vmem:[%s16800_s0 + $0x3b8] sm:$0xff] }
  0xb6   :  { %v516_v1 = vld [vmem:[%s16800_s0 + $0x2e8] sm:$0xff]  ;;  %17327 = vst [vmem:[#allocation161_spill] sm:$0xff] %v13424_v59  ;;  %v351_v10 = vld [vmem:[%s16799_s4 + $0xa40] sm:$0xff]  ;;  %v13448_v2 = vpack.c.bf16 %v400_v61, %v399_v57  ;;  %v369_v42 = vld [vmem:[%s16799_s4 + $0xad0] sm:$0xff]  ;;  %10038 = vmatpush3.bf16.msra.mxu0 %v13412_v47 }
  0xb7   :  { %v352_v15 = vld [vmem:[%s16799_s4 + $0xa48] sm:$0xff]  ;;  %17328 = vst [vmem:[#allocation162_spill] sm:$0xff] %v13436_v31  ;;  %v383_v28 = vld [vmem:[%s16799_s4 + $0xb40] sm:$0xff]  ;;  %v370_v45 = vld [vmem:[%s16799_s4 + $0xad8] sm:$0xff]  ;;  %1648 = vmatmul.mubr.f32.gmra.mrb[70].mxu1 %v516_v1  ;;  %10040 = vmatprep.subr.bf16.mxu0 %v13436_v31 }
  0xb8   :  { %v540_v18 = vld [vmem:[%s16800_s0 + $0x3a8] sm:$0xff]  ;;  %17329 = vst [vmem:[#allocation163_spill] sm:$0xff] %v13448_v2  ;;  %v539_v48 = vld [vmem:[%s16800_s0 + $0x3a0] sm:$0xff]  ;;  %v13460_v13 = vpack.c.bf16 %v352_v15, %v351_v10  ;;  %v401_v57 = vld [vmem:[%s16799_s4 + $0xbd0] sm:$0xff]  ;;  %10070 = vmatpush3.bf16.msra.mxu1 %v13424_v59  ;;  %1652 = vmatprep.mubr.f32.mxu1 %v542_v32  ;;  %v13484_v59 = vpack.c.bf16 %v370_v45, %v369_v42 }
  0xb9   :  { %v384_v29 = vld [vmem:[%s16799_s4 + $0xb48] sm:$0xff]  ;;  %v402_v61 = vld [vmem:[%s16799_s4 + $0xbd8] sm:$0xff]  ;;  %1547 = vmatprep.mubr.f32.mxu0 %v540_v18  ;;  %v541_v1 = vld [vmem:[%s16800_s0 + $0x3b0] sm:$0xff]  ;;  %10072 = vmatprep.subr.bf16.mxu1 %v13448_v2 }
  0xba   :  { %17330 = vst [vmem:[#allocation164_spill] sm:$0xff] %v13460_v13  ;;  %v13472_v47 = vpack.c.bf16 %v384_v29, %v383_v28  ;;  %v353_v10 = vld [vmem:[%s16799_s4 + $0xa50] sm:$0xff]  ;;  %v354_v15 = vld [vmem:[%s16799_s4 + $0xa58] sm:$0xff]  ;;  %17332 = vst [vmem:[#allocation166_spill] sm:$0xff] %v13484_v59  ;;  %1548 = vmatmul.mubr.f32.gmra.mrb[72].mxu0 %v539_v48  ;;  %v13496_v31 = vpack.c.bf16 %v402_v61, %v401_v57 }
  0xbb   :  { %v565_v18 = vld [vmem:[%s16800_s0 + $0x470] sm:$0xff]  ;;  %v386_v29 = vld [vmem:[%s16799_s4 + $0xb58] sm:$0xff]  ;;  %v567_v32 = vld [vmem:[%s16800_s0 + $0x480] sm:$0xff]  ;;  %1653 = vmatmul.mubr.f32.gmra.mrb[72].mxu1 %v541_v1  ;;  %10042 = vmatpush3.bf16.msra.mxu0 %v13460_v13  ;;  %v13508_v2 = vpack.c.bf16 %v354_v15, %v353_v10 }
  0xbc   :  { %17331 = vst [vmem:[#allocation165_spill] sm:$0xff] %v13472_v47  ;;  %v385_v28 = vld [vmem:[%s16799_s4 + $0xb50] sm:$0xff]  ;;  %17333 = vst [vmem:[#allocation167_spill] sm:$0xff] %v13496_v31  ;;  %v371_v42 = vld [vmem:[%s16799_s4 + $0xae0] sm:$0xff]  ;;  %10074 = vmatpush3.bf16.msra.mxu1 %v13472_v47  ;;  %1552 = vmatprep.mubr.f32.mxu0 %v565_v18 }
  0xbd   :  { %v372_v45 = vld [vmem:[%s16799_s4 + $0xae8] sm:$0xff]  ;;  %17334 = vst [vmem:[#allocation168_spill] sm:$0xff] %v13508_v2  ;;  %v403_v57 = vld [vmem:[%s16799_s4 + $0xbe0] sm:$0xff]  ;;  %v566_v1 = vld [vmem:[%s16800_s0 + $0x478] sm:$0xff]  ;;  %v13520_v13 = vpack.c.bf16 %v386_v29, %v385_v28  ;;  %1657 = vmatprep.mubr.f32.mxu1 %v567_v32  ;;  %10044 = vmatprep.subr.bf16.mxu0 %v13484_v59 }
  0xbe   :  { %v564_v48 = vld [vmem:[%s16800_s0 + $0x468] sm:$0xff]  ;;  %v355_v10 = vld [vmem:[%s16799_s4 + $0xa60] sm:$0xff]  ;;  %v590_v18 = vld [vmem:[%s16800_s0 + $0x538] sm:$0xff]  ;;  %v13532_v47 = vpack.c.bf16 %v372_v45, %v371_v42  ;;  %10076 = vmatprep.subr.bf16.mxu1 %v13496_v31 }
  0xbf   :  { %v404_v61 = vld [vmem:[%s16799_s4 + $0xbe8] sm:$0xff]  ;;  %17335 = vst [vmem:[#allocation169_spill] sm:$0xff] %v13520_v13  ;;  %v387_v28 = vld [vmem:[%s16799_s4 + $0xb60] sm:$0xff]  ;;  %1553 = vmatmul.mubr.f32.gmra.mrb[74].mxu0 %v564_v48  ;;  %v373_v42 = vld [vmem:[%s16799_s4 + $0xaf0] sm:$0xff]  ;;  %1658 = vmatmul.mubr.f32.gmra.mrb[74].mxu1 %v566_v1 }
  0xc0   :  { %v356_v15 = vld [vmem:[%s16799_s4 + $0xa68] sm:$0xff]  ;;  %17336 = vst [vmem:[#allocation170_spill] sm:$0xff] %v13532_v47  ;;  %v13544_v59 = vpack.c.bf16 %v404_v61, %v403_v57  ;;  %v374_v45 = vld [vmem:[%s16799_s4 + $0xaf8] sm:$0xff]  ;;  %10046 = vmatpush3.bf16.msra.mxu0 %v13508_v2  ;;  %v589_v48 = vld [vmem:[%s16800_s0 + $0x530] sm:$0xff]  ;;  %10078 = vmatpush3.bf16.msra.mxu1 %v13520_v13 }
  0xc1   :  { %v388_v29 = vld [vmem:[%s16799_s4 + $0xb68] sm:$0xff]  ;;  %v13556_v31 = vpack.c.bf16 %v356_v15, %v355_v10  ;;  %v405_v57 = vld [vmem:[%s16799_s4 + $0xbf0] sm:$0xff]  ;;  %v406_v61 = vld [vmem:[%s16799_s4 + $0xbf8] sm:$0xff]  ;;  %1557 = vmatprep.mubr.f32.mxu0 %v590_v18  ;;  %10048 = vmatprep.subr.bf16.mxu0 %v13532_v47  ;;  %v13580_v13 = vpack.c.bf16 %v374_v45, %v373_v42 }
  0xc2   :  { %v592_v32 = vld [vmem:[%s16800_s0 + $0x548] sm:$0xff]  ;;  %17337 = vst [vmem:[#allocation171_spill] sm:$0xff] %v13544_v59  ;;  %v591_v1 = vld [vmem:[%s16800_s0 + $0x540] sm:$0xff]  ;;  %v13568_v2 = vpack.c.bf16 %v388_v29, %v387_v28  ;;  %v357_v10 = vld [vmem:[%s16799_s4 + $0xa70] sm:$0xff]  ;;  %10080 = vmatprep.subr.bf16.mxu1 %v13544_v59  ;;  %v13592_v47 = vpack.c.bf16 %v406_v61, %v405_v57 }
  0xc3   :  { %17338 = vst [vmem:[#allocation172_spill] sm:$0xff] %v13556_v31  ;;  %v358_v15 = vld [vmem:[%s16799_s4 + $0xa78] sm:$0xff]  ;;  %1662 = vmatprep.mubr.f32.mxu1 %v592_v32  ;;  %v615_v18 = vld [vmem:[%s16800_s0 + $0x600] sm:$0xff]  ;;  %17340 = vst [vmem:[#allocation174_spill] sm:$0xff] %v13580_v13  ;;  %1558 = vmatmul.mubr.f32.gmra.mrb[76].mxu0 %v589_v48 }
  0xc4   :  { %17339 = vst [vmem:[#allocation173_spill] sm:$0xff] %v13568_v2  ;;  %v389_v28 = vld [vmem:[%s16799_s4 + $0xb70] sm:$0xff]  ;;  %v390_v29 = vld [vmem:[%s16799_s4 + $0xb78] sm:$0xff]  ;;  %17341 = vst [vmem:[#allocation175_spill] sm:$0xff] %v13592_v47  ;;  %1663 = vmatmul.mubr.f32.gmra.mrb[76].mxu1 %v591_v1  ;;  %10050 = vmatpush3.bf16.msra.mxu0 %v13556_v31  ;;  %v13604_v59 = vpack.c.bf16 %v358_v15, %v357_v10 }
  0xc5   :  { %v617_v32 = vld [vmem:[%s16800_s0 + $0x610] sm:$0xff]  ;;  %v407_v42 = vld [vmem:[%s16799_s4 + $0xc00] sm:$0xff]  ;;  %v408_v45 = vld [vmem:[%s16799_s4 + $0xc08] sm:$0xff]  ;;  %10082 = vmatpush3.bf16.msra.mxu1 %v13568_v2  ;;  %1562 = vmatprep.mubr.f32.mxu0 %v615_v18  ;;  %v13610_v61 = vpack.c.bf16 %v390_v29, %v389_v28 }
  0xc6   :  { %v614_v48 = vld [vmem:[%s16800_s0 + $0x5f8] sm:$0xff]  ;;  %17342 = vst [vmem:[#allocation176_spill] sm:$0xff] %v13604_v59  ;;  %v616_v57 = vld [vmem:[%s16800_s0 + $0x608] sm:$0xff]  ;;  %1667 = vmatprep.mubr.f32.mxu1 %v617_v32  ;;  %10052 = vmatprep.subr.bf16.mxu0 %v13580_v13  ;;  %v13616_v31 = vpack.c.bf16 %v408_v45, %v407_v42  ;;  %v409_v15 = vld [vmem:[%s16799_s4 + $0xc10] sm:$0xff] }
  0xc7   :  { %v444_v1 = vld [vmem:[%s16800_s0 + $0xa8] sm:$0xff]  ;;  %1563 = vmatmul.mubr.f32.gmra.mrb[78].mxu0 %v614_v48  ;;  %10084 = vmatprep.subr.bf16.mxu1 %v13592_v47  ;;  %v446_v10 = vld [vmem:[%s16800_s0 + $0xb8] sm:$0xff]  ;;  %v443_v28 = vld [vmem:[%s16800_s0 + $0xa0] sm:$0xff] }
  0xc8   :  { %17343 = vst [vmem:[#allocation177_spill] sm:$0xff] %v13616_v31  ;;  %v410_v18 = vld [vmem:[%s16799_s4 + $0xc18] sm:$0xff]  ;;  %1668 = vmatmul.mubr.f32.gmra.mrb[78].mxu1 %v616_v57  ;;  %10054 = vmatpush3.bf16.msra.mxu0 %v13604_v59  ;;  %v445_v29 = vld [vmem:[%s16800_s0 + $0xb0] sm:$0xff]  ;;  %v471_v45 = vld [vmem:[%s16800_s0 + $0x180] sm:$0xff] }
  0xc9   :  { %10086 = vmatpush3.bf16.msra.mxu1 %v13610_v61  ;;  %1737 = vmatprep.mubr.f32.mxu0 %v444_v1  ;;  %v469_v32 = vld [vmem:[%s16800_s0 + $0x170] sm:$0xff]  ;;  %v13640_v42 = vpack.c.bf16 %v410_v18, %v409_v15  ;;  %v411_v48 = vld [vmem:[%s16799_s4 + $0xc20] sm:$0xff]  ;;  %v412_v57 = vld [vmem:[%s16799_s4 + $0xc28] sm:$0xff] }
  0xca   :  { %1842 = vmatprep.mubr.f32.mxu1 %v446_v10  ;;  %10088 = vmatprep.subr.bf16.mxu0 %v13616_v31  ;;  %v468_v1 = vld [vmem:[%s16800_s0 + $0x168] sm:$0xff]  ;;  %v470_v10 = vld [vmem:[%s16800_s0 + $0x178] sm:$0xff]  ;;  %v13664_v18 = vpack.c.bf16 %v412_v57, %v411_v48  ;;  %v495_v48 = vld [vmem:[%s16800_s0 + $0x240] sm:$0xff] }
  0xcb   :  { %17344 = vst [vmem:[#allocation178_spill] sm:$0xff] %v13640_v42  ;;  %1738 = vmatmul.mubr.f32.vlgmr.msra.gmra.mrb[80].mxu0 %v443_v28  ;;  %10120 = vmatprep.subr.bf16.mxu1 %v11411_v3  ;;  %v494_v15 = vld [vmem:[%s16800_s0 + $0x238] sm:$0xff]  ;;  %v496_v28 = vld [vmem:[%s16800_s0 + $0x248] sm:$0xff]  ;;  %v519_v57 = vld [vmem:[%s16800_s0 + $0x300] sm:$0xff] }
  0xcc   :  { %1843 = vmatmul.mubr.f32.vlgmr.msra.gmra.mrb[80].mxu1 %v445_v29  ;;  %10090 = vmatpush3.bf16.msra.mxu0 %v13616_v31  ;;  %17345 = vst [vmem:[#allocation179_spill] sm:$0xff] %v13664_v18  ;;  %v413_v29 = vld [vmem:[%s16799_s4 + $0xc30] sm:$0xff] }
  0xcd   :  { %10122 = vmatpush3.bf16.msra.mxu1 %v11424_v8  ;;  %1742 = vmatprep.mubr.f32.mxu0 %v469_v32  ;;  %v414_v32 = vld [vmem:[%s16799_s4 + $0xc38] sm:$0xff] }
  0xce   :  { %1847 = vmatprep.mubr.f32.mxu1 %v471_v45  ;;  %10092 = vmatprep.subr.bf16.mxu0 %v13640_v42  ;;  %v493_v45 = vld [vmem:[%s16800_s0 + $0x230] sm:$0xff] }
  0xcf   :  { %1743 = vmatmul.mubr.f32.gmra.mrb[82].mxu0 %v468_v1  ;;  %10124 = vmatprep.subr.bf16.mxu1 %v11449_v16  ;;  %v13688_v1 = vpack.c.bf16 %v414_v32, %v413_v29  ;;  %v518_v29 = vld [vmem:[%s16800_s0 + $0x2f8] sm:$0xff]  ;;  %v520_v32 = vld [vmem:[%s16800_s0 + $0x308] sm:$0xff] }
  0xd0   :  { %1848 = vmatmul.mubr.f32.gmra.mrb[82].mxu1 %v470_v10  ;;  %10094 = vmatpush3.bf16.msra.mxu0 %v13640_v42  ;;  %v521_v10 = vld [vmem:[%s16800_s0 + $0x310] sm:$0xff] }
  0xd1   :  { %10126 = vmatpush3.bf16.msra.mxu1 %v11463_v21  ;;  %1747 = vmatprep.mubr.f32.mxu0 %v494_v15  ;;  %17346 = vst [vmem:[#allocation180_spill] sm:$0xff] %v13688_v1  ;;  %v415_v15 = vld [vmem:[%s16799_s4 + $0xc40] sm:$0xff] }
  0xd2   :  { %1852 = vmatprep.mubr.f32.mxu1 %v496_v28  ;;  %10096 = vmatprep.subr.bf16.mxu0 %v13664_v18  ;;  %v416_v28 = vld [vmem:[%s16799_s4 + $0xc48] sm:$0xff] }
  0xd3   :  { %1748 = vmatmul.mubr.f32.gmra.mrb[84].mxu0 %v493_v45  ;;  %10128 = vmatprep.subr.bf16.mxu1 %v11478_v26  ;;  %v544_v45 = vld [vmem:[%s16800_s0 + $0x3c8] sm:$0xff] }
  0xd4   :  { %1853 = vmatmul.mubr.f32.gmra.mrb[84].mxu1 %v495_v48  ;;  %10098 = vmatpush3.bf16.msra.mxu0 %v13664_v18  ;;  %v13712_v48 = vpack.c.bf16 %v416_v28, %v415_v15  ;;  %v543_v15 = vld [vmem:[%s16800_s0 + $0x3c0] sm:$0xff]  ;;  %v545_v28 = vld [vmem:[%s16800_s0 + $0x3d0] sm:$0xff] }
  0xd5   :  { %10130 = vmatpush3.bf16.msra.mxu1 %v11501_v34  ;;  %1752 = vmatprep.mubr.f32.mxu0 %v519_v57  ;;  %v546_v57 = vld [vmem:[%s16800_s0 + $0x3d8] sm:$0xff]  ;;  %v417_v34 = vld [vmem:[%s16799_s4 + $0xc50] sm:$0xff] }
  0xd6   :  { %1857 = vmatprep.mubr.f32.mxu1 %v521_v10  ;;  %10100 = vmatprep.subr.bf16.mxu0 %v13688_v1  ;;  %17347 = vst [vmem:[#allocation181_spill] sm:$0xff] %v13712_v48  ;;  %v418_v10 = vld [vmem:[%s16799_s4 + $0xc58] sm:$0xff] }
  0xd7   :  { %1753 = vmatmul.mubr.f32.gmra.mrb[86].mxu0 %v518_v29  ;;  %10132 = vmatprep.subr.bf16.mxu1 %v11516_v39  ;;  %v569_v29 = vld [vmem:[%s16800_s0 + $0x490] sm:$0xff] }
  0xd8   :  { %1858 = vmatmul.mubr.f32.gmra.mrb[86].mxu1 %v520_v32  ;;  %10102 = vmatpush3.bf16.msra.mxu0 %v13688_v1  ;;  %v13736_v32 = vpack.c.bf16 %v418_v10, %v417_v34  ;;  %v568_v34 = vld [vmem:[%s16800_s0 + $0x488] sm:$0xff]  ;;  %v570_v10 = vld [vmem:[%s16800_s0 + $0x498] sm:$0xff] }
  0xd9   :  { %10134 = vmatpush3.bf16.msra.mxu1 %v11549_v50  ;;  %1757 = vmatprep.mubr.f32.mxu0 %v544_v45  ;;  %v571_v45 = vld [vmem:[%s16800_s0 + $0x4a0] sm:$0xff] }
  0xda   :  { %1862 = vmatprep.mubr.f32.mxu1 %v546_v57  ;;  %10104 = vmatprep.subr.bf16.mxu0 %v13712_v48  ;;  %17348 = vst [vmem:[#allocation182_spill] sm:$0xff] %v13736_v32  ;;  %v419_v50 = vld [vmem:[%s16799_s4 + $0xc60] sm:$0xff]  ;;  %v420_v57 = vld [vmem:[%s16799_s4 + $0xc68] sm:$0xff] }
  0xdb   :  { %1758 = vmatmul.mubr.f32.gmra.mrb[88].mxu0 %v543_v15  ;;  %10136 = vmatprep.subr.bf16.mxu1 %v11555_v52  ;;  %v594_v15 = vld [vmem:[%s16800_s0 + $0x558] sm:$0xff] }
  0xdc   :  { %1863 = vmatmul.mubr.f32.gmra.mrb[88].mxu1 %v545_v28  ;;  %10106 = vmatpush3.bf16.msra.mxu0 %v13712_v48  ;;  %v13760_v28 = vpack.c.bf16 %v420_v57, %v419_v50  ;;  %v593_v50 = vld [vmem:[%s16800_s0 + $0x550] sm:$0xff]  ;;  %v595_v57 = vld [vmem:[%s16800_s0 + $0x560] sm:$0xff] }
  0xdd   :  { %10138 = vmatpush3.bf16.msra.mxu1 %v11585_v62  ;;  %1762 = vmatprep.mubr.f32.mxu0 %v569_v29  ;;  %v596_v29 = vld [vmem:[%s16800_s0 + $0x568] sm:$0xff]  ;;  %v421_v62 = vld [vmem:[%s16799_s4 + $0xc70] sm:$0xff] }
  0xde   :  { %1867 = vmatprep.mubr.f32.mxu1 %v571_v45  ;;  %10108 = vmatprep.subr.bf16.mxu0 %v13736_v32  ;;  %v422_v45 = vld [vmem:[%s16799_s4 + $0xc78] sm:$0xff] }
  0xdf   :  { %1763 = vmatmul.mubr.f32.gmra.mrb[90].mxu0 %v568_v34  ;;  %10140 = vmatprep.subr.bf16.mxu1 %v11591_v0  ;;  %v619_v34 = vld [vmem:[%s16800_s0 + $0x620] sm:$0xff] }
  0xe0   :  { %1868 = vmatmul.mubr.f32.gmra.mrb[90].mxu1 %v570_v10  ;;  %10110 = vmatpush3.bf16.msra.mxu0 %v13736_v32  ;;  %v13784_v10 = vpack.c.bf16 %v422_v45, %v421_v62  ;;  %v620_v62 = vld [vmem:[%s16800_s0 + $0x628] sm:$0xff]  ;;  %v447_v45 = vld [vmem:[%s16800_s0 + $0xc0] sm:$0xff] }
  0xe1   :  { %10142 = vmatpush3.bf16.msra.mxu1 %v11621_v14  ;;  %1767 = vmatprep.mubr.f32.mxu0 %v594_v15  ;;  %v621_v15 = vld [vmem:[%s16800_s0 + $0x630] sm:$0xff] }
  0xe2   :  { %1872 = vmatprep.mubr.f32.mxu1 %v596_v29  ;;  %10112 = vmatprep.subr.bf16.mxu0 %v13760_v28  ;;  %v618_v29 = vld [vmem:[%s16800_s0 + $0x618] sm:$0xff] }
  0xe3   :  { %1768 = vmatmul.mubr.f32.gmra.mrb[92].mxu0 %v593_v50  ;;  %10144 = vmatprep.subr.bf16.mxu1 %v11633_v20  ;;  %v1989_v50 = vld [vmem:[%s16801_s1 + $0x8] sm:$0xff] }
  0xe4   :  { %1873 = vmatmul.mubr.f32.gmra.mrb[92].mxu1 %v595_v57  ;;  %10114 = vmatpush3.bf16.msra.mxu0 %v13760_v28  ;;  %v472_v57 = vld [vmem:[%s16800_s0 + $0x188] sm:$0xff] }
  0xe5   :  { %10146 = vmatpush3.bf16.msra.mxu1 %v11663_v35  ;;  %1772 = vmatprep.mubr.f32.mxu0 %v619_v34  ;;  %v1988_v34 = vld [vmem:[%s16801_s1] sm:$0xff] }
  0xe6   :  { %1877 = vmatprep.mubr.f32.mxu1 %v621_v15  ;;  %10116 = vmatprep.subr.bf16.mxu0 %v13784_v10  ;;  %v497_v15 = vld [vmem:[%s16800_s0 + $0x250] sm:$0xff] }
  0xe7   :  { %1773 = vmatmul.mubr.f32.gmra.mrb[94].mxu0 %v618_v29  ;;  %10148 = vmatprep.subr.bf16.mxu1 %v11669_v37  ;;  %v2014_v29 = vld [vmem:[%s16801_s1 + $0xd0] sm:$0xff] }
  0xe8   :  { %1878 = vmatmul.mubr.f32.gmra.mrb[94].mxu1 %v620_v62  ;;  %10118 = vmatpush3.bf16.msra.mxu0 %v13784_v10  ;;  %v522_v62 = vld [vmem:[%s16800_s0 + $0x318] sm:$0xff] }
  0xe9   :  { %10150 = vmatpush3.bf16.msra.mxu1 %v11699_v53  ;;  %9559 = vmatprep.mubr.f32.mxu0 %v447_v45  ;;  %v2013_v45 = vld [vmem:[%s16801_s1 + $0xc8] sm:$0xff] }
  0xea   :  { %2252 = vmatprep.mubr.f32.mxu1 %v1989_v50  ;;  %10152 = vmatprep.subr.bf16.mxu0 %v11422_v7  ;;  %v547_v50 = vld [vmem:[%s16800_s0 + $0x3e0] sm:$0xff] }
  0xeb   :  { %9560 = vmatmul.mubr.f32.vlgmr.msra.gmra.mrb[96].mxu0 %v472_v57  ;;  %10184 = vmatprep.subr.bf16.mxu1 %v11705_v55  ;;  %v2039_v57 = vld [vmem:[%s16801_s1 + $0x198] sm:$0xff]  ;;  %v17370_v55 = vld [vmem:[#allocation39_spill] sm:$0xff] }
  0xec   :  { %2253 = vmatmul.mubr.f32.vlgmr.msra.gmra.mrb[96].mxu1 %v1988_v34  ;;  %10154 = vmatpush3.bf16.msra.mxu0 %v11436_v12  ;;  %v572_v34 = vld [vmem:[%s16800_s0 + $0x4a8] sm:$0xff] }
  0xed   :  { %10186 = vmatpush3.bf16.msra.mxu1 %v11732_v6  ;;  %9562 = vmatprep.mubr.f32.mxu0 %v497_v15  ;;  %v2038_v15 = vld [vmem:[%s16801_s1 + $0x190] sm:$0xff]  ;;  %v17362_v6 = vld [vmem:[#allocation31_spill] sm:$0xff] }
  0xee   :  { %2257 = vmatprep.mubr.f32.mxu1 %v2014_v29  ;;  %10156 = vmatprep.subr.bf16.mxu0 %v11451_v17  ;;  %v597_v29 = vld [vmem:[%s16800_s0 + $0x570] sm:$0xff] }
  0xef   :  { %9563 = vmatmul.mubr.f32.gmra.mrb[98].mxu0 %v522_v62  ;;  %10188 = vmatprep.subr.bf16.mxu1 %v11757_v23  ;;  %v2064_v62 = vld [vmem:[%s16801_s1 + $0x260] sm:$0xff] }
  0xf0   :  { %2258 = vmatmul.mubr.f32.gmra.mrb[98].mxu1 %v2013_v45  ;;  %10158 = vmatpush3.bf16.msra.mxu0 %v11476_v25  ;;  %v622_v45 = vld [vmem:[%s16800_s0 + $0x638] sm:$0xff] }
  0xf1   :  { %10190 = vmatpush3.bf16.msra.mxu1 %v11780_v41  ;;  %9565 = vmatprep.mubr.f32.mxu0 %v547_v50  ;;  %v2063_v50 = vld [vmem:[%s16801_s1 + $0x258] sm:$0xff]  ;;  %v17353_v41 = vld [vmem:[#allocation52_spill] sm:$0xff] }
  0xf2   :  { %2262 = vmatprep.mubr.f32.mxu1 %v2039_v57  ;;  %10160 = vmatprep.subr.bf16.mxu0 %v11489_v30  ;;  %v2089_v57 = vld [vmem:[%s16801_s1 + $0x328] sm:$0xff] }
  0xf3   :  { %9566 = vmatmul.mubr.f32.gmra.mrb[100].mxu0 %v572_v34  ;;  %10192 = vmatprep.subr.bf16.mxu1 %v11804_v58  ;;  %v1991_v34 = vld [vmem:[%s16801_s1 + $0x18] sm:$0xff] }
  0xf4   :  { %2263 = vmatmul.mubr.f32.gmra.mrb[100].mxu1 %v2038_v15  ;;  %10162 = vmatpush3.bf16.msra.mxu0 %v11514_v38  ;;  %v2088_v15 = vld [vmem:[%s16801_s1 + $0x320] sm:$0xff] }
  0xf5   :  { %10194 = vmatpush3.bf16.msra.mxu1 %v11828_v11  ;;  %9568 = vmatprep.mubr.f32.mxu0 %v597_v29  ;;  %v2114_v29 = vld [vmem:[%s16801_s1 + $0x3f0] sm:$0xff]  ;;  %v17352_v11 = vld [vmem:[#allocation21_spill] sm:$0xff] }
  0xf6   :  { %2267 = vmatprep.mubr.f32.mxu1 %v2064_v62  ;;  %10164 = vmatprep.subr.bf16.mxu0 %v11528_v43  ;;  %v2113_v62 = vld [vmem:[%s16801_s1 + $0x3e8] sm:$0xff] }
  0xf7   :  { %9569 = vmatmul.mubr.f32.gmra.mrb[102].mxu0 %v622_v45  ;;  %10196 = vmatprep.subr.bf16.mxu1 %v11852_v33 }
  0xf8   :  { %2268 = vmatmul.mubr.f32.gmra.mrb[102].mxu1 %v2063_v50  ;;  %10166 = vmatpush3.bf16.msra.mxu0 %v11553_v51  ;;  %v6775_v45 = vpop.f32.mrb[0].mxu0  ;;  %v2139_v50 = vld [vmem:[%s16801_s1 + $0x4b8] sm:$0xff] }
  0xf9   :  { %10198 = vmatpush3.bf16.msra.mxu1 %v11876_v60  ;;  %2272 = vmatprep.mubr.f32.mxu1 %v2089_v57  ;;  %v6831_v57 = vpop.f32.mrb[0].mxu1 }
  0xfa   :  { %10168 = vmatprep.subr.bf16.mxu0 %v11567_v56  ;;  %10200 = vmatprep.subr.bf16.mxu1 %v11900_v22  ;;  %v6832_v22 = vpop.f32.mrb[1].mxu1 }
  0xfb   :  { %2357 = vmatprep.mubr.f32.mxu0 %v1991_v34  ;;  %v6776_v34 = vpop.f32.mrb[1].mxu0 }
  0xfc   :  { %2273 = vmatmul.mubr.f32.gmra.mrb[104].mxu1 %v2088_v15  ;;  %10170 = vmatpush3.bf16.msra.mxu0 %v11589_v63  ;;  %v6777_v15 = vadd.f32 %v6776_v34, %v6775_v45  ;;  %v2164_v45 = vld [vmem:[%s16801_s1 + $0x580] sm:$0xff] }
  0xfd   :  { %10202 = vmatpush3.bf16.msra.mxu1 %v11924_v49  ;;  %2277 = vmatprep.mubr.f32.mxu1 %v2114_v29  ;;  %v6833_v29 = vadd.f32 %v6832_v22, %v6831_v57  ;;  %v2138_v49 = vld [vmem:[%s16801_s1 + $0x4b0] sm:$0xff]  ;;  %v6834_v34 = vpop.f32.mrb[2].mxu1 }
  0xfe   :  { %10172 = vmatprep.subr.bf16.mxu0 %v11603_v5  ;;  %10204 = vmatprep.subr.bf16.mxu1 %v11948_v9  ;;  %v6778_v9 = vpop.f32.mrb[2].mxu0 }
  0xff   :  { %v6779_v22 = vpop.f32.mrb[3].mxu0 }
 0x100   :  { %2278 = vmatmul.mubr.f32.gmra.mrb[106].mxu1 %v2113_v62  ;;  %10174 = vmatpush3.bf16.msra.mxu0 %v11631_v19  ;;  %v13900_v62 = vadd.f32 %v6833_v29, %v6777_v15  ;;  %v6780_v57 = vadd.f32 %v6779_v22, %v6778_v9  ;;  %v6781_v60 = vpop.f32.mrb[4].mxu0  ;;  %v1993_v9 = vld [vmem:[%s16801_s1 + $0x28] sm:$0xff] }
 0x101   :  { %10206 = vmatpush3.bf16.msra.mxu1 %v11972_v40  ;;  %2282 = vmatprep.mubr.f32.mxu1 %v2139_v50  ;;  %v6835_v40 = vpop.f32.mrb[3].mxu1 }
 0x102   :  { %10176 = vmatprep.subr.bf16.mxu0 %v11645_v27  ;;  %10208 = vmatprep.subr.bf16.mxu1 %v11996_v4  ;;  %v6836_v50 = vadd.f32 %v6835_v40, %v6834_v34  ;;  %v2163_v4 = vld [vmem:[%s16801_s1 + $0x578] sm:$0xff]  ;;  %v6837_v15 = vpop.f32.mrb[4].mxu1  ;;  %v6782_v40 = vpop.f32.mrb[5].mxu0 }
 0x103   :  { %v6783_v29 = vadd.f32 %v6782_v40, %v6781_v60  ;;  %v6838_v34 = vpop.f32.mrb[5].mxu1  ;;  %v17351_v60 = vld [vmem:[#allocation50_spill] sm:$0xff] }
 0x104   :  { %2283 = vmatmul.mubr.f32.gmra.mrb[108].mxu1 %v2138_v49  ;;  %10178 = vmatpush3.bf16.msra.mxu0 %v11667_v36  ;;  %v13912_v49 = vadd.f32 %v6836_v50, %v6780_v57  ;;  %v6839_v22 = vadd.f32 %v6838_v34, %v6837_v15  ;;  %v1992_v57 = vld [vmem:[%s16801_s1 + $0x20] sm:$0xff]  ;;  %v6784_v50 = vpop.f32.mrb[6].mxu0 }
 0x105   :  { %10210 = vmatpush3.bf16.msra.mxu1 %v12020_v46  ;;  %2287 = vmatprep.mubr.f32.mxu1 %v2164_v45  ;;  %v1990_v45 = vld [vmem:[%s16801_s1 + $0x10] sm:$0xff]  ;;  %v6840_v33 = vpop.f32.mrb[6].mxu1  ;;  %v6785_v15 = vpop.f32.mrb[7].mxu0 }
 0x106   :  { %10180 = vmatprep.subr.bf16.mxu0 %v11681_v44  ;;  %10212 = vmatprep.subr.bf16.mxu1 %v12044_v24  ;;  %v17349_v46 = vld [vmem:[#allocation48_spill] sm:$0xff]  ;;  %v17350_v24 = vld [vmem:[#allocation19_spill] sm:$0xff]  ;;  %v13927_v40 = vadd.f32 %v6839_v22, %v6783_v29  ;;  %v6786_v34 = vadd.f32 %v6785_v15, %v6784_v50 }
 0x107   :  { %v2017_v29 = vld [vmem:[%s16801_s1 + $0xe8] sm:$0xff] }
 0x108   :  { %2288 = vmatmul.mubr.f32.gmra.mrb[110].mxu1 %v2163_v4  ;;  %10182 = vmatpush3.bf16.msra.mxu0 %v11703_v54  ;;  %v2016_v4 = vld [vmem:[%s16801_s1 + $0xe0] sm:$0xff]  ;;  %v17354_v22 = vld [vmem:[#allocation23_spill] sm:$0xff] }
 0x109   :  { %10214 = vmatpush3.bf16.msra.mxu1 %v17349_v46  ;;  %2462 = vmatprep.mubr.f32.mxu1 %v1993_v9  ;;  %v2018_v9 = vld [vmem:[%s16801_s1 + $0xf0] sm:$0xff]  ;;  %v6841_v46 = vpop.f32.mrb[7].mxu1 }
 0x10a   :  { %10216 = vmatprep.subr.bf16.mxu0 %v17350_v24  ;;  %10248 = vmatprep.subr.bf16.mxu1 %v17351_v60  ;;  %v2015_v60 = vld [vmem:[%s16801_s1 + $0xd8] sm:$0xff]  ;;  %v6842_v58 = vadd.f32 %v6841_v46, %v6840_v33  ;;  %v6843_v15 = vpop.f32.mrb[8].mxu1  ;;  %v17355_v33 = vld [vmem:[#allocation54_spill] sm:$0xff]  ;;  %v17366_v24 = vld [vmem:[#allocation35_spill] sm:$0xff] }
 0x10b   :  { %2358 = vmatmul.mubr.f32.vlgmr.msra.gmra.mrb[104].mxu0 %v1990_v45  ;;  %v6787_v45 = vpop.f32.mrb[8].mxu0  ;;  %v2043_v46 = vld [vmem:[%s16801_s1 + $0x1b8] sm:$0xff] }
 0x10c   :  { %2463 = vmatmul.mubr.f32.vlgmr.msra.gmra.mrb[112].mxu1 %v1992_v57  ;;  %10218 = vmatpush3.bf16.msra.mxu0 %v17352_v11  ;;  %v2041_v57 = vld [vmem:[%s16801_s1 + $0x1a8] sm:$0xff]  ;;  %v13944_v50 = vadd.f32 %v6842_v58, %v6786_v34  ;;  %v6788_v23 = vpop.f32.mrb[9].mxu0  ;;  %v17357_v34 = vld [vmem:[#allocation56_spill] sm:$0xff] }
 0x10d   :  { %10250 = vmatpush3.bf16.msra.mxu1 %v17353_v41  ;;  %2362 = vmatprep.mubr.f32.mxu0 %v2016_v4  ;;  %v6789_v4 = vadd.f32 %v6788_v23, %v6787_v45  ;;  %v6844_v41 = vpop.f32.mrb[9].mxu1  ;;  %v17358_v11 = vld [vmem:[#allocation27_spill] sm:$0xff]  ;;  %v2066_v23 = vld [vmem:[%s16801_s1 + $0x270] sm:$0xff] }
 0x10e   :  { %2467 = vmatprep.mubr.f32.mxu1 %v2018_v9  ;;  %10220 = vmatprep.subr.bf16.mxu0 %v17354_v22  ;;  %v17356_v9 = vld [vmem:[#allocation25_spill] sm:$0xff]  ;;  %v2040_v22 = vld [vmem:[%s16801_s1 + $0x1a0] sm:$0xff]  ;;  %v6845_v58 = vadd.f32 %v6844_v41, %v6843_v15  ;;  %v6846_v45 = vpop.f32.mrb[10].mxu1 }
 0x10f   :  { %2363 = vmatmul.mubr.f32.gmra.mrb[106].mxu0 %v2015_v60  ;;  %10252 = vmatprep.subr.bf16.mxu1 %v17355_v33  ;;  %v2042_v60 = vld [vmem:[%s16801_s1 + $0x1b0] sm:$0xff]  ;;  %v6790_v33 = vpop.f32.mrb[10].mxu0  ;;  %v17359_v41 = vld [vmem:[#allocation58_spill] sm:$0xff] }
 0x110   :  { %2468 = vmatmul.mubr.f32.gmra.mrb[114].mxu1 %v2017_v29  ;;  %10222 = vmatpush3.bf16.msra.mxu0 %v17356_v9  ;;  %v13962_v29 = vadd.f32 %v6845_v58, %v6789_v4  ;;  %v6791_v9 = vpop.f32.mrb[11].mxu0  ;;  %v17361_v58 = vld [vmem:[#allocation60_spill] sm:$0xff] }
 0x111   :  { %10254 = vmatpush3.bf16.msra.mxu1 %v17357_v34  ;;  %2367 = vmatprep.mubr.f32.mxu0 %v2041_v57  ;;  %v2068_v57 = vld [vmem:[%s16801_s1 + $0x280] sm:$0xff]  ;;  %v6792_v15 = vadd.f32 %v6791_v9, %v6790_v33  ;;  %v6847_v34 = vpop.f32.mrb[11].mxu1  ;;  %v2091_v33 = vld [vmem:[%s16801_s1 + $0x338] sm:$0xff] }
 0x112   :  { %2472 = vmatprep.mubr.f32.mxu1 %v2043_v46  ;;  %10224 = vmatprep.subr.bf16.mxu0 %v17358_v11  ;;  %v17360_v46 = vld [vmem:[#allocation29_spill] sm:$0xff]  ;;  %v2065_v11 = vld [vmem:[%s16801_s1 + $0x268] sm:$0xff]  ;;  %v6848_v4 = vadd.f32 %v6847_v34, %v6846_v45  ;;  %v17363_v34 = vld [vmem:[#allocation62_spill] sm:$0xff] }
 0x113   :  { %2368 = vmatmul.mubr.f32.gmra.mrb[108].mxu0 %v2040_v22  ;;  %10256 = vmatprep.subr.bf16.mxu1 %v17359_v41  ;;  %v2067_v22 = vld [vmem:[%s16801_s1 + $0x278] sm:$0xff]  ;;  %v6793_v41 = vpop.f32.mrb[12].mxu0 }
 0x114   :  { %2473 = vmatmul.mubr.f32.gmra.mrb[116].mxu1 %v2042_v60  ;;  %10226 = vmatpush3.bf16.msra.mxu0 %v17360_v46  ;;  %v13980_v9 = vadd.f32 %v6848_v4, %v6792_v15  ;;  %v6849_v60 = vpop.f32.mrb[12].mxu1  ;;  %v6794_v46 = vpop.f32.mrb[13].mxu0  ;;  %v17365_v4 = vld [vmem:[#allocation64_spill] sm:$0xff] }
 0x115   :  { %10258 = vmatpush3.bf16.msra.mxu1 %v17361_v58  ;;  %2372 = vmatprep.mubr.f32.mxu0 %v2066_v23  ;;  %v2093_v23 = vld [vmem:[%s16801_s1 + $0x348] sm:$0xff]  ;;  %v6795_v45 = vadd.f32 %v6794_v46, %v6793_v41  ;;  %v6850_v58 = vpop.f32.mrb[13].mxu1  ;;  %v2116_v41 = vld [vmem:[%s16801_s1 + $0x400] sm:$0xff] }
 0x116   :  { %2477 = vmatprep.mubr.f32.mxu1 %v2068_v57  ;;  %10228 = vmatprep.subr.bf16.mxu0 %v17362_v6  ;;  %v17364_v57 = vld [vmem:[#allocation33_spill] sm:$0xff]  ;;  %v2090_v6 = vld [vmem:[%s16801_s1 + $0x330] sm:$0xff]  ;;  %v6851_v15 = vadd.f32 %v6850_v58, %v6849_v60  ;;  %v17367_v58 = vld [vmem:[#allocation66_spill] sm:$0xff] }
 0x117   :  { %2373 = vmatmul.mubr.f32.gmra.mrb[110].mxu0 %v2065_v11  ;;  %10260 = vmatprep.subr.bf16.mxu1 %v17363_v34  ;;  %v2092_v11 = vld [vmem:[%s16801_s1 + $0x340] sm:$0xff]  ;;  %v6796_v34 = vpop.f32.mrb[14].mxu0 }
 0x118   :  { %2478 = vmatmul.mubr.f32.gmra.mrb[118].mxu1 %v2067_v22  ;;  %10230 = vmatpush3.bf16.msra.mxu0 %v17364_v57  ;;  %v13998_v46 = vadd.f32 %v6851_v15, %v6795_v45  ;;  %v6852_v22 = vpop.f32.mrb[14].mxu1  ;;  %v6797_v57 = vpop.f32.mrb[15].mxu0  ;;  %v17369_v15 = vld [vmem:[#allocation68_spill] sm:$0xff] }
 0x119   :  { %10262 = vmatpush3.bf16.msra.mxu1 %v17365_v4  ;;  %2377 = vmatprep.mubr.f32.mxu0 %v2091_v33  ;;  %v2118_v33 = vld [vmem:[%s16801_s1 + $0x410] sm:$0xff]  ;;  %v6798_v60 = vadd.f32 %v6797_v57, %v6796_v34  ;;  %v6853_v4 = vpop.f32.mrb[15].mxu1  ;;  %v2141_v34 = vld [vmem:[%s16801_s1 + $0x4c8] sm:$0xff] }
 0x11a   :  { %2482 = vmatprep.mubr.f32.mxu1 %v2093_v23  ;;  %10232 = vmatprep.subr.bf16.mxu0 %v17366_v24  ;;  %v17368_v23 = vld [vmem:[#allocation37_spill] sm:$0xff]  ;;  %v6854_v45 = vadd.f32 %v6853_v4, %v6852_v22  ;;  %v17371_v4 = vld [vmem:[#allocation70_spill] sm:$0xff]  ;;  %v6943_v22 = vpop.f32.mrb[16].mxu1 }
 0x11b   :  { %2378 = vmatmul.mubr.f32.gmra.mrb[112].mxu0 %v2090_v6  ;;  %10264 = vmatprep.subr.bf16.mxu1 %v17367_v58  ;;  %v2115_v24 = vld [vmem:[%s16801_s1 + $0x3f8] sm:$0xff]  ;;  %v2117_v6 = vld [vmem:[%s16801_s1 + $0x408] sm:$0xff]  ;;  %v6887_v58 = vpop.f32.mrb[16].mxu0 }
 0x11c   :  { %2483 = vmatmul.mubr.f32.gmra.mrb[120].mxu1 %v2092_v11  ;;  %10234 = vmatpush3.bf16.msra.mxu0 %v17368_v23  ;;  %v14016_v57 = vadd.f32 %v6854_v45, %v6798_v60  ;;  %v6888_v11 = vpop.f32.mrb[17].mxu0  ;;  %v2140_v23 = vld [vmem:[%s16801_s1 + $0x4c0] sm:$0xff]  ;;  %v17373_v60 = vld [vmem:[#allocation72_spill] sm:$0xff] }
 0x11d   :  { %10266 = vmatpush3.bf16.msra.mxu1 %v17369_v15  ;;  %2382 = vmatprep.mubr.f32.mxu0 %v2116_v41  ;;  %v2143_v41 = vld [vmem:[%s16801_s1 + $0x4d8] sm:$0xff]  ;;  %v6889_v15 = vadd.f32 %v6888_v11, %v6887_v58  ;;  %v6890_v54 = vpop.f32.mrb[18].mxu0  ;;  %v17374_v58 = vld [vmem:[#allocation43_spill] sm:$0xff] }
 0x11e   :  { %2487 = vmatprep.mubr.f32.mxu1 %v2118_v33  ;;  %10236 = vmatprep.subr.bf16.mxu0 %v17370_v55  ;;  %v17372_v33 = vld [vmem:[#allocation41_spill] sm:$0xff]  ;;  %v6944_v55 = vpop.f32.mrb[17].mxu1  ;;  %v6891_v11 = vpop.f32.mrb[19].mxu0 }
 0x11f   :  { %2383 = vmatmul.mubr.f32.gmra.mrb[114].mxu0 %v2115_v24  ;;  %10268 = vmatprep.subr.bf16.mxu1 %v17371_v4  ;;  %v6945_v45 = vadd.f32 %v6944_v55, %v6943_v22  ;;  %v2142_v24 = vld [vmem:[%s16801_s1 + $0x4d0] sm:$0xff]  ;;  %v900_v4 = vadd.f32 %v6889_v15, %v13900_v62  ;;  %v6946_v55 = vpop.f32.mrb[18].mxu1  ;;  %v6892_v62 = vadd.f32 %v6891_v11, %v6890_v54  ;;  %v17376_v15 = vld [vmem:[#allocation45_spill] sm:$0xff]  ;;  %v17378_v54 = vld [vmem:[#allocation47_spill] sm:$0xff] }
 0x120   :  { %2488 = vmatmul.mubr.f32.gmra.mrb[122].mxu1 %v2117_v6  ;;  %10238 = vmatpush3.bf16.msra.mxu0 %v17372_v33  ;;  %v2166_v6 = vld [vmem:[%s16801_s1 + $0x590] sm:$0xff]  ;;  %v17375_v33 = vld [vmem:[#allocation74_spill] sm:$0xff] }
 0x121   :  { %10270 = vmatpush3.bf16.msra.mxu1 %v17373_v60  ;;  %2387 = vmatprep.mubr.f32.mxu0 %v2141_v34  ;;  %v2168_v34 = vld [vmem:[%s16801_s1 + $0x5a0] sm:$0xff]  ;;  %v14039_v22 = vadd.f32 %v6945_v45, %v900_v4  ;;  %v2165_v60 = vld [vmem:[%s16801_s1 + $0x588] sm:$0xff]  ;;  %v905_v4 = vadd.f32 %v6892_v62, %v13912_v49  ;;  %v6893_v45 = vpop.f32.mrb[20].mxu0 }
 0x122   :  { %2492 = vmatprep.mubr.f32.mxu1 %v2143_v41  ;;  %10240 = vmatprep.subr.bf16.mxu0 %v17374_v58  ;;  %v6947_v41 = vpop.f32.mrb[19].mxu1  ;;  %v17377_v58 = vld [vmem:[#allocation76_spill] sm:$0xff]  ;;  %v6894_v11 = vpop.f32.mrb[21].mxu0 }
 0x123   :  { %2388 = vmatmul.mubr.f32.gmra.mrb[116].mxu0 %v2140_v23  ;;  %10272 = vmatprep.subr.bf16.mxu1 %v17375_v33  ;;  %v6948_v23 = vadd.f32 %v6947_v41, %v6946_v55  ;;  %v2167_v33 = vld [vmem:[%s16801_s1 + $0x598] sm:$0xff]  ;;  %v6949_v55 = vpop.f32.mrb[20].mxu1  ;;  %v6895_v49 = vadd.f32 %v6894_v11, %v6893_v45  ;;  %v2020_v45 = vld [vmem:[%s16801_s1 + $0x100] sm:$0xff] }
 0x124   :  { %2493 = vmatmul.mubr.f32.gmra.mrb[124].mxu1 %v2142_v24  ;;  %10242 = vmatpush3.bf16.msra.mxu0 %v17376_v15  ;;  %v1995_v24 = vld [vmem:[%s16801_s1 + $0x38] sm:$0xff]  ;;  %v17379_v15 = vld [vmem:[#allocation78_spill] sm:$0xff]  ;;  %v6950_v62 = vpop.f32.mrb[21].mxu1 }
 0x125   :  { %10274 = vmatpush3.bf16.msra.mxu1 %v17377_v58  ;;  %2392 = vmatprep.mubr.f32.mxu0 %v2166_v6  ;;  %v1997_v6 = vld [vmem:[%s16801_s1 + $0x48] sm:$0xff]  ;;  %v14058_v41 = vadd.f32 %v6948_v23, %v905_v4  ;;  %v1994_v58 = vld [vmem:[%s16801_s1 + $0x30] sm:$0xff]  ;;  %v910_v23 = vadd.f32 %v6895_v49, %v13927_v40  ;;  %v6896_v4 = vpop.f32.mrb[22].mxu0 }
 0x126   :  { %2497 = vmatprep.mubr.f32.mxu1 %v2168_v34  ;;  %10244 = vmatprep.subr.bf16.mxu0 %v17378_v54  ;;  %v17380_v34 = vld [vmem:[#allocation49_spill] sm:$0xff]  ;;  %v17381_v54 = vld [vmem:[#allocation80_spill] sm:$0xff]  ;;  %v6897_v11 = vpop.f32.mrb[23].mxu0 }
 0x127   :  { %2393 = vmatmul.mubr.f32.gmra.mrb[118].mxu0 %v2165_v60  ;;  %10276 = vmatprep.subr.bf16.mxu1 %v17379_v15  ;;  %v6951_v60 = vadd.f32 %v6950_v62, %v6949_v55  ;;  %v1996_v15 = vld [vmem:[%s16801_s1 + $0x40] sm:$0xff]  ;;  %v6952_v55 = vpop.f32.mrb[22].mxu1  ;;  %v6898_v40 = vadd.f32 %v6897_v11, %v6896_v4  ;;  %v2045_v4 = vld [vmem:[%s16801_s1 + $0x1c8] sm:$0xff] }
 0x128   :  { %2498 = vmatmul.mubr.f32.gmra.mrb[126].mxu1 %v2167_v33  ;;  %10246 = vmatpush3.bf16.msra.mxu0 %v17380_v34  ;;  %v17382_v33 = vld [vmem:[#allocation51_spill] sm:$0xff]  ;;  %v17383_v34 = vld [vmem:[#allocation82_spill] sm:$0xff]  ;;  %v6953_v49 = vpop.f32.mrb[23].mxu1 }
 0x129   :  { %10278 = vmatpush3.bf16.msra.mxu1 %v17381_v54  ;;  %2567 = vmatprep.mubr.f32.mxu0 %v1995_v24  ;;  %v2022_v24 = vld [vmem:[%s16801_s1 + $0x110] sm:$0xff]  ;;  %v14077_v62 = vadd.f32 %v6951_v60, %v910_v23  ;;  %v2019_v54 = vld [vmem:[%s16801_s1 + $0xf8] sm:$0xff]  ;;  %v915_v60 = vadd.f32 %v6898_v40, %v13944_v50  ;;  %v6899_v23 = vpop.f32.mrb[24].mxu0 }
 0x12a   :  { %2672 = vmatprep.mubr.f32.mxu1 %v1997_v6  ;;  %10280 = vmatprep.subr.bf16.mxu0 %v17382_v33  ;;  %v17384_v6 = vld [vmem:[#allocation53_spill] sm:$0xff]  ;;  %v17385_v33 = vld [vmem:[#allocation84_spill] sm:$0xff]  ;;  %v6900_v11 = vpop.f32.mrb[25].mxu0 }
 0x12b   :  { %2568 = vmatmul.mubr.f32.vlgmr.msra.gmra.mrb[120].mxu0 %v1994_v58  ;;  %10312 = vmatprep.subr.bf16.mxu1 %v17383_v34  ;;  %v6954_v58 = vadd.f32 %v6953_v49, %v6952_v55  ;;  %v2021_v34 = vld [vmem:[%s16801_s1 + $0x108] sm:$0xff]  ;;  %v6955_v55 = vpop.f32.mrb[24].mxu1  ;;  %v6901_v50 = vadd.f32 %v6900_v11, %v6899_v23  ;;  %v2070_v23 = vld [vmem:[%s16801_s1 + $0x290] sm:$0xff] }
 0x12c   :  { %2673 = vmatmul.mubr.f32.vlgmr.msra.gmra.mrb[128].mxu1 %v1996_v15  ;;  %10282 = vmatpush3.bf16.msra.mxu0 %v17384_v6  ;;  %v17386_v15 = vld [vmem:[#allocation55_spill] sm:$0xff]  ;;  %v17387_v6 = vld [vmem:[#allocation86_spill] sm:$0xff]  ;;  %v6956_v40 = vpop.f32.mrb[25].mxu1 }
 0x12d   :  { %10314 = vmatpush3.bf16.msra.mxu1 %v17385_v33  ;;  %2572 = vmatprep.mubr.f32.mxu0 %v2020_v45  ;;  %v2047_v45 = vld [vmem:[%s16801_s1 + $0x1d8] sm:$0xff]  ;;  %v14096_v49 = vadd.f32 %v6954_v58, %v915_v60  ;;  %v2044_v33 = vld [vmem:[%s16801_s1 + $0x1c0] sm:$0xff]  ;;  %v920_v58 = vadd.f32 %v6901_v50, %v13962_v29  ;;  %v6902_v60 = vpop.f32.mrb[26].mxu0 }
 0x12e   :  { %2677 = vmatprep.mubr.f32.mxu1 %v2022_v24  ;;  %10284 = vmatprep.subr.bf16.mxu0 %v17386_v15  ;;  %v17388_v24 = vld [vmem:[#allocation57_spill] sm:$0xff]  ;;  %v17389_v15 = vld [vmem:[#allocation88_spill] sm:$0xff]  ;;  %v6903_v11 = vpop.f32.mrb[27].mxu0 }
 0x12f   :  { %2573 = vmatmul.mubr.f32.gmra.mrb[122].mxu0 %v2019_v54  ;;  %10316 = vmatprep.subr.bf16.mxu1 %v17387_v6  ;;  %v6957_v54 = vadd.f32 %v6956_v40, %v6955_v55  ;;  %v2046_v6 = vld [vmem:[%s16801_s1 + $0x1d0] sm:$0xff]  ;;  %v6958_v55 = vpop.f32.mrb[26].mxu1  ;;  %v6904_v29 = vadd.f32 %v6903_v11, %v6902_v60  ;;  %v2095_v60 = vld [vmem:[%s16801_s1 + $0x358] sm:$0xff] }
 0x130   :  { %2678 = vmatmul.mubr.f32.gmra.mrb[130].mxu1 %v2021_v34  ;;  %10286 = vmatpush3.bf16.msra.mxu0 %v17388_v24  ;;  %v17390_v34 = vld [vmem:[#allocation59_spill] sm:$0xff]  ;;  %v17391_v24 = vld [vmem:[#allocation90_spill] sm:$0xff]  ;;  %v6959_v50 = vpop.f32.mrb[27].mxu1 }
 0x131   :  { %10318 = vmatpush3.bf16.msra.mxu1 %v17389_v15  ;;  %2577 = vmatprep.mubr.f32.mxu0 %v2045_v4  ;;  %v2072_v4 = vld [vmem:[%s16801_s1 + $0x2a0] sm:$0xff]  ;;  %v14115_v40 = vadd.f32 %v6957_v54, %v920_v58  ;;  %v2069_v15 = vld [vmem:[%s16801_s1 + $0x288] sm:$0xff]  ;;  %v925_v54 = vadd.f32 %v6904_v29, %v13980_v9  ;;  %v6905_v58 = vpop.f32.mrb[28].mxu0 }
 0x132   :  { %2682 = vmatprep.mubr.f32.mxu1 %v2047_v45  ;;  %10288 = vmatprep.subr.bf16.mxu0 %v17390_v34  ;;  %v17392_v45 = vld [vmem:[#allocation61_spill] sm:$0xff]  ;;  %v17393_v34 = vld [vmem:[#allocation92_spill] sm:$0xff]  ;;  %v6906_v11 = vpop.f32.mrb[29].mxu0 }
 0x133   :  { %2578 = vmatmul.mubr.f32.gmra.mrb[124].mxu0 %v2044_v33  ;;  %10320 = vmatprep.subr.bf16.mxu1 %v17391_v24  ;;  %v6960_v33 = vadd.f32 %v6959_v50, %v6958_v55  ;;  %v2071_v24 = vld [vmem:[%s16801_s1 + $0x298] sm:$0xff]  ;;  %v6961_v55 = vpop.f32.mrb[28].mxu1  ;;  %v6907_v9 = vadd.f32 %v6906_v11, %v6905_v58  ;;  %v2120_v58 = vld [vmem:[%s16801_s1 + $0x420] sm:$0xff] }
 0x134   :  { %2683 = vmatmul.mubr.f32.gmra.mrb[132].mxu1 %v2046_v6  ;;  %10290 = vmatpush3.bf16.msra.mxu0 %v17392_v45  ;;  %v17394_v6 = vld [vmem:[#allocation63_spill] sm:$0xff]  ;;  %v17395_v45 = vld [vmem:[#allocation94_spill] sm:$0xff]  ;;  %v6962_v29 = vpop.f32.mrb[29].mxu1 }
 0x135   :  { %10322 = vmatpush3.bf16.msra.mxu1 %v17393_v34  ;;  %2582 = vmatprep.mubr.f32.mxu0 %v2070_v23  ;;  %v2097_v23 = vld [vmem:[%s16801_s1 + $0x368] sm:$0xff]  ;;  %v14134_v50 = vadd.f32 %v6960_v33, %v925_v54  ;;  %v2094_v34 = vld [vmem:[%s16801_s1 + $0x350] sm:$0xff]  ;;  %v930_v33 = vadd.f32 %v6907_v9, %v13998_v46  ;;  %v6908_v54 = vpop.f32.mrb[30].mxu0 }
 0x136   :  { %2687 = vmatprep.mubr.f32.mxu1 %v2072_v4  ;;  %10292 = vmatprep.subr.bf16.mxu0 %v17394_v6  ;;  %v17396_v4 = vld [vmem:[#allocation65_spill] sm:$0xff]  ;;  %v17397_v6 = vld [vmem:[#allocation96_spill] sm:$0xff]  ;;  %v6909_v11 = vpop.f32.mrb[31].mxu0 }
 0x137   :  { %2583 = vmatmul.mubr.f32.gmra.mrb[126].mxu0 %v2069_v15  ;;  %10324 = vmatprep.subr.bf16.mxu1 %v17395_v45  ;;  %v6963_v15 = vadd.f32 %v6962_v29, %v6961_v55  ;;  %v2096_v45 = vld [vmem:[%s16801_s1 + $0x360] sm:$0xff]  ;;  %v6964_v55 = vpop.f32.mrb[30].mxu1  ;;  %v6910_v46 = vadd.f32 %v6909_v11, %v6908_v54  ;;  %v2145_v54 = vld [vmem:[%s16801_s1 + $0x4e8] sm:$0xff] }
 0x138   :  { %2688 = vmatmul.mubr.f32.gmra.mrb[134].mxu1 %v2071_v24  ;;  %10294 = vmatpush3.bf16.msra.mxu0 %v17396_v4  ;;  %v17398_v24 = vld [vmem:[#allocation67_spill] sm:$0xff]  ;;  %v17399_v4 = vld [vmem:[#allocation98_spill] sm:$0xff]  ;;  %v6965_v9 = vpop.f32.mrb[31].mxu1 }
 0x139   :  { %10326 = vmatpush3.bf16.msra.mxu1 %v17397_v6  ;;  %2587 = vmatprep.mubr.f32.mxu0 %v2095_v60  ;;  %v2122_v60 = vld [vmem:[%s16801_s1 + $0x430] sm:$0xff]  ;;  %v14153_v29 = vadd.f32 %v6963_v15, %v930_v33  ;;  %v2119_v6 = vld [vmem:[%s16801_s1 + $0x418] sm:$0xff]  ;;  %v935_v15 = vadd.f32 %v6910_v46, %v14016_v57  ;;  %v6999_v33 = vpop.f32.mrb[32].mxu0 }
 0x13a   :  { %2692 = vmatprep.mubr.f32.mxu1 %v2097_v23  ;;  %10296 = vmatprep.subr.bf16.mxu0 %v17398_v24  ;;  %v17400_v23 = vld [vmem:[#allocation69_spill] sm:$0xff]  ;;  %v17401_v24 = vld [vmem:[#allocation100_spill] sm:$0xff]  ;;  %v7000_v11 = vpop.f32.mrb[33].mxu0 }
 0x13b   :  { %2588 = vmatmul.mubr.f32.gmra.mrb[128].mxu0 %v2094_v34  ;;  %10328 = vmatprep.subr.bf16.mxu1 %v17399_v4  ;;  %v6966_v34 = vadd.f32 %v6965_v9, %v6964_v55  ;;  %v2121_v4 = vld [vmem:[%s16801_s1 + $0x428] sm:$0xff]  ;;  %v7055_v55 = vpop.f32.mrb[32].mxu1  ;;  %v7001_v57 = vadd.f32 %v7000_v11, %v6999_v33  ;;  %v2170_v33 = vld [vmem:[%s16801_s1 + $0x5b0] sm:$0xff] }
 0x13c   :  { %2693 = vmatmul.mubr.f32.gmra.mrb[136].mxu1 %v2096_v45  ;;  %10298 = vmatpush3.bf16.msra.mxu0 %v17400_v23  ;;  %v17402_v45 = vld [vmem:[#allocation71_spill] sm:$0xff]  ;;  %v17403_v23 = vld [vmem:[#allocation102_spill] sm:$0xff]  ;;  %v7056_v46 = vpop.f32.mrb[33].mxu1 }
 0x13d   :  { %10330 = vmatpush3.bf16.msra.mxu1 %v17401_v24  ;;  %2592 = vmatprep.mubr.f32.mxu0 %v2120_v58  ;;  %v2147_v58 = vld [vmem:[%s16801_s1 + $0x4f8] sm:$0xff]  ;;  %v14172_v9 = vadd.f32 %v6966_v34, %v935_v15  ;;  %v2144_v24 = vld [vmem:[%s16801_s1 + $0x4e0] sm:$0xff]  ;;  %v1110_v34 = vadd.f32 %v7001_v57, %v14039_v22  ;;  %v7002_v15 = vpop.f32.mrb[34].mxu0 }
 0x13e   :  { %2697 = vmatprep.mubr.f32.mxu1 %v2122_v60  ;;  %10300 = vmatprep.subr.bf16.mxu0 %v17402_v45  ;;  %v17404_v60 = vld [vmem:[#allocation73_spill] sm:$0xff]  ;;  %v17405_v45 = vld [vmem:[#allocation104_spill] sm:$0xff]  ;;  %v7003_v11 = vpop.f32.mrb[35].mxu0 }
 0x13f   :  { %2593 = vmatmul.mubr.f32.gmra.mrb[130].mxu0 %v2119_v6  ;;  %10332 = vmatprep.subr.bf16.mxu1 %v17403_v23  ;;  %v7057_v6 = vadd.f32 %v7056_v46, %v7055_v55  ;;  %v2146_v23 = vld [vmem:[%s16801_s1 + $0x4f0] sm:$0xff]  ;;  %v7058_v55 = vpop.f32.mrb[34].mxu1  ;;  %v7004_v22 = vadd.f32 %v7003_v11, %v7002_v15  ;;  %v1999_v15 = vld [vmem:[%s16801_s1 + $0x58] sm:$0xff] }
 0x140   :  { %2698 = vmatmul.mubr.f32.gmra.mrb[138].mxu1 %v2121_v4  ;;  %10302 = vmatpush3.bf16.msra.mxu0 %v17404_v60  ;;  %v17406_v4 = vld [vmem:[#allocation75_spill] sm:$0xff]  ;;  %v17407_v60 = vld [vmem:[#allocation106_spill] sm:$0xff]  ;;  %v7059_v57 = vpop.f32.mrb[35].mxu1 }
 0x141   :  { %10334 = vmatpush3.bf16.msra.mxu1 %v17405_v45  ;;  %2597 = vmatprep.mubr.f32.mxu0 %v2145_v54  ;;  %v2172_v54 = vld [vmem:[%s16801_s1 + $0x5c0] sm:$0xff]  ;;  %v14191_v46 = vadd.f32 %v7057_v6, %v1110_v34  ;;  %v2169_v45 = vld [vmem:[%s16801_s1 + $0x5a8] sm:$0xff]  ;;  %v1115_v6 = vadd.f32 %v7004_v22, %v14058_v41  ;;  %v7005_v34 = vpop.f32.mrb[36].mxu0 }
 0x142   :  { %2702 = vmatprep.mubr.f32.mxu1 %v2147_v58  ;;  %10304 = vmatprep.subr.bf16.mxu0 %v17406_v4  ;;  %v17408_v58 = vld [vmem:[#allocation77_spill] sm:$0xff]  ;;  %v17409_v4 = vld [vmem:[#allocation108_spill] sm:$0xff]  ;;  %v7006_v11 = vpop.f32.mrb[37].mxu0 }
 0x143   :  { %2598 = vmatmul.mubr.f32.gmra.mrb[132].mxu0 %v2144_v24  ;;  %10336 = vmatprep.subr.bf16.mxu1 %v17407_v60  ;;  %v7060_v24 = vadd.f32 %v7059_v57, %v7058_v55  ;;  %v2171_v60 = vld [vmem:[%s16801_s1 + $0x5b8] sm:$0xff]  ;;  %v7061_v55 = vpop.f32.mrb[36].mxu1  ;;  %v7007_v41 = vadd.f32 %v7006_v11, %v7005_v34  ;;  %v2024_v34 = vld [vmem:[%s16801_s1 + $0x120] sm:$0xff] }
 0x144   :  { %2703 = vmatmul.mubr.f32.gmra.mrb[140].mxu1 %v2146_v23  ;;  %10306 = vmatpush3.bf16.msra.mxu0 %v17408_v58  ;;  %v17410_v23 = vld [vmem:[#allocation79_spill] sm:$0xff]  ;;  %v17411_v58 = vld [vmem:[#allocation110_spill] sm:$0xff]  ;;  %v7062_v22 = vpop.f32.mrb[37].mxu1 }
 0x145   :  { %10338 = vmatpush3.bf16.msra.mxu1 %v17409_v4  ;;  %2602 = vmatprep.mubr.f32.mxu0 %v2170_v33  ;;  %v2001_v33 = vld [vmem:[%s16801_s1 + $0x68] sm:$0xff]  ;;  %v14210_v57 = vadd.f32 %v7060_v24, %v1115_v6  ;;  %v1998_v4 = vld [vmem:[%s16801_s1 + $0x50] sm:$0xff]  ;;  %v1120_v24 = vadd.f32 %v7007_v41, %v14077_v62  ;;  %v7008_v6 = vpop.f32.mrb[38].mxu0 }
 0x146   :  { %2707 = vmatprep.mubr.f32.mxu1 %v2172_v54  ;;  %10308 = vmatprep.subr.bf16.mxu0 %v17410_v23  ;;  %v17412_v54 = vld [vmem:[#allocation81_spill] sm:$0xff]  ;;  %v17413_v23 = vld [vmem:[#allocation112_spill] sm:$0xff]  ;;  %v7009_v11 = vpop.f32.mrb[39].mxu0 }
 0x147   :  { %2603 = vmatmul.mubr.f32.gmra.mrb[134].mxu0 %v2169_v45  ;;  %10340 = vmatprep.subr.bf16.mxu1 %v17411_v58  ;;  %v7063_v45 = vadd.f32 %v7062_v22, %v7061_v55  ;;  %v2000_v58 = vld [vmem:[%s16801_s1 + $0x60] sm:$0xff]  ;;  %v7064_v55 = vpop.f32.mrb[38].mxu1  ;;  %v7010_v62 = vadd.f32 %v7009_v11, %v7008_v6  ;;  %v2049_v6 = vld [vmem:[%s16801_s1 + $0x1e8] sm:$0xff] }
 0x148   :  { %2708 = vmatmul.mubr.f32.gmra.mrb[142].mxu1 %v2171_v60  ;;  %10310 = vmatpush3.bf16.msra.mxu0 %v17412_v54  ;;  %v17414_v60 = vld [vmem:[#allocation83_spill] sm:$0xff]  ;;  %v17415_v54 = vld [vmem:[#allocation114_spill] sm:$0xff]  ;;  %v7065_v41 = vpop.f32.mrb[39].mxu1 }
 0x149   :  { %10342 = vmatpush3.bf16.msra.mxu1 %v17413_v23  ;;  %2777 = vmatprep.mubr.f32.mxu0 %v1999_v15  ;;  %v2026_v15 = vld [vmem:[%s16801_s1 + $0x130] sm:$0xff]  ;;  %v14229_v22 = vadd.f32 %v7063_v45, %v1120_v24  ;;  %v2023_v23 = vld [vmem:[%s16801_s1 + $0x118] sm:$0xff]  ;;  %v1125_v45 = vadd.f32 %v7010_v62, %v14096_v49  ;;  %v7011_v24 = vpop.f32.mrb[40].mxu0 }
 0x14a   :  { %2882 = vmatprep.mubr.f32.mxu1 %v2001_v33  ;;  %10344 = vmatprep.subr.bf16.mxu0 %v17414_v60  ;;  %v17416_v33 = vld [vmem:[#allocation85_spill] sm:$0xff]  ;;  %v17417_v60 = vld [vmem:[#allocation116_spill] sm:$0xff]  ;;  %v7012_v11 = vpop.f32.mrb[41].mxu0 }
 0x14b   :  { %2778 = vmatmul.mubr.f32.vlgmr.msra.gmra.mrb[136].mxu0 %v1998_v4  ;;  %10376 = vmatprep.subr.bf16.mxu1 %v17415_v54  ;;  %v7066_v4 = vadd.f32 %v7065_v41, %v7064_v55  ;;  %v2025_v54 = vld [vmem:[%s16801_s1 + $0x128] sm:$0xff]  ;;  %v7067_v55 = vpop.f32.mrb[40].mxu1  ;;  %v7013_v49 = vadd.f32 %v7012_v11, %v7011_v24  ;;  %v2074_v24 = vld [vmem:[%s16801_s1 + $0x2b0] sm:$0xff] }
 0x14c   :  { %2883 = vmatmul.mubr.f32.vlgmr.msra.gmra.mrb[144].mxu1 %v2000_v58  ;;  %10346 = vmatpush3.bf16.msra.mxu0 %v17416_v33  ;;  %v17418_v58 = vld [vmem:[#allocation87_spill] sm:$0xff]  ;;  %v17419_v33 = vld [vmem:[#allocation118_spill] sm:$0xff]  ;;  %v7068_v62 = vpop.f32.mrb[41].mxu1 }
 0x14d   :  { %10378 = vmatpush3.bf16.msra.mxu1 %v17417_v60  ;;  %2782 = vmatprep.mubr.f32.mxu0 %v2024_v34  ;;  %v2051_v34 = vld [vmem:[%s16801_s1 + $0x1f8] sm:$0xff]  ;;  %v14248_v41 = vadd.f32 %v7066_v4, %v1125_v45  ;;  %v2048_v60 = vld [vmem:[%s16801_s1 + $0x1e0] sm:$0xff]  ;;  %v1130_v4 = vadd.f32 %v7013_v49, %v14115_v40 }
 0x14e   :  { %2887 = vmatprep.mubr.f32.mxu1 %v2026_v15  ;;  %10348 = vmatprep.subr.bf16.mxu0 %v17418_v58  ;;  %v17420_v15 = vld [vmem:[#allocation89_spill] sm:$0xff]  ;;  %v17421_v58 = vld [vmem:[#allocation120_spill] sm:$0xff]  ;;  %v7014_v45 = vpop.f32.mrb[42].mxu0 }
 0x14f   :  { %2783 = vmatmul.mubr.f32.gmra.mrb[138].mxu0 %v2023_v23  ;;  %10380 = vmatprep.subr.bf16.mxu1 %v17419_v33  ;;  %v7069_v23 = vadd.f32 %v7068_v62, %v7067_v55  ;;  %v2050_v33 = vld [vmem:[%s16801_s1 + $0x1f0] sm:$0xff]  ;;  %v7015_v11 = vpop.f32.mrb[43].mxu0  ;;  %v7070_v55 = vpop.f32.mrb[42].mxu1 }
 0x150   :  { %2888 = vmatmul.mubr.f32.gmra.mrb[146].mxu1 %v2025_v54  ;;  %10350 = vmatpush3.bf16.msra.mxu0 %v17420_v15  ;;  %v17422_v54 = vld [vmem:[#allocation91_spill] sm:$0xff]  ;;  %v17423_v15 = vld [vmem:[#allocation122_spill] sm:$0xff]  ;;  %v7016_v40 = vadd.f32 %v7015_v11, %v7014_v45  ;;  %v7071_v49 = vpop.f32.mrb[43].mxu1  ;;  %v2099_v45 = vld [vmem:[%s16801_s1 + $0x378] sm:$0xff] }
 0x151   :  { %10382 = vmatpush3.bf16.msra.mxu1 %v17421_v58  ;;  %2787 = vmatprep.mubr.f32.mxu0 %v2049_v6  ;;  %v2076_v6 = vld [vmem:[%s16801_s1 + $0x2c0] sm:$0xff]  ;;  %v14267_v62 = vadd.f32 %v7069_v23, %v1130_v4  ;;  %v2073_v58 = vld [vmem:[%s16801_s1 + $0x2a8] sm:$0xff] }
 0x152   :  { %2892 = vmatprep.mubr.f32.mxu1 %v2051_v34  ;;  %10352 = vmatprep.subr.bf16.mxu0 %v17422_v54  ;;  %v17424_v34 = vld [vmem:[#allocation93_spill] sm:$0xff]  ;;  %v17425_v54 = vld [vmem:[#allocation124_spill] sm:$0xff]  ;;  %v1135_v23 = vadd.f32 %v7016_v40, %v14134_v50  ;;  %v7017_v4 = vpop.f32.mrb[44].mxu0 }
 0x153   :  { %2788 = vmatmul.mubr.f32.gmra.mrb[140].mxu0 %v2048_v60  ;;  %10384 = vmatprep.subr.bf16.mxu1 %v17423_v15  ;;  %v7072_v60 = vadd.f32 %v7071_v49, %v7070_v55  ;;  %v2075_v15 = vld [vmem:[%s16801_s1 + $0x2b8] sm:$0xff]  ;;  %v7018_v11 = vpop.f32.mrb[45].mxu0  ;;  %v7073_v55 = vpop.f32.mrb[44].mxu1 }
 0x154   :  { %2893 = vmatmul.mubr.f32.gmra.mrb[148].mxu1 %v2050_v33  ;;  %10354 = vmatpush3.bf16.msra.mxu0 %v17424_v34  ;;  %v17426_v33 = vld [vmem:[#allocation95_spill] sm:$0xff]  ;;  %v17427_v34 = vld [vmem:[#allocation126_spill] sm:$0xff]  ;;  %v7019_v50 = vadd.f32 %v7018_v11, %v7017_v4  ;;  %v7074_v40 = vpop.f32.mrb[45].mxu1 }
 0x155   :  { %10386 = vmatpush3.bf16.msra.mxu1 %v17425_v54  ;;  %2792 = vmatprep.mubr.f32.mxu0 %v2074_v24  ;;  %v2101_v24 = vld [vmem:[%s16801_s1 + $0x388] sm:$0xff]  ;;  %v14286_v49 = vadd.f32 %v7072_v60, %v1135_v23  ;;  %v2098_v54 = vld [vmem:[%s16801_s1 + $0x370] sm:$0xff]  ;;  %v2124_v4 = vld [vmem:[%s16801_s1 + $0x440] sm:$0xff] }
 0x156   :  { %2897 = vmatprep.mubr.f32.mxu1 %v2076_v6  ;;  %10356 = vmatprep.subr.bf16.mxu0 %v17426_v33  ;;  %v17428_v6 = vld [vmem:[#allocation97_spill] sm:$0xff]  ;;  %v17429_v33 = vld [vmem:[#allocation128_spill] sm:$0xff]  ;;  %v1140_v60 = vadd.f32 %v7019_v50, %v14153_v29  ;;  %v7020_v23 = vpop.f32.mrb[46].mxu0 }
 0x157   :  { %2793 = vmatmul.mubr.f32.gmra.mrb[142].mxu0 %v2073_v58  ;;  %10388 = vmatprep.subr.bf16.mxu1 %v17427_v34  ;;  %v7075_v58 = vadd.f32 %v7074_v40, %v7073_v55  ;;  %v2100_v34 = vld [vmem:[%s16801_s1 + $0x380] sm:$0xff]  ;;  %v7021_v11 = vpop.f32.mrb[47].mxu0  ;;  %v7076_v55 = vpop.f32.mrb[46].mxu1 }
 0x158   :  { %2898 = vmatmul.mubr.f32.gmra.mrb[150].mxu1 %v2075_v15  ;;  %10358 = vmatpush3.bf16.msra.mxu0 %v17428_v6  ;;  %v17430_v15 = vld [vmem:[#allocation99_spill] sm:$0xff]  ;;  %v17431_v6 = vld [vmem:[#allocation130_spill] sm:$0xff]  ;;  %v7022_v29 = vadd.f32 %v7021_v11, %v7020_v23  ;;  %v7077_v50 = vpop.f32.mrb[47].mxu1 }
 0x159   :  { %10390 = vmatpush3.bf16.msra.mxu1 %v17429_v33  ;;  %2797 = vmatprep.mubr.f32.mxu0 %v2099_v45  ;;  %v2126_v45 = vld [vmem:[%s16801_s1 + $0x450] sm:$0xff]  ;;  %v14305_v40 = vadd.f32 %v7075_v58, %v1140_v60  ;;  %v2123_v33 = vld [vmem:[%s16801_s1 + $0x438] sm:$0xff]  ;;  %v2149_v23 = vld [vmem:[%s16801_s1 + $0x508] sm:$0xff] }
 0x15a   :  { %2902 = vmatprep.mubr.f32.mxu1 %v2101_v24  ;;  %10360 = vmatprep.subr.bf16.mxu0 %v17430_v15  ;;  %v17432_v24 = vld [vmem:[#allocation101_spill] sm:$0xff]  ;;  %v17433_v15 = vld [vmem:[#allocation132_spill] sm:$0xff]  ;;  %v1145_v58 = vadd.f32 %v7022_v29, %v14172_v9  ;;  %v7111_v60 = vpop.f32.mrb[48].mxu0 }
 0x15b   :  { %2798 = vmatmul.mubr.f32.gmra.mrb[144].mxu0 %v2098_v54  ;;  %10392 = vmatprep.subr.bf16.mxu1 %v17431_v6  ;;  %v7078_v54 = vadd.f32 %v7077_v50, %v7076_v55  ;;  %v2125_v6 = vld [vmem:[%s16801_s1 + $0x448] sm:$0xff]  ;;  %v7112_v11 = vpop.f32.mrb[49].mxu0  ;;  %v7167_v55 = vpop.f32.mrb[48].mxu1 }
 0x15c   :  { %2903 = vmatmul.mubr.f32.gmra.mrb[152].mxu1 %v2100_v34  ;;  %10362 = vmatpush3.bf16.msra.mxu0 %v17432_v24  ;;  %v17434_v34 = vld [vmem:[#allocation103_spill] sm:$0xff]  ;;  %v17435_v24 = vld [vmem:[#allocation134_spill] sm:$0xff]  ;;  %v7113_v9 = vadd.f32 %v7112_v11, %v7111_v60  ;;  %v7168_v29 = vpop.f32.mrb[49].mxu1  ;;  %v2174_v60 = vld [vmem:[%s16801_s1 + $0x5d0] sm:$0xff] }
 0x15d   :  { %10394 = vmatpush3.bf16.msra.mxu1 %v17433_v15  ;;  %2802 = vmatprep.mubr.f32.mxu0 %v2124_v4  ;;  %v2151_v4 = vld [vmem:[%s16801_s1 + $0x518] sm:$0xff]  ;;  %v14324_v50 = vadd.f32 %v7078_v54, %v1145_v58  ;;  %v2148_v15 = vld [vmem:[%s16801_s1 + $0x500] sm:$0xff] }
 0x15e   :  { %2907 = vmatprep.mubr.f32.mxu1 %v2126_v45  ;;  %10364 = vmatprep.subr.bf16.mxu0 %v17434_v34  ;;  %v17436_v45 = vld [vmem:[#allocation105_spill] sm:$0xff]  ;;  %v17437_v34 = vld [vmem:[#allocation136_spill] sm:$0xff]  ;;  %v1320_v54 = vadd.f32 %v7113_v9, %v14191_v46  ;;  %v7114_v58 = vpop.f32.mrb[50].mxu0 }
 0x15f   :  { %2803 = vmatmul.mubr.f32.gmra.mrb[146].mxu0 %v2123_v33  ;;  %10396 = vmatprep.subr.bf16.mxu1 %v17435_v24  ;;  %v7169_v33 = vadd.f32 %v7168_v29, %v7167_v55  ;;  %v2150_v24 = vld [vmem:[%s16801_s1 + $0x510] sm:$0xff]  ;;  %v7115_v11 = vpop.f32.mrb[51].mxu0  ;;  %v7170_v55 = vpop.f32.mrb[50].mxu1 }
 0x160   :  { %2908 = vmatmul.mubr.f32.gmra.mrb[154].mxu1 %v2125_v6  ;;  %10366 = vmatpush3.bf16.msra.mxu0 %v17436_v45  ;;  %v17438_v6 = vld [vmem:[#allocation107_spill] sm:$0xff]  ;;  %v17439_v45 = vld [vmem:[#allocation138_spill] sm:$0xff]  ;;  %v7116_v46 = vadd.f32 %v7115_v11, %v7114_v58  ;;  %v7171_v9 = vpop.f32.mrb[51].mxu1  ;;  %v2003_v58 = vld [vmem:[%s16801_s1 + $0x78] sm:$0xff] }
 0x161   :  { %10398 = vmatpush3.bf16.msra.mxu1 %v17437_v34  ;;  %2807 = vmatprep.mubr.f32.mxu0 %v2149_v23  ;;  %v2176_v23 = vld [vmem:[%s16801_s1 + $0x5e0] sm:$0xff]  ;;  %v14343_v29 = vadd.f32 %v7169_v33, %v1320_v54  ;;  %v2173_v34 = vld [vmem:[%s16801_s1 + $0x5c8] sm:$0xff] }
 0x162   :  { %2912 = vmatprep.mubr.f32.mxu1 %v2151_v4  ;;  %10368 = vmatprep.subr.bf16.mxu0 %v17438_v6  ;;  %v17440_v4 = vld [vmem:[#allocation109_spill] sm:$0xff]  ;;  %v17441_v6 = vld [vmem:[#allocation140_spill] sm:$0xff]  ;;  %v1325_v33 = vadd.f32 %v7116_v46, %v14210_v57  ;;  %v7117_v54 = vpop.f32.mrb[52].mxu0 }
 0x163   :  { %2808 = vmatmul.mubr.f32.gmra.mrb[148].mxu0 %v2148_v15  ;;  %10400 = vmatprep.subr.bf16.mxu1 %v17439_v45  ;;  %v7172_v15 = vadd.f32 %v7171_v9, %v7170_v55  ;;  %v2175_v45 = vld [vmem:[%s16801_s1 + $0x5d8] sm:$0xff]  ;;  %v7118_v11 = vpop.f32.mrb[53].mxu0  ;;  %v7173_v55 = vpop.f32.mrb[52].mxu1 }
 0x164   :  { %2913 = vmatmul.mubr.f32.gmra.mrb[156].mxu1 %v2150_v24  ;;  %10370 = vmatpush3.bf16.msra.mxu0 %v17440_v4  ;;  %v17442_v24 = vld [vmem:[#allocation111_spill] sm:$0xff]  ;;  %v17443_v4 = vld [vmem:[#allocation142_spill] sm:$0xff]  ;;  %v7119_v57 = vadd.f32 %v7118_v11, %v7117_v54  ;;  %v7174_v46 = vpop.f32.mrb[53].mxu1 }
 0x165   :  { %10402 = vmatpush3.bf16.msra.mxu1 %v17441_v6  ;;  %2812 = vmatprep.mubr.f32.mxu0 %v2174_v60  ;;  %v2005_v60 = vld [vmem:[%s16801_s1 + $0x88] sm:$0xff]  ;;  %v14362_v9 = vadd.f32 %v7172_v15, %v1325_v33  ;;  %v2002_v6 = vld [vmem:[%s16801_s1 + $0x70] sm:$0xff]  ;;  %v2028_v54 = vld [vmem:[%s16801_s1 + $0x140] sm:$0xff] }
 0x166   :  { %2917 = vmatprep.mubr.f32.mxu1 %v2176_v23  ;;  %10372 = vmatprep.subr.bf16.mxu0 %v17442_v24  ;;  %v17444_v23 = vld [vmem:[#allocation113_spill] sm:$0xff]  ;;  %v17445_v24 = vld [vmem:[#allocation144_spill] sm:$0xff]  ;;  %v1330_v15 = vadd.f32 %v7119_v57, %v14229_v22  ;;  %v7120_v33 = vpop.f32.mrb[54].mxu0 }
 0x167   :  { %2813 = vmatmul.mubr.f32.gmra.mrb[150].mxu0 %v2173_v34  ;;  %10404 = vmatprep.subr.bf16.mxu1 %v17443_v4  ;;  %v7175_v34 = vadd.f32 %v7174_v46, %v7173_v55  ;;  %v2004_v4 = vld [vmem:[%s16801_s1 + $0x80] sm:$0xff]  ;;  %v7121_v11 = vpop.f32.mrb[55].mxu0 }
 0x168   :  { %2918 = vmatmul.mubr.f32.gmra.mrb[158].mxu1 %v2175_v45  ;;  %10374 = vmatpush3.bf16.msra.mxu0 %v17444_v23  ;;  %v17446_v45 = vld [vmem:[#allocation115_spill] sm:$0xff]  ;;  %v17447_v23 = vld [vmem:[#allocation146_spill] sm:$0xff]  ;;  %v7176_v55 = vpop.f32.mrb[54].mxu1  ;;  %v7122_v22 = vadd.f32 %v7121_v11, %v7120_v33 }
 0x169   :  { %10406 = vmatpush3.bf16.msra.mxu1 %v17445_v24  ;;  %2987 = vmatprep.mubr.f32.mxu0 %v2003_v58  ;;  %v2030_v58 = vld [vmem:[%s16801_s1 + $0x150] sm:$0xff]  ;;  %v14381_v46 = vadd.f32 %v7175_v34, %v1330_v15  ;;  %v7177_v57 = vpop.f32.mrb[55].mxu1  ;;  %v2027_v24 = vld [vmem:[%s16801_s1 + $0x138] sm:$0xff]  ;;  %v2053_v33 = vld [vmem:[%s16801_s1 + $0x208] sm:$0xff] }
 0x16a   :  { %3092 = vmatprep.mubr.f32.mxu1 %v2005_v60  ;;  %10408 = vmatprep.subr.bf16.mxu0 %v17446_v45  ;;  %v17448_v60 = vld [vmem:[#allocation117_spill] sm:$0xff]  ;;  %v17449_v45 = vld [vmem:[#allocation148_spill] sm:$0xff]  ;;  %v1335_v34 = vadd.f32 %v7122_v22, %v14248_v41 }
 0x16b   :  { %2988 = vmatmul.mubr.f32.vlgmr.msra.gmra.mrb[152].mxu0 %v2002_v6  ;;  %10440 = vmatprep.subr.bf16.mxu1 %v17447_v23  ;;  %v7178_v6 = vadd.f32 %v7177_v57, %v7176_v55  ;;  %v2029_v23 = vld [vmem:[%s16801_s1 + $0x148] sm:$0xff]  ;;  %v7123_v15 = vpop.f32.mrb[56].mxu0 }
 0x16c   :  { %3093 = vmatmul.mubr.f32.vlgmr.msra.gmra.mrb[160].mxu1 %v2004_v4  ;;  %10410 = vmatpush3.bf16.msra.mxu0 %v17448_v60  ;;  %v17450_v4 = vld [vmem:[#allocation119_spill] sm:$0xff]  ;;  %v7124_v11 = vpop.f32.mrb[57].mxu0  ;;  %v17451_v60 = vld [vmem:[#allocation150_spill] sm:$0xff]  ;;  %v7179_v55 = vpop.f32.mrb[56].mxu1 }
 0x16d   :  { %10442 = vmatpush3.bf16.msra.mxu1 %v17449_v45  ;;  %2992 = vmatprep.mubr.f32.mxu0 %v2028_v54  ;;  %v2055_v54 = vld [vmem:[%s16801_s1 + $0x218] sm:$0xff]  ;;  %v14400_v57 = vadd.f32 %v7178_v6, %v1335_v34  ;;  %v7125_v41 = vadd.f32 %v7124_v11, %v7123_v15  ;;  %v7180_v22 = vpop.f32.mrb[57].mxu1  ;;  %v2052_v45 = vld [vmem:[%s16801_s1 + $0x200] sm:$0xff]  ;;  %v2078_v15 = vld [vmem:[%s16801_s1 + $0x2d0] sm:$0xff] }
 0x16e   :  { %3097 = vmatprep.mubr.f32.mxu1 %v2030_v58  ;;  %10412 = vmatprep.subr.bf16.mxu0 %v17450_v4  ;;  %v17452_v58 = vld [vmem:[#allocation121_spill] sm:$0xff]  ;;  %v17453_v4 = vld [vmem:[#allocation152_spill] sm:$0xff] }
 0x16f   :  { %2993 = vmatmul.mubr.f32.gmra.mrb[154].mxu0 %v2027_v24  ;;  %10444 = vmatprep.subr.bf16.mxu1 %v17451_v60  ;;  %v7181_v24 = vadd.f32 %v7180_v22, %v7179_v55  ;;  %v2054_v60 = vld [vmem:[%s16801_s1 + $0x210] sm:$0xff]  ;;  %v1340_v6 = vadd.f32 %v7125_v41, %v14267_v62 }
 0x170   :  { %3098 = vmatmul.mubr.f32.gmra.mrb[162].mxu1 %v2029_v23  ;;  %10414 = vmatpush3.bf16.msra.mxu0 %v17452_v58  ;;  %v7126_v34 = vpop.f32.mrb[58].mxu0  ;;  %v17454_v23 = vld [vmem:[#allocation123_spill] sm:$0xff]  ;;  %v17455_v58 = vld [vmem:[#allocation154_spill] sm:$0xff]  ;;  %v7182_v55 = vpop.f32.mrb[58].mxu1 }
 0x171   :  { %10446 = vmatpush3.bf16.msra.mxu1 %v17453_v4  ;;  %2997 = vmatprep.mubr.f32.mxu0 %v2053_v33  ;;  %v7127_v11 = vpop.f32.mrb[59].mxu0  ;;  %v2080_v33 = vld [vmem:[%s16801_s1 + $0x2e0] sm:$0xff]  ;;  %v14419_v22 = vadd.f32 %v7181_v24, %v1340_v6  ;;  %v7183_v41 = vpop.f32.mrb[59].mxu1  ;;  %v2077_v4 = vld [vmem:[%s16801_s1 + $0x2c8] sm:$0xff] }
 0x172   :  { %3102 = vmatprep.mubr.f32.mxu1 %v2055_v54  ;;  %10416 = vmatprep.subr.bf16.mxu0 %v17454_v23  ;;  %v7128_v62 = vadd.f32 %v7127_v11, %v7126_v34  ;;  %v17456_v54 = vld [vmem:[#allocation125_spill] sm:$0xff]  ;;  %v17457_v23 = vld [vmem:[#allocation156_spill] sm:$0xff] }
 0x173   :  { %2998 = vmatmul.mubr.f32.gmra.mrb[156].mxu0 %v2052_v45  ;;  %10448 = vmatprep.subr.bf16.mxu1 %v17455_v58  ;;  %v7184_v45 = vadd.f32 %v7183_v41, %v7182_v55  ;;  %v2079_v58 = vld [vmem:[%s16801_s1 + $0x2d8] sm:$0xff] }
 0x174   :  { %3103 = vmatmul.mubr.f32.gmra.mrb[164].mxu1 %v2054_v60  ;;  %10418 = vmatpush3.bf16.msra.mxu0 %v17456_v54  ;;  %v1345_v24 = vadd.f32 %v7128_v62, %v14286_v49  ;;  %v7129_v6 = vpop.f32.mrb[60].mxu0  ;;  %v17458_v60 = vld [vmem:[#allocation127_spill] sm:$0xff]  ;;  %v2103_v34 = vld [vmem:[%s16801_s1 + $0x398] sm:$0xff]  ;;  %v17459_v54 = vld [vmem:[#allocation158_spill] sm:$0xff] }
 0x175   :  { %10450 = vmatpush3.bf16.msra.mxu1 %v17457_v23  ;;  %3002 = vmatprep.mubr.f32.mxu0 %v2078_v15  ;;  %v7130_v11 = vpop.f32.mrb[61].mxu0  ;;  %v7185_v55 = vpop.f32.mrb[60].mxu1  ;;  %v2105_v15 = vld [vmem:[%s16801_s1 + $0x3a8] sm:$0xff]  ;;  %v2102_v23 = vld [vmem:[%s16801_s1 + $0x390] sm:$0xff] }
 0x176   :  { %3107 = vmatprep.mubr.f32.mxu1 %v2080_v33  ;;  %10420 = vmatprep.subr.bf16.mxu0 %v17458_v60  ;;  %v14438_v41 = vadd.f32 %v7184_v45, %v1345_v24  ;;  %v7131_v49 = vadd.f32 %v7130_v11, %v7129_v6  ;;  %v17460_v33 = vld [vmem:[#allocation129_spill] sm:$0xff]  ;;  %v7186_v62 = vpop.f32.mrb[61].mxu1  ;;  %v17461_v60 = vld [vmem:[#allocation160_spill] sm:$0xff]  ;;  %v2128_v6 = vld [vmem:[%s16801_s1 + $0x460] sm:$0xff] }
 0x177   :  { %3003 = vmatmul.mubr.f32.gmra.mrb[158].mxu0 %v2077_v4  ;;  %10452 = vmatprep.subr.bf16.mxu1 %v17459_v54  ;;  %v7187_v4 = vadd.f32 %v7186_v62, %v7185_v55  ;;  %v2104_v54 = vld [vmem:[%s16801_s1 + $0x3a0] sm:$0xff] }
 0x178   :  { %3108 = vmatmul.mubr.f32.gmra.mrb[166].mxu1 %v2079_v58  ;;  %10422 = vmatpush3.bf16.msra.mxu0 %v17460_v33  ;;  %v1350_v45 = vadd.f32 %v7131_v49, %v14305_v40  ;;  %v7132_v24 = vpop.f32.mrb[62].mxu0  ;;  %v17462_v58 = vld [vmem:[#allocation131_spill] sm:$0xff]  ;;  %v17463_v33 = vld [vmem:[#allocation162_spill] sm:$0xff] }
 0x179   :  { %10454 = vmatpush3.bf16.msra.mxu1 %v17461_v60  ;;  %3007 = vmatprep.mubr.f32.mxu0 %v2103_v34  ;;  %v7133_v11 = vpop.f32.mrb[63].mxu0  ;;  %v7188_v55 = vpop.f32.mrb[62].mxu1  ;;  %v2130_v34 = vld [vmem:[%s16801_s1 + $0x470] sm:$0xff]  ;;  %v2127_v60 = vld [vmem:[%s16801_s1 + $0x458] sm:$0xff] }
 0x17a   :  { %3112 = vmatprep.mubr.f32.mxu1 %v2105_v15  ;;  %10424 = vmatprep.subr.bf16.mxu0 %v17462_v58  ;;  %v14457_v62 = vadd.f32 %v7187_v4, %v1350_v45  ;;  %v7134_v40 = vadd.f32 %v7133_v11, %v7132_v24  ;;  %v17464_v15 = vld [vmem:[#allocation133_spill] sm:$0xff]  ;;  %v7189_v49 = vpop.f32.mrb[63].mxu1  ;;  %v17465_v58 = vld [vmem:[#allocation164_spill] sm:$0xff]  ;;  %v2153_v24 = vld [vmem:[%s16801_s1 + $0x528] sm:$0xff] }
 0x17b   :  { %3008 = vmatmul.mubr.f32.gmra.mrb[160].mxu0 %v2102_v23  ;;  %10456 = vmatprep.subr.bf16.mxu1 %v17463_v33  ;;  %v7190_v23 = vadd.f32 %v7189_v49, %v7188_v55  ;;  %v2129_v33 = vld [vmem:[%s16801_s1 + $0x468] sm:$0xff] }
 0x17c   :  { %3113 = vmatmul.mubr.f32.gmra.mrb[168].mxu1 %v2104_v54  ;;  %10426 = vmatpush3.bf16.msra.mxu0 %v17464_v15  ;;  %v1355_v4 = vadd.f32 %v7134_v40, %v14324_v50  ;;  %v7223_v45 = vpop.f32.mrb[64].mxu0  ;;  %v17466_v54 = vld [vmem:[#allocation135_spill] sm:$0xff]  ;;  %v17467_v15 = vld [vmem:[#allocation166_spill] sm:$0xff] }
 0x17d   :  { %10458 = vmatpush3.bf16.msra.mxu1 %v17465_v58  ;;  %3012 = vmatprep.mubr.f32.mxu0 %v2128_v6  ;;  %v7224_v11 = vpop.f32.mrb[65].mxu0  ;;  %v7279_v55 = vpop.f32.mrb[64].mxu1  ;;  %v2155_v6 = vld [vmem:[%s16801_s1 + $0x538] sm:$0xff]  ;;  %v2152_v58 = vld [vmem:[%s16801_s1 + $0x520] sm:$0xff] }
 0x17e   :  { %3117 = vmatprep.mubr.f32.mxu1 %v2130_v34  ;;  %10428 = vmatprep.subr.bf16.mxu0 %v17466_v54  ;;  %v14476_v49 = vadd.f32 %v7190_v23, %v1355_v4  ;;  %v7225_v50 = vadd.f32 %v7224_v11, %v7223_v45  ;;  %v17468_v34 = vld [vmem:[#allocation137_spill] sm:$0xff]  ;;  %v7280_v40 = vpop.f32.mrb[65].mxu1  ;;  %v17469_v54 = vld [vmem:[#allocation168_spill] sm:$0xff] }
 0x17f   :  { %3013 = vmatmul.mubr.f32.gmra.mrb[162].mxu0 %v2127_v60  ;;  %10460 = vmatprep.subr.bf16.mxu1 %v17467_v15  ;;  %v7281_v60 = vadd.f32 %v7280_v40, %v7279_v55  ;;  %v2154_v15 = vld [vmem:[%s16801_s1 + $0x530] sm:$0xff] }
 0x180   :  { %3118 = vmatmul.mubr.f32.gmra.mrb[170].mxu1 %v2129_v33  ;;  %10430 = vmatpush3.bf16.msra.mxu0 %v17468_v34  ;;  %v1530_v23 = vadd.f32 %v7225_v50, %v14343_v29  ;;  %v7226_v4 = vpop.f32.mrb[66].mxu0  ;;  %v17470_v33 = vld [vmem:[#allocation139_spill] sm:$0xff]  ;;  %v2178_v45 = vld [vmem:[%s16801_s1 + $0x5f0] sm:$0xff]  ;;  %v17471_v34 = vld [vmem:[#allocation170_spill] sm:$0xff] }
 0x181   :  { %10462 = vmatpush3.bf16.msra.mxu1 %v17469_v54  ;;  %3017 = vmatprep.mubr.f32.mxu0 %v2153_v24  ;;  %v7227_v11 = vpop.f32.mrb[67].mxu0  ;;  %v7282_v55 = vpop.f32.mrb[66].mxu1  ;;  %v2180_v24 = vld [vmem:[%s16801_s1 + $0x600] sm:$0xff]  ;;  %v2177_v54 = vld [vmem:[%s16801_s1 + $0x5e8] sm:$0xff] }
 0x182   :  { %3122 = vmatprep.mubr.f32.mxu1 %v2155_v6  ;;  %10432 = vmatprep.subr.bf16.mxu0 %v17470_v33  ;;  %v14495_v40 = vadd.f32 %v7281_v60, %v1530_v23  ;;  %v7228_v29 = vadd.f32 %v7227_v11, %v7226_v4  ;;  %v17472_v6 = vld [vmem:[#allocation141_spill] sm:$0xff]  ;;  %v7283_v50 = vpop.f32.mrb[67].mxu1  ;;  %v17473_v33 = vld [vmem:[#allocation172_spill] sm:$0xff] }
 0x183   :  { %3018 = vmatmul.mubr.f32.gmra.mrb[164].mxu0 %v2152_v58  ;;  %10464 = vmatprep.subr.bf16.mxu1 %v17471_v34  ;;  %v7284_v58 = vadd.f32 %v7283_v50, %v7282_v55  ;;  %v2179_v34 = vld [vmem:[%s16801_s1 + $0x5f8] sm:$0xff] }
 0x184   :  { %3123 = vmatmul.mubr.f32.gmra.mrb[172].mxu1 %v2154_v15  ;;  %10434 = vmatpush3.bf16.msra.mxu0 %v17472_v6  ;;  %v1535_v60 = vadd.f32 %v7228_v29, %v14362_v9  ;;  %v7229_v23 = vpop.f32.mrb[68].mxu0  ;;  %v17474_v15 = vld [vmem:[#allocation143_spill] sm:$0xff]  ;;  %v2007_v4 = vld [vmem:[%s16801_s1 + $0x98] sm:$0xff] }
 0x185   :  { %10466 = vmatpush3.bf16.msra.mxu1 %v17473_v33  ;;  %3022 = vmatprep.mubr.f32.mxu0 %v2178_v45  ;;  %v7230_v11 = vpop.f32.mrb[69].mxu0  ;;  %v7285_v55 = vpop.f32.mrb[68].mxu1  ;;  %v2009_v45 = vld [vmem:[%s16801_s1 + $0xa8] sm:$0xff]  ;;  %v2006_v33 = vld [vmem:[%s16801_s1 + $0x90] sm:$0xff] }
 0x186   :  { %3127 = vmatprep.mubr.f32.mxu1 %v2180_v24  ;;  %10436 = vmatprep.subr.bf16.mxu0 %v17474_v15  ;;  %v14514_v50 = vadd.f32 %v7284_v58, %v1535_v60  ;;  %v7231_v9 = vadd.f32 %v7230_v11, %v7229_v23  ;;  %v17475_v24 = vld [vmem:[#allocation145_spill] sm:$0xff]  ;;  %v7286_v29 = vpop.f32.mrb[69].mxu1  ;;  %v2032_v23 = vld [vmem:[%s16801_s1 + $0x160] sm:$0xff] }
 0x187   :  { %3023 = vmatmul.mubr.f32.gmra.mrb[166].mxu0 %v2177_v54  ;;  %10468 = vmatprep.subr.bf16.mxu1 %v13580_v13  ;;  %v7287_v54 = vadd.f32 %v7286_v29, %v7285_v55  ;;  %v2008_v13 = vld [vmem:[%s16801_s1 + $0xa0] sm:$0xff] }
 0x188   :  { %3128 = vmatmul.mubr.f32.gmra.mrb[174].mxu1 %v2179_v34  ;;  %10438 = vmatpush3.bf16.msra.mxu0 %v17475_v24  ;;  %v1540_v58 = vadd.f32 %v7231_v9, %v14381_v46  ;;  %v7232_v60 = vpop.f32.mrb[70].mxu0  ;;  %v17476_v34 = vld [vmem:[#allocation147_spill] sm:$0xff] }
 0x189   :  { %10470 = vmatpush3.bf16.msra.mxu1 %v13604_v59  ;;  %3197 = vmatprep.mubr.f32.mxu0 %v2007_v4  ;;  %v7233_v11 = vpop.f32.mrb[71].mxu0  ;;  %v2034_v4 = vld [vmem:[%s16801_s1 + $0x170] sm:$0xff]  ;;  %v2031_v59 = vld [vmem:[%s16801_s1 + $0x158] sm:$0xff] }
 0x18a   :  { %3302 = vmatprep.mubr.f32.mxu1 %v2009_v45  ;;  %10472 = vmatprep.subr.bf16.mxu0 %v17476_v34  ;;  %v7288_v55 = vpop.f32.mrb[70].mxu1  ;;  %v14533_v29 = vadd.f32 %v7287_v54, %v1540_v58  ;;  %v7234_v46 = vadd.f32 %v7233_v11, %v7232_v60  ;;  %v17477_v45 = vld [vmem:[#allocation149_spill] sm:$0xff]  ;;  %v2033_v34 = vld [vmem:[%s16801_s1 + $0x168] sm:$0xff] }
 0x18b   :  { %3198 = vmatmul.mubr.f32.vlgmr.msra.gmra.mrb[168].mxu0 %v2006_v33  ;;  %10504 = vmatprep.subr.bf16.mxu1 %v13616_v31  ;;  %v7289_v9 = vpop.f32.mrb[71].mxu1  ;;  %v2057_v60 = vld [vmem:[%s16801_s1 + $0x228] sm:$0xff] }
 0x18c   :  { %3303 = vmatmul.mubr.f32.vlgmr.msra.gmra.mrb[176].mxu1 %v2008_v13  ;;  %10474 = vmatpush3.bf16.msra.mxu0 %v17477_v45  ;;  %v7290_v33 = vadd.f32 %v7289_v9, %v7288_v55  ;;  %v1545_v54 = vadd.f32 %v7234_v46, %v14400_v57  ;;  %v17478_v13 = vld [vmem:[#allocation151_spill] sm:$0xff] }
 0x18d   :  { %10506 = vmatpush3.bf16.msra.mxu1 %v13616_v31  ;;  %3202 = vmatprep.mubr.f32.mxu0 %v2032_v23  ;;  %v7235_v58 = vpop.f32.mrb[72].mxu0  ;;  %v2059_v23 = vld [vmem:[%s16801_s1 + $0x238] sm:$0xff]  ;;  %v2056_v31 = vld [vmem:[%s16801_s1 + $0x220] sm:$0xff] }
 0x18e   :  { %3307 = vmatprep.mubr.f32.mxu1 %v2034_v4  ;;  %10476 = vmatprep.subr.bf16.mxu0 %v17478_v13  ;;  %v7236_v11 = vpop.f32.mrb[73].mxu0  ;;  %v7291_v55 = vpop.f32.mrb[72].mxu1  ;;  %v14552_v9 = vadd.f32 %v7290_v33, %v1545_v54  ;;  %v17479_v4 = vld [vmem:[#allocation153_spill] sm:$0xff]  ;;  %v2058_v13 = vld [vmem:[%s16801_s1 + $0x230] sm:$0xff] }
 0x18f   :  { %3203 = vmatmul.mubr.f32.gmra.mrb[170].mxu0 %v2031_v59  ;;  %10508 = vmatprep.subr.bf16.mxu1 %v13640_v42  ;;  %v7237_v57 = vadd.f32 %v7236_v11, %v7235_v58  ;;  %v7292_v46 = vpop.f32.mrb[73].mxu1  ;;  %v2082_v58 = vld [vmem:[%s16801_s1 + $0x2f0] sm:$0xff] }
 0x190   :  { %3308 = vmatmul.mubr.f32.gmra.mrb[178].mxu1 %v2033_v34  ;;  %10478 = vmatpush3.bf16.msra.mxu0 %v17479_v4  ;;  %v7293_v59 = vadd.f32 %v7292_v46, %v7291_v55  ;;  %v17480_v34 = vld [vmem:[#allocation155_spill] sm:$0xff] }
 0x191   :  { %10510 = vmatpush3.bf16.msra.mxu1 %v13640_v42  ;;  %3207 = vmatprep.mubr.f32.mxu0 %v2057_v60  ;;  %v1550_v33 = vadd.f32 %v7237_v57, %v14419_v22  ;;  %v2084_v60 = vld [vmem:[%s16801_s1 + $0x300] sm:$0xff]  ;;  %v2081_v42 = vld [vmem:[%s16801_s1 + $0x2e8] sm:$0xff] }
 0x192   :  { %v7238_v54 = vpop.f32.mrb[74].mxu0  ;;  %3312 = vmatprep.mubr.f32.mxu1 %v2059_v23  ;;  %10480 = vmatprep.subr.bf16.mxu0 %v17480_v34  ;;  %v7294_v55 = vpop.f32.mrb[74].mxu1  ;;  %v17481_v23 = vld [vmem:[#allocation157_spill] sm:$0xff] }
 0x193   :  { %v7239_v11 = vpop.f32.mrb[75].mxu0  ;;  %3208 = vmatmul.mubr.f32.gmra.mrb[172].mxu0 %v2056_v31  ;;  %10512 = vmatprep.subr.bf16.mxu1 %v13664_v18  ;;  %v14571_v46 = vadd.f32 %v7293_v59, %v1550_v33  ;;  %v7295_v57 = vpop.f32.mrb[75].mxu1  ;;  %v2083_v34 = vld [vmem:[%s16801_s1 + $0x2f8] sm:$0xff] }
 0x194   :  { %v7240_v22 = vadd.f32 %v7239_v11, %v7238_v54  ;;  %3313 = vmatmul.mubr.f32.gmra.mrb[180].mxu1 %v2058_v13  ;;  %10482 = vmatpush3.bf16.msra.mxu0 %v17481_v23  ;;  %v7296_v31 = vadd.f32 %v7295_v57, %v7294_v55  ;;  %v17482_v13 = vld [vmem:[#allocation159_spill] sm:$0xff]  ;;  %v2107_v54 = vld [vmem:[%s16801_s1 + $0x3b8] sm:$0xff] }
 0x195   :  { %10514 = vmatpush3.bf16.msra.mxu1 %v13664_v18  ;;  %3212 = vmatprep.mubr.f32.mxu0 %v2082_v58  ;;  %v2109_v58 = vld [vmem:[%s16801_s1 + $0x3c8] sm:$0xff]  ;;  %v2106_v18 = vld [vmem:[%s16801_s1 + $0x3b0] sm:$0xff] }
 0x196   :  { %v1555_v59 = vadd.f32 %v7240_v22, %v14438_v41  ;;  %v7241_v33 = vpop.f32.mrb[76].mxu0  ;;  %3317 = vmatprep.mubr.f32.mxu1 %v2084_v60  ;;  %10484 = vmatprep.subr.bf16.mxu0 %v17482_v13  ;;  %v17483_v60 = vld [vmem:[#allocation161_spill] sm:$0xff]  ;;  %v2108_v13 = vld [vmem:[%s16801_s1 + $0x3c0] sm:$0xff] }
 0x197   :  { %v7242_v11 = vpop.f32.mrb[77].mxu0  ;;  %3213 = vmatmul.mubr.f32.gmra.mrb[174].mxu0 %v2081_v42  ;;  %10516 = vmatprep.subr.bf16.mxu1 %v13688_v1  ;;  %v7297_v55 = vpop.f32.mrb[76].mxu1 }
 0x198   :  { %v14590_v57 = vadd.f32 %v7296_v31, %v1555_v59  ;;  %v7243_v41 = vadd.f32 %v7242_v11, %v7241_v33  ;;  %3318 = vmatmul.mubr.f32.gmra.mrb[182].mxu1 %v2083_v34  ;;  %10486 = vmatpush3.bf16.msra.mxu0 %v17483_v60  ;;  %v7298_v22 = vpop.f32.mrb[77].mxu1  ;;  %v17484_v34 = vld [vmem:[#allocation163_spill] sm:$0xff]  ;;  %v2132_v33 = vld [vmem:[%s16801_s1 + $0x480] sm:$0xff] }
 0x199   :  { %10518 = vmatpush3.bf16.msra.mxu1 %v13688_v1  ;;  %v7299_v42 = vadd.f32 %v7298_v22, %v7297_v55  ;;  %3217 = vmatprep.mubr.f32.mxu0 %v2107_v54  ;;  %v2134_v54 = vld [vmem:[%s16801_s1 + $0x490] sm:$0xff]  ;;  %v2131_v1 = vld [vmem:[%s16801_s1 + $0x478] sm:$0xff] }
 0x19a   :  { %v1560_v31 = vadd.f32 %v7243_v41, %v14457_v62  ;;  %v7244_v59 = vpop.f32.mrb[78].mxu0  ;;  %3322 = vmatprep.mubr.f32.mxu1 %v2109_v58  ;;  %10488 = vmatprep.subr.bf16.mxu0 %v17484_v34  ;;  %v17485_v58 = vld [vmem:[#allocation165_spill] sm:$0xff]  ;;  %v2133_v34 = vld [vmem:[%s16801_s1 + $0x488] sm:$0xff] }
 0x19b   :  { %v7245_v11 = vpop.f32.mrb[79].mxu0  ;;  %3218 = vmatmul.mubr.f32.gmra.mrb[176].mxu0 %v2106_v18  ;;  %10520 = vmatprep.subr.bf16.mxu1 %v13712_v48  ;;  %v7300_v55 = vpop.f32.mrb[78].mxu1 }
 0x19c   :  { %v14609_v22 = vadd.f32 %v7299_v42, %v1560_v31  ;;  %v7246_v62 = vadd.f32 %v7245_v11, %v7244_v59  ;;  %3323 = vmatmul.mubr.f32.gmra.mrb[184].mxu1 %v2108_v13  ;;  %10490 = vmatpush3.bf16.msra.mxu0 %v17485_v58  ;;  %v7301_v41 = vpop.f32.mrb[79].mxu1  ;;  %v17486_v13 = vld [vmem:[#allocation167_spill] sm:$0xff] }
 0x19d   :  { %10522 = vmatpush3.bf16.msra.mxu1 %v13712_v48  ;;  %v7302_v18 = vadd.f32 %v7301_v41, %v7300_v55  ;;  %3222 = vmatprep.mubr.f32.mxu0 %v2132_v33  ;;  %v2157_v59 = vld [vmem:[%s16801_s1 + $0x548] sm:$0xff]  ;;  %v2159_v33 = vld [vmem:[%s16801_s1 + $0x558] sm:$0xff]  ;;  %v2156_v48 = vld [vmem:[%s16801_s1 + $0x540] sm:$0xff] }
 0x19e   :  { %v1565_v42 = vadd.f32 %v7246_v62, %v14476_v49  ;;  %v7335_v31 = vpop.f32.mrb[80].mxu0  ;;  %3327 = vmatprep.mubr.f32.mxu1 %v2134_v54  ;;  %10492 = vmatprep.subr.bf16.mxu0 %v17486_v13  ;;  %v17487_v54 = vld [vmem:[#allocation169_spill] sm:$0xff]  ;;  %v2158_v13 = vld [vmem:[%s16801_s1 + $0x550] sm:$0xff] }
 0x19f   :  { %v7336_v11 = vpop.f32.mrb[81].mxu0  ;;  %3223 = vmatmul.mubr.f32.gmra.mrb[178].mxu0 %v2131_v1  ;;  %10524 = vmatprep.subr.bf16.mxu1 %v13736_v32  ;;  %v7391_v55 = vpop.f32.mrb[80].mxu1 }
 0x1a0   :  { %v14628_v41 = vadd.f32 %v7302_v18, %v1565_v42  ;;  %v7337_v49 = vadd.f32 %v7336_v11, %v7335_v31  ;;  %3328 = vmatmul.mubr.f32.gmra.mrb[186].mxu1 %v2133_v34  ;;  %10494 = vmatpush3.bf16.msra.mxu0 %v17487_v54  ;;  %v7392_v62 = vpop.f32.mrb[81].mxu1  ;;  %v17488_v34 = vld [vmem:[#allocation171_spill] sm:$0xff]  ;;  %v2182_v31 = vld [vmem:[%s16801_s1 + $0x610] sm:$0xff] }
 0x1a1   :  { %10526 = vmatpush3.bf16.msra.mxu1 %v13736_v32  ;;  %v7393_v1 = vadd.f32 %v7392_v62, %v7391_v55  ;;  %3227 = vmatprep.mubr.f32.mxu0 %v2157_v59  ;;  %v2184_v59 = vld [vmem:[%s16801_s1 + $0x620] sm:$0xff]  ;;  %v2183_v32 = vld [vmem:[%s16801_s1 + $0x618] sm:$0xff] }
 0x1a2   :  { %v1740_v18 = vadd.f32 %v7337_v49, %v14495_v40  ;;  %v7338_v42 = vpop.f32.mrb[82].mxu0  ;;  %3332 = vmatprep.mubr.f32.mxu1 %v2159_v33  ;;  %10496 = vmatprep.subr.bf16.mxu0 %v17488_v34  ;;  %v2181_v33 = vld [vmem:[%s16801_s1 + $0x608] sm:$0xff] }
 0x1a3   :  { %v7339_v11 = vpop.f32.mrb[83].mxu0  ;;  %3228 = vmatmul.mubr.f32.gmra.mrb[180].mxu0 %v2156_v48  ;;  %10528 = vmatprep.subr.bf16.mxu1 %v13760_v28  ;;  %v7394_v55 = vpop.f32.mrb[82].mxu1 }
 0x1a4   :  { %v7340_v62 = vadd.f32 %v7339_v11, %v7338_v42  ;;  %3333 = vmatmul.mubr.f32.gmra.mrb[188].mxu1 %v2158_v13  ;;  %10498 = vmatpush3.bf16.msra.mxu0 %v13568_v2  ;;  %v7395_v40 = vpop.f32.mrb[83].mxu1  ;;  %v14651_v49 = vadd.f32 %v7393_v1, %v1740_v18  ;;  %v2011_v11 = vld [vmem:[%s16801_s1 + $0xb8] sm:$0xff] }
 0x1a5   :  { %10530 = vmatpush3.bf16.msra.mxu1 %v13760_v28  ;;  %v7396_v48 = vadd.f32 %v7395_v40, %v7394_v55  ;;  %3232 = vmatprep.mubr.f32.mxu0 %v2182_v31  ;;  %v2012_v31 = vld [vmem:[%s16801_s1 + $0xc0] sm:$0xff] }
 0x1a6   :  { %v1745_v42 = vadd.f32 %v7340_v62, %v14514_v50  ;;  %v7341_v13 = vpop.f32.mrb[84].mxu0  ;;  %3337 = vmatprep.mubr.f32.mxu1 %v2184_v59  ;;  %10500 = vmatprep.subr.bf16.mxu0 %v13592_v47  ;;  %v2010_v59 = vld [vmem:[%s16801_s1 + $0xb0] sm:$0xff] }
 0x1a7   :  { %v7342_v1 = vpop.f32.mrb[85].mxu0  ;;  %3233 = vmatmul.mubr.f32.gmra.mrb[182].mxu0 %v2181_v33  ;;  %10532 = vmatprep.subr.bf16.mxu1 %v13784_v10  ;;  %v7397_v18 = vpop.f32.mrb[84].mxu1  ;;  %v2037_v33 = vld [vmem:[%s16801_s1 + $0x188] sm:$0xff] }
 0x1a8   :  { %v7343_v55 = vadd.f32 %v7342_v1, %v7341_v13  ;;  %3338 = vmatmul.mubr.f32.gmra.mrb[190].mxu1 %v2183_v32  ;;  %10502 = vmatpush3.bf16.msra.mxu0 %v13610_v61  ;;  %v7398_v50 = vpop.f32.mrb[85].mxu1  ;;  %v14670_v62 = vadd.f32 %v7396_v48, %v1745_v42  ;;  %v2036_v1 = vld [vmem:[%s16801_s1 + $0x180] sm:$0xff] }
 0x1a9   :  { %10534 = vmatpush3.bf16.msra.mxu1 %v13784_v10  ;;  %v7399_v40 = vadd.f32 %v7398_v50, %v7397_v18  ;;  %3407 = vmatprep.mubr.f32.mxu0 %v2011_v11 }
 0x1aa   :  { %v1750_v13 = vadd.f32 %v7343_v55, %v14533_v29  ;;  %v7344_v32 = vpop.f32.mrb[86].mxu0  ;;  %9603 = vmatprep.mubr.f32.mxu1 %v2012_v31  ;;  %10536 = vmatprep.subr.bf16.mxu0 %v11411_v3  ;;  %v2035_v29 = vld [vmem:[%s16801_s1 + $0x178] sm:$0xff]  ;;  %v2062_v31 = vld [vmem:[%s16801_s1 + $0x250] sm:$0xff] }
 0x1ab   :  { %v7345_v48 = vpop.f32.mrb[87].mxu0  ;;  %3408 = vmatmul.mubr.f32.vlgmr.msra.gmra.mrb[184].mxu0 %v2010_v59  ;;  %10568 = vmatprep.subr.bf16.mxu1 %v11422_v7  ;;  %v7400_v42 = vpop.f32.mrb[86].mxu1  ;;  %v2061_v59 = vld [vmem:[%s16801_s1 + $0x248] sm:$0xff] }
 0x1ac   :  { %v7346_v11 = vadd.f32 %v7345_v48, %v7344_v32  ;;  %9604 = vmatmul.mubr.f32.vlgmr.msra.gmra.mrb[192].mxu1 %v2037_v33  ;;  %10538 = vmatpush3.bf16.msra.mxu0 %v11424_v8  ;;  %v7401_v18 = vpop.f32.mrb[87].mxu1  ;;  %v14689_v55 = vadd.f32 %v7399_v40, %v1750_v13  ;;  %v2087_v40 = vld [vmem:[%s16801_s1 + $0x318] sm:$0xff] }
 0x1ad   :  { %10570 = vmatpush3.bf16.msra.mxu1 %v11436_v12  ;;  %v7402_v50 = vadd.f32 %v7401_v18, %v7400_v42  ;;  %3412 = vmatprep.mubr.f32.mxu0 %v2036_v1  ;;  %v2112_v42 = vld [vmem:[%s16801_s1 + $0x3e0] sm:$0xff] }
 0x1ae   :  { %v1755_v33 = vadd.f32 %v7346_v11, %v14552_v9  ;;  %v7347_v32 = vpop.f32.mrb[88].mxu0  ;;  %10540 = vmatprep.subr.bf16.mxu0 %v11449_v16  ;;  %10572 = vmatprep.subr.bf16.mxu1 %v11451_v17  ;;  %v2060_v9 = vld [vmem:[%s16801_s1 + $0x240] sm:$0xff] }
 0x1af   :  { %v7348_v48 = vpop.f32.mrb[89].mxu0  ;;  %3413 = vmatmul.mubr.f32.gmra.mrb[186].mxu0 %v2035_v29  ;;  %v7403_v7 = vpop.f32.mrb[88].mxu1  ;;  %9606 = vmatprep.mubr.f32.mxu1 %v2062_v31  ;;  %v2086_v29 = vld [vmem:[%s16801_s1 + $0x310] sm:$0xff] }
 0x1b0   :  { %v7349_v13 = vadd.f32 %v7348_v48, %v7347_v32  ;;  %10542 = vmatpush3.bf16.msra.mxu0 %v11463_v21  ;;  %v7404_v1 = vpop.f32.mrb[89].mxu1  ;;  %3417 = vmatprep.mubr.f32.mxu0 %v2061_v59  ;;  %v14708_v11 = vadd.f32 %v7402_v50, %v1755_v33  ;;  %v17489_v33 = vld [vmem:[#allocation4_spill] sm:$0xff] }
 0x1b1   :  { %10574 = vmatpush3.bf16.msra.mxu1 %v11476_v25  ;;  %v7405_v18 = vadd.f32 %v7404_v1, %v7403_v7  ;;  %10544 = vmatprep.subr.bf16.mxu0 %v11478_v26  ;;  %v2137_v7 = vld [vmem:[%s16801_s1 + $0x4a8] sm:$0xff] }
 0x1b2   :  { %v1760_v31 = vadd.f32 %v7349_v13, %v14571_v46  ;;  %v7350_v59 = vpop.f32.mrb[90].mxu0  ;;  %10576 = vmatprep.subr.bf16.mxu1 %v11489_v30  ;;  %9607 = vmatmul.mubr.f32.gmra.mrb[194].mxu1 %v2087_v40  ;;  %v2085_v46 = vld [vmem:[%s16801_s1 + $0x308] sm:$0xff]  ;;  %v2162_v40 = vld [vmem:[%s16801_s1 + $0x570] sm:$0xff] }
 0x1b3   :  { %v7351_v32 = vpop.f32.mrb[91].mxu0  ;;  %3418 = vmatmul.mubr.f32.gmra.mrb[188].mxu0 %v2060_v9  ;;  %v7406_v48 = vpop.f32.mrb[90].mxu1  ;;  %9609 = vmatprep.mubr.f32.mxu1 %v2112_v42  ;;  %v2111_v42 = vld [vmem:[%s16801_s1 + $0x3d8] sm:$0xff] }
 0x1b4   :  { %v7352_v50 = vadd.f32 %v7351_v32, %v7350_v59  ;;  %10546 = vmatpush3.bf16.msra.mxu0 %v17489_v33  ;;  %v7407_v1 = vpop.f32.mrb[91].mxu1  ;;  %3422 = vmatprep.mubr.f32.mxu0 %v2086_v29  ;;  %v14727_v13 = vadd.f32 %v7405_v18, %v1760_v31  ;;  %v2187_v18 = vld [vmem:[%s16801_s1 + $0x638] sm:$0xff] }
 0x1b5   :  { %10578 = vmatpush3.bf16.msra.mxu1 %v11514_v38  ;;  %v7408_v9 = vadd.f32 %v7407_v1, %v7406_v48  ;;  %10548 = vmatprep.subr.bf16.mxu0 %v11516_v39  ;;  %v17490_v48 = vld [vmem:[#allocation7_spill] sm:$0xff] }
 0x1b6   :  { %v1765_v29 = vadd.f32 %v7352_v50, %v14590_v57  ;;  %v7353_v59 = vpop.f32.mrb[92].mxu0  ;;  %10580 = vmatprep.subr.bf16.mxu1 %v11528_v43  ;;  %9610 = vmatmul.mubr.f32.gmra.mrb[196].mxu1 %v2137_v7  ;;  %v2110_v57 = vld [vmem:[%s16801_s1 + $0x3d0] sm:$0xff]  ;;  %v3556_v7 = vld [vmem:[%s16802_s2 + $0x18] sm:$0xff]  ;;  %v17491_v43 = vld [vmem:[#allocation10_spill] sm:$0xff] }
 0x1b7   :  { %v7354_v32 = vpop.f32.mrb[93].mxu0  ;;  %3423 = vmatmul.mubr.f32.gmra.mrb[190].mxu0 %v2085_v46  ;;  %v7409_v30 = vpop.f32.mrb[92].mxu1  ;;  %9612 = vmatprep.mubr.f32.mxu1 %v2162_v40  ;;  %v2136_v40 = vld [vmem:[%s16801_s1 + $0x4a0] sm:$0xff] }
 0x1b8   :  { %v7355_v31 = vadd.f32 %v7354_v32, %v7353_v59  ;;  %10550 = vmatpush3.bf16.msra.mxu0 %v17490_v48  ;;  %v7410_v1 = vpop.f32.mrb[93].mxu1  ;;  %3427 = vmatprep.mubr.f32.mxu0 %v2111_v42  ;;  %v1870_v50 = vadd.f32 %v7408_v9, %v1765_v29 }
 0x1b9   :  { %10582 = vmatpush3.bf16.msra.mxu1 %v11553_v51  ;;  %v7411_v46 = vadd.f32 %v7410_v1, %v7409_v30  ;;  %10552 = vmatprep.subr.bf16.mxu0 %v11555_v52  ;;  %v2135_v1 = vld [vmem:[%s16801_s1 + $0x498] sm:$0xff] }
 0x1ba   :  { %v1770_v42 = vadd.f32 %v7355_v31, %v14609_v22  ;;  %v7356_v59 = vpop.f32.mrb[94].mxu0  ;;  %10584 = vmatprep.subr.bf16.mxu1 %v11567_v56  ;;  %9613 = vmatmul.mubr.f32.gmra.mrb[198].mxu1 %v2187_v18  ;;  %v2161_v18 = vld [vmem:[%s16801_s1 + $0x568] sm:$0xff] }
 0x1bb   :  { %v7357_v9 = vpop.f32.mrb[95].mxu0  ;;  %3428 = vmatmul.mubr.f32.gmra.mrb[192].mxu0 %v2110_v57  ;;  %v7412_v29 = vpop.f32.mrb[94].mxu1  ;;  %3922 = vmatprep.mubr.f32.mxu1 %v3556_v7 }
 0x1bc   :  { %v7358_v32 = vadd.f32 %v7357_v9, %v7356_v59  ;;  %10554 = vmatpush3.bf16.msra.mxu0 %v17491_v43  ;;  %v7413_v30 = vpop.f32.mrb[95].mxu1  ;;  %3432 = vmatprep.mubr.f32.mxu0 %v2136_v40  ;;  %v1875_v51 = vadd.f32 %v7411_v46, %v1770_v42  ;;  %v2160_v59 = vld [vmem:[%s16801_s1 + $0x560] sm:$0xff] }
 0x1bd   :  { %10586 = vmatpush3.bf16.msra.mxu1 %v11589_v63  ;;  %v7414_v22 = vadd.f32 %v7413_v30, %v7412_v29  ;;  %10556 = vmatprep.subr.bf16.mxu0 %v11591_v0  ;;  %v3656_v63 = vld [vmem:[%s16802_s2 + $0x338] sm:$0xff] }
 0x1be   :  { %v1775_v31 = vadd.f32 %v7358_v32, %v14628_v41  ;;  %v9561_v57 = vpop.f32.mrb[96].mxu0  ;;  %10588 = vmatprep.subr.bf16.mxu1 %v11603_v5 }
 0x1bf   :  { %v14765_v7 = vadd.f32 %v9561_v57, %v14670_v62  ;;  %v1949_v40 = vpop.f32.mrb[97].mxu0  ;;  %3433 = vmatmul.mubr.f32.gmra.mrb[194].mxu0 %v2135_v1  ;;  %v7471_v46 = vpop.f32.mrb[96].mxu1  ;;  %v2186_v62 = vld [vmem:[%s16801_s1 + $0x630] sm:$0xff] }
 0x1c0   :  { %v14768_v42 = vadd.f32 %v1949_v40, %v14651_v49  ;;  %10558 = vmatpush3.bf16.msra.mxu0 %v11621_v14  ;;  %3437 = vmatprep.mubr.f32.mxu0 %v2161_v18  ;;  %v1880_v41 = vadd.f32 %v7414_v22, %v1775_v31  ;;  %v7472_v9 = vpop.f32.mrb[97].mxu1  ;;  %v2185_v18 = vld [vmem:[%s16801_s1 + $0x628] sm:$0xff] }
 0x1c1   :  { %10590 = vmatpush3.bf16.msra.mxu1 %v11631_v19  ;;  %10560 = vmatprep.subr.bf16.mxu0 %v11633_v20  ;;  %v14779_v29 = vadd.f32 %v7472_v9, %v7471_v46  ;;  %v3631_v19 = vld [vmem:[%s16802_s2 + $0x270] sm:$0xff] }
 0x1c2   :  { %v9564_v49 = vpop.f32.mrb[98].mxu0  ;;  %10592 = vmatprep.subr.bf16.mxu1 %v11645_v27 }
 0x1c3   :  { %v14783_v32 = vadd.f32 %v9564_v49, %v14708_v11  ;;  %v1959_v30 = vpop.f32.mrb[99].mxu0  ;;  %3438 = vmatmul.mubr.f32.gmra.mrb[196].mxu0 %v2160_v59  ;;  %v7474_v1 = vpop.f32.mrb[98].mxu1  ;;  %v3554_v11 = vld [vmem:[%s16802_s2 + $0x8] sm:$0xff] }
 0x1c4   :  { %v14786_v22 = vadd.f32 %v1959_v30, %v14689_v55  ;;  %10562 = vmatpush3.bf16.msra.mxu0 %v11663_v35  ;;  %3442 = vmatprep.mubr.f32.mxu0 %v2186_v62  ;;  %v7475_v31 = vpop.f32.mrb[99].mxu1  ;;  %v3553_v62 = vld [vmem:[%s16802_s2] sm:$0xff]  ;;  %v17494_v30 = vld [vmem:[#allocation17_spill] sm:$0xff] }
 0x1c5   :  { %10594 = vmatpush3.bf16.msra.mxu1 %v11667_v36  ;;  %10564 = vmatprep.subr.bf16.mxu0 %v11669_v37  ;;  %v14797_v57 = vadd.f32 %v7475_v31, %v7474_v1  ;;  %v17495_v1 = vld [vmem:[#allocation18_spill] sm:$0xff]  ;;  %v17496_v31 = vld [vmem:[#allocation19_spill] sm:$0xff] }
 0x1c6   :  { %v9567_v55 = vpop.f32.mrb[100].mxu0  ;;  %10596 = vmatprep.subr.bf16.mxu1 %v11681_v44 }
 0x1c7   :  { %v14800_v40 = vadd.f32 %v9567_v55, %v1870_v50  ;;  %v1969_v46 = vpop.f32.mrb[101].mxu0  ;;  %3443 = vmatmul.mubr.f32.gmra.mrb[198].mxu0 %v2185_v18  ;;  %v7477_v59 = vpop.f32.mrb[100].mxu1  ;;  %v3555_v50 = vld [vmem:[%s16802_s2 + $0x10] sm:$0xff]  ;;  %v3581_v55 = vld [vmem:[%s16802_s2 + $0xe0] sm:$0xff] }
 0x1c8   :  { %v14803_v9 = vadd.f32 %v1969_v46, %v14727_v13  ;;  %10566 = vmatpush3.bf16.msra.mxu0 %v11699_v53  ;;  %3817 = vmatprep.mubr.f32.mxu0 %v3554_v11  ;;  %v7478_v49 = vpop.f32.mrb[101].mxu1  ;;  %v3579_v11 = vld [vmem:[%s16802_s2 + $0xd0] sm:$0xff] }
 0x1c9   :  { %17492 = vst [vmem:[#allocation4_spill] sm:$0xff] %v14800_v40  ;;  %10598 = vmatpush3.bf16.msra.mxu1 %v17494_v30  ;;  %10600 = vmatprep.subr.bf16.mxu0 %v17495_v1  ;;  %v14814_v18 = vadd.f32 %v7478_v49, %v7477_v59  ;;  %v17499_v59 = vld [vmem:[#allocation20_spill] sm:$0xff]  ;;  %v3578_v49 = vld [vmem:[%s16802_s2 + $0xc8] sm:$0xff] }
 0x1ca   :  { %17493 = vst [vmem:[#allocation7_spill] sm:$0xff] %v14803_v9  ;;  %v9570_v13 = vpop.f32.mrb[102].mxu0  ;;  %10632 = vmatprep.subr.bf16.mxu1 %v17496_v31  ;;  %v17511_v40 = vld [vmem:[#allocation32_spill] sm:$0xff] }
 0x1cb   :  { %v14823_v46 = vadd.f32 %v9570_v13, %v1880_v41  ;;  %v1979_v30 = vpop.f32.mrb[103].mxu0  ;;  %3818 = vmatmul.mubr.f32.vlgmr.msra.gmra.mrb[200].mxu0 %v3553_v62  ;;  %v7480_v44 = vpop.f32.mrb[102].mxu1  ;;  %v3580_v41 = vld [vmem:[%s16802_s2 + $0xd8] sm:$0xff]  ;;  %v17519_v9 = vld [vmem:[#allocation40_spill] sm:$0xff] }
 0x1cc   :  { %v14825_v36 = vadd.f32 %v1979_v30, %v1875_v51  ;;  %3923 = vmatmul.mubr.f32.vlgmr.msra.gmra.mrb[200].mxu1 %v3555_v50  ;;  %10602 = vmatpush3.bf16.msra.mxu0 %v17499_v59  ;;  %v7481_v31 = vpop.f32.mrb[103].mxu1  ;;  %v17500_v62 = vld [vmem:[#allocation21_spill] sm:$0xff]  ;;  %v17501_v51 = vld [vmem:[#allocation22_spill] sm:$0xff]  ;;  %v3606_v50 = vld [vmem:[%s16802_s2 + $0x1a8] sm:$0xff] }
 0x1cd   :  { %17497 = vst [vmem:[#allocation10_spill] sm:$0xff] %v14823_v46  ;;  %3822 = vmatprep.mubr.f32.mxu0 %v3579_v11  ;;  %3927 = vmatprep.mubr.f32.mxu1 %v3581_v55  ;;  %v14834_v13 = vadd.f32 %v7481_v31, %v7480_v44  ;;  %v3604_v30 = vld [vmem:[%s16802_s2 + $0x198] sm:$0xff]  ;;  %v17502_v11 = vld [vmem:[#allocation23_spill] sm:$0xff]  ;;  %v17503_v46 = vld [vmem:[#allocation24_spill] sm:$0xff] }
 0x1ce   :  { %17498 = vst [vmem:[#allocation18_spill] sm:$0xff] %v14825_v36  ;;  %10634 = vmatpush3.bf16.msra.mxu1 %v17500_v62  ;;  %10604 = vmatprep.subr.bf16.mxu0 %v17501_v51  ;;  %v3603_v44 = vld [vmem:[%s16802_s2 + $0x190] sm:$0xff]  ;;  %v3605_v62 = vld [vmem:[%s16802_s2 + $0x1a0] sm:$0xff] }
 0x1cf   :  { %3823 = vmatmul.mubr.f32.gmra.mrb[202].mxu0 %v3578_v49  ;;  %10636 = vmatprep.subr.bf16.mxu1 %v17502_v11  ;;  %v7483_v55 = vpop.f32.mrb[104].mxu1  ;;  %v17504_v49 = vld [vmem:[#allocation25_spill] sm:$0xff]  ;;  %v17505_v11 = vld [vmem:[#allocation26_spill] sm:$0xff]  ;;  %v17507_v36 = vld [vmem:[#allocation28_spill] sm:$0xff] }
 0x1d0   :  { %3928 = vmatmul.mubr.f32.gmra.mrb[202].mxu1 %v3580_v41  ;;  %10606 = vmatpush3.bf16.msra.mxu0 %v17503_v46  ;;  %v7484_v31 = vpop.f32.mrb[105].mxu1  ;;  %v3629_v41 = vld [vmem:[%s16802_s2 + $0x260] sm:$0xff] }
 0x1d1   :  { %3827 = vmatprep.mubr.f32.mxu0 %v3604_v30  ;;  %3932 = vmatprep.mubr.f32.mxu1 %v3606_v50  ;;  %v14852_v27 = vadd.f32 %v7484_v31, %v7483_v55  ;;  %v17506_v30 = vld [vmem:[#allocation27_spill] sm:$0xff]  ;;  %v3628_v55 = vld [vmem:[%s16802_s2 + $0x258] sm:$0xff] }
 0x1d2   :  { %10638 = vmatpush3.bf16.msra.mxu1 %v17504_v49  ;;  %10608 = vmatprep.subr.bf16.mxu0 %v17505_v11  ;;  %v3630_v49 = vld [vmem:[%s16802_s2 + $0x268] sm:$0xff]  ;;  %v3705_v11 = vld [vmem:[%s16802_s2 + $0x4c0] sm:$0xff] }
 0x1d3   :  { %3828 = vmatmul.mubr.f32.gmra.mrb[204].mxu0 %v3603_v44  ;;  %10640 = vmatprep.subr.bf16.mxu1 %v17506_v30  ;;  %v7486_v50 = vpop.f32.mrb[106].mxu1  ;;  %v17508_v44 = vld [vmem:[#allocation29_spill] sm:$0xff]  ;;  %v17509_v30 = vld [vmem:[#allocation30_spill] sm:$0xff] }
 0x1d4   :  { %3933 = vmatmul.mubr.f32.gmra.mrb[204].mxu1 %v3605_v62  ;;  %10610 = vmatpush3.bf16.msra.mxu0 %v17507_v36  ;;  %v7487_v31 = vpop.f32.mrb[107].mxu1  ;;  %v3654_v62 = vld [vmem:[%s16802_s2 + $0x328] sm:$0xff]  ;;  %v17516_v36 = vld [vmem:[#allocation37_spill] sm:$0xff] }
 0x1d5   :  { %3832 = vmatprep.mubr.f32.mxu0 %v3629_v41  ;;  %3937 = vmatprep.mubr.f32.mxu1 %v3631_v19  ;;  %v14870_v5 = vadd.f32 %v7487_v31, %v7486_v50  ;;  %v17510_v19 = vld [vmem:[#allocation31_spill] sm:$0xff]  ;;  %v3653_v50 = vld [vmem:[%s16802_s2 + $0x320] sm:$0xff] }
 0x1d6   :  { %10642 = vmatpush3.bf16.msra.mxu1 %v17508_v44  ;;  %10612 = vmatprep.subr.bf16.mxu0 %v17509_v30  ;;  %v3655_v44 = vld [vmem:[%s16802_s2 + $0x330] sm:$0xff] }
 0x1d7   :  { %3833 = vmatmul.mubr.f32.gmra.mrb[206].mxu0 %v3628_v55  ;;  %10644 = vmatprep.subr.bf16.mxu1 %v17510_v19  ;;  %v7489_v41 = vpop.f32.mrb[108].mxu1  ;;  %v17512_v55 = vld [vmem:[#allocation33_spill] sm:$0xff]  ;;  %v17513_v19 = vld [vmem:[#allocation34_spill] sm:$0xff]  ;;  %v17515_v30 = vld [vmem:[#allocation36_spill] sm:$0xff] }
 0x1d8   :  { %3938 = vmatmul.mubr.f32.gmra.mrb[206].mxu1 %v3630_v49  ;;  %10614 = vmatpush3.bf16.msra.mxu0 %v17511_v40  ;;  %v7490_v31 = vpop.f32.mrb[109].mxu1  ;;  %v3679_v49 = vld [vmem:[%s16802_s2 + $0x3f0] sm:$0xff]  ;;  %v3681_v40 = vld [vmem:[%s16802_s2 + $0x400] sm:$0xff] }
 0x1d9   :  { %3837 = vmatprep.mubr.f32.mxu0 %v3654_v62  ;;  %3942 = vmatprep.mubr.f32.mxu1 %v3656_v63  ;;  %v14888_v56 = vadd.f32 %v7490_v31, %v7489_v41  ;;  %v17514_v63 = vld [vmem:[#allocation35_spill] sm:$0xff] }
 0x1da   :  { %10646 = vmatpush3.bf16.msra.mxu1 %v17512_v55  ;;  %10616 = vmatprep.subr.bf16.mxu0 %v17513_v19  ;;  %v3678_v31 = vld [vmem:[%s16802_s2 + $0x3e8] sm:$0xff]  ;;  %v3680_v19 = vld [vmem:[%s16802_s2 + $0x3f8] sm:$0xff] }
 0x1db   :  { %3838 = vmatmul.mubr.f32.gmra.mrb[208].mxu0 %v3653_v50  ;;  %10648 = vmatprep.subr.bf16.mxu1 %v17514_v63  ;;  %v7492_v62 = vpop.f32.mrb[110].mxu1  ;;  %v17517_v63 = vld [vmem:[#allocation38_spill] sm:$0xff] }
 0x1dc   :  { %3943 = vmatmul.mubr.f32.gmra.mrb[208].mxu1 %v3655_v44  ;;  %10618 = vmatpush3.bf16.msra.mxu0 %v17515_v30  ;;  %v7493_v41 = vpop.f32.mrb[111].mxu1  ;;  %v3704_v44 = vld [vmem:[%s16802_s2 + $0x4b8] sm:$0xff] }
 0x1dd   :  { %3842 = vmatprep.mubr.f32.mxu0 %v3679_v49  ;;  %3947 = vmatprep.mubr.f32.mxu1 %v3681_v40  ;;  %v14903_v55 = vadd.f32 %v7493_v41, %v7492_v62  ;;  %v3706_v49 = vld [vmem:[%s16802_s2 + $0x4c8] sm:$0xff] }
 0x1de   :  { %v7527_v50 = vpop.f32.mrb[104].mxu0  ;;  %10650 = vmatpush3.bf16.msra.mxu1 %v17516_v36  ;;  %10620 = vmatprep.subr.bf16.mxu0 %v17517_v63  ;;  %v17518_v41 = vld [vmem:[#allocation39_spill] sm:$0xff]  ;;  %v3703_v63 = vld [vmem:[%s16802_s2 + $0x4b0] sm:$0xff] }
 0x1df   :  { %v7528_v40 = vpop.f32.mrb[105].mxu0  ;;  %3843 = vmatmul.mubr.f32.gmra.mrb[210].mxu0 %v3678_v31  ;;  %v7583_v62 = vpop.f32.mrb[112].mxu1  ;;  %10652 = vmatprep.subr.bf16.mxu1 %v17518_v41  ;;  %v17520_v41 = vld [vmem:[#allocation41_spill] sm:$0xff] }
 0x1e0   :  { %v7529_v30 = vadd.f32 %v7528_v40, %v7527_v50  ;;  %3948 = vmatmul.mubr.f32.gmra.mrb[210].mxu1 %v3680_v19  ;;  %10622 = vmatpush3.bf16.msra.mxu0 %v17519_v9  ;;  %v7584_v36 = vpop.f32.mrb[113].mxu1  ;;  %v17521_v19 = vld [vmem:[#allocation42_spill] sm:$0xff]  ;;  %v17522_v40 = vld [vmem:[#allocation43_spill] sm:$0xff] }
 0x1e1   :  { %v7585_v38 = vadd.f32 %v7584_v36, %v7583_v62  ;;  %3847 = vmatprep.mubr.f32.mxu0 %v3704_v44  ;;  %3952 = vmatprep.mubr.f32.mxu1 %v3706_v49  ;;  %v3729_v50 = vld [vmem:[%s16802_s2 + $0x580] sm:$0xff]  ;;  %v3731_v36 = vld [vmem:[%s16802_s2 + $0x590] sm:$0xff] }
 0x1e2   :  { %v2360_v31 = vadd.f32 %v7529_v30, %v14779_v29  ;;  %v7530_v46 = vpop.f32.mrb[106].mxu0  ;;  %10654 = vmatpush3.bf16.msra.mxu1 %v17520_v41  ;;  %10624 = vmatprep.subr.bf16.mxu0 %v17521_v19  ;;  %v17523_v30 = vld [vmem:[#allocation44_spill] sm:$0xff]  ;;  %v3728_v19 = vld [vmem:[%s16802_s2 + $0x578] sm:$0xff] }
 0x1e3   :  { %v7531_v44 = vpop.f32.mrb[107].mxu0  ;;  %3848 = vmatmul.mubr.f32.gmra.mrb[212].mxu0 %v3703_v63  ;;  %v7586_v49 = vpop.f32.mrb[114].mxu1  ;;  %10656 = vmatprep.subr.bf16.mxu1 %v17522_v40  ;;  %v3730_v63 = vld [vmem:[%s16802_s2 + $0x588] sm:$0xff] }
 0x1e4   :  { %v14934_v62 = vadd.f32 %v7585_v38, %v2360_v31  ;;  %v7532_v29 = vadd.f32 %v7531_v44, %v7530_v46  ;;  %3953 = vmatmul.mubr.f32.gmra.mrb[212].mxu1 %v3705_v11  ;;  %10626 = vmatpush3.bf16.msra.mxu0 %v17523_v30  ;;  %v7587_v41 = vpop.f32.mrb[115].mxu1  ;;  %v17524_v31 = vld [vmem:[#allocation45_spill] sm:$0xff]  ;;  %v17525_v46 = vld [vmem:[#allocation46_spill] sm:$0xff]  ;;  %v3558_v11 = vld [vmem:[%s16802_s2 + $0x28] sm:$0xff] }
 0x1e5   :  { %v7588_v9 = vadd.f32 %v7587_v41, %v7586_v49  ;;  %3852 = vmatprep.mubr.f32.mxu0 %v3729_v50  ;;  %3957 = vmatprep.mubr.f32.mxu1 %v3731_v36  ;;  %v17526_v50 = vld [vmem:[#allocation47_spill] sm:$0xff]  ;;  %v3560_v36 = vld [vmem:[%s16802_s2 + $0x38] sm:$0xff] }
 0x1e6   :  { %v2365_v40 = vadd.f32 %v7532_v29, %v14797_v57  ;;  %v7533_v38 = vpop.f32.mrb[108].mxu0  ;;  %10658 = vmatpush3.bf16.msra.mxu1 %v17524_v31  ;;  %10628 = vmatprep.subr.bf16.mxu0 %v17525_v46  ;;  %v17527_v29 = vld [vmem:[#allocation48_spill] sm:$0xff]  ;;  %v3557_v46 = vld [vmem:[%s16802_s2 + $0x20] sm:$0xff] }
 0x1e7   :  { %v7534_v44 = vpop.f32.mrb[109].mxu0  ;;  %3853 = vmatmul.mubr.f32.gmra.mrb[214].mxu0 %v3728_v19  ;;  %v7589_v41 = vpop.f32.mrb[116].mxu1  ;;  %10660 = vmatprep.subr.bf16.mxu1 %v17526_v50  ;;  %v17528_v19 = vld [vmem:[#allocation50_spill] sm:$0xff]  ;;  %v3583_v50 = vld [vmem:[%s16802_s2 + $0xf0] sm:$0xff] }
 0x1e8   :  { %v14953_v49 = vadd.f32 %v7588_v9, %v2365_v40  ;;  %v7535_v57 = vadd.f32 %v7534_v44, %v7533_v38  ;;  %3958 = vmatmul.mubr.f32.gmra.mrb[214].mxu1 %v3730_v63  ;;  %10630 = vmatpush3.bf16.msra.mxu0 %v17527_v29  ;;  %v7590_v31 = vpop.f32.mrb[117].mxu1  ;;  %v17529_v38 = vld [vmem:[#allocation49_spill] sm:$0xff]  ;;  %v3559_v63 = vld [vmem:[%s16802_s2 + $0x30] sm:$0xff] }
 0x1e9   :  { %v7591_v30 = vadd.f32 %v7590_v31, %v7589_v41  ;;  %4027 = vmatprep.mubr.f32.mxu0 %v3558_v11  ;;  %10664 = vmatprep.subr.bf16.mxu0 %v17528_v19  ;;  %v17530_v11 = vld [vmem:[#allocation51_spill] sm:$0xff]  ;;  %v3585_v41 = vld [vmem:[%s16802_s2 + $0x100] sm:$0xff] }
 0x1ea   :  { %v2370_v9 = vadd.f32 %v7535_v57, %v14814_v18  ;;  %v7536_v40 = vpop.f32.mrb[110].mxu0  ;;  %10662 = vmatpush3.bf16.msra.mxu1 %v17529_v38  ;;  %4132 = vmatprep.mubr.f32.mxu1 %v3560_v36  ;;  %v17531_v57 = vld [vmem:[#allocation52_spill] sm:$0xff]  ;;  %v3582_v36 = vld [vmem:[%s16802_s2 + $0xe8] sm:$0xff] }
 0x1eb   :  { %v7537_v44 = vpop.f32.mrb[111].mxu0  ;;  %4028 = vmatmul.mubr.f32.vlgmr.msra.gmra.mrb[216].mxu0 %v3557_v46  ;;  %v7592_v31 = vpop.f32.mrb[118].mxu1  ;;  %10696 = vmatprep.subr.bf16.mxu1 %v17530_v11  ;;  %v17532_v46 = vld [vmem:[#allocation54_spill] sm:$0xff]  ;;  %v3608_v11 = vld [vmem:[%s16802_s2 + $0x1b8] sm:$0xff] }
 0x1ec   :  { %v14972_v19 = vadd.f32 %v7591_v30, %v2370_v9  ;;  %v7538_v18 = vadd.f32 %v7537_v44, %v7536_v40  ;;  %10666 = vmatpush3.bf16.msra.mxu0 %v17531_v57  ;;  %v7593_v38 = vpop.f32.mrb[119].mxu1  ;;  %4032 = vmatprep.mubr.f32.mxu0 %v3583_v50  ;;  %v17533_v40 = vld [vmem:[#allocation53_spill] sm:$0xff] }
 0x1ed   :  { %v7594_v29 = vadd.f32 %v7593_v38, %v7592_v31  ;;  %4133 = vmatmul.mubr.f32.vlgmr.msra.gmra.mrb[216].mxu1 %v3559_v63  ;;  %10668 = vmatprep.subr.bf16.mxu0 %v17532_v46  ;;  %v3584_v50 = vld [vmem:[%s16802_s2 + $0xf8] sm:$0xff]  ;;  %v17534_v63 = vld [vmem:[#allocation55_spill] sm:$0xff] }
 0x1ee   :  { %v2375_v30 = vadd.f32 %v7538_v18, %v14834_v13  ;;  %v7539_v9 = vpop.f32.mrb[112].mxu0  ;;  %10698 = vmatpush3.bf16.msra.mxu1 %v17533_v40  ;;  %4137 = vmatprep.mubr.f32.mxu1 %v3585_v41  ;;  %v3610_v31 = vld [vmem:[%s16802_s2 + $0x1c8] sm:$0xff]  ;;  %v17535_v18 = vld [vmem:[#allocation56_spill] sm:$0xff] }
 0x1ef   :  { %v7540_v44 = vpop.f32.mrb[113].mxu0  ;;  %4033 = vmatmul.mubr.f32.gmra.mrb[218].mxu0 %v3582_v36  ;;  %v7595_v38 = vpop.f32.mrb[120].mxu1  ;;  %10700 = vmatprep.subr.bf16.mxu1 %v17534_v63  ;;  %v3607_v41 = vld [vmem:[%s16802_s2 + $0x1b0] sm:$0xff]  ;;  %v17536_v36 = vld [vmem:[#allocation58_spill] sm:$0xff] }
 0x1f0   :  { %v14991_v46 = vadd.f32 %v7594_v29, %v2375_v30  ;;  %v7541_v13 = vadd.f32 %v7540_v44, %v7539_v9  ;;  %10670 = vmatpush3.bf16.msra.mxu0 %v17535_v18  ;;  %v7596_v40 = vpop.f32.mrb[121].mxu1  ;;  %4037 = vmatprep.mubr.f32.mxu0 %v3608_v11  ;;  %v3633_v63 = vld [vmem:[%s16802_s2 + $0x280] sm:$0xff]  ;;  %v17537_v9 = vld [vmem:[#allocation57_spill] sm:$0xff] }
 0x1f1   :  { %v7597_v57 = vadd.f32 %v7596_v40, %v7595_v38  ;;  %4138 = vmatmul.mubr.f32.gmra.mrb[218].mxu1 %v3584_v50  ;;  %10672 = vmatprep.subr.bf16.mxu0 %v17536_v36  ;;  %v3609_v11 = vld [vmem:[%s16802_s2 + $0x1c0] sm:$0xff]  ;;  %v17538_v50 = vld [vmem:[#allocation59_spill] sm:$0xff]  ;;  %v3635_v38 = vld [vmem:[%s16802_s2 + $0x290] sm:$0xff] }
 0x1f2   :  { %v2380_v29 = vadd.f32 %v7541_v13, %v14852_v27  ;;  %v7542_v30 = vpop.f32.mrb[114].mxu0  ;;  %10702 = vmatpush3.bf16.msra.mxu1 %v17537_v9  ;;  %4142 = vmatprep.mubr.f32.mxu1 %v3610_v31  ;;  %v17539_v13 = vld [vmem:[#allocation60_spill] sm:$0xff]  ;;  %v3632_v31 = vld [vmem:[%s16802_s2 + $0x278] sm:$0xff] }
 0x1f3   :  { %v7543_v44 = vpop.f32.mrb[115].mxu0  ;;  %4038 = vmatmul.mubr.f32.gmra.mrb[220].mxu0 %v3607_v41  ;;  %v7598_v40 = vpop.f32.mrb[122].mxu1  ;;  %10704 = vmatprep.subr.bf16.mxu1 %v17538_v50  ;;  %v17540_v41 = vld [vmem:[#allocation62_spill] sm:$0xff]  ;;  %v3658_v50 = vld [vmem:[%s16802_s2 + $0x348] sm:$0xff] }
 0x1f4   :  { %v15010_v36 = vadd.f32 %v7597_v57, %v2380_v29  ;;  %v7544_v27 = vadd.f32 %v7543_v44, %v7542_v30  ;;  %10674 = vmatpush3.bf16.msra.mxu0 %v17539_v13  ;;  %v7599_v9 = vpop.f32.mrb[123].mxu1  ;;  %4042 = vmatprep.mubr.f32.mxu0 %v3633_v63  ;;  %v17541_v30 = vld [vmem:[#allocation61_spill] sm:$0xff]  ;;  %v3634_v63 = vld [vmem:[%s16802_s2 + $0x288] sm:$0xff] }
 0x1f5   :  { %v7600_v18 = vadd.f32 %v7599_v9, %v7598_v40  ;;  %4143 = vmatmul.mubr.f32.gmra.mrb[220].mxu1 %v3609_v11  ;;  %10676 = vmatprep.subr.bf16.mxu0 %v17540_v41  ;;  %v17542_v11 = vld [vmem:[#allocation63_spill] sm:$0xff]  ;;  %v3660_v40 = vld [vmem:[%s16802_s2 + $0x358] sm:$0xff] }
 0x1f6   :  { %v2385_v57 = vadd.f32 %v7544_v27, %v14870_v5  ;;  %v7545_v29 = vpop.f32.mrb[116].mxu0  ;;  %10706 = vmatpush3.bf16.msra.mxu1 %v17541_v30  ;;  %4147 = vmatprep.mubr.f32.mxu1 %v3635_v38  ;;  %v17543_v27 = vld [vmem:[#allocation64_spill] sm:$0xff]  ;;  %v3657_v38 = vld [vmem:[%s16802_s2 + $0x340] sm:$0xff] }
 0x1f7   :  { %v7546_v44 = vpop.f32.mrb[117].mxu0  ;;  %4043 = vmatmul.mubr.f32.gmra.mrb[222].mxu0 %v3632_v31  ;;  %v7601_v9 = vpop.f32.mrb[124].mxu1  ;;  %10708 = vmatprep.subr.bf16.mxu1 %v17542_v11  ;;  %v17544_v31 = vld [vmem:[#allocation66_spill] sm:$0xff]  ;;  %v3683_v11 = vld [vmem:[%s16802_s2 + $0x410] sm:$0xff] }
 0x1f8   :  { %v15029_v41 = vadd.f32 %v7600_v18, %v2385_v57  ;;  %v7547_v5 = vadd.f32 %v7546_v44, %v7545_v29  ;;  %10678 = vmatpush3.bf16.msra.mxu0 %v17543_v27  ;;  %v7602_v30 = vpop.f32.mrb[125].mxu1  ;;  %4047 = vmatprep.mubr.f32.mxu0 %v3658_v50  ;;  %v17545_v29 = vld [vmem:[#allocation65_spill] sm:$0xff]  ;;  %v3659_v50 = vld [vmem:[%s16802_s2 + $0x350] sm:$0xff] }
 0x1f9   :  { %v7603_v13 = vadd.f32 %v7602_v30, %v7601_v9  ;;  %4148 = vmatmul.mubr.f32.gmra.mrb[222].mxu1 %v3634_v63  ;;  %10680 = vmatprep.subr.bf16.mxu0 %v17544_v31  ;;  %v17546_v63 = vld [vmem:[#allocation67_spill] sm:$0xff]  ;;  %v3685_v9 = vld [vmem:[%s16802_s2 + $0x420] sm:$0xff] }
 0x1fa   :  { %v2390_v18 = vadd.f32 %v7547_v5, %v14888_v56  ;;  %v7548_v57 = vpop.f32.mrb[118].mxu0  ;;  %10710 = vmatpush3.bf16.msra.mxu1 %v17545_v29  ;;  %4152 = vmatprep.mubr.f32.mxu1 %v3660_v40  ;;  %v17547_v5 = vld [vmem:[#allocation68_spill] sm:$0xff]  ;;  %v3682_v40 = vld [vmem:[%s16802_s2 + $0x408] sm:$0xff] }
 0x1fb   :  { %v7549_v44 = vpop.f32.mrb[119].mxu0  ;;  %4048 = vmatmul.mubr.f32.gmra.mrb[224].mxu0 %v3657_v38  ;;  %v7604_v30 = vpop.f32.mrb[126].mxu1  ;;  %10712 = vmatprep.subr.bf16.mxu1 %v17546_v63  ;;  %v17548_v38 = vld [vmem:[#allocation70_spill] sm:$0xff]  ;;  %v3708_v63 = vld [vmem:[%s16802_s2 + $0x4d8] sm:$0xff] }
 0x1fc   :  { %v15048_v31 = vadd.f32 %v7603_v13, %v2390_v18  ;;  %v7550_v56 = vadd.f32 %v7549_v44, %v7548_v57  ;;  %10682 = vmatpush3.bf16.msra.mxu0 %v17547_v5  ;;  %v7605_v29 = vpop.f32.mrb[127].mxu1  ;;  %4052 = vmatprep.mubr.f32.mxu0 %v3683_v11  ;;  %v17549_v57 = vld [vmem:[#allocation69_spill] sm:$0xff] }
 0x1fd   :  { %v7606_v27 = vadd.f32 %v7605_v29, %v7604_v30  ;;  %4153 = vmatmul.mubr.f32.gmra.mrb[224].mxu1 %v3659_v50  ;;  %10684 = vmatprep.subr.bf16.mxu0 %v17548_v38  ;;  %v3684_v11 = vld [vmem:[%s16802_s2 + $0x418] sm:$0xff]  ;;  %v17550_v50 = vld [vmem:[#allocation71_spill] sm:$0xff] }
 0x1fe   :  { %v2395_v13 = vadd.f32 %v7550_v56, %v14903_v55  ;;  %v7639_v18 = vpop.f32.mrb[120].mxu0  ;;  %10714 = vmatpush3.bf16.msra.mxu1 %v17549_v57  ;;  %4157 = vmatprep.mubr.f32.mxu1 %v3685_v9  ;;  %v3710_v30 = vld [vmem:[%s16802_s2 + $0x4e8] sm:$0xff]  ;;  %v17551_v56 = vld [vmem:[#allocation72_spill] sm:$0xff] }
 0x1ff   :  { %v7640_v44 = vpop.f32.mrb[121].mxu0  ;;  %4053 = vmatmul.mubr.f32.gmra.mrb[226].mxu0 %v3682_v40  ;;  %v7695_v29 = vpop.f32.mrb[128].mxu1  ;;  %10716 = vmatprep.subr.bf16.mxu1 %v17550_v50  ;;  %v3707_v9 = vld [vmem:[%s16802_s2 + $0x4d0] sm:$0xff]  ;;  %v17552_v40 = vld [vmem:[#allocation74_spill] sm:$0xff] }
 0x200   :  { %v15067_v38 = vadd.f32 %v7606_v27, %v2395_v13  ;;  %v7641_v55 = vadd.f32 %v7640_v44, %v7639_v18  ;;  %10686 = vmatpush3.bf16.msra.mxu0 %v17551_v56  ;;  %v7696_v57 = vpop.f32.mrb[129].mxu1  ;;  %4057 = vmatprep.mubr.f32.mxu0 %v3708_v63  ;;  %v3733_v50 = vld [vmem:[%s16802_s2 + $0x5a0] sm:$0xff]  ;;  %v17553_v18 = vld [vmem:[#allocation73_spill] sm:$0xff] }
 0x201   :  { %v7697_v5 = vadd.f32 %v7696_v57, %v7695_v29  ;;  %4158 = vmatmul.mubr.f32.gmra.mrb[226].mxu1 %v3684_v11  ;;  %10688 = vmatprep.subr.bf16.mxu0 %v17552_v40  ;;  %v3709_v63 = vld [vmem:[%s16802_s2 + $0x4e0] sm:$0xff]  ;;  %v17554_v11 = vld [vmem:[#allocation75_spill] sm:$0xff]  ;;  %v3735_v29 = vld [vmem:[%s16802_s2 + $0x5b0] sm:$0xff] }
 0x202   :  { %v2570_v27 = vadd.f32 %v7641_v55, %v14934_v62  ;;  %v7642_v13 = vpop.f32.mrb[122].mxu0  ;;  %10718 = vmatpush3.bf16.msra.mxu1 %v17553_v18  ;;  %4162 = vmatprep.mubr.f32.mxu1 %v3710_v30  ;;  %v17555_v55 = vld [vmem:[#allocation76_spill] sm:$0xff]  ;;  %v3732_v30 = vld [vmem:[%s16802_s2 + $0x598] sm:$0xff] }
 0x203   :  { %v7643_v44 = vpop.f32.mrb[123].mxu0  ;;  %4058 = vmatmul.mubr.f32.gmra.mrb[228].mxu0 %v3707_v9  ;;  %v7698_v57 = vpop.f32.mrb[130].mxu1  ;;  %10720 = vmatprep.subr.bf16.mxu1 %v17554_v11  ;;  %v17556_v9 = vld [vmem:[#allocation78_spill] sm:$0xff]  ;;  %v3562_v11 = vld [vmem:[%s16802_s2 + $0x48] sm:$0xff] }
 0x204   :  { %v15086_v40 = vadd.f32 %v7697_v5, %v2570_v27  ;;  %v7644_v62 = vadd.f32 %v7643_v44, %v7642_v13  ;;  %10690 = vmatpush3.bf16.msra.mxu0 %v17555_v55  ;;  %v7699_v18 = vpop.f32.mrb[131].mxu1  ;;  %4062 = vmatprep.mubr.f32.mxu0 %v3733_v50  ;;  %v17557_v13 = vld [vmem:[#allocation77_spill] sm:$0xff]  ;;  %v3734_v50 = vld [vmem:[%s16802_s2 + $0x5a8] sm:$0xff] }
 0x205   :  { %v7700_v56 = vadd.f32 %v7699_v18, %v7698_v57  ;;  %4163 = vmatmul.mubr.f32.gmra.mrb[228].mxu1 %v3709_v63  ;;  %10692 = vmatprep.subr.bf16.mxu0 %v17556_v9  ;;  %v17558_v63 = vld [vmem:[#allocation79_spill] sm:$0xff]  ;;  %v3564_v57 = vld [vmem:[%s16802_s2 + $0x58] sm:$0xff] }
 0x206   :  { %v2575_v5 = vadd.f32 %v7644_v62, %v14953_v49  ;;  %v7645_v27 = vpop.f32.mrb[124].mxu0  ;;  %10722 = vmatpush3.bf16.msra.mxu1 %v17557_v13  ;;  %4167 = vmatprep.mubr.f32.mxu1 %v3735_v29  ;;  %v17559_v62 = vld [vmem:[#allocation80_spill] sm:$0xff]  ;;  %v3561_v29 = vld [vmem:[%s16802_s2 + $0x40] sm:$0xff] }
 0x207   :  { %v7646_v44 = vpop.f32.mrb[125].mxu0  ;;  %4063 = vmatmul.mubr.f32.gmra.mrb[230].mxu0 %v3732_v30  ;;  %v7701_v18 = vpop.f32.mrb[132].mxu1  ;;  %10724 = vmatprep.subr.bf16.mxu1 %v17558_v63  ;;  %v17560_v30 = vld [vmem:[#allocation82_spill] sm:$0xff]  ;;  %v3587_v63 = vld [vmem:[%s16802_s2 + $0x110] sm:$0xff] }
 0x208   :  { %v15105_v9 = vadd.f32 %v7700_v56, %v2575_v5  ;;  %v7647_v49 = vadd.f32 %v7646_v44, %v7645_v27  ;;  %10694 = vmatpush3.bf16.msra.mxu0 %v17559_v62  ;;  %v7702_v13 = vpop.f32.mrb[133].mxu1  ;;  %4237 = vmatprep.mubr.f32.mxu0 %v3562_v11  ;;  %v17561_v27 = vld [vmem:[#allocation81_spill] sm:$0xff]  ;;  %v3563_v11 = vld [vmem:[%s16802_s2 + $0x50] sm:$0xff] }
 0x209   :  { %v7703_v55 = vadd.f32 %v7702_v13, %v7701_v18  ;;  %4168 = vmatmul.mubr.f32.gmra.mrb[230].mxu1 %v3734_v50  ;;  %10728 = vmatprep.subr.bf16.mxu0 %v17560_v30  ;;  %v17562_v50 = vld [vmem:[#allocation83_spill] sm:$0xff]  ;;  %v3589_v18 = vld [vmem:[%s16802_s2 + $0x120] sm:$0xff] }
 0x20a   :  { %v2580_v56 = vadd.f32 %v7647_v49, %v14972_v19  ;;  %v7648_v5 = vpop.f32.mrb[126].mxu0  ;;  %10726 = vmatpush3.bf16.msra.mxu1 %v17561_v27  ;;  %4342 = vmatprep.mubr.f32.mxu1 %v3564_v57  ;;  %v17563_v49 = vld [vmem:[#allocation84_spill] sm:$0xff]  ;;  %v3586_v57 = vld [vmem:[%s16802_s2 + $0x108] sm:$0xff] }
 0x20b   :  { %v7649_v44 = vpop.f32.mrb[127].mxu0  ;;  %4238 = vmatmul.mubr.f32.vlgmr.msra.gmra.mrb[232].mxu0 %v3561_v29  ;;  %v7704_v13 = vpop.f32.mrb[134].mxu1  ;;  %10760 = vmatprep.subr.bf16.mxu1 %v17562_v50  ;;  %v17564_v29 = vld [vmem:[#allocation86_spill] sm:$0xff]  ;;  %v3612_v50 = vld [vmem:[%s16802_s2 + $0x1d8] sm:$0xff] }
 0x20c   :  { %v15124_v30 = vadd.f32 %v7703_v55, %v2580_v56  ;;  %v7650_v19 = vadd.f32 %v7649_v44, %v7648_v5  ;;  %10730 = vmatpush3.bf16.msra.mxu0 %v17563_v49  ;;  %v7705_v27 = vpop.f32.mrb[135].mxu1  ;;  %4242 = vmatprep.mubr.f32.mxu0 %v3587_v63  ;;  %v17565_v5 = vld [vmem:[#allocation85_spill] sm:$0xff] }
 0x20d   :  { %v7706_v62 = vadd.f32 %v7705_v27, %v7704_v13  ;;  %4343 = vmatmul.mubr.f32.vlgmr.msra.gmra.mrb[232].mxu1 %v3563_v11  ;;  %10732 = vmatprep.subr.bf16.mxu0 %v17564_v29  ;;  %v3588_v63 = vld [vmem:[%s16802_s2 + $0x118] sm:$0xff]  ;;  %v17566_v11 = vld [vmem:[#allocation87_spill] sm:$0xff] }
 0x20e   :  { %v2585_v55 = vadd.f32 %v7650_v19, %v14991_v46  ;;  %v7651_v56 = vpop.f32.mrb[128].mxu0  ;;  %10762 = vmatpush3.bf16.msra.mxu1 %v17565_v5  ;;  %4347 = vmatprep.mubr.f32.mxu1 %v3589_v18  ;;  %v3614_v13 = vld [vmem:[%s16802_s2 + $0x1e8] sm:$0xff]  ;;  %v17567_v19 = vld [vmem:[#allocation88_spill] sm:$0xff] }
 0x20f   :  { %v7652_v44 = vpop.f32.mrb[129].mxu0  ;;  %4243 = vmatmul.mubr.f32.gmra.mrb[234].mxu0 %v3586_v57  ;;  %v7707_v27 = vpop.f32.mrb[136].mxu1  ;;  %10764 = vmatprep.subr.bf16.mxu1 %v17566_v11  ;;  %v3611_v18 = vld [vmem:[%s16802_s2 + $0x1d0] sm:$0xff]  ;;  %v17568_v57 = vld [vmem:[#allocation90_spill] sm:$0xff] }
 0x210   :  { %v15143_v29 = vadd.f32 %v7706_v62, %v2585_v55  ;;  %v7653_v46 = vadd.f32 %v7652_v44, %v7651_v56  ;;  %10734 = vmatpush3.bf16.msra.mxu0 %v17567_v19  ;;  %v7708_v5 = vpop.f32.mrb[137].mxu1  ;;  %4247 = vmatprep.mubr.f32.mxu0 %v3612_v50  ;;  %v3637_v11 = vld [vmem:[%s16802_s2 + $0x2a0] sm:$0xff]  ;;  %v17569_v56 = vld [vmem:[#allocation89_spill] sm:$0xff]  ;;  %v17571_v19 = vld [vmem:[#allocation92_spill] sm:$0xff] }
 0x211   :  { %v7709_v49 = vadd.f32 %v7708_v5, %v7707_v27  ;;  %4348 = vmatmul.mubr.f32.gmra.mrb[234].mxu1 %v3588_v63  ;;  %10736 = vmatprep.subr.bf16.mxu0 %v17568_v57  ;;  %v3613_v50 = vld [vmem:[%s16802_s2 + $0x1e0] sm:$0xff]  ;;  %v17570_v63 = vld [vmem:[#allocation91_spill] sm:$0xff]  ;;  %v3639_v27 = vld [vmem:[%s16802_s2 + $0x2b0] sm:$0xff] }
 0x212   :  { %v2590_v62 = vadd.f32 %v7653_v46, %v15010_v36  ;;  %v7654_v55 = vpop.f32.mrb[130].mxu0  ;;  %10766 = vmatpush3.bf16.msra.mxu1 %v17569_v56  ;;  %4352 = vmatprep.mubr.f32.mxu1 %v3614_v13  ;;  %v3636_v13 = vld [vmem:[%s16802_s2 + $0x298] sm:$0xff] }
 0x213   :  { %v7655_v44 = vpop.f32.mrb[131].mxu0  ;;  %4248 = vmatmul.mubr.f32.gmra.mrb[236].mxu0 %v3611_v18  ;;  %v7710_v5 = vpop.f32.mrb[138].mxu1  ;;  %10768 = vmatprep.subr.bf16.mxu1 %v17570_v63  ;;  %v17572_v18 = vld [vmem:[#allocation94_spill] sm:$0xff]  ;;  %v3662_v63 = vld [vmem:[%s16802_s2 + $0x368] sm:$0xff] }
 0x214   :  { %v7656_v57 = vadd.f32 %v7655_v44, %v7654_v55  ;;  %10738 = vmatpush3.bf16.msra.mxu0 %v17571_v19  ;;  %v7711_v36 = vpop.f32.mrb[139].mxu1  ;;  %4252 = vmatprep.mubr.f32.mxu0 %v3637_v11  ;;  %v15166_v46 = vadd.f32 %v7709_v49, %v2590_v62  ;;  %v17573_v19 = vld [vmem:[#allocation93_spill] sm:$0xff]  ;;  %v3638_v11 = vld [vmem:[%s16802_s2 + $0x2a8] sm:$0xff] }
 0x215   :  { %v7712_v56 = vadd.f32 %v7711_v36, %v7710_v5  ;;  %4353 = vmatmul.mubr.f32.gmra.mrb[236].mxu1 %v3613_v50  ;;  %10740 = vmatprep.subr.bf16.mxu0 %v17572_v18  ;;  %v17574_v50 = vld [vmem:[#allocation95_spill] sm:$0xff]  ;;  %v3664_v5 = vld [vmem:[%s16802_s2 + $0x378] sm:$0xff]  ;;  %v17575_v18 = vld [vmem:[#allocation96_spill] sm:$0xff] }
 0x216   :  { %v2595_v55 = vadd.f32 %v7656_v57, %v15029_v41  ;;  %v7657_v44 = vpop.f32.mrb[132].mxu0  ;;  %10770 = vmatpush3.bf16.msra.mxu1 %v17573_v19  ;;  %4357 = vmatprep.mubr.f32.mxu1 %v3639_v27  ;;  %v3661_v57 = vld [vmem:[%s16802_s2 + $0x360] sm:$0xff] }
 0x217   :  { %v7658_v49 = vpop.f32.mrb[133].mxu0  ;;  %4253 = vmatmul.mubr.f32.gmra.mrb[238].mxu0 %v3636_v13  ;;  %v7713_v62 = vpop.f32.mrb[140].mxu1  ;;  %10772 = vmatprep.subr.bf16.mxu1 %v17574_v50  ;;  %v17576_v13 = vld [vmem:[#allocation98_spill] sm:$0xff]  ;;  %v3687_v50 = vld [vmem:[%s16802_s2 + $0x430] sm:$0xff] }
 0x218   :  { %v7659_v36 = vadd.f32 %v7658_v49, %v7657_v44  ;;  %10742 = vmatpush3.bf16.msra.mxu0 %v17575_v18  ;;  %v7714_v41 = vpop.f32.mrb[141].mxu1  ;;  %4257 = vmatprep.mubr.f32.mxu0 %v3662_v63  ;;  %v15185_v27 = vadd.f32 %v7712_v56, %v2595_v55  ;;  %v17577_v18 = vld [vmem:[#allocation97_spill] sm:$0xff]  ;;  %v3663_v63 = vld [vmem:[%s16802_s2 + $0x370] sm:$0xff] }
 0x219   :  { %v7715_v19 = vadd.f32 %v7714_v41, %v7713_v62  ;;  %4358 = vmatmul.mubr.f32.gmra.mrb[238].mxu1 %v3638_v11  ;;  %10744 = vmatprep.subr.bf16.mxu0 %v17576_v13  ;;  %v17578_v11 = vld [vmem:[#allocation99_spill] sm:$0xff]  ;;  %v3689_v62 = vld [vmem:[%s16802_s2 + $0x440] sm:$0xff]  ;;  %v17579_v13 = vld [vmem:[#allocation100_spill] sm:$0xff] }
 0x21a   :  { %v2600_v44 = vadd.f32 %v7659_v36, %v15048_v31  ;;  %v7660_v49 = vpop.f32.mrb[134].mxu0  ;;  %10774 = vmatpush3.bf16.msra.mxu1 %v17577_v18  ;;  %4362 = vmatprep.mubr.f32.mxu1 %v3664_v5  ;;  %v3686_v5 = vld [vmem:[%s16802_s2 + $0x428] sm:$0xff] }
 0x21b   :  { %v7661_v56 = vpop.f32.mrb[135].mxu0  ;;  %4258 = vmatmul.mubr.f32.gmra.mrb[240].mxu0 %v3661_v57  ;;  %v7716_v55 = vpop.f32.mrb[142].mxu1  ;;  %10776 = vmatprep.subr.bf16.mxu1 %v17578_v11  ;;  %v17580_v57 = vld [vmem:[#allocation102_spill] sm:$0xff]  ;;  %v3712_v11 = vld [vmem:[%s16802_s2 + $0x4f8] sm:$0xff] }
 0x21c   :  { %v7662_v41 = vadd.f32 %v7661_v56, %v7660_v49  ;;  %10746 = vmatpush3.bf16.msra.mxu0 %v17579_v13  ;;  %v7717_v31 = vpop.f32.mrb[143].mxu1  ;;  %4262 = vmatprep.mubr.f32.mxu0 %v3687_v50  ;;  %v15204_v36 = vadd.f32 %v7715_v19, %v2600_v44  ;;  %v17581_v13 = vld [vmem:[#allocation101_spill] sm:$0xff] }
 0x21d   :  { %v7718_v18 = vadd.f32 %v7717_v31, %v7716_v55  ;;  %4363 = vmatmul.mubr.f32.gmra.mrb[240].mxu1 %v3663_v63  ;;  %10748 = vmatprep.subr.bf16.mxu0 %v17580_v57  ;;  %v3688_v50 = vld [vmem:[%s16802_s2 + $0x438] sm:$0xff]  ;;  %v17582_v63 = vld [vmem:[#allocation103_spill] sm:$0xff]  ;;  %v17583_v57 = vld [vmem:[#allocation104_spill] sm:$0xff] }
 0x21e   :  { %v2605_v49 = vadd.f32 %v7662_v41, %v15067_v38  ;;  %v7751_v56 = vpop.f32.mrb[136].mxu0  ;;  %10778 = vmatpush3.bf16.msra.mxu1 %v17581_v13  ;;  %4367 = vmatprep.mubr.f32.mxu1 %v3689_v62  ;;  %v3714_v55 = vld [vmem:[%s16802_s2 + $0x508] sm:$0xff]  ;;  %v3711_v62 = vld [vmem:[%s16802_s2 + $0x4f0] sm:$0xff] }
 0x21f   :  { %v7752_v19 = vpop.f32.mrb[137].mxu0  ;;  %4263 = vmatmul.mubr.f32.gmra.mrb[242].mxu0 %v3686_v5  ;;  %v7807_v44 = vpop.f32.mrb[144].mxu1  ;;  %10780 = vmatprep.subr.bf16.mxu1 %v17582_v63  ;;  %v17584_v5 = vld [vmem:[#allocation106_spill] sm:$0xff] }
 0x220   :  { %v7753_v31 = vadd.f32 %v7752_v19, %v7751_v56  ;;  %10750 = vmatpush3.bf16.msra.mxu0 %v17583_v57  ;;  %v7808_v38 = vpop.f32.mrb[145].mxu1  ;;  %4267 = vmatprep.mubr.f32.mxu0 %v3712_v11  ;;  %v15223_v41 = vadd.f32 %v7718_v18, %v2605_v49  ;;  %v3737_v63 = vld [vmem:[%s16802_s2 + $0x5c0] sm:$0xff]  ;;  %v17585_v57 = vld [vmem:[#allocation105_spill] sm:$0xff] }
 0x221   :  { %v7809_v13 = vadd.f32 %v7808_v38, %v7807_v44  ;;  %4368 = vmatmul.mubr.f32.gmra.mrb[242].mxu1 %v3688_v50  ;;  %10752 = vmatprep.subr.bf16.mxu0 %v17584_v5  ;;  %v3713_v11 = vld [vmem:[%s16802_s2 + $0x500] sm:$0xff]  ;;  %v17586_v50 = vld [vmem:[#allocation107_spill] sm:$0xff]  ;;  %v3739_v44 = vld [vmem:[%s16802_s2 + $0x5d0] sm:$0xff] }
 0x222   :  { %v2780_v56 = vadd.f32 %v7753_v31, %v15086_v40  ;;  %v7754_v19 = vpop.f32.mrb[138].mxu0  ;;  %10782 = vmatpush3.bf16.msra.mxu1 %v17585_v57  ;;  %4372 = vmatprep.mubr.f32.mxu1 %v3714_v55  ;;  %v17587_v31 = vld [vmem:[#allocation108_spill] sm:$0xff]  ;;  %v3736_v55 = vld [vmem:[%s16802_s2 + $0x5b8] sm:$0xff] }
 0x223   :  { %v7755_v18 = vpop.f32.mrb[139].mxu0  ;;  %4268 = vmatmul.mubr.f32.gmra.mrb[244].mxu0 %v3711_v62  ;;  %v7810_v49 = vpop.f32.mrb[146].mxu1  ;;  %10784 = vmatprep.subr.bf16.mxu1 %v17586_v50  ;;  %v17588_v62 = vld [vmem:[#allocation110_spill] sm:$0xff]  ;;  %v3566_v50 = vld [vmem:[%s16802_s2 + $0x68] sm:$0xff] }
 0x224   :  { %v15238_v38 = vadd.f32 %v7809_v13, %v2780_v56  ;;  %v7756_v40 = vadd.f32 %v7755_v18, %v7754_v19  ;;  %10754 = vmatpush3.bf16.msra.mxu0 %v17587_v31  ;;  %v7811_v57 = vpop.f32.mrb[147].mxu1  ;;  %4272 = vmatprep.mubr.f32.mxu0 %v3737_v63  ;;  %v17589_v19 = vld [vmem:[#allocation109_spill] sm:$0xff]  ;;  %v3738_v63 = vld [vmem:[%s16802_s2 + $0x5c8] sm:$0xff] }
 0x225   :  { %v7812_v5 = vadd.f32 %v7811_v57, %v7810_v49  ;;  %4373 = vmatmul.mubr.f32.gmra.mrb[244].mxu1 %v3713_v11  ;;  %10756 = vmatprep.subr.bf16.mxu0 %v17588_v62  ;;  %v17590_v11 = vld [vmem:[#allocation111_spill] sm:$0xff]  ;;  %v3568_v49 = vld [vmem:[%s16802_s2 + $0x78] sm:$0xff] }
 0x226   :  { %v2785_v13 = vadd.f32 %v7756_v40, %v15105_v9  ;;  %v7757_v56 = vpop.f32.mrb[140].mxu0  ;;  %10786 = vmatpush3.bf16.msra.mxu1 %v17589_v19  ;;  %4377 = vmatprep.mubr.f32.mxu1 %v3739_v44  ;;  %v17591_v40 = vld [vmem:[#allocation112_spill] sm:$0xff]  ;;  %v3565_v44 = vld [vmem:[%s16802_s2 + $0x60] sm:$0xff] }
 0x227   :  { %v7758_v18 = vpop.f32.mrb[141].mxu0  ;;  %4273 = vmatmul.mubr.f32.gmra.mrb[246].mxu0 %v3736_v55  ;;  %v7813_v57 = vpop.f32.mrb[148].mxu1  ;;  %10788 = vmatprep.subr.bf16.mxu1 %v17590_v11  ;;  %v17592_v55 = vld [vmem:[#allocation114_spill] sm:$0xff]  ;;  %v3591_v11 = vld [vmem:[%s16802_s2 + $0x130] sm:$0xff] }
 0x228   :  { %v15257_v62 = vadd.f32 %v7812_v5, %v2785_v13  ;;  %v7759_v9 = vadd.f32 %v7758_v18, %v7757_v56  ;;  %10758 = vmatpush3.bf16.msra.mxu0 %v17591_v40  ;;  %v7814_v19 = vpop.f32.mrb[149].mxu1  ;;  %4447 = vmatprep.mubr.f32.mxu0 %v3566_v50  ;;  %v17593_v56 = vld [vmem:[#allocation113_spill] sm:$0xff]  ;;  %v3567_v50 = vld [vmem:[%s16802_s2 + $0x70] sm:$0xff] }
 0x229   :  { %v7815_v31 = vadd.f32 %v7814_v19, %v7813_v57  ;;  %4378 = vmatmul.mubr.f32.gmra.mrb[246].mxu1 %v3738_v63  ;;  %10792 = vmatprep.subr.bf16.mxu0 %v17592_v55  ;;  %v17594_v63 = vld [vmem:[#allocation115_spill] sm:$0xff]  ;;  %v3593_v57 = vld [vmem:[%s16802_s2 + $0x140] sm:$0xff] }
 0x22a   :  { %v2790_v5 = vadd.f32 %v7759_v9, %v15124_v30  ;;  %v7760_v13 = vpop.f32.mrb[142].mxu0  ;;  %10790 = vmatpush3.bf16.msra.mxu1 %v17593_v56  ;;  %4552 = vmatprep.mubr.f32.mxu1 %v3568_v49  ;;  %v17595_v9 = vld [vmem:[#allocation116_spill] sm:$0xff]  ;;  %v3590_v49 = vld [vmem:[%s16802_s2 + $0x128] sm:$0xff] }
 0x22b   :  { %v7761_v18 = vpop.f32.mrb[143].mxu0  ;;  %4448 = vmatmul.mubr.f32.vlgmr.msra.gmra.mrb[248].mxu0 %v3565_v44  ;;  %v7816_v19 = vpop.f32.mrb[150].mxu1  ;;  %10824 = vmatprep.subr.bf16.mxu1 %v17594_v63  ;;  %v17596_v44 = vld [vmem:[#allocation118_spill] sm:$0xff]  ;;  %v3616_v63 = vld [vmem:[%s16802_s2 + $0x1f8] sm:$0xff] }
 0x22c   :  { %v15276_v55 = vadd.f32 %v7815_v31, %v2790_v5  ;;  %v7762_v30 = vadd.f32 %v7761_v18, %v7760_v13  ;;  %10794 = vmatpush3.bf16.msra.mxu0 %v17595_v9  ;;  %v7817_v56 = vpop.f32.mrb[151].mxu1  ;;  %4452 = vmatprep.mubr.f32.mxu0 %v3591_v11  ;;  %v17597_v13 = vld [vmem:[#allocation117_spill] sm:$0xff] }
 0x22d   :  { %v7818_v40 = vadd.f32 %v7817_v56, %v7816_v19  ;;  %4553 = vmatmul.mubr.f32.vlgmr.msra.gmra.mrb[248].mxu1 %v3567_v50  ;;  %10796 = vmatprep.subr.bf16.mxu0 %v17596_v44  ;;  %v3592_v11 = vld [vmem:[%s16802_s2 + $0x138] sm:$0xff]  ;;  %v17598_v50 = vld [vmem:[#allocation119_spill] sm:$0xff] }
 0x22e   :  { %v2795_v31 = vadd.f32 %v7762_v30, %v15143_v29  ;;  %v7763_v5 = vpop.f32.mrb[144].mxu0  ;;  %10826 = vmatpush3.bf16.msra.mxu1 %v17597_v13  ;;  %4557 = vmatprep.mubr.f32.mxu1 %v3593_v57  ;;  %v3618_v19 = vld [vmem:[%s16802_s2 + $0x208] sm:$0xff]  ;;  %v17599_v30 = vld [vmem:[#allocation120_spill] sm:$0xff] }
 0x22f   :  { %v7764_v18 = vpop.f32.mrb[145].mxu0  ;;  %4453 = vmatmul.mubr.f32.gmra.mrb[250].mxu0 %v3590_v49  ;;  %v7819_v56 = vpop.f32.mrb[152].mxu1  ;;  %10828 = vmatprep.subr.bf16.mxu1 %v17598_v50  ;;  %v3615_v57 = vld [vmem:[%s16802_s2 + $0x1f0] sm:$0xff]  ;;  %v17600_v49 = vld [vmem:[#allocation122_spill] sm:$0xff] }
 0x230   :  { %v15295_v44 = vadd.f32 %v7818_v40, %v2795_v31  ;;  %v7765_v29 = vadd.f32 %v7764_v18, %v7763_v5  ;;  %10798 = vmatpush3.bf16.msra.mxu0 %v17599_v30  ;;  %v7820_v13 = vpop.f32.mrb[153].mxu1  ;;  %4457 = vmatprep.mubr.f32.mxu0 %v3616_v63  ;;  %v3641_v50 = vld [vmem:[%s16802_s2 + $0x2c0] sm:$0xff]  ;;  %v17601_v5 = vld [vmem:[#allocation121_spill] sm:$0xff] }
 0x231   :  { %v7821_v9 = vadd.f32 %v7820_v13, %v7819_v56  ;;  %4558 = vmatmul.mubr.f32.gmra.mrb[250].mxu1 %v3592_v11  ;;  %10800 = vmatprep.subr.bf16.mxu0 %v17600_v49  ;;  %v3617_v63 = vld [vmem:[%s16802_s2 + $0x200] sm:$0xff]  ;;  %v17602_v11 = vld [vmem:[#allocation123_spill] sm:$0xff]  ;;  %v3643_v56 = vld [vmem:[%s16802_s2 + $0x2d0] sm:$0xff] }
 0x232   :  { %v2800_v40 = vadd.f32 %v7765_v29, %v15166_v46  ;;  %v7766_v31 = vpop.f32.mrb[146].mxu0  ;;  %10830 = vmatpush3.bf16.msra.mxu1 %v17601_v5  ;;  %4562 = vmatprep.mubr.f32.mxu1 %v3618_v19  ;;  %v17603_v29 = vld [vmem:[#allocation124_spill] sm:$0xff]  ;;  %v3640_v19 = vld [vmem:[%s16802_s2 + $0x2b8] sm:$0xff] }
 0x233   :  { %v7767_v18 = vpop.f32.mrb[147].mxu0  ;;  %4458 = vmatmul.mubr.f32.gmra.mrb[252].mxu0 %v3615_v57  ;;  %v7822_v13 = vpop.f32.mrb[154].mxu1  ;;  %10832 = vmatprep.subr.bf16.mxu1 %v17602_v11  ;;  %v17604_v57 = vld [vmem:[#allocation126_spill] sm:$0xff]  ;;  %v3666_v11 = vld [vmem:[%s16802_s2 + $0x388] sm:$0xff] }
 0x234   :  { %v15314_v49 = vadd.f32 %v7821_v9, %v2800_v40  ;;  %v7768_v46 = vadd.f32 %v7767_v18, %v7766_v31  ;;  %10802 = vmatpush3.bf16.msra.mxu0 %v17603_v29  ;;  %v7823_v5 = vpop.f32.mrb[155].mxu1  ;;  %4462 = vmatprep.mubr.f32.mxu0 %v3641_v50  ;;  %v17605_v31 = vld [vmem:[#allocation125_spill] sm:$0xff]  ;;  %v3642_v50 = vld [vmem:[%s16802_s2 + $0x2c8] sm:$0xff] }
 0x235   :  { %v7824_v30 = vadd.f32 %v7823_v5, %v7822_v13  ;;  %4563 = vmatmul.mubr.f32.gmra.mrb[252].mxu1 %v3617_v63  ;;  %10804 = vmatprep.subr.bf16.mxu0 %v17604_v57  ;;  %v17606_v63 = vld [vmem:[#allocation127_spill] sm:$0xff]  ;;  %v3668_v13 = vld [vmem:[%s16802_s2 + $0x398] sm:$0xff] }
 0x236   :  { %v2805_v9 = vadd.f32 %v7768_v46, %v15185_v27  ;;  %v7769_v40 = vpop.f32.mrb[148].mxu0  ;;  %10834 = vmatpush3.bf16.msra.mxu1 %v17605_v31  ;;  %4567 = vmatprep.mubr.f32.mxu1 %v3643_v56  ;;  %v17607_v46 = vld [vmem:[#allocation128_spill] sm:$0xff]  ;;  %v3665_v56 = vld [vmem:[%s16802_s2 + $0x380] sm:$0xff] }
 0x237   :  { %v7770_v18 = vpop.f32.mrb[149].mxu0  ;;  %4463 = vmatmul.mubr.f32.gmra.mrb[254].mxu0 %v3640_v19  ;;  %v7825_v5 = vpop.f32.mrb[156].mxu1  ;;  %10836 = vmatprep.subr.bf16.mxu1 %v17606_v63  ;;  %v17608_v19 = vld [vmem:[#allocation130_spill] sm:$0xff]  ;;  %v3691_v63 = vld [vmem:[%s16802_s2 + $0x450] sm:$0xff] }
 0x238   :  { %v15333_v57 = vadd.f32 %v7824_v30, %v2805_v9  ;;  %v7771_v27 = vadd.f32 %v7770_v18, %v7769_v40  ;;  %10806 = vmatpush3.bf16.msra.mxu0 %v17607_v46  ;;  %v7826_v31 = vpop.f32.mrb[157].mxu1  ;;  %4467 = vmatprep.mubr.f32.mxu0 %v3666_v11  ;;  %v17609_v40 = vld [vmem:[#allocation129_spill] sm:$0xff]  ;;  %v3667_v11 = vld [vmem:[%s16802_s2 + $0x390] sm:$0xff] }
 0x239   :  { %v7827_v29 = vadd.f32 %v7826_v31, %v7825_v5  ;;  %4568 = vmatmul.mubr.f32.gmra.mrb[254].mxu1 %v3642_v50  ;;  %10808 = vmatprep.subr.bf16.mxu0 %v17608_v19  ;;  %v17610_v50 = vld [vmem:[#allocation131_spill] sm:$0xff]  ;;  %v3693_v5 = vld [vmem:[%s16802_s2 + $0x460] sm:$0xff] }
 0x23a   :  { %v2810_v30 = vadd.f32 %v7771_v27, %v15204_v36  ;;  %v7772_v9 = vpop.f32.mrb[150].mxu0  ;;  %10838 = vmatpush3.bf16.msra.mxu1 %v17609_v40  ;;  %4572 = vmatprep.mubr.f32.mxu1 %v3668_v13  ;;  %v17611_v27 = vld [vmem:[#allocation132_spill] sm:$0xff]  ;;  %v3690_v13 = vld [vmem:[%s16802_s2 + $0x448] sm:$0xff] }
 0x23b   :  { %v7773_v18 = vpop.f32.mrb[151].mxu0  ;;  %4468 = vmatmul.mubr.f32.gmra.mrb[0].mxu0 %v3665_v56  ;;  %v7828_v31 = vpop.f32.mrb[158].mxu1  ;;  %10840 = vmatprep.subr.bf16.mxu1 %v17610_v50  ;;  %v17612_v56 = vld [vmem:[#allocation134_spill] sm:$0xff]  ;;  %v3716_v50 = vld [vmem:[%s16802_s2 + $0x518] sm:$0xff] }
 0x23c   :  { %v15352_v19 = vadd.f32 %v7827_v29, %v2810_v30  ;;  %v7774_v36 = vadd.f32 %v7773_v18, %v7772_v9  ;;  %10810 = vmatpush3.bf16.msra.mxu0 %v17611_v27  ;;  %v7829_v40 = vpop.f32.mrb[159].mxu1  ;;  %4472 = vmatprep.mubr.f32.mxu0 %v3691_v63  ;;  %v17613_v9 = vld [vmem:[#allocation133_spill] sm:$0xff] }
 0x23d   :  { %v7830_v46 = vadd.f32 %v7829_v40, %v7828_v31  ;;  %4573 = vmatmul.mubr.f32.gmra.mrb[0].mxu1 %v3667_v11  ;;  %10812 = vmatprep.subr.bf16.mxu0 %v17612_v56  ;;  %v3692_v63 = vld [vmem:[%s16802_s2 + $0x458] sm:$0xff]  ;;  %v17614_v11 = vld [vmem:[#allocation135_spill] sm:$0xff] }
 0x23e   :  { %v2815_v29 = vadd.f32 %v7774_v36, %v15223_v41  ;;  %v7863_v30 = vpop.f32.mrb[152].mxu0  ;;  %10842 = vmatpush3.bf16.msra.mxu1 %v17613_v9  ;;  %4577 = vmatprep.mubr.f32.mxu1 %v3693_v5  ;;  %v3718_v31 = vld [vmem:[%s16802_s2 + $0x528] sm:$0xff]  ;;  %v17615_v36 = vld [vmem:[#allocation136_spill] sm:$0xff] }
 0x23f   :  { %v7864_v18 = vpop.f32.mrb[153].mxu0  ;;  %4473 = vmatmul.mubr.f32.gmra.mrb[2].mxu0 %v3690_v13  ;;  %v7919_v40 = vpop.f32.mrb[160].mxu1  ;;  %10844 = vmatprep.subr.bf16.mxu1 %v17614_v11  ;;  %v3715_v5 = vld [vmem:[%s16802_s2 + $0x510] sm:$0xff]  ;;  %v17616_v13 = vld [vmem:[#allocation138_spill] sm:$0xff] }
 0x240   :  { %v15371_v56 = vadd.f32 %v7830_v46, %v2815_v29  ;;  %v7865_v41 = vadd.f32 %v7864_v18, %v7863_v30  ;;  %10814 = vmatpush3.bf16.msra.mxu0 %v17615_v36  ;;  %v7920_v9 = vpop.f32.mrb[161].mxu1  ;;  %4477 = vmatprep.mubr.f32.mxu0 %v3716_v50  ;;  %v3741_v11 = vld [vmem:[%s16802_s2 + $0x5e0] sm:$0xff]  ;;  %v17617_v30 = vld [vmem:[#allocation137_spill] sm:$0xff] }
 0x241   :  { %v7921_v27 = vadd.f32 %v7920_v9, %v7919_v40  ;;  %4578 = vmatmul.mubr.f32.gmra.mrb[2].mxu1 %v3692_v63  ;;  %10816 = vmatprep.subr.bf16.mxu0 %v17616_v13  ;;  %v3717_v50 = vld [vmem:[%s16802_s2 + $0x520] sm:$0xff]  ;;  %v17618_v63 = vld [vmem:[#allocation139_spill] sm:$0xff]  ;;  %v3743_v40 = vld [vmem:[%s16802_s2 + $0x5f0] sm:$0xff] }
 0x242   :  { %v2990_v46 = vadd.f32 %v7865_v41, %v15238_v38  ;;  %v7866_v29 = vpop.f32.mrb[154].mxu0  ;;  %10846 = vmatpush3.bf16.msra.mxu1 %v17617_v30  ;;  %4582 = vmatprep.mubr.f32.mxu1 %v3718_v31  ;;  %v17619_v41 = vld [vmem:[#allocation140_spill] sm:$0xff]  ;;  %v3740_v31 = vld [vmem:[%s16802_s2 + $0x5d8] sm:$0xff] }
 0x243   :  { %v7867_v18 = vpop.f32.mrb[155].mxu0  ;;  %4478 = vmatmul.mubr.f32.gmra.mrb[4].mxu0 %v3715_v5  ;;  %v7922_v9 = vpop.f32.mrb[162].mxu1  ;;  %10848 = vmatprep.subr.bf16.mxu1 %v17618_v63  ;;  %v17620_v5 = vld [vmem:[#allocation142_spill] sm:$0xff]  ;;  %v3570_v63 = vld [vmem:[%s16802_s2 + $0x88] sm:$0xff] }
 0x244   :  { %v15390_v13 = vadd.f32 %v7921_v27, %v2990_v46  ;;  %v7868_v38 = vadd.f32 %v7867_v18, %v7866_v29  ;;  %10818 = vmatpush3.bf16.msra.mxu0 %v17619_v41  ;;  %v7923_v30 = vpop.f32.mrb[163].mxu1  ;;  %4482 = vmatprep.mubr.f32.mxu0 %v3741_v11  ;;  %v3742_v11 = vld [vmem:[%s16802_s2 + $0x5e8] sm:$0xff] }
 0x245   :  { %v7924_v36 = vadd.f32 %v7923_v30, %v7922_v9  ;;  %4583 = vmatmul.mubr.f32.gmra.mrb[4].mxu1 %v3717_v50  ;;  %10820 = vmatprep.subr.bf16.mxu0 %v17620_v5  ;;  %v3572_v50 = vld [vmem:[%s16802_s2 + $0x98] sm:$0xff]  ;;  %v17621_v9 = vld [vmem:[#allocation144_spill] sm:$0xff] }
 0x246   :  { %v2995_v27 = vadd.f32 %v7868_v38, %v15257_v62  ;;  %v7869_v46 = vpop.f32.mrb[156].mxu0  ;;  %10850 = vmatpush3.bf16.msra.mxu1 %v17472_v6  ;;  %4587 = vmatprep.mubr.f32.mxu1 %v3743_v40  ;;  %v3569_v40 = vld [vmem:[%s16802_s2 + $0x80] sm:$0xff] }
 0x247   :  { %v7870_v29 = vpop.f32.mrb[157].mxu0  ;;  %4483 = vmatmul.mubr.f32.gmra.mrb[6].mxu0 %v3740_v31  ;;  %v7925_v30 = vpop.f32.mrb[164].mxu1  ;;  %10852 = vmatprep.subr.bf16.mxu1 %v17474_v15  ;;  %v17622_v31 = vld [vmem:[#allocation146_spill] sm:$0xff]  ;;  %v3595_v15 = vld [vmem:[%s16802_s2 + $0x150] sm:$0xff] }
 0x248   :  { %v15409_v18 = vadd.f32 %v7924_v36, %v2995_v27  ;;  %v7871_v62 = vadd.f32 %v7870_v29, %v7869_v46  ;;  %10822 = vmatpush3.bf16.msra.mxu0 %v17621_v9  ;;  %v7926_v38 = vpop.f32.mrb[165].mxu1  ;;  %4657 = vmatprep.mubr.f32.mxu0 %v3570_v63  ;;  %v3571_v63 = vld [vmem:[%s16802_s2 + $0x90] sm:$0xff] }
 0x249   :  { %v7927_v6 = vadd.f32 %v7926_v38, %v7925_v30  ;;  %4588 = vmatmul.mubr.f32.gmra.mrb[6].mxu1 %v3742_v11  ;;  %10856 = vmatprep.subr.bf16.mxu0 %v17622_v31  ;;  %v17623_v11 = vld [vmem:[#allocation147_spill] sm:$0xff]  ;;  %v3597_v30 = vld [vmem:[%s16802_s2 + $0x160] sm:$0xff] }
 0x24a   :  { %v3000_v36 = vadd.f32 %v7871_v62, %v15276_v55  ;;  %v7872_v27 = vpop.f32.mrb[158].mxu0  ;;  %10854 = vmatpush3.bf16.msra.mxu1 %v17475_v24  ;;  %4762 = vmatprep.mubr.f32.mxu1 %v3572_v50  ;;  %v17624_v62 = vld [vmem:[#allocation148_spill] sm:$0xff]  ;;  %v3594_v50 = vld [vmem:[%s16802_s2 + $0x148] sm:$0xff] }
 0x24b   :  { %v7873_v46 = vpop.f32.mrb[159].mxu0  ;;  %4658 = vmatmul.mubr.f32.vlgmr.msra.gmra.mrb[8].mxu0 %v3569_v40  ;;  %v7928_v29 = vpop.f32.mrb[166].mxu1  ;;  %10888 = vmatprep.subr.bf16.mxu1 %v17623_v11  ;;  %v17625_v40 = vld [vmem:[#allocation150_spill] sm:$0xff]  ;;  %v3620_v11 = vld [vmem:[%s16802_s2 + $0x218] sm:$0xff] }
 0x24c   :  { %v15428_v38 = vadd.f32 %v7927_v6, %v3000_v36  ;;  %v7874_v55 = vadd.f32 %v7873_v46, %v7872_v27  ;;  %10858 = vmatpush3.bf16.msra.mxu0 %v17624_v62  ;;  %v7929_v24 = vpop.f32.mrb[167].mxu1  ;;  %4662 = vmatprep.mubr.f32.mxu0 %v3595_v15  ;;  %v3596_v15 = vld [vmem:[%s16802_s2 + $0x158] sm:$0xff]  ;;  %v3622_v46 = vld [vmem:[%s16802_s2 + $0x228] sm:$0xff] }
 0x24d   :  { %v7930_v31 = vadd.f32 %v7929_v24, %v7928_v29  ;;  %4763 = vmatmul.mubr.f32.vlgmr.msra.gmra.mrb[8].mxu1 %v3571_v63  ;;  %10860 = vmatprep.subr.bf16.mxu0 %v17625_v40  ;;  %v17626_v63 = vld [vmem:[#allocation151_spill] sm:$0xff] }
 0x24e   :  { %v3005_v6 = vadd.f32 %v7874_v55, %v15295_v44  ;;  %v7875_v36 = vpop.f32.mrb[160].mxu0  ;;  %10890 = vmatpush3.bf16.msra.mxu1 %v17477_v45  ;;  %4767 = vmatprep.mubr.f32.mxu1 %v3597_v30  ;;  %v17627_v55 = vld [vmem:[#allocation152_spill] sm:$0xff] }
 0x24f   :  { %v7876_v27 = vpop.f32.mrb[161].mxu0  ;;  %4663 = vmatmul.mubr.f32.gmra.mrb[10].mxu0 %v3594_v50  ;;  %v7931_v24 = vpop.f32.mrb[168].mxu1  ;;  %10892 = vmatprep.subr.bf16.mxu1 %v17626_v63  ;;  %v3619_v30 = vld [vmem:[%s16802_s2 + $0x210] sm:$0xff]  ;;  %v17628_v50 = vld [vmem:[#allocation154_spill] sm:$0xff] }
 0x250   :  { %v15447_v29 = vadd.f32 %v7930_v31, %v3005_v6  ;;  %v7877_v44 = vadd.f32 %v7876_v27, %v7875_v36  ;;  %10862 = vmatpush3.bf16.msra.mxu0 %v17627_v55  ;;  %v7932_v45 = vpop.f32.mrb[169].mxu1  ;;  %4667 = vmatprep.mubr.f32.mxu0 %v3620_v11  ;;  %v3645_v63 = vld [vmem:[%s16802_s2 + $0x2e0] sm:$0xff]  ;;  %v3647_v27 = vld [vmem:[%s16802_s2 + $0x2f0] sm:$0xff] }
 0x251   :  { %v7933_v40 = vadd.f32 %v7932_v45, %v7931_v24  ;;  %4768 = vmatmul.mubr.f32.gmra.mrb[10].mxu1 %v3596_v15  ;;  %10864 = vmatprep.subr.bf16.mxu0 %v17628_v50  ;;  %v3621_v11 = vld [vmem:[%s16802_s2 + $0x220] sm:$0xff]  ;;  %v17629_v15 = vld [vmem:[#allocation155_spill] sm:$0xff] }
 0x252   :  { %v3010_v31 = vadd.f32 %v7877_v44, %v15314_v49  ;;  %v7878_v6 = vpop.f32.mrb[162].mxu0  ;;  %10894 = vmatpush3.bf16.msra.mxu1 %v17479_v4  ;;  %4772 = vmatprep.mubr.f32.mxu1 %v3622_v46  ;;  %v17630_v44 = vld [vmem:[#allocation156_spill] sm:$0xff]  ;;  %v3644_v46 = vld [vmem:[%s16802_s2 + $0x2d8] sm:$0xff] }
 0x253   :  { %v7879_v36 = vpop.f32.mrb[163].mxu0  ;;  %4668 = vmatmul.mubr.f32.gmra.mrb[12].mxu0 %v3619_v30  ;;  %v7934_v45 = vpop.f32.mrb[170].mxu1  ;;  %10896 = vmatprep.subr.bf16.mxu1 %v17629_v15  ;;  %v17631_v30 = vld [vmem:[#allocation158_spill] sm:$0xff]  ;;  %v3670_v15 = vld [vmem:[%s16802_s2 + $0x3a8] sm:$0xff] }
 0x254   :  { %v15466_v24 = vadd.f32 %v7933_v40, %v3010_v31  ;;  %v7880_v49 = vadd.f32 %v7879_v36, %v7878_v6  ;;  %10866 = vmatpush3.bf16.msra.mxu0 %v17630_v44  ;;  %v7935_v4 = vpop.f32.mrb[171].mxu1  ;;  %4672 = vmatprep.mubr.f32.mxu0 %v3645_v63  ;;  %v3646_v63 = vld [vmem:[%s16802_s2 + $0x2e8] sm:$0xff]  ;;  %v3672_v36 = vld [vmem:[%s16802_s2 + $0x3b8] sm:$0xff] }
 0x255   :  { %v7936_v50 = vadd.f32 %v7935_v4, %v7934_v45  ;;  %4773 = vmatmul.mubr.f32.gmra.mrb[12].mxu1 %v3621_v11  ;;  %10868 = vmatprep.subr.bf16.mxu0 %v17631_v30  ;;  %v17632_v11 = vld [vmem:[#allocation159_spill] sm:$0xff] }
 0x256   :  { %v3015_v40 = vadd.f32 %v7880_v49, %v15333_v57  ;;  %v7881_v31 = vpop.f32.mrb[164].mxu0  ;;  %10898 = vmatpush3.bf16.msra.mxu1 %v17481_v23  ;;  %4777 = vmatprep.mubr.f32.mxu1 %v3647_v27  ;;  %v17633_v49 = vld [vmem:[#allocation160_spill] sm:$0xff]  ;;  %v3669_v27 = vld [vmem:[%s16802_s2 + $0x3a0] sm:$0xff] }
 0x257   :  { %v7882_v6 = vpop.f32.mrb[165].mxu0  ;;  %4673 = vmatmul.mubr.f32.gmra.mrb[14].mxu0 %v3644_v46  ;;  %v7937_v4 = vpop.f32.mrb[172].mxu1  ;;  %10900 = vmatprep.subr.bf16.mxu1 %v17632_v11  ;;  %v17634_v46 = vld [vmem:[#allocation162_spill] sm:$0xff]  ;;  %v3695_v11 = vld [vmem:[%s16802_s2 + $0x470] sm:$0xff] }
 0x258   :  { %v15485_v45 = vadd.f32 %v7936_v50, %v3015_v40  ;;  %v7883_v57 = vadd.f32 %v7882_v6, %v7881_v31  ;;  %10870 = vmatpush3.bf16.msra.mxu0 %v17633_v49  ;;  %v7938_v23 = vpop.f32.mrb[173].mxu1  ;;  %4677 = vmatprep.mubr.f32.mxu0 %v3670_v15  ;;  %v3671_v15 = vld [vmem:[%s16802_s2 + $0x3b0] sm:$0xff]  ;;  %v3697_v6 = vld [vmem:[%s16802_s2 + $0x480] sm:$0xff] }
 0x259   :  { %v7939_v30 = vadd.f32 %v7938_v23, %v7937_v4  ;;  %4778 = vmatmul.mubr.f32.gmra.mrb[14].mxu1 %v3646_v63  ;;  %10872 = vmatprep.subr.bf16.mxu0 %v17634_v46  ;;  %v17635_v63 = vld [vmem:[#allocation163_spill] sm:$0xff] }
 0x25a   :  { %v3020_v50 = vadd.f32 %v7883_v57, %v15352_v19  ;;  %v7884_v40 = vpop.f32.mrb[166].mxu0  ;;  %10902 = vmatpush3.bf16.msra.mxu1 %v17483_v60  ;;  %4782 = vmatprep.mubr.f32.mxu1 %v3672_v36  ;;  %v17636_v57 = vld [vmem:[#allocation164_spill] sm:$0xff]  ;;  %v3694_v36 = vld [vmem:[%s16802_s2 + $0x468] sm:$0xff] }
 0x25b   :  { %v7885_v31 = vpop.f32.mrb[167].mxu0  ;;  %4678 = vmatmul.mubr.f32.gmra.mrb[16].mxu0 %v3669_v27  ;;  %v7940_v23 = vpop.f32.mrb[174].mxu1  ;;  %10904 = vmatprep.subr.bf16.mxu1 %v17635_v63  ;;  %v17637_v27 = vld [vmem:[#allocation166_spill] sm:$0xff]  ;;  %v3720_v63 = vld [vmem:[%s16802_s2 + $0x538] sm:$0xff] }
 0x25c   :  { %v15504_v4 = vadd.f32 %v7939_v30, %v3020_v50  ;;  %v7886_v19 = vadd.f32 %v7885_v31, %v7884_v40  ;;  %10874 = vmatpush3.bf16.msra.mxu0 %v17636_v57  ;;  %v7941_v60 = vpop.f32.mrb[175].mxu1  ;;  %4682 = vmatprep.mubr.f32.mxu0 %v3695_v11  ;;  %v3696_v11 = vld [vmem:[%s16802_s2 + $0x478] sm:$0xff]  ;;  %v3722_v31 = vld [vmem:[%s16802_s2 + $0x548] sm:$0xff] }
 0x25d   :  { %v7942_v46 = vadd.f32 %v7941_v60, %v7940_v23  ;;  %4783 = vmatmul.mubr.f32.gmra.mrb[16].mxu1 %v3671_v15  ;;  %10876 = vmatprep.subr.bf16.mxu0 %v17637_v27  ;;  %v17638_v15 = vld [vmem:[#allocation167_spill] sm:$0xff] }
 0x25e   :  { %v3025_v30 = vadd.f32 %v7886_v19, %v15371_v56  ;;  %v7975_v50 = vpop.f32.mrb[168].mxu0  ;;  %10906 = vmatpush3.bf16.msra.mxu1 %v17485_v58  ;;  %4787 = vmatprep.mubr.f32.mxu1 %v3697_v6  ;;  %v17639_v19 = vld [vmem:[#allocation168_spill] sm:$0xff] }
 0x25f   :  { %v7976_v40 = vpop.f32.mrb[169].mxu0  ;;  %4683 = vmatmul.mubr.f32.gmra.mrb[18].mxu0 %v3694_v36  ;;  %v8031_v60 = vpop.f32.mrb[176].mxu1  ;;  %10908 = vmatprep.subr.bf16.mxu1 %v17638_v15  ;;  %v3719_v6 = vld [vmem:[%s16802_s2 + $0x530] sm:$0xff]  ;;  %v17640_v36 = vld [vmem:[#allocation170_spill] sm:$0xff] }
 0x260   :  { %v15523_v23 = vadd.f32 %v7942_v46, %v3025_v30  ;;  %v7977_v56 = vadd.f32 %v7976_v40, %v7975_v50  ;;  %10878 = vmatpush3.bf16.msra.mxu0 %v17639_v19  ;;  %v8032_v58 = vpop.f32.mrb[177].mxu1  ;;  %4687 = vmatprep.mubr.f32.mxu0 %v3720_v63  ;;  %v3745_v15 = vld [vmem:[%s16802_s2 + $0x600] sm:$0xff] }
 0x261   :  { %v8033_v27 = vadd.f32 %v8032_v58, %v8031_v60  ;;  %4788 = vmatmul.mubr.f32.gmra.mrb[18].mxu1 %v3696_v11  ;;  %10880 = vmatprep.subr.bf16.mxu0 %v17640_v36  ;;  %v3721_v63 = vld [vmem:[%s16802_s2 + $0x540] sm:$0xff]  ;;  %v3747_v11 = vld [vmem:[%s16802_s2 + $0x610] sm:$0xff] }
 0x262   :  { %v3200_v46 = vadd.f32 %v7977_v56, %v15390_v13  ;;  %v7978_v30 = vpop.f32.mrb[170].mxu0  ;;  %10910 = vmatpush3.bf16.msra.mxu1 %v17487_v54  ;;  %4792 = vmatprep.mubr.f32.mxu1 %v3722_v31  ;;  %v17641_v60 = vld [vmem:[#allocation172_spill] sm:$0xff]  ;;  %v3744_v31 = vld [vmem:[%s16802_s2 + $0x5f8] sm:$0xff] }
 0x263   :  { %v7979_v50 = vpop.f32.mrb[171].mxu0  ;;  %4688 = vmatmul.mubr.f32.gmra.mrb[20].mxu0 %v3719_v6  ;;  %v8034_v58 = vpop.f32.mrb[178].mxu1  ;;  %10912 = vmatprep.subr.bf16.mxu1 %v17488_v34  ;;  %v17642_v6 = vld [vmem:[#allocation174_spill] sm:$0xff]  ;;  %v3574_v34 = vld [vmem:[%s16802_s2 + $0xa8] sm:$0xff] }
 0x264   :  { %v15542_v40 = vadd.f32 %v8033_v27, %v3200_v46  ;;  %v7980_v13 = vadd.f32 %v7979_v50, %v7978_v30  ;;  %10882 = vmatpush3.bf16.msra.mxu0 %v17641_v60  ;;  %v8035_v56 = vpop.f32.mrb[179].mxu1  ;;  %4692 = vmatprep.mubr.f32.mxu0 %v3745_v15  ;;  %v3746_v15 = vld [vmem:[%s16802_s2 + $0x608] sm:$0xff] }
 0x265   :  { %v8036_v54 = vadd.f32 %v8035_v56, %v8034_v58  ;;  %4793 = vmatmul.mubr.f32.gmra.mrb[20].mxu1 %v3721_v63  ;;  %10884 = vmatprep.subr.bf16.mxu0 %v17642_v6  ;;  %v3576_v63 = vld [vmem:[%s16802_s2 + $0xb8] sm:$0xff] }
 0x266   :  { %v3205_v27 = vadd.f32 %v7980_v13, %v15409_v18  ;;  %v7981_v46 = vpop.f32.mrb[172].mxu0  ;;  %10914 = vmatpush3.bf16.msra.mxu1 %v13568_v2  ;;  %4797 = vmatprep.mubr.f32.mxu1 %v3747_v11  ;;  %v17643_v13 = vld [vmem:[#allocation176_spill] sm:$0xff]  ;;  %v3573_v11 = vld [vmem:[%s16802_s2 + $0xa0] sm:$0xff] }
 0x267   :  { %v7982_v30 = vpop.f32.mrb[173].mxu0  ;;  %4693 = vmatmul.mubr.f32.gmra.mrb[22].mxu0 %v3744_v31  ;;  %v8037_v50 = vpop.f32.mrb[180].mxu1  ;;  %10916 = vmatprep.subr.bf16.mxu1 %v13592_v47  ;;  %v17644_v31 = vld [vmem:[#allocation177_spill] sm:$0xff]  ;;  %v3599_v47 = vld [vmem:[%s16802_s2 + $0x170] sm:$0xff] }
 0x268   :  { %v15561_v58 = vadd.f32 %v8036_v54, %v3205_v27  ;;  %v7983_v18 = vadd.f32 %v7982_v30, %v7981_v46  ;;  %10886 = vmatpush3.bf16.msra.mxu0 %v17643_v13  ;;  %v8038_v56 = vpop.f32.mrb[181].mxu1  ;;  %4867 = vmatprep.mubr.f32.mxu0 %v3574_v34  ;;  %v3575_v34 = vld [vmem:[%s16802_s2 + $0xb0] sm:$0xff] }
 0x269   :  { %v8039_v2 = vadd.f32 %v8038_v56, %v8037_v50  ;;  %4798 = vmatmul.mubr.f32.gmra.mrb[22].mxu1 %v3746_v15  ;;  %10920 = vmatprep.subr.bf16.mxu0 %v17644_v31  ;;  %v3601_v15 = vld [vmem:[%s16802_s2 + $0x180] sm:$0xff] }
 0x26a   :  { %v3210_v54 = vadd.f32 %v7983_v18, %v15428_v38  ;;  %v7984_v27 = vpop.f32.mrb[174].mxu0  ;;  %10918 = vmatpush3.bf16.msra.mxu1 %v13610_v61  ;;  %4972 = vmatprep.mubr.f32.mxu1 %v3576_v63  ;;  %v3598_v63 = vld [vmem:[%s16802_s2 + $0x168] sm:$0xff] }
 0x26b   :  { %v7985_v46 = vpop.f32.mrb[175].mxu0  ;;  %4868 = vmatmul.mubr.f32.vlgmr.msra.gmra.mrb[24].mxu0 %v3573_v11  ;;  %v8040_v30 = vpop.f32.mrb[182].mxu1  ;;  %10952 = vmatprep.subr.bf16.mxu1 %v11411_v3  ;;  %v17645_v11 = vld [vmem:[#allocation178_spill] sm:$0xff]  ;;  %v3624_v3 = vld [vmem:[%s16802_s2 + $0x238] sm:$0xff] }
 0x26c   :  { %v15580_v50 = vadd.f32 %v8039_v2, %v3210_v54  ;;  %v7986_v38 = vadd.f32 %v7985_v46, %v7984_v27  ;;  %10922 = vmatpush3.bf16.msra.mxu0 %v17644_v31  ;;  %v8041_v18 = vpop.f32.mrb[183].mxu1  ;;  %4872 = vmatprep.mubr.f32.mxu0 %v3599_v47  ;;  %v3600_v47 = vld [vmem:[%s16802_s2 + $0x178] sm:$0xff] }
 0x26d   :  { %v8042_v56 = vadd.f32 %v8041_v18, %v8040_v30  ;;  %4973 = vmatmul.mubr.f32.vlgmr.msra.gmra.mrb[24].mxu1 %v3575_v34  ;;  %10924 = vmatprep.subr.bf16.mxu0 %v17645_v11  ;;  %v3626_v34 = vld [vmem:[%s16802_s2 + $0x248] sm:$0xff] }
 0x26e   :  { %v3215_v2 = vadd.f32 %v7986_v38, %v15447_v29  ;;  %v7987_v54 = vpop.f32.mrb[176].mxu0  ;;  %10954 = vmatpush3.bf16.msra.mxu1 %v11424_v8  ;;  %4977 = vmatprep.mubr.f32.mxu1 %v3601_v15  ;;  %v3623_v15 = vld [vmem:[%s16802_s2 + $0x230] sm:$0xff]  ;;  %v17646_v18 = vld [vmem:[#allocation179_spill] sm:$0xff] }
 0x26f   :  { %v7988_v27 = vpop.f32.mrb[177].mxu0  ;;  %4873 = vmatmul.mubr.f32.gmra.mrb[26].mxu0 %v3598_v63  ;;  %v8043_v46 = vpop.f32.mrb[184].mxu1  ;;  %10956 = vmatprep.subr.bf16.mxu1 %v11449_v16  ;;  %v3649_v16 = vld [vmem:[%s16802_s2 + $0x300] sm:$0xff] }
 0x270   :  { %v15599_v30 = vadd.f32 %v8042_v56, %v3215_v2  ;;  %v7989_v29 = vadd.f32 %v7988_v27, %v7987_v54  ;;  %10926 = vmatpush3.bf16.msra.mxu0 %v17645_v11  ;;  %v8044_v8 = vpop.f32.mrb[185].mxu1  ;;  %4877 = vmatprep.mubr.f32.mxu0 %v3624_v3  ;;  %v3625_v3 = vld [vmem:[%s16802_s2 + $0x240] sm:$0xff] }
 0x271   :  { %v8045_v38 = vadd.f32 %v8044_v8, %v8043_v46  ;;  %4978 = vmatmul.mubr.f32.gmra.mrb[26].mxu1 %v3600_v47  ;;  %10928 = vmatprep.subr.bf16.mxu0 %v17646_v18  ;;  %v3651_v47 = vld [vmem:[%s16802_s2 + $0x310] sm:$0xff]  ;;  %v3648_v46 = vld [vmem:[%s16802_s2 + $0x2f8] sm:$0xff] }
 0x272   :  { %v3220_v63 = vadd.f32 %v7989_v29, %v15466_v24  ;;  %v7990_v56 = vpop.f32.mrb[178].mxu0  ;;  %10958 = vmatpush3.bf16.msra.mxu1 %v11463_v21  ;;  %4982 = vmatprep.mubr.f32.mxu1 %v3626_v34  ;;  %v17647_v29 = vld [vmem:[#allocation180_spill] sm:$0xff] }
 0x273   :  { %v7991_v2 = vpop.f32.mrb[179].mxu0  ;;  %4878 = vmatmul.mubr.f32.gmra.mrb[28].mxu0 %v3623_v15  ;;  %v8046_v54 = vpop.f32.mrb[186].mxu1  ;;  %10960 = vmatprep.subr.bf16.mxu1 %v11478_v26  ;;  %v3674_v26 = vld [vmem:[%s16802_s2 + $0x3c8] sm:$0xff] }
 0x274   :  { %v15618_v27 = vadd.f32 %v8045_v38, %v3220_v63  ;;  %v7992_v24 = vadd.f32 %v7991_v2, %v7990_v56  ;;  %10930 = vmatpush3.bf16.msra.mxu0 %v17646_v18  ;;  %v8047_v21 = vpop.f32.mrb[187].mxu1  ;;  %4882 = vmatprep.mubr.f32.mxu0 %v3649_v16  ;;  %v3650_v38 = vld [vmem:[%s16802_s2 + $0x308] sm:$0xff]  ;;  %v3676_v56 = vld [vmem:[%s16802_s2 + $0x3d8] sm:$0xff]  ;;  %v3673_v2 = vld [vmem:[%s16802_s2 + $0x3c0] sm:$0xff] }
 0x275   :  { %v8048_v34 = vadd.f32 %v8047_v21, %v8046_v54  ;;  %4983 = vmatmul.mubr.f32.gmra.mrb[28].mxu1 %v3625_v3  ;;  %10932 = vmatprep.subr.bf16.mxu0 %v17647_v29 }
 0x276   :  { %v3225_v8 = vadd.f32 %v7992_v24, %v15485_v45  ;;  %v7993_v15 = vpop.f32.mrb[180].mxu0  ;;  %10962 = vmatpush3.bf16.msra.mxu1 %v17489_v33  ;;  %4987 = vmatprep.mubr.f32.mxu1 %v3651_v47  ;;  %v17648_v47 = vld [vmem:[#allocation181_spill] sm:$0xff] }
 0x277   :  { %v7994_v16 = vpop.f32.mrb[181].mxu0  ;;  %4883 = vmatmul.mubr.f32.gmra.mrb[30].mxu0 %v3648_v46  ;;  %v8049_v63 = vpop.f32.mrb[188].mxu1  ;;  %10964 = vmatprep.subr.bf16.mxu1 %v11516_v39  ;;  %v3699_v39 = vld [vmem:[%s16802_s2 + $0x490] sm:$0xff] }
 0x278   :  { %v15637_v3 = vadd.f32 %v8048_v34, %v3225_v8  ;;  %v7995_v45 = vadd.f32 %v7994_v16, %v7993_v15  ;;  %10934 = vmatpush3.bf16.msra.mxu0 %v17647_v29  ;;  %v8050_v33 = vpop.f32.mrb[189].mxu1  ;;  %4887 = vmatprep.mubr.f32.mxu0 %v3674_v26  ;;  %v3675_v46 = vld [vmem:[%s16802_s2 + $0x3d0] sm:$0xff]  ;;  %v3701_v8 = vld [vmem:[%s16802_s2 + $0x4a0] sm:$0xff] }
 0x279   :  { %v8051_v54 = vadd.f32 %v8050_v33, %v8049_v63  ;;  %4988 = vmatmul.mubr.f32.gmra.mrb[30].mxu1 %v3650_v38  ;;  %10936 = vmatprep.subr.bf16.mxu0 %v17648_v47  ;;  %v3698_v38 = vld [vmem:[%s16802_s2 + $0x488] sm:$0xff]  ;;  %v17649_v63 = vld [vmem:[#allocation182_spill] sm:$0xff]  ;;  %v3700_v33 = vld [vmem:[%s16802_s2 + $0x498] sm:$0xff] }
 0x27a   :  { %v3230_v24 = vadd.f32 %v7995_v45, %v15504_v4  ;;  %v7996_v21 = vpop.f32.mrb[182].mxu0  ;;  %10966 = vmatpush3.bf16.msra.mxu1 %v17490_v48  ;;  %4992 = vmatprep.mubr.f32.mxu1 %v3676_v56 }
 0x27b   :  { %v7997_v34 = vpop.f32.mrb[183].mxu0  ;;  %4888 = vmatmul.mubr.f32.gmra.mrb[32].mxu0 %v3673_v2  ;;  %v8052_v26 = vpop.f32.mrb[190].mxu1  ;;  %10968 = vmatprep.subr.bf16.mxu1 %v11555_v52  ;;  %v3724_v52 = vld [vmem:[%s16802_s2 + $0x558] sm:$0xff] }
 0x27c   :  { %v15656_v15 = vadd.f32 %v8051_v54, %v3230_v24  ;;  %v7998_v4 = vadd.f32 %v7997_v34, %v7996_v21  ;;  %10938 = vmatpush3.bf16.msra.mxu0 %v17648_v47  ;;  %v8053_v48 = vpop.f32.mrb[191].mxu1  ;;  %4892 = vmatprep.mubr.f32.mxu0 %v3699_v39  ;;  %v3726_v39 = vld [vmem:[%s16802_s2 + $0x568] sm:$0xff]  ;;  %v3723_v21 = vld [vmem:[%s16802_s2 + $0x550] sm:$0xff] }
 0x27d   :  { %v8054_v16 = vadd.f32 %v8053_v48, %v8052_v26  ;;  %4993 = vmatmul.mubr.f32.gmra.mrb[32].mxu1 %v3675_v46  ;;  %10940 = vmatprep.subr.bf16.mxu0 %v17649_v63  ;;  %v3725_v26 = vld [vmem:[%s16802_s2 + $0x560] sm:$0xff] }
 0x27e   :  { %v3235_v56 = vadd.f32 %v7998_v4, %v15523_v23  ;;  %v8087_v45 = vpop.f32.mrb[184].mxu0  ;;  %10970 = vmatpush3.bf16.msra.mxu1 %v17491_v43  ;;  %4997 = vmatprep.mubr.f32.mxu1 %v3701_v8  ;;  %v3751_v4 = vld [vmem:[%s16802_s2 + $0x630] sm:$0xff] }
 0x27f   :  { %v8088_v2 = vpop.f32.mrb[185].mxu0  ;;  %4893 = vmatmul.mubr.f32.gmra.mrb[34].mxu0 %v3698_v38  ;;  %10972 = vmatprep.subr.bf16.mxu1 %v11591_v0  ;;  %v9605_v54 = vpop.f32.mrb[192].mxu1  ;;  %v3749_v0 = vld [vmem:[%s16802_s2 + $0x620] sm:$0xff] }
 0x280   :  { %v15675_v24 = vadd.f32 %v8054_v16, %v3235_v56  ;;  %v8089_v23 = vadd.f32 %v8088_v2, %v8087_v45  ;;  %10942 = vmatpush3.bf16.msra.mxu0 %v17649_v63  ;;  %4897 = vmatprep.mubr.f32.mxu0 %v3724_v52  ;;  %v3514_v43 = vpop.f32.mrb[193].mxu1  ;;  %v3750_v45 = vld [vmem:[%s16802_s2 + $0x628] sm:$0xff] }
 0x281   :  { %4998 = vmatmul.mubr.f32.gmra.mrb[34].mxu1 %v3700_v33  ;;  %10944 = vmatprep.subr.bf16.mxu0 %v13760_v28 }
 0x282   :  { %v8090_v46 = vpop.f32.mrb[186].mxu0  ;;  %10974 = vmatpush3.bf16.msra.mxu1 %v11621_v14  ;;  %v3410_v34 = vadd.f32 %v8089_v23, %v15542_v40  ;;  %5002 = vmatprep.mubr.f32.mxu1 %v3726_v39  ;;  %v3748_v14 = vld [vmem:[%s16802_s2 + $0x618] sm:$0xff] }
 0x283   :  { %v8091_v8 = vpop.f32.mrb[187].mxu0  ;;  %4898 = vmatmul.mubr.f32.gmra.mrb[36].mxu0 %v3723_v21  ;;  %10976 = vmatprep.subr.bf16.mxu1 %v11633_v20  ;;  %v3577_v20 = vld [vmem:[%s16802_s2 + $0xc0] sm:$0xff] }
 0x284   :  { %v8092_v48 = vadd.f32 %v8091_v8, %v8090_v46  ;;  %v15694_v38 = vadd.f32 %v3514_v43, %v3410_v34  ;;  %10946 = vmatpush3.bf16.msra.mxu0 %v13760_v28  ;;  %4902 = vmatprep.mubr.f32.mxu0 %v3749_v0  ;;  %v17650_v43 = vld [vmem:[#allocation2_spill] sm:$0xff] }
 0x285   :  { %5003 = vmatmul.mubr.f32.gmra.mrb[36].mxu1 %v3725_v26  ;;  %10948 = vmatprep.subr.bf16.mxu0 %v13784_v10  ;;  %v9608_v40 = vpop.f32.mrb[194].mxu1  ;;  %v5118_v34 = vld [vmem:[%s16803_s3] sm:$0xff] }
 0x286   :  { %v3415_v16 = vadd.f32 %v8092_v48, %v15561_v58  ;;  %v6683_v52 = vmax.f32 %v14768_v42, %v15694_v38  ;;  %v8093_v56 = vpop.f32.mrb[188].mxu0  ;;  %10978 = vmatpush3.bf16.msra.mxu1 %v11663_v35  ;;  %5007 = vmatprep.mubr.f32.mxu1 %v3751_v4  ;;  %v3524_v33 = vpop.f32.mrb[195].mxu1  ;;  %v5119_v58 = vld [vmem:[%s16803_s3 + $0x8] sm:$0xff]  ;;  %v5144_v4 = vld [vmem:[%s16803_s3 + $0xd0] sm:$0xff] }
 0x287   :  { %v8094_v2 = vpop.f32.mrb[189].mxu0  ;;  %4903 = vmatmul.mubr.f32.gmra.mrb[38].mxu0 %v3748_v14  ;;  %10980 = vmatprep.subr.bf16.mxu1 %v11669_v37  ;;  %v3602_v35 = vld [vmem:[%s16802_s2 + $0x188] sm:$0xff]  ;;  %v3627_v37 = vld [vmem:[%s16802_s2 + $0x250] sm:$0xff] }
 0x288   :  { %v15715_v39 = vadd.f32 %v9605_v54, %v3415_v16  ;;  %v8095_v23 = vadd.f32 %v8094_v2, %v8093_v56  ;;  %10950 = vmatpush3.bf16.msra.mxu0 %v13784_v10  ;;  %9647 = vmatprep.mubr.f32.mxu0 %v3577_v20  ;;  %v5143_v56 = vld [vmem:[%s16803_s3 + $0xc8] sm:$0xff] }
 0x289   :  { %5008 = vmatmul.mubr.f32.gmra.mrb[38].mxu1 %v3750_v45  ;;  %10984 = vmatprep.subr.bf16.mxu0 %v17650_v43  ;;  %v15725_v21 = vpop.f32.mrb[196].mxu1  ;;  %v5168_v43 = vld [vmem:[%s16803_s3 + $0x190] sm:$0xff] }
 0x28a   :  { %v6684_v54 = vmax.f32 %v14765_v7, %v15715_v39  ;;  %v8096_v0 = vpop.f32.mrb[190].mxu0  ;;  %10982 = vmatpush3.bf16.msra.mxu1 %v11699_v53  ;;  %v3420_v46 = vadd.f32 %v8095_v23, %v15580_v50  ;;  %5382 = vmatprep.mubr.f32.mxu1 %v5119_v58  ;;  %v3534_v26 = vpop.f32.mrb[197].mxu1  ;;  %v3652_v53 = vld [vmem:[%s16802_s2 + $0x318] sm:$0xff]  ;;  %v17651_v58 = vld [vmem:[#allocation3_spill] sm:$0xff] }
 0x28b   :  { %v8097_v8 = vpop.f32.mrb[191].mxu0  ;;  %9648 = vmatmul.mubr.f32.vlgmr.msra.gmra.mrb[40].mxu0 %v3602_v35  ;;  %11016 = vmatprep.subr.bf16.mxu1 %v17495_v1  ;;  %v3677_v1 = vld [vmem:[%s16802_s2 + $0x3e0] sm:$0xff]  ;;  %v17652_v35 = vld [vmem:[#allocation24_spill] sm:$0xff] }
 0x28c   :  { %v8098_v48 = vadd.f32 %v8097_v8, %v8096_v0  ;;  %v15738_v14 = vadd.f32 %v3524_v33, %v3420_v46  ;;  %10986 = vmatpush3.bf16.msra.mxu0 %v11436_v12  ;;  %9650 = vmatprep.mubr.f32.mxu0 %v3627_v37  ;;  %v17653_v0 = vld [vmem:[#allocation26_spill] sm:$0xff] }
 0x28d   :  { %5383 = vmatmul.mubr.f32.vlgmr.msra.gmra.mrb[40].mxu1 %v5118_v34  ;;  %10988 = vmatprep.subr.bf16.mxu0 %v11451_v17  ;;  %v15748_v50 = vpop.f32.mrb[198].mxu1  ;;  %v5194_v46 = vld [vmem:[%s16803_s3 + $0x260] sm:$0xff] }
 0x28e   :  { %v3425_v20 = vadd.f32 %v8098_v48, %v15599_v30  ;;  %v6685_v16 = vmax.f32 %v14786_v22, %v15738_v14  ;;  %v8099_v12 = vpop.f32.mrb[192].mxu0  ;;  %11018 = vmatpush3.bf16.msra.mxu1 %v17499_v59  ;;  %5387 = vmatprep.mubr.f32.mxu1 %v5144_v4  ;;  %v3544_v17 = vpop.f32.mrb[199].mxu1  ;;  %v5169_v30 = vld [vmem:[%s16803_s3 + $0x198] sm:$0xff]  ;;  %v3702_v59 = vld [vmem:[%s16802_s2 + $0x4a8] sm:$0xff]  ;;  %v17655_v48 = vld [vmem:[#allocation6_spill] sm:$0xff] }
 0x28f   :  { %v8100_v45 = vpop.f32.mrb[193].mxu0  ;;  %9651 = vmatmul.mubr.f32.gmra.mrb[42].mxu0 %v3652_v53  ;;  %11020 = vmatprep.subr.bf16.mxu1 %v17501_v51  ;;  %v3727_v51 = vld [vmem:[%s16802_s2 + $0x570] sm:$0xff]  ;;  %v17654_v4 = vld [vmem:[#allocation5_spill] sm:$0xff] }
 0x290   :  { %v15761_v33 = vadd.f32 %v9608_v40, %v3425_v20  ;;  %v8101_v2 = vadd.f32 %v8100_v45, %v8099_v12  ;;  %10990 = vmatpush3.bf16.msra.mxu0 %v11476_v25  ;;  %9653 = vmatprep.mubr.f32.mxu0 %v3677_v1  ;;  %v5121_v53 = vld [vmem:[%s16803_s3 + $0x18] sm:$0xff]  ;;  %v17656_v20 = vld [vmem:[#allocation7_spill] sm:$0xff] }
 0x291   :  { %5388 = vmatmul.mubr.f32.gmra.mrb[42].mxu1 %v5143_v56  ;;  %10992 = vmatprep.subr.bf16.mxu0 %v17651_v58  ;;  %v17657_v56 = vld [vmem:[#allocation28_spill] sm:$0xff]  ;;  %v5193_v45 = vld [vmem:[%s16803_s3 + $0x258] sm:$0xff] }
 0x292   :  { %v8102_v40 = vpop.f32.mrb[194].mxu0  ;;  %11022 = vmatpush3.bf16.msra.mxu1 %v17652_v35  ;;  %v3430_v25 = vadd.f32 %v8101_v2, %v15618_v27  ;;  %5392 = vmatprep.mubr.f32.mxu1 %v5169_v30  ;;  %v3752_v27 = vld [vmem:[%s16802_s2 + $0x638] sm:$0xff]  ;;  %v17658_v2 = vld [vmem:[#allocation30_spill] sm:$0xff]  ;;  %v17661_v35 = vld [vmem:[#allocation4_spill] sm:$0xff] }
 0x293   :  { %v8103_v37 = vpop.f32.mrb[195].mxu0  ;;  %9654 = vmatmul.mubr.f32.gmra.mrb[44].mxu0 %v3702_v59  ;;  %11024 = vmatprep.subr.bf16.mxu1 %v17653_v0  ;;  %v5219_v59 = vld [vmem:[%s16803_s3 + $0x328] sm:$0xff] }
 0x294   :  { %v8104_v34 = vadd.f32 %v8103_v37, %v8102_v40  ;;  %v15782_v8 = vadd.f32 %v3534_v26, %v3430_v25  ;;  %10994 = vmatpush3.bf16.msra.mxu0 %v17654_v4  ;;  %9656 = vmatprep.mubr.f32.mxu0 %v3727_v51  ;;  %v17659_v51 = vld [vmem:[#allocation8_spill] sm:$0xff]  ;;  %v17660_v40 = vld [vmem:[#allocation9_spill] sm:$0xff] }
 0x295   :  { %5393 = vmatmul.mubr.f32.gmra.mrb[44].mxu1 %v5168_v43  ;;  %10996 = vmatprep.subr.bf16.mxu0 %v17655_v48  ;;  %v17662_v37 = vld [vmem:[#allocation32_spill] sm:$0xff]  ;;  %v17694_v25 = vld [vmem:[#allocation33_spill] sm:$0xff] }
 0x296   :  { %v3435_v1 = vadd.f32 %v8104_v34, %v15637_v3  ;;  %v8105_v12 = vpop.f32.mrb[196].mxu0  ;;  %11026 = vmatpush3.bf16.msra.mxu1 %v17657_v56  ;;  %5397 = vmatprep.mubr.f32.mxu1 %v5194_v46  ;;  %v17663_v34 = vld [vmem:[#allocation34_spill] sm:$0xff]  ;;  %v5244_v4 = vld [vmem:[%s16803_s3 + $0x3f0] sm:$0xff]  ;;  %v17690_v56 = vld [vmem:[#allocation29_spill] sm:$0xff] }
 0x297   :  { %v8106_v30 = vpop.f32.mrb[197].mxu0  ;;  %9657 = vmatmul.mubr.f32.gmra.mrb[46].mxu0 %v3752_v27  ;;  %11028 = vmatprep.subr.bf16.mxu1 %v17658_v2  ;;  %v5243_v2 = vld [vmem:[%s16803_s3 + $0x3e8] sm:$0xff]  ;;  %v17698_v26 = vld [vmem:[#allocation37_spill] sm:$0xff] }
 0x298   :  { %v15804_v3 = vadd.f32 %v15725_v21, %v3435_v1  ;;  %v8107_v58 = vadd.f32 %v8106_v30, %v8105_v12  ;;  %10998 = vmatpush3.bf16.msra.mxu0 %v17659_v51  ;;  %5487 = vmatprep.mubr.f32.mxu0 %v5121_v53  ;;  %v5218_v21 = vld [vmem:[%s16803_s3 + $0x320] sm:$0xff]  ;;  %v17664_v53 = vld [vmem:[#allocation11_spill] sm:$0xff]  ;;  %v17665_v1 = vld [vmem:[#allocation12_spill] sm:$0xff] }
 0x299   :  { %5398 = vmatmul.mubr.f32.gmra.mrb[46].mxu1 %v5193_v45  ;;  %11000 = vmatprep.subr.bf16.mxu0 %v17660_v40  ;;  %v17666_v12 = vld [vmem:[#allocation18_spill] sm:$0xff]  ;;  %v17667_v30 = vld [vmem:[#allocation36_spill] sm:$0xff]  ;;  %v5269_v51 = vld [vmem:[%s16803_s3 + $0x4b8] sm:$0xff] }
 0x29a   :  { %v8108_v43 = vpop.f32.mrb[198].mxu0  ;;  %11030 = vmatpush3.bf16.msra.mxu1 %v17662_v37  ;;  %v3440_v0 = vadd.f32 %v8107_v58, %v15656_v15  ;;  %5402 = vmatprep.mubr.f32.mxu1 %v5219_v59  ;;  %v17668_v58 = vld [vmem:[#allocation38_spill] sm:$0xff]  ;;  %v17669_v37 = vld [vmem:[#allocation13_spill] sm:$0xff] }
 0x29b   :  { %v8109_v46 = vpop.f32.mrb[199].mxu0  ;;  %11032 = vmatprep.subr.bf16.mxu1 %v17663_v34  ;;  %v17686_v34 = vld [vmem:[#allocation25_spill] sm:$0xff] }
 0x29c   :  { %v8110_v27 = vadd.f32 %v8109_v46, %v8108_v43  ;;  %v15819_v48 = vadd.f32 %v3544_v17, %v3440_v0  ;;  %11002 = vmatpush3.bf16.msra.mxu0 %v17664_v53  ;;  %v17671_v46 = vld [vmem:[#allocation10_spill] sm:$0xff] }
 0x29d   :  { %5403 = vmatmul.mubr.f32.gmra.mrb[48].mxu1 %v5218_v21  ;;  %11004 = vmatprep.subr.bf16.mxu0 %v17665_v1  ;;  %v17670_v21 = vld [vmem:[#allocation14_spill] sm:$0xff] }
 0x29e   :  { %v3445_v15 = vadd.f32 %v8110_v27, %v15675_v24  ;;  %v8167_v45 = vpop.f32.mrb[200].mxu0  ;;  %11034 = vmatpush3.bf16.msra.mxu1 %v17667_v30  ;;  %5407 = vmatprep.mubr.f32.mxu1 %v5244_v4  ;;  %v17672_v27 = vld [vmem:[#allocation40_spill] sm:$0xff]  ;;  %v5294_v30 = vld [vmem:[%s16803_s3 + $0x580] sm:$0xff] }
 0x29f   :  { %v8223_v17 = vpop.f32.mrb[200].mxu1  ;;  %v8168_v59 = vpop.f32.mrb[201].mxu0  ;;  %11036 = vmatprep.subr.bf16.mxu1 %v17668_v58 }
 0x2a0   :  { %v15835_v24 = vadd.f32 %v15748_v50, %v3445_v15  ;;  %v8169_v40 = vadd.f32 %v8168_v59, %v8167_v45  ;;  %v8224_v43 = vpop.f32.mrb[201].mxu1  ;;  %11006 = vmatpush3.bf16.msra.mxu0 %v17669_v37  ;;  %v5268_v50 = vld [vmem:[%s16803_s3 + $0x4b0] sm:$0xff]  ;;  %v17673_v45 = vld [vmem:[#allocation42_spill] sm:$0xff]  ;;  %v17674_v59 = vld [vmem:[#allocation15_spill] sm:$0xff] }
 0x2a1   :  { %v8225_v0 = vadd.f32 %v8224_v43, %v8223_v17  ;;  %5408 = vmatmul.mubr.f32.gmra.mrb[50].mxu1 %v5243_v2  ;;  %11008 = vmatprep.subr.bf16.mxu0 %v17670_v21  ;;  %v17676_v37 = vld [vmem:[#allocation44_spill] sm:$0xff] }
 0x2a2   :  { %v8170_v4 = vpop.f32.mrb[202].mxu0  ;;  %11038 = vmatpush3.bf16.msra.mxu1 %v17672_v27  ;;  %5412 = vmatprep.mubr.f32.mxu1 %v5269_v51  ;;  %v17675_v51 = vld [vmem:[#allocation16_spill] sm:$0xff] }
 0x2a3   :  { %v15845_v53 = vadd.f32 %v8225_v0, %v8169_v40  ;;  %v8226_v1 = vpop.f32.mrb[202].mxu1  ;;  %v8171_v15 = vpop.f32.mrb[203].mxu0  ;;  %11040 = vmatprep.subr.bf16.mxu1 %v17673_v45  ;;  %v5293_v40 = vld [vmem:[%s16803_s3 + $0x578] sm:$0xff] }
 0x2a4   :  { %v8172_v2 = vadd.f32 %v8171_v15, %v8170_v4  ;;  %v8227_v17 = vpop.f32.mrb[203].mxu1  ;;  %11010 = vmatpush3.bf16.msra.mxu0 %v17674_v59  ;;  %v17677_v4 = vld [vmem:[#allocation46_spill] sm:$0xff]  ;;  %v17678_v45 = vld [vmem:[#allocation17_spill] sm:$0xff] }
 0x2a5   :  { %v8228_v58 = vadd.f32 %v8227_v17, %v8226_v1  ;;  %5413 = vmatmul.mubr.f32.gmra.mrb[52].mxu1 %v5268_v50  ;;  %11012 = vmatprep.subr.bf16.mxu0 %v17675_v51  ;;  %v5123_v50 = vld [vmem:[%s16803_s3 + $0x28] sm:$0xff]  ;;  %v5146_v59 = vld [vmem:[%s16803_s3 + $0xe0] sm:$0xff]  ;;  %v17680_v51 = vld [vmem:[#allocation48_spill] sm:$0xff] }
 0x2a6   :  { %v8173_v43 = vpop.f32.mrb[204].mxu0  ;;  %11042 = vmatpush3.bf16.msra.mxu1 %v17676_v37  ;;  %5417 = vmatprep.mubr.f32.mxu1 %v5294_v30  ;;  %v5120_v30 = vld [vmem:[%s16803_s3 + $0x10] sm:$0xff] }
 0x2a7   :  { %v15857_v0 = vadd.f32 %v8228_v58, %v8172_v2  ;;  %v8229_v21 = vpop.f32.mrb[204].mxu1  ;;  %v8174_v27 = vpop.f32.mrb[205].mxu0  ;;  %11044 = vmatprep.subr.bf16.mxu1 %v17677_v4  ;;  %v17679_v2 = vld [vmem:[#allocation19_spill] sm:$0xff] }
 0x2a8   :  { %v8175_v1 = vadd.f32 %v8174_v27, %v8173_v43  ;;  %v8230_v15 = vpop.f32.mrb[205].mxu1  ;;  %11014 = vmatpush3.bf16.msra.mxu0 %v17678_v45  ;;  %v5122_v43 = vld [vmem:[%s16803_s3 + $0x20] sm:$0xff] }
 0x2a9   :  { %v8231_v17 = vadd.f32 %v8230_v15, %v8229_v21  ;;  %5418 = vmatmul.mubr.f32.gmra.mrb[54].mxu1 %v5293_v40  ;;  %11048 = vmatprep.subr.bf16.mxu0 %v17679_v2  ;;  %v17681_v40 = vld [vmem:[#allocation50_spill] sm:$0xff]  ;;  %v5148_v21 = vld [vmem:[%s16803_s3 + $0xf0] sm:$0xff]  ;;  %v17682_v2 = vld [vmem:[#allocation21_spill] sm:$0xff] }
 0x2aa   :  { %v8176_v58 = vpop.f32.mrb[206].mxu0  ;;  %11046 = vmatpush3.bf16.msra.mxu1 %v17680_v51  ;;  %5592 = vmatprep.mubr.f32.mxu1 %v5123_v50  ;;  %v5145_v50 = vld [vmem:[%s16803_s3 + $0xd8] sm:$0xff] }
 0x2ab   :  { %v15875_v37 = vadd.f32 %v8231_v17, %v8175_v1  ;;  %v8232_v27 = vpop.f32.mrb[206].mxu1  ;;  %v8177_v4 = vpop.f32.mrb[207].mxu0  ;;  %5488 = vmatmul.mubr.f32.vlgmr.msra.gmra.mrb[48].mxu0 %v5120_v30  ;;  %11080 = vmatprep.subr.bf16.mxu1 %v17681_v40  ;;  %v17683_v17 = vld [vmem:[#allocation23_spill] sm:$0xff]  ;;  %v17684_v40 = vld [vmem:[#allocation52_spill] sm:$0xff] }
 0x2ac   :  { %v8178_v15 = vadd.f32 %v8177_v4, %v8176_v58  ;;  %v8233_v45 = vpop.f32.mrb[207].mxu1  ;;  %11050 = vmatpush3.bf16.msra.mxu0 %v17682_v2  ;;  %5492 = vmatprep.mubr.f32.mxu0 %v5146_v59  ;;  %v5171_v30 = vld [vmem:[%s16803_s3 + $0x1a8] sm:$0xff] }
 0x2ad   :  { %v8234_v1 = vadd.f32 %v8233_v45, %v8232_v27  ;;  %5593 = vmatmul.mubr.f32.vlgmr.msra.gmra.mrb[56].mxu1 %v5122_v43  ;;  %11052 = vmatprep.subr.bf16.mxu0 %v17683_v17  ;;  %v5147_v59 = vld [vmem:[%s16803_s3 + $0xe8] sm:$0xff]  ;;  %v17685_v43 = vld [vmem:[#allocation54_spill] sm:$0xff]  ;;  %v5173_v27 = vld [vmem:[%s16803_s3 + $0x1b8] sm:$0xff] }
 0x2ae   :  { %v8179_v51 = vpop.f32.mrb[208].mxu0  ;;  %11082 = vmatpush3.bf16.msra.mxu1 %v17684_v40  ;;  %5597 = vmatprep.mubr.f32.mxu1 %v5148_v21  ;;  %v5170_v21 = vld [vmem:[%s16803_s3 + $0x1a0] sm:$0xff] }
 0x2af   :  { %v15893_v58 = vadd.f32 %v8234_v1, %v8178_v15  ;;  %v8235_v4 = vpop.f32.mrb[208].mxu1  ;;  %v8180_v2 = vpop.f32.mrb[209].mxu0  ;;  %5493 = vmatmul.mubr.f32.gmra.mrb[50].mxu0 %v5145_v50  ;;  %11084 = vmatprep.subr.bf16.mxu1 %v17685_v43  ;;  %v17687_v1 = vld [vmem:[#allocation27_spill] sm:$0xff]  ;;  %v5196_v50 = vld [vmem:[%s16803_s3 + $0x270] sm:$0xff] }
 0x2b0   :  { %v8181_v45 = vadd.f32 %v8180_v2, %v8179_v51  ;;  %v8236_v17 = vpop.f32.mrb[209].mxu1  ;;  %11054 = vmatpush3.bf16.msra.mxu0 %v17686_v34  ;;  %5497 = vmatprep.mubr.f32.mxu0 %v5171_v30  ;;  %v17688_v43 = vld [vmem:[#allocation56_spill] sm:$0xff] }
 0x2b1   :  { %v8237_v15 = vadd.f32 %v8236_v17, %v8235_v4  ;;  %5598 = vmatmul.mubr.f32.gmra.mrb[58].mxu1 %v5147_v59  ;;  %11056 = vmatprep.subr.bf16.mxu0 %v17687_v1  ;;  %v5172_v34 = vld [vmem:[%s16803_s3 + $0x1b0] sm:$0xff]  ;;  %v17689_v59 = vld [vmem:[#allocation58_spill] sm:$0xff] }
 0x2b2   :  { %v8182_v40 = vpop.f32.mrb[210].mxu0  ;;  %11086 = vmatpush3.bf16.msra.mxu1 %v17688_v43  ;;  %5602 = vmatprep.mubr.f32.mxu1 %v5173_v27  ;;  %v5198_v4 = vld [vmem:[%s16803_s3 + $0x280] sm:$0xff]  ;;  %v5195_v27 = vld [vmem:[%s16803_s3 + $0x268] sm:$0xff] }
 0x2b3   :  { %v15911_v30 = vadd.f32 %v8237_v15, %v8181_v45  ;;  %v8238_v51 = vpop.f32.mrb[210].mxu1  ;;  %v8183_v2 = vpop.f32.mrb[211].mxu0  ;;  %5498 = vmatmul.mubr.f32.gmra.mrb[52].mxu0 %v5170_v21  ;;  %11088 = vmatprep.subr.bf16.mxu1 %v17689_v59  ;;  %v17691_v15 = vld [vmem:[#allocation31_spill] sm:$0xff]  ;;  %v5221_v21 = vld [vmem:[%s16803_s3 + $0x338] sm:$0xff]  ;;  %v17692_v59 = vld [vmem:[#allocation60_spill] sm:$0xff] }
 0x2b4   :  { %v8184_v17 = vadd.f32 %v8183_v2, %v8182_v40  ;;  %v8239_v1 = vpop.f32.mrb[211].mxu1  ;;  %11058 = vmatpush3.bf16.msra.mxu0 %v17690_v56  ;;  %5502 = vmatprep.mubr.f32.mxu0 %v5196_v50  ;;  %v5197_v56 = vld [vmem:[%s16803_s3 + $0x278] sm:$0xff] }
 0x2b5   :  { %v8240_v45 = vadd.f32 %v8239_v1, %v8238_v51  ;;  %5603 = vmatmul.mubr.f32.gmra.mrb[60].mxu1 %v5172_v34  ;;  %11060 = vmatprep.subr.bf16.mxu0 %v17691_v15  ;;  %v17693_v34 = vld [vmem:[#allocation62_spill] sm:$0xff]  ;;  %v5223_v51 = vld [vmem:[%s16803_s3 + $0x348] sm:$0xff] }
 0x2b6   :  { %v8185_v43 = vpop.f32.mrb[212].mxu0  ;;  %11090 = vmatpush3.bf16.msra.mxu1 %v17692_v59  ;;  %5607 = vmatprep.mubr.f32.mxu1 %v5198_v4  ;;  %v5220_v4 = vld [vmem:[%s16803_s3 + $0x330] sm:$0xff] }
 0x2b7   :  { %v15929_v50 = vadd.f32 %v8240_v45, %v8184_v17  ;;  %v8241_v40 = vpop.f32.mrb[212].mxu1  ;;  %v8186_v2 = vpop.f32.mrb[213].mxu0  ;;  %5503 = vmatmul.mubr.f32.gmra.mrb[54].mxu0 %v5195_v27  ;;  %11092 = vmatprep.subr.bf16.mxu1 %v17693_v34  ;;  %v17695_v45 = vld [vmem:[#allocation35_spill] sm:$0xff]  ;;  %v5246_v27 = vld [vmem:[%s16803_s3 + $0x400] sm:$0xff]  ;;  %v17696_v34 = vld [vmem:[#allocation64_spill] sm:$0xff] }
 0x2b8   :  { %v8187_v1 = vadd.f32 %v8186_v2, %v8185_v43  ;;  %v8242_v15 = vpop.f32.mrb[213].mxu1  ;;  %11062 = vmatpush3.bf16.msra.mxu0 %v17694_v25  ;;  %5507 = vmatprep.mubr.f32.mxu0 %v5221_v21  ;;  %v5222_v25 = vld [vmem:[%s16803_s3 + $0x340] sm:$0xff] }
 0x2b9   :  { %v8243_v17 = vadd.f32 %v8242_v15, %v8241_v40  ;;  %5608 = vmatmul.mubr.f32.gmra.mrb[62].mxu1 %v5197_v56  ;;  %11064 = vmatprep.subr.bf16.mxu0 %v17695_v45  ;;  %v17697_v56 = vld [vmem:[#allocation66_spill] sm:$0xff]  ;;  %v5248_v40 = vld [vmem:[%s16803_s3 + $0x410] sm:$0xff] }
 0x2ba   :  { %v8188_v59 = vpop.f32.mrb[214].mxu0  ;;  %11094 = vmatpush3.bf16.msra.mxu1 %v17696_v34  ;;  %5612 = vmatprep.mubr.f32.mxu1 %v5223_v51  ;;  %v5245_v51 = vld [vmem:[%s16803_s3 + $0x3f8] sm:$0xff] }
 0x2bb   :  { %v15947_v21 = vadd.f32 %v8243_v17, %v8187_v1  ;;  %v8244_v43 = vpop.f32.mrb[214].mxu1  ;;  %v8189_v2 = vpop.f32.mrb[215].mxu0  ;;  %5508 = vmatmul.mubr.f32.gmra.mrb[56].mxu0 %v5220_v4  ;;  %11096 = vmatprep.subr.bf16.mxu1 %v17697_v56  ;;  %v17699_v17 = vld [vmem:[#allocation39_spill] sm:$0xff]  ;;  %v17700_v56 = vld [vmem:[#allocation68_spill] sm:$0xff] }
 0x2bc   :  { %v8190_v15 = vadd.f32 %v8189_v2, %v8188_v59  ;;  %v8245_v45 = vpop.f32.mrb[215].mxu1  ;;  %11066 = vmatpush3.bf16.msra.mxu0 %v17698_v26  ;;  %5512 = vmatprep.mubr.f32.mxu0 %v5246_v27  ;;  %v5271_v4 = vld [vmem:[%s16803_s3 + $0x4c8] sm:$0xff] }
 0x2bd   :  { %v8246_v1 = vadd.f32 %v8245_v45, %v8244_v43  ;;  %5613 = vmatmul.mubr.f32.gmra.mrb[64].mxu1 %v5222_v25  ;;  %11068 = vmatprep.subr.bf16.mxu0 %v17699_v17  ;;  %v5247_v26 = vld [vmem:[%s16803_s3 + $0x408] sm:$0xff]  ;;  %v17701_v43 = vld [vmem:[#allocation70_spill] sm:$0xff]  ;;  %v5273_v25 = vld [vmem:[%s16803_s3 + $0x4d8] sm:$0xff] }
 0x2be   :  { %v8279_v34 = vpop.f32.mrb[216].mxu0  ;;  %11098 = vmatpush3.bf16.msra.mxu1 %v17700_v56  ;;  %5617 = vmatprep.mubr.f32.mxu1 %v5248_v40  ;;  %v17702_v17 = vld [vmem:[#allocation41_spill] sm:$0xff]  ;;  %v5270_v40 = vld [vmem:[%s16803_s3 + $0x4c0] sm:$0xff] }
 0x2bf   :  { %v15965_v27 = vadd.f32 %v8246_v1, %v8190_v15  ;;  %v8280_v59 = vpop.f32.mrb[217].mxu0  ;;  %5513 = vmatmul.mubr.f32.gmra.mrb[58].mxu0 %v5245_v51  ;;  %11100 = vmatprep.subr.bf16.mxu1 %v17701_v43  ;;  %v17703_v15 = vld [vmem:[#allocation43_spill] sm:$0xff]  ;;  %v5296_v51 = vld [vmem:[%s16803_s3 + $0x590] sm:$0xff] }
 0x2c0   :  { %v8281_v2 = vadd.f32 %v8280_v59, %v8279_v34  ;;  %v8335_v45 = vpop.f32.mrb[216].mxu1  ;;  %11070 = vmatpush3.bf16.msra.mxu0 %v17702_v17  ;;  %5517 = vmatprep.mubr.f32.mxu0 %v5271_v4  ;;  %v17704_v59 = vld [vmem:[#allocation72_spill] sm:$0xff] }
 0x2c1   :  { %v8336_v56 = vpop.f32.mrb[217].mxu1  ;;  %5618 = vmatmul.mubr.f32.gmra.mrb[66].mxu1 %v5247_v26  ;;  %11072 = vmatprep.subr.bf16.mxu0 %v17703_v15  ;;  %v5272_v4 = vld [vmem:[%s16803_s3 + $0x4d0] sm:$0xff]  ;;  %v17705_v26 = vld [vmem:[#allocation74_spill] sm:$0xff] }
 0x2c2   :  { %v4030_v1 = vadd.f32 %v8281_v2, %v15845_v53  ;;  %v8337_v43 = vadd.f32 %v8336_v56, %v8335_v45  ;;  %v8282_v34 = vpop.f32.mrb[218].mxu0  ;;  %11102 = vmatpush3.bf16.msra.mxu1 %v17704_v59  ;;  %5622 = vmatprep.mubr.f32.mxu1 %v5273_v25  ;;  %v5298_v15 = vld [vmem:[%s16803_s3 + $0x5a0] sm:$0xff]  ;;  %v17706_v45 = vld [vmem:[#allocation45_spill] sm:$0xff]  ;;  %v5295_v25 = vld [vmem:[%s16803_s3 + $0x588] sm:$0xff] }
 0x2c3   :  { %v8283_v17 = vpop.f32.mrb[219].mxu0  ;;  %5518 = vmatmul.mubr.f32.gmra.mrb[60].mxu0 %v5270_v40  ;;  %11104 = vmatprep.subr.bf16.mxu1 %v17705_v26  ;;  %v17707_v40 = vld [vmem:[#allocation47_spill] sm:$0xff]  ;;  %v5125_v59 = vld [vmem:[%s16803_s3 + $0x38] sm:$0xff] }
 0x2c4   :  { %v15988_v23 = vadd.f32 %v8337_v43, %v4030_v1  ;;  %v8284_v53 = vadd.f32 %v8283_v17, %v8282_v34  ;;  %v8338_v2 = vpop.f32.mrb[218].mxu1  ;;  %11074 = vmatpush3.bf16.msra.mxu0 %v17706_v45  ;;  %5522 = vmatprep.mubr.f32.mxu0 %v5296_v51  ;;  %v17708_v17 = vld [vmem:[#allocation76_spill] sm:$0xff]  ;;  %v5297_v51 = vld [vmem:[%s16803_s3 + $0x598] sm:$0xff]  ;;  %v5127_v45 = vld [vmem:[%s16803_s3 + $0x48] sm:$0xff] }
 0x2c5   :  { %v8339_v56 = vpop.f32.mrb[219].mxu1  ;;  %5623 = vmatmul.mubr.f32.gmra.mrb[68].mxu1 %v5272_v4  ;;  %11076 = vmatprep.subr.bf16.mxu0 %v17707_v40  ;;  %v17709_v4 = vld [vmem:[#allocation78_spill] sm:$0xff] }
 0x2c6   :  { %v4035_v1 = vadd.f32 %v8284_v53, %v15857_v0  ;;  %v8340_v43 = vadd.f32 %v8339_v56, %v8338_v2  ;;  %v8285_v34 = vpop.f32.mrb[220].mxu0  ;;  %11106 = vmatpush3.bf16.msra.mxu1 %v17708_v17  ;;  %5627 = vmatprep.mubr.f32.mxu1 %v5298_v15  ;;  %v17710_v2 = vld [vmem:[#allocation49_spill] sm:$0xff]  ;;  %v5124_v15 = vld [vmem:[%s16803_s3 + $0x30] sm:$0xff]  ;;  %v5150_v17 = vld [vmem:[%s16803_s3 + $0x100] sm:$0xff] }
 0x2c7   :  { %v8286_v26 = vpop.f32.mrb[221].mxu0  ;;  %5523 = vmatmul.mubr.f32.gmra.mrb[62].mxu0 %v5295_v25  ;;  %11108 = vmatprep.subr.bf16.mxu1 %v17709_v4  ;;  %v17711_v25 = vld [vmem:[#allocation51_spill] sm:$0xff] }
 0x2c8   :  { %v16007_v40 = vadd.f32 %v8340_v43, %v4035_v1  ;;  %v8287_v0 = vadd.f32 %v8286_v26, %v8285_v34  ;;  %v8341_v53 = vpop.f32.mrb[220].mxu1  ;;  %11078 = vmatpush3.bf16.msra.mxu0 %v17710_v2  ;;  %5697 = vmatprep.mubr.f32.mxu0 %v5125_v59  ;;  %v17712_v26 = vld [vmem:[#allocation80_spill] sm:$0xff]  ;;  %v5126_v59 = vld [vmem:[%s16803_s3 + $0x40] sm:$0xff] }
 0x2c9   :  { %v8342_v56 = vpop.f32.mrb[221].mxu1  ;;  %5628 = vmatmul.mubr.f32.gmra.mrb[70].mxu1 %v5297_v51  ;;  %11112 = vmatprep.subr.bf16.mxu0 %v17711_v25  ;;  %v17713_v51 = vld [vmem:[#allocation82_spill] sm:$0xff]  ;;  %v5152_v2 = vld [vmem:[%s16803_s3 + $0x110] sm:$0xff] }
 0x2ca   :  { %v4040_v1 = vadd.f32 %v8287_v0, %v15875_v37  ;;  %v8343_v43 = vadd.f32 %v8342_v56, %v8341_v53  ;;  %v8288_v34 = vpop.f32.mrb[222].mxu0  ;;  %11110 = vmatpush3.bf16.msra.mxu1 %v17712_v26  ;;  %5802 = vmatprep.mubr.f32.mxu1 %v5127_v45  ;;  %v17714_v53 = vld [vmem:[#allocation53_spill] sm:$0xff]  ;;  %v5175_v26 = vld [vmem:[%s16803_s3 + $0x1c8] sm:$0xff] }
 0x2cb   :  { %v8289_v4 = vpop.f32.mrb[223].mxu0  ;;  %5698 = vmatmul.mubr.f32.vlgmr.msra.gmra.mrb[64].mxu0 %v5124_v15  ;;  %11144 = vmatprep.subr.bf16.mxu1 %v17713_v51  ;;  %v5149_v45 = vld [vmem:[%s16803_s3 + $0xf8] sm:$0xff]  ;;  %v17715_v15 = vld [vmem:[#allocation55_spill] sm:$0xff] }
 0x2cc   :  { %v16026_v25 = vadd.f32 %v8343_v43, %v4040_v1  ;;  %v8290_v37 = vadd.f32 %v8289_v4, %v8288_v34  ;;  %v8344_v0 = vpop.f32.mrb[222].mxu1  ;;  %11114 = vmatpush3.bf16.msra.mxu0 %v17714_v53  ;;  %5702 = vmatprep.mubr.f32.mxu0 %v5150_v17  ;;  %v17716_v4 = vld [vmem:[#allocation84_spill] sm:$0xff]  ;;  %v5151_v17 = vld [vmem:[%s16803_s3 + $0x108] sm:$0xff]  ;;  %v5177_v53 = vld [vmem:[%s16803_s3 + $0x1d8] sm:$0xff] }
 0x2cd   :  { %v8345_v56 = vpop.f32.mrb[223].mxu1  ;;  %5803 = vmatmul.mubr.f32.vlgmr.msra.gmra.mrb[72].mxu1 %v5126_v59  ;;  %11116 = vmatprep.subr.bf16.mxu0 %v17715_v15  ;;  %v17717_v59 = vld [vmem:[#allocation86_spill] sm:$0xff] }
 0x2ce   :  { %v4045_v1 = vadd.f32 %v8290_v37, %v15893_v58  ;;  %v8346_v43 = vadd.f32 %v8345_v56, %v8344_v0  ;;  %v8291_v34 = vpop.f32.mrb[224].mxu0  ;;  %11146 = vmatpush3.bf16.msra.mxu1 %v17716_v4  ;;  %5807 = vmatprep.mubr.f32.mxu1 %v5152_v2  ;;  %v17718_v0 = vld [vmem:[#allocation57_spill] sm:$0xff]  ;;  %v5174_v2 = vld [vmem:[%s16803_s3 + $0x1c0] sm:$0xff]  ;;  %v5200_v4 = vld [vmem:[%s16803_s3 + $0x290] sm:$0xff] }
 0x2cf   :  { %v8292_v51 = vpop.f32.mrb[225].mxu0  ;;  %5703 = vmatmul.mubr.f32.gmra.mrb[66].mxu0 %v5149_v45  ;;  %11148 = vmatprep.subr.bf16.mxu1 %v17717_v59  ;;  %v17719_v45 = vld [vmem:[#allocation59_spill] sm:$0xff] }
 0x2d0   :  { %v16045_v15 = vadd.f32 %v8346_v43, %v4045_v1  ;;  %v8293_v58 = vadd.f32 %v8292_v51, %v8291_v34  ;;  %v8347_v37 = vpop.f32.mrb[224].mxu1  ;;  %11118 = vmatpush3.bf16.msra.mxu0 %v17718_v0  ;;  %5707 = vmatprep.mubr.f32.mxu0 %v5175_v26  ;;  %v17720_v51 = vld [vmem:[#allocation88_spill] sm:$0xff]  ;;  %v5202_v0 = vld [vmem:[%s16803_s3 + $0x2a0] sm:$0xff] }
 0x2d1   :  { %v8348_v56 = vpop.f32.mrb[225].mxu1  ;;  %5808 = vmatmul.mubr.f32.gmra.mrb[74].mxu1 %v5151_v17  ;;  %11120 = vmatprep.subr.bf16.mxu0 %v17719_v45  ;;  %v5176_v26 = vld [vmem:[%s16803_s3 + $0x1d0] sm:$0xff]  ;;  %v17721_v17 = vld [vmem:[#allocation90_spill] sm:$0xff] }
 0x2d2   :  { %v4050_v1 = vadd.f32 %v8293_v58, %v15911_v30  ;;  %v8349_v43 = vadd.f32 %v8348_v56, %v8347_v37  ;;  %v8294_v34 = vpop.f32.mrb[226].mxu0  ;;  %11150 = vmatpush3.bf16.msra.mxu1 %v17720_v51  ;;  %5812 = vmatprep.mubr.f32.mxu1 %v5177_v53  ;;  %v17722_v37 = vld [vmem:[#allocation61_spill] sm:$0xff]  ;;  %v5199_v53 = vld [vmem:[%s16803_s3 + $0x288] sm:$0xff] }
 0x2d3   :  { %v8295_v59 = vpop.f32.mrb[227].mxu0  ;;  %5708 = vmatmul.mubr.f32.gmra.mrb[68].mxu0 %v5174_v2  ;;  %11152 = vmatprep.subr.bf16.mxu1 %v17721_v17  ;;  %v17723_v2 = vld [vmem:[#allocation63_spill] sm:$0xff]  ;;  %v5225_v51 = vld [vmem:[%s16803_s3 + $0x358] sm:$0xff] }
 0x2d4   :  { %v16064_v45 = vadd.f32 %v8349_v43, %v4050_v1  ;;  %v8296_v30 = vadd.f32 %v8295_v59, %v8294_v34  ;;  %v8350_v58 = vpop.f32.mrb[226].mxu1  ;;  %11122 = vmatpush3.bf16.msra.mxu0 %v17722_v37  ;;  %5712 = vmatprep.mubr.f32.mxu0 %v5200_v4  ;;  %v17724_v59 = vld [vmem:[#allocation92_spill] sm:$0xff]  ;;  %v5201_v4 = vld [vmem:[%s16803_s3 + $0x298] sm:$0xff]  ;;  %v5227_v37 = vld [vmem:[%s16803_s3 + $0x368] sm:$0xff] }
 0x2d5   :  { %v8351_v56 = vpop.f32.mrb[227].mxu1  ;;  %5813 = vmatmul.mubr.f32.gmra.mrb[76].mxu1 %v5176_v26  ;;  %11124 = vmatprep.subr.bf16.mxu0 %v17723_v2  ;;  %v17725_v26 = vld [vmem:[#allocation94_spill] sm:$0xff] }
 0x2d6   :  { %v4055_v1 = vadd.f32 %v8296_v30, %v15929_v50  ;;  %v8352_v43 = vadd.f32 %v8351_v56, %v8350_v58  ;;  %v8297_v34 = vpop.f32.mrb[228].mxu0  ;;  %11154 = vmatpush3.bf16.msra.mxu1 %v17724_v59  ;;  %5817 = vmatprep.mubr.f32.mxu1 %v5202_v0  ;;  %v17726_v58 = vld [vmem:[#allocation65_spill] sm:$0xff]  ;;  %v5224_v0 = vld [vmem:[%s16803_s3 + $0x350] sm:$0xff]  ;;  %v5250_v59 = vld [vmem:[%s16803_s3 + $0x420] sm:$0xff] }
 0x2d7   :  { %v8298_v17 = vpop.f32.mrb[229].mxu0  ;;  %5713 = vmatmul.mubr.f32.gmra.mrb[70].mxu0 %v5199_v53  ;;  %11156 = vmatprep.subr.bf16.mxu1 %v17725_v26  ;;  %v17727_v53 = vld [vmem:[#allocation67_spill] sm:$0xff] }
 0x2d8   :  { %v16083_v2 = vadd.f32 %v8352_v43, %v4055_v1  ;;  %v8299_v50 = vadd.f32 %v8298_v17, %v8297_v34  ;;  %v8353_v30 = vpop.f32.mrb[228].mxu1  ;;  %11126 = vmatpush3.bf16.msra.mxu0 %v17726_v58  ;;  %5717 = vmatprep.mubr.f32.mxu0 %v5225_v51  ;;  %v17728_v17 = vld [vmem:[#allocation96_spill] sm:$0xff]  ;;  %v5226_v51 = vld [vmem:[%s16803_s3 + $0x360] sm:$0xff] }
 0x2d9   :  { %v8354_v56 = vpop.f32.mrb[229].mxu1  ;;  %5818 = vmatmul.mubr.f32.gmra.mrb[78].mxu1 %v5201_v4  ;;  %11128 = vmatprep.subr.bf16.mxu0 %v17727_v53  ;;  %v17729_v4 = vld [vmem:[#allocation98_spill] sm:$0xff]  ;;  %v5252_v58 = vld [vmem:[%s16803_s3 + $0x430] sm:$0xff] }
 0x2da   :  { %v4060_v1 = vadd.f32 %v8299_v50, %v15947_v21  ;;  %v8355_v43 = vadd.f32 %v8354_v56, %v8353_v30  ;;  %v8300_v34 = vpop.f32.mrb[230].mxu0  ;;  %11158 = vmatpush3.bf16.msra.mxu1 %v17728_v17  ;;  %5822 = vmatprep.mubr.f32.mxu1 %v5227_v37  ;;  %v17730_v30 = vld [vmem:[#allocation69_spill] sm:$0xff]  ;;  %v5275_v17 = vld [vmem:[%s16803_s3 + $0x4e8] sm:$0xff] }
 0x2db   :  { %v8301_v26 = vpop.f32.mrb[231].mxu0  ;;  %5718 = vmatmul.mubr.f32.gmra.mrb[72].mxu0 %v5224_v0  ;;  %11160 = vmatprep.subr.bf16.mxu1 %v17729_v4  ;;  %v5249_v37 = vld [vmem:[%s16803_s3 + $0x418] sm:$0xff]  ;;  %v17731_v0 = vld [vmem:[#allocation71_spill] sm:$0xff] }
 0x2dc   :  { %v16102_v53 = vadd.f32 %v8355_v43, %v4060_v1  ;;  %v8302_v21 = vadd.f32 %v8301_v26, %v8300_v34  ;;  %v8356_v50 = vpop.f32.mrb[230].mxu1  ;;  %11130 = vmatpush3.bf16.msra.mxu0 %v17730_v30  ;;  %5722 = vmatprep.mubr.f32.mxu0 %v5250_v59  ;;  %v17732_v26 = vld [vmem:[#allocation100_spill] sm:$0xff]  ;;  %v5251_v59 = vld [vmem:[%s16803_s3 + $0x428] sm:$0xff]  ;;  %v5277_v30 = vld [vmem:[%s16803_s3 + $0x4f8] sm:$0xff] }
 0x2dd   :  { %v8357_v56 = vpop.f32.mrb[231].mxu1  ;;  %5823 = vmatmul.mubr.f32.gmra.mrb[80].mxu1 %v5226_v51  ;;  %11132 = vmatprep.subr.bf16.mxu0 %v17731_v0  ;;  %v17733_v51 = vld [vmem:[#allocation102_spill] sm:$0xff] }
 0x2de   :  { %v4065_v1 = vadd.f32 %v8302_v21, %v15965_v27  ;;  %v8358_v43 = vadd.f32 %v8357_v56, %v8356_v50  ;;  %v8391_v34 = vpop.f32.mrb[232].mxu0  ;;  %11162 = vmatpush3.bf16.msra.mxu1 %v17732_v26  ;;  %5827 = vmatprep.mubr.f32.mxu1 %v5252_v58  ;;  %v17734_v50 = vld [vmem:[#allocation73_spill] sm:$0xff]  ;;  %v5274_v58 = vld [vmem:[%s16803_s3 + $0x4e0] sm:$0xff]  ;;  %v5300_v26 = vld [vmem:[%s16803_s3 + $0x5b0] sm:$0xff] }
 0x2df   :  { %v8392_v4 = vpop.f32.mrb[233].mxu0  ;;  %5723 = vmatmul.mubr.f32.gmra.mrb[74].mxu0 %v5249_v37  ;;  %11164 = vmatprep.subr.bf16.mxu1 %v17733_v51  ;;  %v17735_v37 = vld [vmem:[#allocation75_spill] sm:$0xff] }
 0x2e0   :  { %v16121_v0 = vadd.f32 %v8358_v43, %v4065_v1  ;;  %v8393_v27 = vadd.f32 %v8392_v4, %v8391_v34  ;;  %v8447_v21 = vpop.f32.mrb[232].mxu1  ;;  %11134 = vmatpush3.bf16.msra.mxu0 %v17734_v50  ;;  %5727 = vmatprep.mubr.f32.mxu0 %v5275_v17  ;;  %v17736_v4 = vld [vmem:[#allocation104_spill] sm:$0xff]  ;;  %v5302_v50 = vld [vmem:[%s16803_s3 + $0x5c0] sm:$0xff] }
 0x2e1   :  { %v8448_v56 = vpop.f32.mrb[233].mxu1  ;;  %5828 = vmatmul.mubr.f32.gmra.mrb[82].mxu1 %v5251_v59  ;;  %11136 = vmatprep.subr.bf16.mxu0 %v17735_v37  ;;  %v5276_v17 = vld [vmem:[%s16803_s3 + $0x4f0] sm:$0xff]  ;;  %v17737_v59 = vld [vmem:[#allocation106_spill] sm:$0xff] }
 0x2e2   :  { %v4240_v1 = vadd.f32 %v8393_v27, %v15988_v23  ;;  %v8449_v43 = vadd.f32 %v8448_v56, %v8447_v21  ;;  %v8394_v34 = vpop.f32.mrb[234].mxu0  ;;  %11166 = vmatpush3.bf16.msra.mxu1 %v17736_v4  ;;  %5832 = vmatprep.mubr.f32.mxu1 %v5277_v30  ;;  %v17738_v21 = vld [vmem:[#allocation77_spill] sm:$0xff]  ;;  %v5299_v30 = vld [vmem:[%s16803_s3 + $0x5a8] sm:$0xff] }
 0x2e3   :  { %v8395_v51 = vpop.f32.mrb[235].mxu0  ;;  %5728 = vmatmul.mubr.f32.gmra.mrb[76].mxu0 %v5274_v58  ;;  %11168 = vmatprep.subr.bf16.mxu1 %v17737_v59  ;;  %v17739_v58 = vld [vmem:[#allocation79_spill] sm:$0xff]  ;;  %v5129_v4 = vld [vmem:[%s16803_s3 + $0x58] sm:$0xff] }
 0x2e4   :  { %v16140_v37 = vadd.f32 %v8449_v43, %v4240_v1  ;;  %v8396_v23 = vadd.f32 %v8395_v51, %v8394_v34  ;;  %v8450_v27 = vpop.f32.mrb[234].mxu1  ;;  %11138 = vmatpush3.bf16.msra.mxu0 %v17738_v21  ;;  %5732 = vmatprep.mubr.f32.mxu0 %v5300_v26  ;;  %v17740_v51 = vld [vmem:[#allocation108_spill] sm:$0xff]  ;;  %v5301_v26 = vld [vmem:[%s16803_s3 + $0x5b8] sm:$0xff]  ;;  %v5131_v21 = vld [vmem:[%s16803_s3 + $0x68] sm:$0xff] }
 0x2e5   :  { %v8451_v56 = vpop.f32.mrb[235].mxu1  ;;  %5833 = vmatmul.mubr.f32.gmra.mrb[84].mxu1 %v5276_v17  ;;  %11140 = vmatprep.subr.bf16.mxu0 %v17739_v58  ;;  %v17741_v17 = vld [vmem:[#allocation110_spill] sm:$0xff] }
 0x2e6   :  { %v4245_v1 = vadd.f32 %v8396_v23, %v16007_v40  ;;  %v8452_v43 = vadd.f32 %v8451_v56, %v8450_v27  ;;  %v8397_v34 = vpop.f32.mrb[236].mxu0  ;;  %11170 = vmatpush3.bf16.msra.mxu1 %v17740_v51  ;;  %5837 = vmatprep.mubr.f32.mxu1 %v5302_v50  ;;  %v17742_v27 = vld [vmem:[#allocation81_spill] sm:$0xff]  ;;  %v5128_v50 = vld [vmem:[%s16803_s3 + $0x50] sm:$0xff]  ;;  %v5154_v51 = vld [vmem:[%s16803_s3 + $0x120] sm:$0xff] }
 0x2e7   :  { %v8398_v59 = vpop.f32.mrb[237].mxu0  ;;  %5733 = vmatmul.mubr.f32.gmra.mrb[78].mxu0 %v5299_v30  ;;  %11172 = vmatprep.subr.bf16.mxu1 %v17741_v17  ;;  %v17743_v30 = vld [vmem:[#allocation83_spill] sm:$0xff] }
 0x2e8   :  { %v16159_v58 = vadd.f32 %v8452_v43, %v4245_v1  ;;  %v8399_v40 = vadd.f32 %v8398_v59, %v8397_v34  ;;  %v8453_v23 = vpop.f32.mrb[236].mxu1  ;;  %11142 = vmatpush3.bf16.msra.mxu0 %v17742_v27  ;;  %5907 = vmatprep.mubr.f32.mxu0 %v5129_v4  ;;  %v17744_v59 = vld [vmem:[#allocation112_spill] sm:$0xff]  ;;  %v5130_v4 = vld [vmem:[%s16803_s3 + $0x60] sm:$0xff] }
 0x2e9   :  { %v8454_v56 = vpop.f32.mrb[237].mxu1  ;;  %5838 = vmatmul.mubr.f32.gmra.mrb[86].mxu1 %v5301_v26  ;;  %11176 = vmatprep.subr.bf16.mxu0 %v17743_v30  ;;  %v17745_v26 = vld [vmem:[#allocation114_spill] sm:$0xff]  ;;  %v5156_v27 = vld [vmem:[%s16803_s3 + $0x130] sm:$0xff] }
 0x2ea   :  { %v4250_v1 = vadd.f32 %v8399_v40, %v16026_v25  ;;  %v8455_v43 = vadd.f32 %v8454_v56, %v8453_v23  ;;  %v8400_v34 = vpop.f32.mrb[238].mxu0  ;;  %11174 = vmatpush3.bf16.msra.mxu1 %v17744_v59  ;;  %6012 = vmatprep.mubr.f32.mxu1 %v5131_v21  ;;  %v17746_v23 = vld [vmem:[#allocation85_spill] sm:$0xff]  ;;  %v5179_v59 = vld [vmem:[%s16803_s3 + $0x1e8] sm:$0xff] }
 0x2eb   :  { %v8401_v17 = vpop.f32.mrb[239].mxu0  ;;  %5908 = vmatmul.mubr.f32.vlgmr.msra.gmra.mrb[80].mxu0 %v5128_v50  ;;  %11208 = vmatprep.subr.bf16.mxu1 %v17745_v26  ;;  %v5153_v21 = vld [vmem:[%s16803_s3 + $0x118] sm:$0xff]  ;;  %v17747_v50 = vld [vmem:[#allocation87_spill] sm:$0xff] }
 0x2ec   :  { %v16178_v30 = vadd.f32 %v8455_v43, %v4250_v1  ;;  %v8402_v25 = vadd.f32 %v8401_v17, %v8400_v34  ;;  %v8456_v40 = vpop.f32.mrb[238].mxu1  ;;  %11178 = vmatpush3.bf16.msra.mxu0 %v17746_v23  ;;  %5912 = vmatprep.mubr.f32.mxu0 %v5154_v51  ;;  %v17748_v17 = vld [vmem:[#allocation116_spill] sm:$0xff]  ;;  %v5155_v51 = vld [vmem:[%s16803_s3 + $0x128] sm:$0xff]  ;;  %v5181_v23 = vld [vmem:[%s16803_s3 + $0x1f8] sm:$0xff] }
 0x2ed   :  { %v8457_v56 = vpop.f32.mrb[239].mxu1  ;;  %6013 = vmatmul.mubr.f32.vlgmr.msra.gmra.mrb[88].mxu1 %v5130_v4  ;;  %11180 = vmatprep.subr.bf16.mxu0 %v17747_v50  ;;  %v17749_v4 = vld [vmem:[#allocation118_spill] sm:$0xff] }
 0x2ee   :  { %v4255_v1 = vadd.f32 %v8402_v25, %v16045_v15  ;;  %v8458_v43 = vadd.f32 %v8457_v56, %v8456_v40  ;;  %v8403_v34 = vpop.f32.mrb[240].mxu0  ;;  %11210 = vmatpush3.bf16.msra.mxu1 %v17748_v17  ;;  %6017 = vmatprep.mubr.f32.mxu1 %v5156_v27  ;;  %v17750_v40 = vld [vmem:[#allocation89_spill] sm:$0xff]  ;;  %v5178_v27 = vld [vmem:[%s16803_s3 + $0x1e0] sm:$0xff]  ;;  %v5204_v17 = vld [vmem:[%s16803_s3 + $0x2b0] sm:$0xff] }
 0x2ef   :  { %v8404_v26 = vpop.f32.mrb[241].mxu0  ;;  %5913 = vmatmul.mubr.f32.gmra.mrb[82].mxu0 %v5153_v21  ;;  %11212 = vmatprep.subr.bf16.mxu1 %v17749_v4  ;;  %v17751_v21 = vld [vmem:[#allocation91_spill] sm:$0xff] }
 0x2f0   :  { %v16197_v50 = vadd.f32 %v8458_v43, %v4255_v1  ;;  %v8405_v15 = vadd.f32 %v8404_v26, %v8403_v34  ;;  %v8459_v25 = vpop.f32.mrb[240].mxu1  ;;  %11182 = vmatpush3.bf16.msra.mxu0 %v17750_v40  ;;  %5917 = vmatprep.mubr.f32.mxu0 %v5179_v59  ;;  %v17752_v26 = vld [vmem:[#allocation120_spill] sm:$0xff]  ;;  %v5206_v40 = vld [vmem:[%s16803_s3 + $0x2c0] sm:$0xff] }
 0x2f1   :  { %v8460_v56 = vpop.f32.mrb[241].mxu1  ;;  %6018 = vmatmul.mubr.f32.gmra.mrb[90].mxu1 %v5155_v51  ;;  %11184 = vmatprep.subr.bf16.mxu0 %v17751_v21  ;;  %v5180_v59 = vld [vmem:[%s16803_s3 + $0x1f0] sm:$0xff]  ;;  %v17753_v51 = vld [vmem:[#allocation122_spill] sm:$0xff] }
 0x2f2   :  { %v4260_v1 = vadd.f32 %v8405_v15, %v16064_v45  ;;  %v8461_v43 = vadd.f32 %v8460_v56, %v8459_v25  ;;  %v8406_v34 = vpop.f32.mrb[242].mxu0  ;;  %11214 = vmatpush3.bf16.msra.mxu1 %v17752_v26  ;;  %6022 = vmatprep.mubr.f32.mxu1 %v5181_v23  ;;  %v17754_v25 = vld [vmem:[#allocation93_spill] sm:$0xff]  ;;  %v5203_v23 = vld [vmem:[%s16803_s3 + $0x2a8] sm:$0xff] }
 0x2f3   :  { %v8407_v4 = vpop.f32.mrb[243].mxu0  ;;  %5918 = vmatmul.mubr.f32.gmra.mrb[84].mxu0 %v5178_v27  ;;  %11216 = vmatprep.subr.bf16.mxu1 %v17753_v51  ;;  %v17755_v27 = vld [vmem:[#allocation95_spill] sm:$0xff]  ;;  %v5229_v26 = vld [vmem:[%s16803_s3 + $0x378] sm:$0xff] }
 0x2f4   :  { %v16216_v21 = vadd.f32 %v8461_v43, %v4260_v1  ;;  %v8408_v45 = vadd.f32 %v8407_v4, %v8406_v34  ;;  %v8462_v15 = vpop.f32.mrb[242].mxu1  ;;  %11186 = vmatpush3.bf16.msra.mxu0 %v17754_v25  ;;  %5922 = vmatprep.mubr.f32.mxu0 %v5204_v17  ;;  %v17756_v4 = vld [vmem:[#allocation124_spill] sm:$0xff]  ;;  %v5205_v17 = vld [vmem:[%s16803_s3 + $0x2b8] sm:$0xff]  ;;  %v5231_v25 = vld [vmem:[%s16803_s3 + $0x388] sm:$0xff] }
 0x2f5   :  { %v8463_v56 = vpop.f32.mrb[243].mxu1  ;;  %6023 = vmatmul.mubr.f32.gmra.mrb[92].mxu1 %v5180_v59  ;;  %11188 = vmatprep.subr.bf16.mxu0 %v17755_v27  ;;  %v17757_v59 = vld [vmem:[#allocation126_spill] sm:$0xff] }
 0x2f6   :  { %v4265_v1 = vadd.f32 %v8408_v45, %v16083_v2  ;;  %v8464_v43 = vadd.f32 %v8463_v56, %v8462_v15  ;;  %v8409_v34 = vpop.f32.mrb[244].mxu0  ;;  %11218 = vmatpush3.bf16.msra.mxu1 %v17756_v4  ;;  %6027 = vmatprep.mubr.f32.mxu1 %v5206_v40  ;;  %v17758_v15 = vld [vmem:[#allocation97_spill] sm:$0xff]  ;;  %v5228_v40 = vld [vmem:[%s16803_s3 + $0x370] sm:$0xff]  ;;  %v5254_v4 = vld [vmem:[%s16803_s3 + $0x440] sm:$0xff] }
 0x2f7   :  { %v8410_v51 = vpop.f32.mrb[245].mxu0  ;;  %5923 = vmatmul.mubr.f32.gmra.mrb[86].mxu0 %v5203_v23  ;;  %11220 = vmatprep.subr.bf16.mxu1 %v17757_v59  ;;  %v17759_v23 = vld [vmem:[#allocation99_spill] sm:$0xff] }
 0x2f8   :  { %v16235_v27 = vadd.f32 %v8464_v43, %v4265_v1  ;;  %v8411_v2 = vadd.f32 %v8410_v51, %v8409_v34  ;;  %v8465_v45 = vpop.f32.mrb[244].mxu1  ;;  %11190 = vmatpush3.bf16.msra.mxu0 %v17758_v15  ;;  %5927 = vmatprep.mubr.f32.mxu0 %v5229_v26  ;;  %v17760_v51 = vld [vmem:[#allocation128_spill] sm:$0xff]  ;;  %v5230_v26 = vld [vmem:[%s16803_s3 + $0x380] sm:$0xff] }
 0x2f9   :  { %v8466_v56 = vpop.f32.mrb[245].mxu1  ;;  %6028 = vmatmul.mubr.f32.gmra.mrb[94].mxu1 %v5205_v17  ;;  %11192 = vmatprep.subr.bf16.mxu0 %v17759_v23  ;;  %v17761_v17 = vld [vmem:[#allocation130_spill] sm:$0xff]  ;;  %v5256_v15 = vld [vmem:[%s16803_s3 + $0x450] sm:$0xff] }
 0x2fa   :  { %v4270_v1 = vadd.f32 %v8411_v2, %v16102_v53  ;;  %v8467_v43 = vadd.f32 %v8466_v56, %v8465_v45  ;;  %v8412_v34 = vpop.f32.mrb[246].mxu0  ;;  %11222 = vmatpush3.bf16.msra.mxu1 %v17760_v51  ;;  %6032 = vmatprep.mubr.f32.mxu1 %v5231_v25  ;;  %v17762_v45 = vld [vmem:[#allocation101_spill] sm:$0xff]  ;;  %v5279_v51 = vld [vmem:[%s16803_s3 + $0x508] sm:$0xff] }
 0x2fb   :  { %v8413_v59 = vpop.f32.mrb[247].mxu0  ;;  %5928 = vmatmul.mubr.f32.gmra.mrb[88].mxu0 %v5228_v40  ;;  %11224 = vmatprep.subr.bf16.mxu1 %v17761_v17  ;;  %v5253_v25 = vld [vmem:[%s16803_s3 + $0x438] sm:$0xff]  ;;  %v17763_v40 = vld [vmem:[#allocation103_spill] sm:$0xff] }
 0x2fc   :  { %v16254_v23 = vadd.f32 %v8467_v43, %v4270_v1  ;;  %v8414_v53 = vadd.f32 %v8413_v59, %v8412_v34  ;;  %v8468_v2 = vpop.f32.mrb[246].mxu1  ;;  %11194 = vmatpush3.bf16.msra.mxu0 %v17762_v45  ;;  %5932 = vmatprep.mubr.f32.mxu0 %v5254_v4  ;;  %v17764_v59 = vld [vmem:[#allocation132_spill] sm:$0xff]  ;;  %v5255_v4 = vld [vmem:[%s16803_s3 + $0x448] sm:$0xff]  ;;  %v5281_v45 = vld [vmem:[%s16803_s3 + $0x518] sm:$0xff] }
 0x2fd   :  { %v8469_v56 = vpop.f32.mrb[247].mxu1  ;;  %6033 = vmatmul.mubr.f32.gmra.mrb[96].mxu1 %v5230_v26  ;;  %11196 = vmatprep.subr.bf16.mxu0 %v17763_v40  ;;  %v17765_v26 = vld [vmem:[#allocation134_spill] sm:$0xff] }
 0x2fe   :  { %v4275_v1 = vadd.f32 %v8414_v53, %v16121_v0  ;;  %v8470_v43 = vadd.f32 %v8469_v56, %v8468_v2  ;;  %v8503_v34 = vpop.f32.mrb[248].mxu0  ;;  %11226 = vmatpush3.bf16.msra.mxu1 %v17764_v59  ;;  %6037 = vmatprep.mubr.f32.mxu1 %v5256_v15  ;;  %v17766_v2 = vld [vmem:[#allocation105_spill] sm:$0xff]  ;;  %v5278_v15 = vld [vmem:[%s16803_s3 + $0x500] sm:$0xff]  ;;  %v5304_v59 = vld [vmem:[%s16803_s3 + $0x5d0] sm:$0xff] }
 0x2ff   :  { %v8504_v17 = vpop.f32.mrb[249].mxu0  ;;  %5933 = vmatmul.mubr.f32.gmra.mrb[90].mxu0 %v5253_v25  ;;  %11228 = vmatprep.subr.bf16.mxu1 %v17765_v26  ;;  %v17767_v25 = vld [vmem:[#allocation107_spill] sm:$0xff] }
 0x300   :  { %v16273_v40 = vadd.f32 %v8470_v43, %v4275_v1  ;;  %v8505_v0 = vadd.f32 %v8504_v17, %v8503_v34  ;;  %v8559_v53 = vpop.f32.mrb[248].mxu1  ;;  %11198 = vmatpush3.bf16.msra.mxu0 %v17766_v2  ;;  %5937 = vmatprep.mubr.f32.mxu0 %v5279_v51  ;;  %v17768_v17 = vld [vmem:[#allocation136_spill] sm:$0xff]  ;;  %v5306_v2 = vld [vmem:[%s16803_s3 + $0x5e0] sm:$0xff] }
 0x301   :  { %v8560_v56 = vpop.f32.mrb[249].mxu1  ;;  %6038 = vmatmul.mubr.f32.gmra.mrb[98].mxu1 %v5255_v4  ;;  %11200 = vmatprep.subr.bf16.mxu0 %v17767_v25  ;;  %v5280_v51 = vld [vmem:[%s16803_s3 + $0x510] sm:$0xff]  ;;  %v17769_v4 = vld [vmem:[#allocation138_spill] sm:$0xff] }
 0x302   :  { %v4450_v1 = vadd.f32 %v8505_v0, %v16140_v37  ;;  %v8561_v43 = vadd.f32 %v8560_v56, %v8559_v53  ;;  %v8506_v34 = vpop.f32.mrb[250].mxu0  ;;  %11230 = vmatpush3.bf16.msra.mxu1 %v17768_v17  ;;  %6042 = vmatprep.mubr.f32.mxu1 %v5281_v45  ;;  %v17770_v53 = vld [vmem:[#allocation109_spill] sm:$0xff]  ;;  %v5303_v45 = vld [vmem:[%s16803_s3 + $0x5c8] sm:$0xff] }
 0x303   :  { %v8507_v26 = vpop.f32.mrb[251].mxu0  ;;  %5938 = vmatmul.mubr.f32.gmra.mrb[92].mxu0 %v5278_v15  ;;  %11232 = vmatprep.subr.bf16.mxu1 %v17769_v4  ;;  %v17771_v15 = vld [vmem:[#allocation111_spill] sm:$0xff]  ;;  %v5133_v17 = vld [vmem:[%s16803_s3 + $0x78] sm:$0xff] }
 0x304   :  { %v16292_v25 = vadd.f32 %v8561_v43, %v4450_v1  ;;  %v8508_v37 = vadd.f32 %v8507_v26, %v8506_v34  ;;  %v8562_v0 = vpop.f32.mrb[250].mxu1  ;;  %11202 = vmatpush3.bf16.msra.mxu0 %v17770_v53  ;;  %5942 = vmatprep.mubr.f32.mxu0 %v5304_v59  ;;  %v5305_v59 = vld [vmem:[%s16803_s3 + $0x5d8] sm:$0xff]  ;;  %v17773_v53 = vld [vmem:[#allocation115_spill] sm:$0xff] }
 0x305   :  { %v8563_v56 = vpop.f32.mrb[251].mxu1  ;;  %6043 = vmatmul.mubr.f32.gmra.mrb[100].mxu1 %v5280_v51  ;;  %11204 = vmatprep.subr.bf16.mxu0 %v17771_v15  ;;  %v5135_v51 = vld [vmem:[%s16803_s3 + $0x88] sm:$0xff] }
 0x306   :  { %v4455_v1 = vadd.f32 %v8508_v37, %v16159_v58  ;;  %v8564_v43 = vadd.f32 %v8563_v56, %v8562_v0  ;;  %v8509_v34 = vpop.f32.mrb[252].mxu0  ;;  %11234 = vmatpush3.bf16.msra.mxu1 %v17619_v41  ;;  %6047 = vmatprep.mubr.f32.mxu1 %v5306_v2  ;;  %v17772_v0 = vld [vmem:[#allocation113_spill] sm:$0xff]  ;;  %v5132_v41 = vld [vmem:[%s16803_s3 + $0x70] sm:$0xff] }
 0x307   :  { %v8510_v26 = vpop.f32.mrb[253].mxu0  ;;  %5943 = vmatmul.mubr.f32.gmra.mrb[94].mxu0 %v5303_v45  ;;  %11236 = vmatprep.subr.bf16.mxu1 %v17620_v5  ;;  %v5158_v5 = vld [vmem:[%s16803_s3 + $0x140] sm:$0xff] }
 0x308   :  { %v16311_v4 = vadd.f32 %v8564_v43, %v4455_v1  ;;  %v8511_v58 = vadd.f32 %v8510_v26, %v8509_v34  ;;  %v8565_v37 = vpop.f32.mrb[252].mxu1  ;;  %11206 = vmatpush3.bf16.msra.mxu0 %v17772_v0  ;;  %6117 = vmatprep.mubr.f32.mxu0 %v5133_v17  ;;  %v5134_v17 = vld [vmem:[%s16803_s3 + $0x80] sm:$0xff]  ;;  %v5160_v34 = vld [vmem:[%s16803_s3 + $0x150] sm:$0xff]  ;;  %v5183_v0 = vld [vmem:[%s16803_s3 + $0x208] sm:$0xff] }
 0x309   :  { %v8566_v2 = vpop.f32.mrb[253].mxu1  ;;  %6048 = vmatmul.mubr.f32.gmra.mrb[102].mxu1 %v5305_v59  ;;  %11240 = vmatprep.subr.bf16.mxu0 %v17773_v53  ;;  %v17774_v43 = vld [vmem:[#allocation146_spill] sm:$0xff] }
 0x30a   :  { %v4460_v45 = vadd.f32 %v8511_v58, %v16178_v30  ;;  %v8567_v56 = vadd.f32 %v8566_v2, %v8565_v37  ;;  %v8512_v15 = vpop.f32.mrb[254].mxu0  ;;  %11238 = vmatpush3.bf16.msra.mxu1 %v17621_v9  ;;  %6222 = vmatprep.mubr.f32.mxu1 %v5135_v51  ;;  %v17775_v58 = vld [vmem:[#allocation117_spill] sm:$0xff]  ;;  %v17776_v37 = vld [vmem:[#allocation119_spill] sm:$0xff] }
 0x30b   :  { %v8513_v1 = vpop.f32.mrb[255].mxu0  ;;  %6118 = vmatmul.mubr.f32.vlgmr.msra.gmra.mrb[96].mxu0 %v5132_v41  ;;  %11272 = vmatprep.subr.bf16.mxu1 %v17774_v43  ;;  %v5157_v9 = vld [vmem:[%s16803_s3 + $0x138] sm:$0xff] }
 0x30c   :  { %v16330_v59 = vadd.f32 %v8567_v56, %v4460_v45  ;;  %v8514_v30 = vadd.f32 %v8513_v1, %v8512_v15  ;;  %v8568_v26 = vpop.f32.mrb[254].mxu1  ;;  %11242 = vmatpush3.bf16.msra.mxu0 %v17775_v58  ;;  %6122 = vmatprep.mubr.f32.mxu0 %v5158_v5  ;;  %v5159_v5 = vld [vmem:[%s16803_s3 + $0x148] sm:$0xff]  ;;  %v17777_v56 = vld [vmem:[#allocation150_spill] sm:$0xff]  ;;  %v5185_v15 = vld [vmem:[%s16803_s3 + $0x218] sm:$0xff] }
 0x30d   :  { %v8569_v51 = vpop.f32.mrb[255].mxu1  ;;  %6223 = vmatmul.mubr.f32.vlgmr.msra.gmra.mrb[104].mxu1 %v5134_v17  ;;  %11244 = vmatprep.subr.bf16.mxu0 %v17776_v37  ;;  %v17778_v43 = vld [vmem:[#allocation121_spill] sm:$0xff]  ;;  %v5184_v37 = vld [vmem:[%s16803_s3 + $0x210] sm:$0xff] }
 0x30e   :  { %v4465_v41 = vadd.f32 %v8514_v30, %v16197_v50  ;;  %v8570_v2 = vadd.f32 %v8569_v51, %v8568_v26  ;;  %v8515_v53 = vpop.f32.mrb[0].mxu0  ;;  %11274 = vmatpush3.bf16.msra.mxu1 %v17624_v62  ;;  %6227 = vmatprep.mubr.f32.mxu1 %v5160_v34  ;;  %v5182_v62 = vld [vmem:[%s16803_s3 + $0x200] sm:$0xff]  ;;  %v17779_v30 = vld [vmem:[#allocation123_spill] sm:$0xff]  ;;  %v5208_v26 = vld [vmem:[%s16803_s3 + $0x2d0] sm:$0xff] }
 0x30f   :  { %v8516_v45 = vpop.f32.mrb[1].mxu0  ;;  %6123 = vmatmul.mubr.f32.gmra.mrb[98].mxu0 %v5157_v9  ;;  %11276 = vmatprep.subr.bf16.mxu1 %v17777_v56 }
 0x310   :  { %v16349_v17 = vadd.f32 %v8570_v2, %v4465_v41  ;;  %v8517_v50 = vadd.f32 %v8516_v45, %v8515_v53  ;;  %v8571_v1 = vpop.f32.mrb[0].mxu1  ;;  %11246 = vmatpush3.bf16.msra.mxu0 %v17778_v43  ;;  %6127 = vmatprep.mubr.f32.mxu0 %v5183_v0  ;;  %v17780_v41 = vld [vmem:[#allocation154_spill] sm:$0xff]  ;;  %v17781_v45 = vld [vmem:[#allocation125_spill] sm:$0xff] }
 0x311   :  { %v8572_v34 = vpop.f32.mrb[1].mxu1  ;;  %6228 = vmatmul.mubr.f32.gmra.mrb[106].mxu1 %v5159_v5  ;;  %11248 = vmatprep.subr.bf16.mxu0 %v17779_v30  ;;  %v5210_v2 = vld [vmem:[%s16803_s3 + $0x2e0] sm:$0xff] }
 0x312   :  { %v4470_v58 = vadd.f32 %v8517_v50, %v16216_v21  ;;  %v8573_v9 = vadd.f32 %v8572_v34, %v8571_v1  ;;  %v8518_v51 = vpop.f32.mrb[2].mxu0  ;;  %11278 = vmatpush3.bf16.msra.mxu1 %v17627_v55  ;;  %6232 = vmatprep.mubr.f32.mxu1 %v5185_v15  ;;  %v5207_v55 = vld [vmem:[%s16803_s3 + $0x2c8] sm:$0xff]  ;;  %v5233_v50 = vld [vmem:[%s16803_s3 + $0x398] sm:$0xff] }
 0x313   :  { %v8519_v0 = vpop.f32.mrb[3].mxu0  ;;  %6128 = vmatmul.mubr.f32.gmra.mrb[100].mxu0 %v5182_v62  ;;  %11280 = vmatprep.subr.bf16.mxu1 %v17780_v41  ;;  %v17782_v15 = vld [vmem:[#allocation127_spill] sm:$0xff]  ;;  %v5209_v34 = vld [vmem:[%s16803_s3 + $0x2d8] sm:$0xff] }
 0x314   :  { %v16368_v53 = vadd.f32 %v8573_v9, %v4470_v58  ;;  %v8520_v21 = vadd.f32 %v8519_v0, %v8518_v51  ;;  %v8574_v5 = vpop.f32.mrb[2].mxu1  ;;  %11250 = vmatpush3.bf16.msra.mxu0 %v17781_v45  ;;  %6132 = vmatprep.mubr.f32.mxu0 %v5208_v26  ;;  %v17783_v26 = vld [vmem:[#allocation158_spill] sm:$0xff]  ;;  %v5235_v58 = vld [vmem:[%s16803_s3 + $0x3a8] sm:$0xff] }
 0x315   :  { %v8575_v56 = vpop.f32.mrb[3].mxu1  ;;  %6233 = vmatmul.mubr.f32.gmra.mrb[108].mxu1 %v5184_v37  ;;  %11252 = vmatprep.subr.bf16.mxu0 %v17782_v15  ;;  %v17784_v37 = vld [vmem:[#allocation129_spill] sm:$0xff]  ;;  %v17785_v41 = vld [vmem:[#allocation131_spill] sm:$0xff]  ;;  %v17786_v15 = vld [vmem:[#allocation162_spill] sm:$0xff] }
 0x316   :  { %v4475_v1 = vadd.f32 %v8520_v21, %v16235_v27  ;;  %v8576_v43 = vadd.f32 %v8575_v56, %v8574_v5  ;;  %v8521_v62 = vpop.f32.mrb[4].mxu0  ;;  %11282 = vmatpush3.bf16.msra.mxu1 %v17630_v44  ;;  %6237 = vmatprep.mubr.f32.mxu1 %v5210_v2  ;;  %v5232_v44 = vld [vmem:[%s16803_s3 + $0x390] sm:$0xff]  ;;  %v5258_v2 = vld [vmem:[%s16803_s3 + $0x460] sm:$0xff] }
 0x317   :  { %v8522_v30 = vpop.f32.mrb[5].mxu0  ;;  %6133 = vmatmul.mubr.f32.gmra.mrb[102].mxu0 %v5207_v55  ;;  %11284 = vmatprep.subr.bf16.mxu1 %v17783_v26  ;;  %v5234_v55 = vld [vmem:[%s16803_s3 + $0x3a0] sm:$0xff]  ;;  %v5283_v26 = vld [vmem:[%s16803_s3 + $0x528] sm:$0xff] }
 0x318   :  { %v16387_v9 = vadd.f32 %v8576_v43, %v4475_v1  ;;  %v8523_v27 = vadd.f32 %v8522_v30, %v8521_v62  ;;  %v8577_v51 = vpop.f32.mrb[4].mxu1  ;;  %11254 = vmatpush3.bf16.msra.mxu0 %v17784_v37  ;;  %6137 = vmatprep.mubr.f32.mxu0 %v5233_v50  ;;  %v5260_v50 = vld [vmem:[%s16803_s3 + $0x470] sm:$0xff]  ;;  %v17787_v62 = vld [vmem:[#allocation133_spill] sm:$0xff]  ;;  %v17788_v30 = vld [vmem:[#allocation135_spill] sm:$0xff] }
 0x319   :  { %v8578_v0 = vpop.f32.mrb[5].mxu1  ;;  %6238 = vmatmul.mubr.f32.gmra.mrb[110].mxu1 %v5209_v34  ;;  %11256 = vmatprep.subr.bf16.mxu0 %v17785_v41  ;;  %v5259_v37 = vld [vmem:[%s16803_s3 + $0x468] sm:$0xff]  ;;  %v5285_v41 = vld [vmem:[%s16803_s3 + $0x538] sm:$0xff] }
 0x31a   :  { %v4480_v21 = vadd.f32 %v8523_v27, %v16254_v23  ;;  %v8579_v5 = vadd.f32 %v8578_v0, %v8577_v51  ;;  %v8524_v45 = vpop.f32.mrb[6].mxu0  ;;  %11286 = vmatpush3.bf16.msra.mxu1 %v17633_v49  ;;  %6242 = vmatprep.mubr.f32.mxu1 %v5235_v58  ;;  %v5257_v49 = vld [vmem:[%s16803_s3 + $0x458] sm:$0xff]  ;;  %v17789_v0 = vld [vmem:[#allocation166_spill] sm:$0xff] }
 0x31b   :  { %v8525_v56 = vpop.f32.mrb[7].mxu0  ;;  %6138 = vmatmul.mubr.f32.gmra.mrb[104].mxu0 %v5232_v44  ;;  %11288 = vmatprep.subr.bf16.mxu1 %v17786_v15 }
 0x31c   :  { %v16406_v1 = vadd.f32 %v8579_v5, %v4480_v21  ;;  %v8526_v23 = vadd.f32 %v8525_v56, %v8524_v45  ;;  %v8580_v43 = vpop.f32.mrb[6].mxu1  ;;  %11258 = vmatpush3.bf16.msra.mxu0 %v17787_v62  ;;  %6142 = vmatprep.mubr.f32.mxu0 %v5258_v2  ;;  %v17790_v5 = vld [vmem:[#allocation137_spill] sm:$0xff]  ;;  %v5308_v56 = vld [vmem:[%s16803_s3 + $0x5f0] sm:$0xff] }
 0x31d   :  { %v8581_v34 = vpop.f32.mrb[7].mxu1  ;;  %6243 = vmatmul.mubr.f32.gmra.mrb[112].mxu1 %v5234_v55  ;;  %11260 = vmatprep.subr.bf16.mxu0 %v17788_v30  ;;  %v17791_v55 = vld [vmem:[#allocation139_spill] sm:$0xff] }
 0x31e   :  { %v4485_v58 = vadd.f32 %v8526_v23, %v16273_v40  ;;  %v8582_v27 = vadd.f32 %v8581_v34, %v8580_v43  ;;  %v8615_v51 = vpop.f32.mrb[8].mxu0  ;;  %11290 = vmatpush3.bf16.msra.mxu1 %v17636_v57  ;;  %6247 = vmatprep.mubr.f32.mxu1 %v5260_v50  ;;  %v5282_v57 = vld [vmem:[%s16803_s3 + $0x520] sm:$0xff]  ;;  %v5284_v43 = vld [vmem:[%s16803_s3 + $0x530] sm:$0xff] }
 0x31f   :  { %v8616_v44 = vpop.f32.mrb[9].mxu0  ;;  %6143 = vmatmul.mubr.f32.gmra.mrb[106].mxu0 %v5257_v49  ;;  %11292 = vmatprep.subr.bf16.mxu1 %v17789_v0  ;;  %v5310_v49 = vld [vmem:[%s16803_s3 + $0x600] sm:$0xff]  ;;  %v5309_v0 = vld [vmem:[%s16803_s3 + $0x5f8] sm:$0xff] }
 0x320   :  { %v16425_v2 = vadd.f32 %v8582_v27, %v4485_v58  ;;  %v8617_v40 = vadd.f32 %v8616_v44, %v8615_v51  ;;  %v8671_v21 = vpop.f32.mrb[8].mxu1  ;;  %11262 = vmatpush3.bf16.msra.mxu0 %v17790_v5  ;;  %6147 = vmatprep.mubr.f32.mxu0 %v5283_v26  ;;  %v17792_v26 = vld [vmem:[#allocation141_spill] sm:$0xff]  ;;  %v17793_v27 = vld [vmem:[#allocation143_spill] sm:$0xff] }
 0x321   :  { %v8672_v45 = vpop.f32.mrb[9].mxu1  ;;  %6248 = vmatmul.mubr.f32.gmra.mrb[114].mxu1 %v5259_v37  ;;  %11264 = vmatprep.subr.bf16.mxu0 %v17791_v55  ;;  %v17795_v55 = vld [vmem:[#allocation147_spill] sm:$0xff] }
 0x322   :  { %v4660_v15 = vadd.f32 %v8617_v40, %v16292_v25  ;;  %v8673_v50 = vadd.f32 %v8672_v45, %v8671_v21  ;;  %v8618_v23 = vpop.f32.mrb[10].mxu0  ;;  %11294 = vmatpush3.bf16.msra.mxu1 %v17639_v19  ;;  %6252 = vmatprep.mubr.f32.mxu1 %v5285_v41  ;;  %v5307_v19 = vld [vmem:[%s16803_s3 + $0x5e8] sm:$0xff] }
 0x323   :  { %v8619_v62 = vpop.f32.mrb[11].mxu0  ;;  %6148 = vmatmul.mubr.f32.gmra.mrb[108].mxu0 %v5282_v57  ;;  %11296 = vmatprep.subr.bf16.mxu1 %v17640_v36  ;;  %v5137_v36 = vld [vmem:[%s16803_s3 + $0x98] sm:$0xff]  ;;  %v5139_v40 = vld [vmem:[%s16803_s3 + $0xa8] sm:$0xff] }
 0x324   :  { %v16444_v34 = vadd.f32 %v8673_v50, %v4660_v15  ;;  %v8620_v25 = vadd.f32 %v8619_v62, %v8618_v23  ;;  %v8674_v30 = vpop.f32.mrb[10].mxu1  ;;  %11266 = vmatpush3.bf16.msra.mxu0 %v17792_v26  ;;  %6152 = vmatprep.mubr.f32.mxu0 %v5308_v56  ;;  %v17794_v57 = vld [vmem:[#allocation145_spill] sm:$0xff]  ;;  %v5138_v23 = vld [vmem:[%s16803_s3 + $0xa0] sm:$0xff]  ;;  %v5164_v62 = vld [vmem:[%s16803_s3 + $0x170] sm:$0xff] }
 0x325   :  { %v8675_v58 = vpop.f32.mrb[11].mxu1  ;;  %6253 = vmatmul.mubr.f32.gmra.mrb[116].mxu1 %v5284_v43  ;;  %11268 = vmatprep.subr.bf16.mxu0 %v17793_v27 }
 0x326   :  { %v4665_v51 = vadd.f32 %v8620_v25, %v16311_v4  ;;  %v8676_v37 = vadd.f32 %v8675_v58, %v8674_v30  ;;  %v8621_v44 = vpop.f32.mrb[12].mxu0  ;;  %11298 = vmatpush3.bf16.msra.mxu1 %v17641_v60  ;;  %6257 = vmatprep.mubr.f32.mxu1 %v5310_v49  ;;  %v5136_v60 = vld [vmem:[%s16803_s3 + $0x90] sm:$0xff]  ;;  %v17796_v30 = vld [vmem:[#allocation149_spill] sm:$0xff]  ;;  %v5187_v58 = vld [vmem:[%s16803_s3 + $0x228] sm:$0xff] }
 0x327   :  { %v8622_v41 = vpop.f32.mrb[13].mxu0  ;;  %6153 = vmatmul.mubr.f32.gmra.mrb[110].mxu0 %v5307_v19  ;;  %11300 = vmatprep.subr.bf16.mxu1 %v17642_v6  ;;  %v5162_v6 = vld [vmem:[%s16803_s3 + $0x160] sm:$0xff]  ;;  %v17797_v19 = vld [vmem:[#allocation151_spill] sm:$0xff] }
 0x328   :  { %v16463_v21 = vadd.f32 %v8676_v37, %v4665_v51  ;;  %v8623_v4 = vadd.f32 %v8622_v41, %v8621_v44  ;;  %v8677_v5 = vpop.f32.mrb[12].mxu1  ;;  %11270 = vmatpush3.bf16.msra.mxu0 %v17794_v57  ;;  %6327 = vmatprep.mubr.f32.mxu0 %v5137_v36  ;;  %v5163_v37 = vld [vmem:[%s16803_s3 + $0x168] sm:$0xff] }
 0x329   :  { %v8678_v45 = vpop.f32.mrb[13].mxu1  ;;  %6258 = vmatmul.mubr.f32.gmra.mrb[118].mxu1 %v5309_v0  ;;  %11304 = vmatprep.subr.bf16.mxu0 %v17795_v55  ;;  %v5189_v0 = vld [vmem:[%s16803_s3 + $0x238] sm:$0xff]  ;;  %v17799_v57 = vld [vmem:[#allocation155_spill] sm:$0xff] }
 0x32a   :  { %v4670_v56 = vadd.f32 %v8623_v4, %v16330_v59  ;;  %v8679_v15 = vadd.f32 %v8678_v45, %v8677_v5  ;;  %v8624_v50 = vpop.f32.mrb[14].mxu0  ;;  %11302 = vmatpush3.bf16.msra.mxu1 %v17643_v13  ;;  %6432 = vmatprep.mubr.f32.mxu1 %v5139_v40  ;;  %v5161_v13 = vld [vmem:[%s16803_s3 + $0x158] sm:$0xff] }
 0x32b   :  { %v8625_v43 = vpop.f32.mrb[15].mxu0  ;;  %6328 = vmatmul.mubr.f32.vlgmr.msra.gmra.mrb[112].mxu0 %v5136_v60  ;;  %11336 = vmatprep.subr.bf16.mxu1 %v17644_v31  ;;  %v17798_v4 = vld [vmem:[#allocation153_spill] sm:$0xff]  ;;  %v5212_v60 = vld [vmem:[%s16803_s3 + $0x2f0] sm:$0xff] }
 0x32c   :  { %v16482_v49 = vadd.f32 %v8679_v15, %v4670_v56  ;;  %v8626_v59 = vadd.f32 %v8625_v43, %v8624_v50  ;;  %v8680_v25 = vpop.f32.mrb[14].mxu1  ;;  %11306 = vmatpush3.bf16.msra.mxu0 %v17796_v30  ;;  %6332 = vmatprep.mubr.f32.mxu0 %v5162_v6  ;;  %v5188_v56 = vld [vmem:[%s16803_s3 + $0x230] sm:$0xff]  ;;  %v5214_v50 = vld [vmem:[%s16803_s3 + $0x300] sm:$0xff]  ;;  %v5237_v30 = vld [vmem:[%s16803_s3 + $0x3b8] sm:$0xff] }
 0x32d   :  { %v8681_v26 = vpop.f32.mrb[15].mxu1  ;;  %6433 = vmatmul.mubr.f32.vlgmr.msra.gmra.mrb[120].mxu1 %v5138_v23  ;;  %11308 = vmatprep.subr.bf16.mxu0 %v17797_v19 }
 0x32e   :  { %v4675_v27 = vadd.f32 %v8626_v59, %v16349_v17  ;;  %v8682_v36 = vadd.f32 %v8681_v26, %v8680_v25  ;;  %v8627_v51 = vpop.f32.mrb[16].mxu0  ;;  %6437 = vmatprep.mubr.f32.mxu1 %v5164_v62  ;;  %11338 = vmatpush3.bf16.msra.mxu1 %v17644_v31  ;;  %v5186_v31 = vld [vmem:[%s16803_s3 + $0x220] sm:$0xff]  ;;  %v17800_v62 = vld [vmem:[#allocation157_spill] sm:$0xff]  ;;  %v17801_v25 = vld [vmem:[#allocation159_spill] sm:$0xff] }
 0x32f   :  { %v8628_v44 = vpop.f32.mrb[17].mxu0  ;;  %6333 = vmatmul.mubr.f32.gmra.mrb[114].mxu0 %v5161_v13  ;;  %11340 = vmatprep.subr.bf16.mxu1 %v17645_v11 }
 0x330   :  { %v16501_v41 = vadd.f32 %v8682_v36, %v4675_v27  ;;  %v8629_v17 = vadd.f32 %v8628_v44, %v8627_v51  ;;  %v8683_v40 = vpop.f32.mrb[16].mxu1  ;;  %11310 = vmatpush3.bf16.msra.mxu0 %v17798_v4  ;;  %6337 = vmatprep.mubr.f32.mxu0 %v5187_v58  ;;  %v5213_v58 = vld [vmem:[%s16803_s3 + $0x2f8] sm:$0xff]  ;;  %v5239_v36 = vld [vmem:[%s16803_s3 + $0x3c8] sm:$0xff] }
 0x331   :  { %v8684_v5 = vpop.f32.mrb[17].mxu1  ;;  %6438 = vmatmul.mubr.f32.gmra.mrb[122].mxu1 %v5163_v37  ;;  %11312 = vmatprep.subr.bf16.mxu0 %v17799_v57  ;;  %v17802_v44 = vld [vmem:[#allocation161_spill] sm:$0xff]  ;;  %v5238_v57 = vld [vmem:[%s16803_s3 + $0x3c0] sm:$0xff] }
 0x332   :  { %v4680_v45 = vadd.f32 %v8629_v17, %v16368_v53  ;;  %v8685_v55 = vadd.f32 %v8684_v5, %v8683_v40  ;;  %v8630_v6 = vpop.f32.mrb[18].mxu0  ;;  %6442 = vmatprep.mubr.f32.mxu1 %v5189_v0  ;;  %11342 = vmatpush3.bf16.msra.mxu1 %v17645_v11  ;;  %v5211_v11 = vld [vmem:[%s16803_s3 + $0x2e8] sm:$0xff]  ;;  %v5262_v40 = vld [vmem:[%s16803_s3 + $0x480] sm:$0xff] }
 0x333   :  { %v8631_v15 = vpop.f32.mrb[19].mxu0  ;;  %6338 = vmatmul.mubr.f32.gmra.mrb[116].mxu0 %v5186_v31  ;;  %11344 = vmatprep.subr.bf16.mxu1 %v17646_v18  ;;  %v17803_v17 = vld [vmem:[#allocation163_spill] sm:$0xff] }
 0x334   :  { %v16520_v23 = vadd.f32 %v8685_v55, %v4680_v45  ;;  %v8632_v53 = vadd.f32 %v8631_v15, %v8630_v6  ;;  %v8686_v43 = vpop.f32.mrb[18].mxu1  ;;  %11314 = vmatpush3.bf16.msra.mxu0 %v17800_v62  ;;  %6342 = vmatprep.mubr.f32.mxu0 %v5212_v60  ;;  %v5264_v45 = vld [vmem:[%s16803_s3 + $0x490] sm:$0xff] }
 0x335   :  { %v8687_v59 = vpop.f32.mrb[19].mxu1  ;;  %6443 = vmatmul.mubr.f32.gmra.mrb[124].mxu1 %v5188_v56  ;;  %11316 = vmatprep.subr.bf16.mxu0 %v17801_v25  ;;  %v17804_v56 = vld [vmem:[#allocation165_spill] sm:$0xff] }
 0x336   :  { %v4685_v13 = vadd.f32 %v8632_v53, %v16387_v9  ;;  %v8688_v26 = vadd.f32 %v8687_v59, %v8686_v43  ;;  %v8633_v19 = vpop.f32.mrb[20].mxu0  ;;  %6447 = vmatprep.mubr.f32.mxu1 %v5214_v50  ;;  %11346 = vmatpush3.bf16.msra.mxu1 %v17646_v18  ;;  %v5236_v18 = vld [vmem:[%s16803_s3 + $0x3b0] sm:$0xff]  ;;  %v17805_v50 = vld [vmem:[#allocation167_spill] sm:$0xff] }
 0x337   :  { %v8634_v27 = vpop.f32.mrb[21].mxu0  ;;  %6343 = vmatmul.mubr.f32.gmra.mrb[118].mxu0 %v5211_v11  ;;  %11348 = vmatprep.subr.bf16.mxu1 %v17647_v29  ;;  %v5287_v53 = vld [vmem:[%s16803_s3 + $0x548] sm:$0xff] }
 0x338   :  { %v16539_v51 = vadd.f32 %v8688_v26, %v4685_v13  ;;  %v8635_v9 = vadd.f32 %v8634_v27, %v8633_v19  ;;  %v8689_v37 = vpop.f32.mrb[20].mxu1  ;;  %11318 = vmatpush3.bf16.msra.mxu0 %v17802_v44  ;;  %6347 = vmatprep.mubr.f32.mxu0 %v5237_v30  ;;  %v5263_v59 = vld [vmem:[%s16803_s3 + $0x488] sm:$0xff]  ;;  %v5289_v30 = vld [vmem:[%s16803_s3 + $0x558] sm:$0xff] }
 0x339   :  { %v8690_v0 = vpop.f32.mrb[21].mxu1  ;;  %6448 = vmatmul.mubr.f32.gmra.mrb[126].mxu1 %v5213_v58  ;;  %11320 = vmatprep.subr.bf16.mxu0 %v17803_v17  ;;  %v17806_v19 = vld [vmem:[#allocation169_spill] sm:$0xff]  ;;  %v17807_v27 = vld [vmem:[#allocation171_spill] sm:$0xff]  ;;  %v5314_v17 = vld [vmem:[%s16803_s3 + $0x620] sm:$0xff] }
 0x33a   :  { %v4690_v4 = vadd.f32 %v8635_v9, %v16406_v1  ;;  %v8691_v31 = vadd.f32 %v8690_v0, %v8689_v37  ;;  %v8636_v5 = vpop.f32.mrb[22].mxu0  ;;  %6452 = vmatprep.mubr.f32.mxu1 %v5239_v36  ;;  %11350 = vmatpush3.bf16.msra.mxu1 %v17647_v29  ;;  %v5261_v29 = vld [vmem:[%s16803_s3 + $0x478] sm:$0xff]  ;;  %v5312_v36 = vld [vmem:[%s16803_s3 + $0x610] sm:$0xff] }
 0x33b   :  { %v8637_v60 = vpop.f32.mrb[23].mxu0  ;;  %6348 = vmatmul.mubr.f32.gmra.mrb[120].mxu0 %v5236_v18  ;;  %11352 = vmatprep.subr.bf16.mxu1 %v17648_v47  ;;  %v5288_v18 = vld [vmem:[%s16803_s3 + $0x550] sm:$0xff] }
 0x33c   :  { %v16558_v55 = vadd.f32 %v8691_v31, %v4690_v4  ;;  %v8638_v1 = vadd.f32 %v8637_v60, %v8636_v5  ;;  %v8692_v6 = vpop.f32.mrb[22].mxu1  ;;  %11322 = vmatpush3.bf16.msra.mxu0 %v17804_v56  ;;  %6352 = vmatprep.mubr.f32.mxu0 %v5262_v40  ;;  %v5141_v60 = vld [vmem:[%s16803_s3 + $0xb8] sm:$0xff] }
 0x33d   :  { %v8693_v15 = vpop.f32.mrb[23].mxu1  ;;  %6453 = vmatmul.mubr.f32.gmra.mrb[128].mxu1 %v5238_v57  ;;  %11324 = vmatprep.subr.bf16.mxu0 %v17805_v50  ;;  %v17809_v57 = vld [vmem:[#allocation175_spill] sm:$0xff]  ;;  %v5313_v56 = vld [vmem:[%s16803_s3 + $0x618] sm:$0xff] }
 0x33e   :  { %v4695_v43 = vadd.f32 %v8638_v1, %v16425_v2  ;;  %v8694_v62 = vadd.f32 %v8693_v15, %v8692_v6  ;;  %v8727_v11 = vpop.f32.mrb[24].mxu0  ;;  %6457 = vmatprep.mubr.f32.mxu1 %v5264_v45  ;;  %11354 = vmatpush3.bf16.msra.mxu1 %v17648_v47  ;;  %v5286_v47 = vld [vmem:[%s16803_s3 + $0x540] sm:$0xff] }
 0x33f   :  { %v8728_v25 = vpop.f32.mrb[25].mxu0  ;;  %6353 = vmatmul.mubr.f32.gmra.mrb[122].mxu0 %v5261_v29  ;;  %11356 = vmatprep.subr.bf16.mxu1 %v17649_v63  ;;  %v5142_v15 = vld [vmem:[%s16803_s3 + $0xc0] sm:$0xff] }
 0x340   :  { %v16577_v13 = vadd.f32 %v8694_v62, %v4695_v43  ;;  %v8729_v2 = vadd.f32 %v8728_v25, %v8727_v11  ;;  %v8783_v26 = vpop.f32.mrb[24].mxu1  ;;  %11326 = vmatpush3.bf16.msra.mxu0 %v17806_v19  ;;  %6357 = vmatprep.mubr.f32.mxu0 %v5287_v53  ;;  %v5166_v62 = vld [vmem:[%s16803_s3 + $0x180] sm:$0xff] }
 0x341   :  { %v8784_v58 = vpop.f32.mrb[25].mxu1  ;;  %6458 = vmatmul.mubr.f32.gmra.mrb[130].mxu1 %v5263_v59  ;;  %11328 = vmatprep.subr.bf16.mxu0 %v17807_v27 }
 0x342   :  { %v4870_v9 = vadd.f32 %v8729_v2, %v16444_v34  ;;  %v8785_v37 = vadd.f32 %v8784_v58, %v8783_v26  ;;  %v8730_v44 = vpop.f32.mrb[26].mxu0  ;;  %6462 = vmatprep.mubr.f32.mxu1 %v5289_v30  ;;  %11358 = vmatpush3.bf16.msra.mxu1 %v17649_v63  ;;  %v17808_v34 = vld [vmem:[#allocation173_spill] sm:$0xff]  ;;  %v5311_v63 = vld [vmem:[%s16803_s3 + $0x608] sm:$0xff]  ;;  %v5192_v2 = vld [vmem:[%s16803_s3 + $0x250] sm:$0xff] }
 0x343   :  { %v8731_v0 = vpop.f32.mrb[27].mxu0  ;;  %6358 = vmatmul.mubr.f32.gmra.mrb[124].mxu0 %v5286_v47  ;;  %11360 = vmatprep.subr.bf16.mxu1 %v13760_v28  ;;  %v5191_v58 = vld [vmem:[%s16803_s3 + $0x248] sm:$0xff] }
 0x344   :  { %v8732_v40 = vadd.f32 %v8731_v0, %v8730_v44  ;;  %v8786_v4 = vpop.f32.mrb[26].mxu1  ;;  %11330 = vmatpush3.bf16.msra.mxu0 %v17808_v34  ;;  %6362 = vmatprep.mubr.f32.mxu0 %v5312_v36  ;;  %v16600_v31 = vadd.f32 %v8785_v37, %v4870_v9  ;;  %v5217_v37 = vld [vmem:[%s16803_s3 + $0x318] sm:$0xff]  ;;  %v5216_v34 = vld [vmem:[%s16803_s3 + $0x310] sm:$0xff] }
 0x345   :  { %v8787_v5 = vpop.f32.mrb[27].mxu1  ;;  %6463 = vmatmul.mubr.f32.gmra.mrb[132].mxu1 %v5288_v18  ;;  %11332 = vmatprep.subr.bf16.mxu0 %v17809_v57  ;;  %v5242_v18 = vld [vmem:[%s16803_s3 + $0x3e0] sm:$0xff] }
 0x346   :  { %v4875_v45 = vadd.f32 %v8732_v40, %v16463_v21  ;;  %v8788_v1 = vadd.f32 %v8787_v5, %v8786_v4  ;;  %v8733_v6 = vpop.f32.mrb[28].mxu0  ;;  %6467 = vmatprep.mubr.f32.mxu1 %v5314_v17  ;;  %11362 = vmatpush3.bf16.msra.mxu1 %v13760_v28  ;;  %v5140_v28 = vld [vmem:[%s16803_s3 + $0xb0] sm:$0xff] }
 0x347   :  { %v8734_v29 = vpop.f32.mrb[29].mxu0  ;;  %6363 = vmatmul.mubr.f32.gmra.mrb[126].mxu0 %v5311_v63  ;;  %11364 = vmatprep.subr.bf16.mxu1 %v13784_v10 }
 0x348   :  { %v8735_v50 = vadd.f32 %v8734_v29, %v8733_v6  ;;  %v8789_v53 = vpop.f32.mrb[28].mxu1  ;;  %11334 = vmatpush3.bf16.msra.mxu0 %v13610_v61  ;;  %6537 = vmatprep.mubr.f32.mxu0 %v5141_v60  ;;  %v16619_v21 = vadd.f32 %v8788_v1, %v4875_v45  ;;  %v5167_v61 = vld [vmem:[%s16803_s3 + $0x188] sm:$0xff]  ;;  %v5292_v1 = vld [vmem:[%s16803_s3 + $0x570] sm:$0xff] }
 0x349   :  { %v8790_v43 = vpop.f32.mrb[29].mxu1  ;;  %6468 = vmatmul.mubr.f32.gmra.mrb[134].mxu1 %v5313_v56  ;;  %v5267_v60 = vld [vmem:[%s16803_s3 + $0x4a8] sm:$0xff] }
 0x34a   :  { %v4880_v11 = vadd.f32 %v8735_v50, %v16482_v49  ;;  %v8791_v59 = vadd.f32 %v8790_v43, %v8789_v53  ;;  %v8736_v25 = vpop.f32.mrb[30].mxu0  ;;  %11366 = vmatpush3.bf16.msra.mxu1 %v13784_v10  ;;  %9691 = vmatprep.mubr.f32.mxu1 %v5142_v15  ;;  %v5165_v49 = vld [vmem:[%s16803_s3 + $0x178] sm:$0xff] }
 0x34b   :  { %v8737_v30 = vpop.f32.mrb[31].mxu0  ;;  %6538 = vmatmul.mubr.f32.vlgmr.msra.gmra.mrb[128].mxu0 %v5140_v28  ;;  %v5241_v50 = vld [vmem:[%s16803_s3 + $0x3d8] sm:$0xff] }
 0x34c   :  { %v8738_v26 = vadd.f32 %v8737_v30, %v8736_v25  ;;  %v8792_v19 = vpop.f32.mrb[30].mxu1  ;;  %6542 = vmatprep.mubr.f32.mxu0 %v5166_v62  ;;  %v16635_v47 = vadd.f32 %v8791_v59, %v4880_v11  ;;  %v5317_v62 = vld [vmem:[%s16803_s3 + $0x638] sm:$0xff] }
 0x34d   :  { %v8793_v10 = vpop.f32.mrb[31].mxu1  ;;  %9692 = vmatmul.mubr.f32.vlgmr.msra.gmra.mrb[136].mxu1 %v5167_v61  ;;  %v5240_v61 = vld [vmem:[%s16803_s3 + $0x3d0] sm:$0xff] }
 0x34e   :  { %v4885_v27 = vadd.f32 %v8738_v26, %v16501_v41  ;;  %v8794_v36 = vadd.f32 %v8793_v10, %v8792_v19  ;;  %v8739_v9 = vpop.f32.mrb[32].mxu0  ;;  %9694 = vmatprep.mubr.f32.mxu1 %v5192_v2  ;;  %v5190_v41 = vld [vmem:[%s16803_s3 + $0x240] sm:$0xff] }
 0x34f   :  { %v8740_v44 = vpop.f32.mrb[33].mxu0  ;;  %6543 = vmatmul.mubr.f32.gmra.mrb[130].mxu0 %v5165_v49 }
 0x350   :  { %v8741_v0 = vadd.f32 %v8740_v44, %v8739_v9  ;;  %v8795_v17 = vpop.f32.mrb[32].mxu1  ;;  %6547 = vmatprep.mubr.f32.mxu0 %v5191_v58  ;;  %v4990_v40 = vadd.f32 %v8794_v36, %v4885_v27  ;;  %v5265_v36 = vld [vmem:[%s16803_s3 + $0x498] sm:$0xff]  ;;  %v5291_v44 = vld [vmem:[%s16803_s3 + $0x568] sm:$0xff] }
 0x351   :  { %v8796_v4 = vpop.f32.mrb[33].mxu1  ;;  %9695 = vmatmul.mubr.f32.gmra.mrb[138].mxu1 %v5217_v37 }
 0x352   :  { %v4890_v63 = vadd.f32 %v8741_v0, %v16520_v23  ;;  %v8797_v5 = vadd.f32 %v8796_v4, %v8795_v17  ;;  %v8742_v57 = vpop.f32.mrb[34].mxu0  ;;  %9697 = vmatprep.mubr.f32.mxu1 %v5242_v18  ;;  %v5215_v23 = vld [vmem:[%s16803_s3 + $0x308] sm:$0xff] }
 0x353   :  { %v8743_v45 = vpop.f32.mrb[35].mxu0  ;;  %6548 = vmatmul.mubr.f32.gmra.mrb[132].mxu0 %v5190_v41 }
 0x354   :  { %v8744_v6 = vadd.f32 %v8743_v45, %v8742_v57  ;;  %v8798_v56 = vpop.f32.mrb[34].mxu1  ;;  %6552 = vmatprep.mubr.f32.mxu0 %v5216_v34  ;;  %v4995_v29 = vadd.f32 %v8797_v5, %v4890_v63  ;;  %v5290_v34 = vld [vmem:[%s16803_s3 + $0x560] sm:$0xff] }
 0x355   :  { %v8799_v15 = vpop.f32.mrb[35].mxu1  ;;  %9698 = vmatmul.mubr.f32.gmra.mrb[140].mxu1 %v5267_v60 }
 0x356   :  { %v4895_v53 = vadd.f32 %v8744_v6, %v16539_v51  ;;  %v8800_v28 = vadd.f32 %v8799_v15, %v8798_v56  ;;  %v8745_v43 = vpop.f32.mrb[36].mxu0  ;;  %9700 = vmatprep.mubr.f32.mxu1 %v5292_v1  ;;  %v5266_v51 = vld [vmem:[%s16803_s3 + $0x4a0] sm:$0xff]  ;;  %v5315_v6 = vld [vmem:[%s16803_s3 + $0x628] sm:$0xff] }
 0x357   :  { %v8746_v11 = vpop.f32.mrb[37].mxu0  ;;  %6553 = vmatmul.mubr.f32.gmra.mrb[134].mxu0 %v5215_v23 }
 0x358   :  { %v8747_v59 = vadd.f32 %v8746_v11, %v8745_v43  ;;  %v8801_v25 = vpop.f32.mrb[36].mxu1  ;;  %6557 = vmatprep.mubr.f32.mxu0 %v5241_v50  ;;  %v5000_v30 = vadd.f32 %v8800_v28, %v4895_v53 }
 0x359   :  { %v8802_v2 = vpop.f32.mrb[37].mxu1  ;;  %9701 = vmatmul.mubr.f32.gmra.mrb[142].mxu1 %v5317_v62 }
 0x35a   :  { %v4900_v26 = vadd.f32 %v8747_v59, %v16558_v55  ;;  %v8803_v19 = vadd.f32 %v8802_v2, %v8801_v25  ;;  %v8748_v49 = vpop.f32.mrb[38].mxu0 }
 0x35b   :  { %v8749_v10 = vpop.f32.mrb[39].mxu0  ;;  %6558 = vmatmul.mubr.f32.gmra.mrb[136].mxu0 %v5240_v61 }
 0x35c   :  { %v8750_v58 = vadd.f32 %v8749_v10, %v8748_v49  ;;  %v8804_v27 = vpop.f32.mrb[38].mxu1  ;;  %6562 = vmatprep.mubr.f32.mxu0 %v5266_v51  ;;  %v5005_v9 = vadd.f32 %v8803_v19, %v4900_v26 }
 0x35d   :  { %v8805_v37 = vpop.f32.mrb[39].mxu1 }
 0x35e   :  { %v4905_v18 = vadd.f32 %v8750_v58, %v16577_v13  ;;  %v8806_v55 = vadd.f32 %v8805_v37, %v8804_v27  ;;  %v9649_v0 = vpop.f32.mrb[40].mxu0  ;;  %v5316_v13 = vld [vmem:[%s16803_s3 + $0x630] sm:$0xff] }
 0x35f   :  { %v16685_v17 = vadd.f32 %v9649_v0, %v16619_v21  ;;  %v5079_v41 = vpop.f32.mrb[41].mxu0  ;;  %6563 = vmatmul.mubr.f32.gmra.mrb[138].mxu0 %v5265_v36 }
 0x360   :  { %v16688_v4 = vadd.f32 %v5079_v41, %v16600_v31  ;;  %6567 = vmatprep.mubr.f32.mxu0 %v5291_v44  ;;  %v5010_v63 = vadd.f32 %v8806_v55, %v4905_v18  ;;  %v8863_v5 = vpop.f32.mrb[40].mxu1 }
 0x361   :  { %v8864_v57 = vpop.f32.mrb[41].mxu1 }
 0x362   :  { %v9652_v60 = vpop.f32.mrb[42].mxu0  ;;  %v8865_v21 = vadd.f32 %v8864_v57, %v8863_v5 }
 0x363   :  { %v16696_v45 = vadd.f32 %v9652_v60, %v4990_v40  ;;  %v5089_v1 = vpop.f32.mrb[43].mxu0  ;;  %6568 = vmatmul.mubr.f32.gmra.mrb[140].mxu0 %v5290_v34 }
 0x364   :  { %v16699_v31 = vadd.f32 %v5089_v1, %v16635_v47  ;;  %6572 = vmatprep.mubr.f32.mxu0 %v5316_v13  ;;  %v8866_v56 = vpop.f32.mrb[42].mxu1 }
 0x365   :  { %v8867_v23 = vpop.f32.mrb[43].mxu1 }
 0x366   :  { %v9655_v15 = vpop.f32.mrb[44].mxu0  ;;  %v8868_v50 = vadd.f32 %v8867_v23, %v8866_v56 }
 0x367   :  { %v16704_v53 = vadd.f32 %v9655_v15, %v5000_v30  ;;  %v5099_v28 = vpop.f32.mrb[45].mxu0  ;;  %6573 = vmatmul.mubr.f32.gmra.mrb[142].mxu0 %v5315_v6 }
 0x368   :  { %v16706_v40 = vadd.f32 %v5099_v28, %v4995_v29  ;;  %v8869_v43 = vpop.f32.mrb[44].mxu1 }
 0x369   :  { %v8870_v62 = vpop.f32.mrb[45].mxu1 }
 0x36a   :  { %v9658_v11 = vpop.f32.mrb[46].mxu0  ;;  %v8871_v47 = vadd.f32 %v8870_v62, %v8869_v43 }
 0x36b   :  { %v16708_v59 = vadd.f32 %v9658_v11, %v5010_v63  ;;  %v5109_v25 = vpop.f32.mrb[47].mxu0 }
 0x36c   :  { %v16710_v61 = vadd.f32 %v5109_v25, %v5005_v9  ;;  %v8872_v2 = vpop.f32.mrb[46].mxu1 }
 0x36d   :  { %v8873_v51 = vpop.f32.mrb[47].mxu1 }
 0x36e   :  { %v8874_v26 = vadd.f32 %v8873_v51, %v8872_v2 }
 0x370   :  { %v8875_v19 = vpop.f32.mrb[48].mxu1 }
 0x371   :  { %v8876_v49 = vpop.f32.mrb[49].mxu1 }
 0x372   :  { %v8877_v30 = vadd.f32 %v8876_v49, %v8875_v19 }
 0x374   :  { %v8878_v10 = vpop.f32.mrb[50].mxu1 }
 0x375   :  { %v8879_v58 = vpop.f32.mrb[51].mxu1 }
 0x376   :  { %v8880_v27 = vadd.f32 %v8879_v58, %v8878_v10 }
 0x378   :  { %v8881_v29 = vpop.f32.mrb[52].mxu1 }
 0x379   :  { %v8882_v36 = vpop.f32.mrb[53].mxu1 }
 0x37a   :  { %v8883_v37 = vadd.f32 %v8882_v36, %v8881_v29 }
 0x37c   :  { %v8884_v44 = vpop.f32.mrb[54].mxu1 }
 0x37d   :  { %v8885_v18 = vpop.f32.mrb[55].mxu1 }
 0x37e   :  { %v8919_v55 = vpop.f32.mrb[48].mxu0  ;;  %v8886_v0 = vadd.f32 %v8885_v18, %v8884_v44 }
 0x37f   :  { %v8920_v41 = vpop.f32.mrb[49].mxu0 }
 0x380   :  { %v8921_v34 = vadd.f32 %v8920_v41, %v8919_v55  ;;  %v8975_v9 = vpop.f32.mrb[56].mxu1 }
 0x381   :  { %v8976_v63 = vpop.f32.mrb[57].mxu1 }
 0x382   :  { %v5490_v5 = vadd.f32 %v8921_v34, %v8865_v21  ;;  %v8977_v13 = vadd.f32 %v8976_v63, %v8975_v9  ;;  %v8922_v57 = vpop.f32.mrb[50].mxu0 }
 0x383   :  { %v8923_v60 = vpop.f32.mrb[51].mxu0 }
 0x384   :  { %v5595_v1 = vadd.f32 %v8977_v13, %v5490_v5  ;;  %v8924_v6 = vadd.f32 %v8923_v60, %v8922_v57  ;;  %v8978_v56 = vpop.f32.mrb[58].mxu1 }
 0x385   :  { %v8979_v23 = vpop.f32.mrb[59].mxu1 }
 0x386   :  { %v5495_v15 = vadd.f32 %v8924_v6, %v8868_v50  ;;  %v8980_v28 = vadd.f32 %v8979_v23, %v8978_v56  ;;  %v8925_v43 = vpop.f32.mrb[52].mxu0 }
 0x387   :  { %v8926_v62 = vpop.f32.mrb[53].mxu0 }
 0x388   :  { %v5600_v11 = vadd.f32 %v8980_v28, %v5495_v15  ;;  %v8927_v25 = vadd.f32 %v8926_v62, %v8925_v43  ;;  %v8981_v2 = vpop.f32.mrb[60].mxu1 }
 0x389   :  { %v8982_v51 = vpop.f32.mrb[61].mxu1 }
 0x38a   :  { %v5500_v19 = vadd.f32 %v8927_v25, %v8871_v47  ;;  %v8983_v49 = vadd.f32 %v8982_v51, %v8981_v2  ;;  %v8928_v10 = vpop.f32.mrb[54].mxu0 }
 0x38b   :  { %v8929_v58 = vpop.f32.mrb[55].mxu0 }
 0x38c   :  { %v5605_v21 = vadd.f32 %v8983_v49, %v5500_v19  ;;  %v8930_v29 = vadd.f32 %v8929_v58, %v8928_v10  ;;  %v8984_v36 = vpop.f32.mrb[62].mxu1 }
 0x38d   :  { %v8985_v44 = vpop.f32.mrb[63].mxu1 }
 0x38e   :  { %v5505_v18 = vadd.f32 %v8930_v29, %v8874_v26  ;;  %v8986_v55 = vadd.f32 %v8985_v44, %v8984_v36  ;;  %v8931_v41 = vpop.f32.mrb[56].mxu0 }
 0x38f   :  { %v8932_v34 = vpop.f32.mrb[57].mxu0 }
 0x390   :  { %v5610_v50 = vadd.f32 %v8986_v55, %v5505_v18  ;;  %v8933_v9 = vadd.f32 %v8932_v34, %v8931_v41  ;;  %v8987_v63 = vpop.f32.mrb[64].mxu1 }
 0x391   :  { %v8988_v5 = vpop.f32.mrb[65].mxu1 }
 0x392   :  { %v5510_v13 = vadd.f32 %v8933_v9, %v8877_v30  ;;  %v8989_v57 = vadd.f32 %v8988_v5, %v8987_v63  ;;  %v8934_v60 = vpop.f32.mrb[58].mxu0 }
 0x393   :  { %v8935_v6 = vpop.f32.mrb[59].mxu0 }
 0x394   :  { %v5615_v47 = vadd.f32 %v8989_v57, %v5510_v13  ;;  %v8936_v56 = vadd.f32 %v8935_v6, %v8934_v60  ;;  %v8990_v23 = vpop.f32.mrb[66].mxu1 }
 0x395   :  { %v8991_v15 = vpop.f32.mrb[67].mxu1 }
 0x396   :  { %v5515_v28 = vadd.f32 %v8936_v56, %v8880_v27  ;;  %v8992_v43 = vadd.f32 %v8991_v15, %v8990_v23  ;;  %v8937_v62 = vpop.f32.mrb[60].mxu0 }
 0x397   :  { %v8938_v25 = vpop.f32.mrb[61].mxu0 }
 0x398   :  { %v5620_v26 = vadd.f32 %v8992_v43, %v5515_v28  ;;  %v8939_v2 = vadd.f32 %v8938_v25, %v8937_v62  ;;  %v8993_v51 = vpop.f32.mrb[68].mxu1 }
 0x399   :  { %v8994_v19 = vpop.f32.mrb[69].mxu1 }
 0x39a   :  { %v5520_v49 = vadd.f32 %v8939_v2, %v8883_v37  ;;  %v8995_v10 = vadd.f32 %v8994_v19, %v8993_v51  ;;  %v8940_v58 = vpop.f32.mrb[62].mxu0 }
 0x39b   :  { %v8941_v29 = vpop.f32.mrb[63].mxu0 }
 0x39c   :  { %v5625_v30 = vadd.f32 %v8995_v10, %v5520_v49  ;;  %v8942_v36 = vadd.f32 %v8941_v29, %v8940_v58  ;;  %v8996_v44 = vpop.f32.mrb[70].mxu1 }
 0x39d   :  { %v8997_v18 = vpop.f32.mrb[71].mxu1 }
 0x39e   :  { %v5525_v55 = vadd.f32 %v8942_v36, %v8886_v0  ;;  %v8998_v41 = vadd.f32 %v8997_v18, %v8996_v44  ;;  %v9031_v34 = vpop.f32.mrb[64].mxu0 }
 0x39f   :  { %v9032_v9 = vpop.f32.mrb[65].mxu0 }
 0x3a0   :  { %v5630_v27 = vadd.f32 %v8998_v41, %v5525_v55  ;;  %v9033_v63 = vadd.f32 %v9032_v9, %v9031_v34  ;;  %v9087_v5 = vpop.f32.mrb[72].mxu1 }
 0x3a1   :  { %v9088_v13 = vpop.f32.mrb[73].mxu1 }
 0x3a2   :  { %v5700_v57 = vadd.f32 %v9033_v63, %v5595_v1  ;;  %v9089_v60 = vadd.f32 %v9088_v13, %v9087_v5  ;;  %v9034_v6 = vpop.f32.mrb[66].mxu0 }
 0x3a3   :  { %v9035_v56 = vpop.f32.mrb[67].mxu0 }
 0x3a4   :  { %v5805_v37 = vadd.f32 %v9089_v60, %v5700_v57  ;;  %v9036_v23 = vadd.f32 %v9035_v56, %v9034_v6  ;;  %v9090_v15 = vpop.f32.mrb[74].mxu1 }
 0x3a5   :  { %v9091_v28 = vpop.f32.mrb[75].mxu1 }
 0x3a6   :  { %v5705_v43 = vadd.f32 %v9036_v23, %v5600_v11  ;;  %v9092_v62 = vadd.f32 %v9091_v28, %v9090_v15  ;;  %v9037_v25 = vpop.f32.mrb[68].mxu0 }
 0x3a7   :  { %v9038_v2 = vpop.f32.mrb[69].mxu0 }
 0x3a8   :  { %v5810_v0 = vadd.f32 %v9092_v62, %v5705_v43  ;;  %v9039_v51 = vadd.f32 %v9038_v2, %v9037_v25  ;;  %v9093_v19 = vpop.f32.mrb[76].mxu1 }
 0x3a9   :  { %v9094_v49 = vpop.f32.mrb[77].mxu1 }
 0x3aa   :  { %v5710_v10 = vadd.f32 %v9039_v51, %v5605_v21  ;;  %v9095_v58 = vadd.f32 %v9094_v49, %v9093_v19  ;;  %v9040_v29 = vpop.f32.mrb[70].mxu0 }
 0x3ab   :  { %v9041_v36 = vpop.f32.mrb[71].mxu0 }
 0x3ac   :  { %v5815_v1 = vadd.f32 %v9095_v58, %v5710_v10  ;;  %v9042_v44 = vadd.f32 %v9041_v36, %v9040_v29  ;;  %v9096_v18 = vpop.f32.mrb[78].mxu1 }
 0x3ad   :  { %v9097_v55 = vpop.f32.mrb[79].mxu1 }
 0x3ae   :  { %v5715_v41 = vadd.f32 %v9042_v44, %v5610_v50  ;;  %v9098_v34 = vadd.f32 %v9097_v55, %v9096_v18  ;;  %v9043_v9 = vpop.f32.mrb[72].mxu0 }
 0x3af   :  { %v9044_v63 = vpop.f32.mrb[73].mxu0 }
 0x3b0   :  { %v5820_v11 = vadd.f32 %v9098_v34, %v5715_v41  ;;  %v9045_v5 = vadd.f32 %v9044_v63, %v9043_v9  ;;  %v9099_v13 = vpop.f32.mrb[80].mxu1 }
 0x3b1   :  { %v9100_v57 = vpop.f32.mrb[81].mxu1 }
 0x3b2   :  { %v5720_v60 = vadd.f32 %v9045_v5, %v5615_v47  ;;  %v9101_v6 = vadd.f32 %v9100_v57, %v9099_v13  ;;  %v9046_v56 = vpop.f32.mrb[74].mxu0 }
 0x3b3   :  { %v9047_v23 = vpop.f32.mrb[75].mxu0 }
 0x3b4   :  { %v5825_v21 = vadd.f32 %v9101_v6, %v5720_v60  ;;  %v9048_v15 = vadd.f32 %v9047_v23, %v9046_v56  ;;  %v9102_v28 = vpop.f32.mrb[82].mxu1 }
 0x3b5   :  { %v9103_v43 = vpop.f32.mrb[83].mxu1 }
 0x3b6   :  { %v5725_v62 = vadd.f32 %v9048_v15, %v5620_v26  ;;  %v9104_v25 = vadd.f32 %v9103_v43, %v9102_v28  ;;  %v9049_v2 = vpop.f32.mrb[76].mxu0 }
 0x3b7   :  { %v9050_v51 = vpop.f32.mrb[77].mxu0 }
 0x3b8   :  { %v5830_v50 = vadd.f32 %v9104_v25, %v5725_v62  ;;  %v9051_v19 = vadd.f32 %v9050_v51, %v9049_v2  ;;  %v9105_v49 = vpop.f32.mrb[84].mxu1 }
 0x3b9   :  { %v9106_v10 = vpop.f32.mrb[85].mxu1 }
 0x3ba   :  { %v5730_v58 = vadd.f32 %v9051_v19, %v5625_v30  ;;  %v9107_v29 = vadd.f32 %v9106_v10, %v9105_v49  ;;  %v9052_v36 = vpop.f32.mrb[78].mxu0 }
 0x3bb   :  { %v9053_v44 = vpop.f32.mrb[79].mxu0 }
 0x3bc   :  { %v5835_v47 = vadd.f32 %v9107_v29, %v5730_v58  ;;  %v9054_v18 = vadd.f32 %v9053_v44, %v9052_v36  ;;  %v9108_v55 = vpop.f32.mrb[86].mxu1 }
 0x3bd   :  { %v9109_v41 = vpop.f32.mrb[87].mxu1 }
 0x3be   :  { %v5735_v34 = vadd.f32 %v9054_v18, %v5630_v27  ;;  %v9110_v9 = vadd.f32 %v9109_v41, %v9108_v55  ;;  %v9143_v63 = vpop.f32.mrb[80].mxu0 }
 0x3bf   :  { %v9144_v5 = vpop.f32.mrb[81].mxu0 }
 0x3c0   :  { %v5840_v26 = vadd.f32 %v9110_v9, %v5735_v34  ;;  %v9145_v13 = vadd.f32 %v9144_v5, %v9143_v63  ;;  %v9199_v57 = vpop.f32.mrb[88].mxu1 }
 0x3c1   :  { %v9200_v60 = vpop.f32.mrb[89].mxu1 }
 0x3c2   :  { %v5910_v6 = vadd.f32 %v9145_v13, %v5805_v37  ;;  %v9201_v56 = vadd.f32 %v9200_v60, %v9199_v57  ;;  %v9146_v23 = vpop.f32.mrb[82].mxu0 }
 0x3c3   :  { %v9147_v15 = vpop.f32.mrb[83].mxu0 }
 0x3c4   :  { %v6015_v30 = vadd.f32 %v9201_v56, %v5910_v6  ;;  %v9148_v28 = vadd.f32 %v9147_v15, %v9146_v23  ;;  %v9202_v43 = vpop.f32.mrb[90].mxu1 }
 0x3c5   :  { %v9203_v62 = vpop.f32.mrb[91].mxu1 }
 0x3c6   :  { %v5915_v25 = vadd.f32 %v9148_v28, %v5810_v0  ;;  %v9204_v2 = vadd.f32 %v9203_v62, %v9202_v43  ;;  %v9149_v51 = vpop.f32.mrb[84].mxu0 }
 0x3c7   :  { %v9150_v19 = vpop.f32.mrb[85].mxu0 }
 0x3c8   :  { %v6020_v27 = vadd.f32 %v9204_v2, %v5915_v25  ;;  %v9151_v49 = vadd.f32 %v9150_v19, %v9149_v51  ;;  %v9205_v10 = vpop.f32.mrb[92].mxu1 }
 0x3c9   :  { %v9206_v58 = vpop.f32.mrb[93].mxu1 }
 0x3ca   :  { %v5920_v29 = vadd.f32 %v9151_v49, %v5815_v1  ;;  %v9207_v36 = vadd.f32 %v9206_v58, %v9205_v10  ;;  %v9152_v44 = vpop.f32.mrb[86].mxu0 }
 0x3cb   :  { %v9153_v18 = vpop.f32.mrb[87].mxu0 }
 0x3cc   :  { %v6025_v37 = vadd.f32 %v9207_v36, %v5920_v29  ;;  %v9154_v55 = vadd.f32 %v9153_v18, %v9152_v44  ;;  %v9208_v41 = vpop.f32.mrb[94].mxu1 }
 0x3cd   :  { %v9209_v34 = vpop.f32.mrb[95].mxu1 }
 0x3ce   :  { %v5925_v9 = vadd.f32 %v9154_v55, %v5820_v11  ;;  %v9210_v63 = vadd.f32 %v9209_v34, %v9208_v41  ;;  %v9155_v5 = vpop.f32.mrb[88].mxu0 }
 0x3cf   :  { %v9156_v13 = vpop.f32.mrb[89].mxu0 }
 0x3d0   :  { %v6030_v0 = vadd.f32 %v9210_v63, %v5925_v9  ;;  %v9157_v57 = vadd.f32 %v9156_v13, %v9155_v5  ;;  %v9211_v60 = vpop.f32.mrb[96].mxu1 }
 0x3d1   :  { %v9212_v6 = vpop.f32.mrb[97].mxu1 }
 0x3d2   :  { %v5930_v56 = vadd.f32 %v9157_v57, %v5825_v21  ;;  %v9213_v23 = vadd.f32 %v9212_v6, %v9211_v60  ;;  %v9158_v15 = vpop.f32.mrb[90].mxu0 }
 0x3d3   :  { %v9159_v28 = vpop.f32.mrb[91].mxu0 }
 0x3d4   :  { %v6035_v1 = vadd.f32 %v9213_v23, %v5930_v56  ;;  %v9160_v43 = vadd.f32 %v9159_v28, %v9158_v15  ;;  %v9214_v62 = vpop.f32.mrb[98].mxu1 }
 0x3d5   :  { %v9215_v25 = vpop.f32.mrb[99].mxu1 }
 0x3d6   :  { %v5935_v2 = vadd.f32 %v9160_v43, %v5830_v50  ;;  %v9216_v51 = vadd.f32 %v9215_v25, %v9214_v62  ;;  %v9161_v19 = vpop.f32.mrb[92].mxu0 }
 0x3d7   :  { %v9162_v49 = vpop.f32.mrb[93].mxu0 }
 0x3d8   :  { %v6040_v11 = vadd.f32 %v9216_v51, %v5935_v2  ;;  %v9163_v10 = vadd.f32 %v9162_v49, %v9161_v19  ;;  %v9217_v58 = vpop.f32.mrb[100].mxu1 }
 0x3d9   :  { %v9218_v29 = vpop.f32.mrb[101].mxu1 }
 0x3da   :  { %v5940_v36 = vadd.f32 %v9163_v10, %v5835_v47  ;;  %v9219_v44 = vadd.f32 %v9218_v29, %v9217_v58  ;;  %v9164_v18 = vpop.f32.mrb[94].mxu0 }
 0x3db   :  { %v9165_v55 = vpop.f32.mrb[95].mxu0 }
 0x3dc   :  { %v6045_v21 = vadd.f32 %v9219_v44, %v5940_v36  ;;  %v9166_v41 = vadd.f32 %v9165_v55, %v9164_v18  ;;  %v9220_v34 = vpop.f32.mrb[102].mxu1 }
 0x3dd   :  { %v9221_v9 = vpop.f32.mrb[103].mxu1 }
 0x3de   :  { %v5945_v63 = vadd.f32 %v9166_v41, %v5840_v26  ;;  %v9222_v5 = vadd.f32 %v9221_v9, %v9220_v34  ;;  %v9255_v13 = vpop.f32.mrb[96].mxu0 }
 0x3df   :  { %v9256_v57 = vpop.f32.mrb[97].mxu0 }
 0x3e0   :  { %v6050_v50 = vadd.f32 %v9222_v5, %v5945_v63  ;;  %v9257_v60 = vadd.f32 %v9256_v57, %v9255_v13  ;;  %v9311_v6 = vpop.f32.mrb[104].mxu1 }
 0x3e1   :  { %v9312_v56 = vpop.f32.mrb[105].mxu1 }
 0x3e2   :  { %v6120_v23 = vadd.f32 %v9257_v60, %v6015_v30  ;;  %v9313_v15 = vadd.f32 %v9312_v56, %v9311_v6  ;;  %v9258_v28 = vpop.f32.mrb[98].mxu0 }
 0x3e3   :  { %v9259_v43 = vpop.f32.mrb[99].mxu0 }
 0x3e4   :  { %v6225_v47 = vadd.f32 %v9313_v15, %v6120_v23  ;;  %v9260_v62 = vadd.f32 %v9259_v43, %v9258_v28  ;;  %v9314_v25 = vpop.f32.mrb[106].mxu1 }
 0x3e5   :  { %v9315_v2 = vpop.f32.mrb[107].mxu1 }
 0x3e6   :  { %v6125_v51 = vadd.f32 %v9260_v62, %v6020_v27  ;;  %v9316_v19 = vadd.f32 %v9315_v2, %v9314_v25  ;;  %v9261_v49 = vpop.f32.mrb[100].mxu0 }
 0x3e7   :  { %v9262_v10 = vpop.f32.mrb[101].mxu0 }
 0x3e8   :  { %v6230_v26 = vadd.f32 %v9316_v19, %v6125_v51  ;;  %v9263_v58 = vadd.f32 %v9262_v10, %v9261_v49  ;;  %v9317_v29 = vpop.f32.mrb[108].mxu1 }
 0x3e9   :  { %v9318_v36 = vpop.f32.mrb[109].mxu1 }
 0x3ea   :  { %v6130_v44 = vadd.f32 %v9263_v58, %v6025_v37  ;;  %v9319_v18 = vadd.f32 %v9318_v36, %v9317_v29  ;;  %v9264_v55 = vpop.f32.mrb[102].mxu0 }
 0x3eb   :  { %v9265_v41 = vpop.f32.mrb[103].mxu0 }
 0x3ec   :  { %v6235_v30 = vadd.f32 %v9319_v18, %v6130_v44  ;;  %v9266_v34 = vadd.f32 %v9265_v41, %v9264_v55  ;;  %v9320_v9 = vpop.f32.mrb[110].mxu1 }
 0x3ed   :  { %v9321_v63 = vpop.f32.mrb[111].mxu1 }
 0x3ee   :  { %v6135_v5 = vadd.f32 %v9266_v34, %v6030_v0  ;;  %v9322_v13 = vadd.f32 %v9321_v63, %v9320_v9  ;;  %v9267_v57 = vpop.f32.mrb[104].mxu0 }
 0x3ef   :  { %v9268_v60 = vpop.f32.mrb[105].mxu0 }
 0x3f0   :  { %v6240_v27 = vadd.f32 %v9322_v13, %v6135_v5  ;;  %v9269_v6 = vadd.f32 %v9268_v60, %v9267_v57  ;;  %v9323_v56 = vpop.f32.mrb[112].mxu1 }
 0x3f1   :  { %v9324_v23 = vpop.f32.mrb[113].mxu1 }
 0x3f2   :  { %v6140_v15 = vadd.f32 %v9269_v6, %v6035_v1  ;;  %v9325_v28 = vadd.f32 %v9324_v23, %v9323_v56  ;;  %v9270_v43 = vpop.f32.mrb[106].mxu0 }
 0x3f3   :  { %v9271_v62 = vpop.f32.mrb[107].mxu0 }
 0x3f4   :  { %v6245_v37 = vadd.f32 %v9325_v28, %v6140_v15  ;;  %v9272_v25 = vadd.f32 %v9271_v62, %v9270_v43  ;;  %v9326_v2 = vpop.f32.mrb[114].mxu1 }
 0x3f5   :  { %v9327_v51 = vpop.f32.mrb[115].mxu1 }
 0x3f6   :  { %v6145_v19 = vadd.f32 %v9272_v25, %v6040_v11  ;;  %v9328_v49 = vadd.f32 %v9327_v51, %v9326_v2  ;;  %v9273_v10 = vpop.f32.mrb[108].mxu0 }
 0x3f7   :  { %v9274_v58 = vpop.f32.mrb[109].mxu0 }
 0x3f8   :  { %v6250_v0 = vadd.f32 %v9328_v49, %v6145_v19  ;;  %v9275_v29 = vadd.f32 %v9274_v58, %v9273_v10  ;;  %v9329_v36 = vpop.f32.mrb[116].mxu1 }
 0x3f9   :  { %v9330_v44 = vpop.f32.mrb[117].mxu1 }
 0x3fa   :  { %v6150_v18 = vadd.f32 %v9275_v29, %v6045_v21  ;;  %v9331_v55 = vadd.f32 %v9330_v44, %v9329_v36  ;;  %v9276_v41 = vpop.f32.mrb[110].mxu0 }
 0x3fb   :  { %v9277_v34 = vpop.f32.mrb[111].mxu0 }
 0x3fc   :  { %v6255_v1 = vadd.f32 %v9331_v55, %v6150_v18  ;;  %v9278_v9 = vadd.f32 %v9277_v34, %v9276_v41  ;;  %v9332_v63 = vpop.f32.mrb[118].mxu1 }
 0x3fd   :  { %v9333_v5 = vpop.f32.mrb[119].mxu1 }
 0x3fe   :  { %v6155_v13 = vadd.f32 %v9278_v9, %v6050_v50  ;;  %v9334_v57 = vadd.f32 %v9333_v5, %v9332_v63  ;;  %v9367_v60 = vpop.f32.mrb[112].mxu0 }
 0x3ff   :  { %v9368_v6 = vpop.f32.mrb[113].mxu0 }
 0x400   :  { %v6260_v11 = vadd.f32 %v9334_v57, %v6155_v13  ;;  %v9369_v56 = vadd.f32 %v9368_v6, %v9367_v60  ;;  %v9423_v23 = vpop.f32.mrb[120].mxu1 }
 0x401   :  { %v9424_v15 = vpop.f32.mrb[121].mxu1 }
 0x402   :  { %v6330_v28 = vadd.f32 %v9369_v56, %v6225_v47  ;;  %v9425_v43 = vadd.f32 %v9424_v15, %v9423_v23  ;;  %v9370_v62 = vpop.f32.mrb[114].mxu0 }
 0x403   :  { %v9371_v25 = vpop.f32.mrb[115].mxu0 }
 0x404   :  { %v6435_v21 = vadd.f32 %v9425_v43, %v6330_v28  ;;  %v9372_v2 = vadd.f32 %v9371_v25, %v9370_v62  ;;  %v9426_v51 = vpop.f32.mrb[122].mxu1 }
 0x405   :  { %v9427_v19 = vpop.f32.mrb[123].mxu1 }
 0x406   :  { %v6335_v49 = vadd.f32 %v9372_v2, %v6230_v26  ;;  %v9428_v10 = vadd.f32 %v9427_v19, %v9426_v51  ;;  %v9373_v58 = vpop.f32.mrb[116].mxu0 }
 0x407   :  { %v9374_v29 = vpop.f32.mrb[117].mxu0 }
 0x408   :  { %v6440_v50 = vadd.f32 %v9428_v10, %v6335_v49  ;;  %v9375_v36 = vadd.f32 %v9374_v29, %v9373_v58  ;;  %v9429_v44 = vpop.f32.mrb[124].mxu1 }
 0x409   :  { %v9430_v18 = vpop.f32.mrb[125].mxu1 }
 0x40a   :  { %v6340_v55 = vadd.f32 %v9375_v36, %v6235_v30  ;;  %v9431_v41 = vadd.f32 %v9430_v18, %v9429_v44  ;;  %v9376_v34 = vpop.f32.mrb[118].mxu0 }
 0x40b   :  { %v9377_v9 = vpop.f32.mrb[119].mxu0 }
 0x40c   :  { %v16712_v47 = vadd.f32 %v9431_v41, %v6340_v55  ;;  %v9378_v63 = vadd.f32 %v9377_v9, %v9376_v34  ;;  %v9432_v5 = vpop.f32.mrb[126].mxu1 }
 0x40d   :  { %v9433_v13 = vpop.f32.mrb[127].mxu1 }
 0x40e   :  { %v6345_v57 = vadd.f32 %v9378_v63, %v6240_v27  ;;  %v9434_v60 = vadd.f32 %v9433_v13, %v9432_v5  ;;  %v9379_v6 = vpop.f32.mrb[120].mxu0 }
 0x40f   :  { %v9380_v26 = vpop.f32.mrb[121].mxu0 }
 0x410   :  { %v16714_v56 = vadd.f32 %v9434_v60, %v6345_v57  ;;  %v9381_v23 = vadd.f32 %v9380_v26, %v9379_v6  ;;  %v9435_v15 = vpop.f32.mrb[128].mxu1 }
 0x411   :  { %v9436_v28 = vpop.f32.mrb[129].mxu1 }
 0x412   :  { %v6350_v43 = vadd.f32 %v9381_v23, %v6245_v37  ;;  %v9437_v62 = vadd.f32 %v9436_v28, %v9435_v15  ;;  %v9382_v30 = vpop.f32.mrb[122].mxu0 }
 0x413   :  { %v9383_v25 = vpop.f32.mrb[123].mxu0 }
 0x414   :  { %v16716_v2 = vadd.f32 %v9437_v62, %v6350_v43  ;;  %v9384_v51 = vadd.f32 %v9383_v25, %v9382_v30  ;;  %v9438_v19 = vpop.f32.mrb[130].mxu1 }
 0x415   :  { %v9439_v49 = vpop.f32.mrb[131].mxu1 }
 0x416   :  { %v6355_v10 = vadd.f32 %v9384_v51, %v6250_v0  ;;  %v9440_v58 = vadd.f32 %v9439_v49, %v9438_v19  ;;  %v9385_v27 = vpop.f32.mrb[124].mxu0 }
 0x417   :  { %v9386_v29 = vpop.f32.mrb[125].mxu0 }
 0x418   :  { %v16718_v36 = vadd.f32 %v9440_v58, %v6355_v10  ;;  %v9387_v44 = vadd.f32 %v9386_v29, %v9385_v27  ;;  %v9441_v18 = vpop.f32.mrb[132].mxu1 }
 0x419   :  { %v9442_v55 = vpop.f32.mrb[133].mxu1 }
 0x41a   :  { %v6360_v41 = vadd.f32 %v9387_v44, %v6255_v1  ;;  %v9443_v34 = vadd.f32 %v9442_v55, %v9441_v18  ;;  %v9388_v37 = vpop.f32.mrb[126].mxu0 }
 0x41b   :  { %v9389_v9 = vpop.f32.mrb[127].mxu0 }
 0x41c   :  { %v16720_v63 = vadd.f32 %v9443_v34, %v6360_v41  ;;  %v9390_v5 = vadd.f32 %v9389_v9, %v9388_v37  ;;  %v9444_v13 = vpop.f32.mrb[134].mxu1 }
 0x41d   :  { %v9445_v57 = vpop.f32.mrb[135].mxu1 }
 0x41e   :  { %v6365_v60 = vadd.f32 %v9390_v5, %v6260_v11  ;;  %v9446_v6 = vadd.f32 %v9445_v57, %v9444_v13  ;;  %v9479_v0 = vpop.f32.mrb[128].mxu0  ;;  %v16728_v11 = vld [vmem:[%s16804_s5] ss:$0 sm:$0xff] }
 0x41f   :  { %v9480_v26 = vpop.f32.mrb[129].mxu0 }
 0x420   :  { %v16722_v23 = vadd.f32 %v9446_v6, %v6365_v60  ;;  %v9481_v15 = vadd.f32 %v9480_v26, %v9479_v0  ;;  %v9693_v28 = vpop.f32.mrb[136].mxu1 }
 0x421   :  { %v6644_v43 = vpop.f32.mrb[137].mxu1 }
 0x422   :  { %v9482_v62 = vpop.f32.mrb[130].mxu0  ;;  %v6540_v30 = vadd.f32 %v9481_v15, %v6435_v21 }
 0x423   :  { %v9483_v1 = vpop.f32.mrb[131].mxu0 }
 0x424   :  { %v9484_v25 = vadd.f32 %v9483_v1, %v9482_v62  ;;  %v6645_v51 = vadd.f32 %v6644_v43, %v6540_v30  ;;  %v9696_v19 = vpop.f32.mrb[138].mxu1  ;;  %v17810_v62 = vmax.f32 %v14783_v32, %v15761_v33  ;;  %v17811_v32 = vmax.f32 %v17656_v20, %v15782_v8 }
 0x425   :  { %v6654_v49 = vpop.f32.mrb[139].mxu1 }
 0x426   :  { %v6545_v10 = vadd.f32 %v9484_v25, %v6440_v50  ;;  %v6691_v58 = vmax.f32 %v16688_v4, %v6645_v51  ;;  %v9485_v27 = vpop.f32.mrb[132].mxu0 }
 0x427   :  { %v9486_v29 = vpop.f32.mrb[133].mxu0 }
 0x428   :  { %v6650_v44 = vadd.f32 %v9693_v28, %v6545_v10  ;;  %v6699_v21 = vmax.f32 %v6683_v52, %v6691_v58  ;;  %v9487_v18 = vadd.f32 %v9486_v29, %v9485_v27  ;;  %v9699_v55 = vpop.f32.mrb[140].mxu1 }
 0x429   :  { %v6664_v41 = vpop.f32.mrb[141].mxu1 }
 0x42a   :  { %v6692_v34 = vmax.f32 %v16685_v17, %v6650_v44  ;;  %v6714_v50 = vadd.f32 %v16728_v11, %v6699_v21  ;;  %v9488_v4 = vpop.f32.mrb[134].mxu0  ;;  %v6550_v37 = vadd.f32 %v9487_v18, %v16712_v47  ;;  %v17812_v44 = vmax.f32 %v17661_v35, %v15804_v3 }
 0x42b   :  { %v9489_v9 = vpop.f32.mrb[135].mxu0 }
 0x42c   :  { %v6700_v5 = vmax.f32 %v6684_v54, %v6692_v34  ;;  %v6722_v13 = vmax.f32 %v6714_v50, 0.0  ;;  %v9490_v57 = vadd.f32 %v9489_v9, %v9488_v4  ;;  %v6655_v60 = vadd.f32 %v6654_v49, %v6550_v37  ;;  %v9702_v42 = vpop.f32.mrb[142].mxu1 }
 0x42d   :  { %v6674_v38 = vpop.f32.mrb[143].mxu1  ;;  %v17813_v50 = vmax.f32 %v17666_v12, %v15819_v48  ;;  %v17814_v37 = vmax.f32 %v17671_v46, %v15835_v24 }
 0x42e   :  { %v6715_v52 = vadd.f32 %v16728_v11, %v6700_v5  ;;  %6730 = vst [vmem:[%s16805_s6] sm:$0xff] %v6722_v13  ;;  %v6555_v17 = vadd.f32 %v9490_v57, %v16714_v56  ;;  %v6693_v47 = vmax.f32 %v16699_v31, %v6655_v60  ;;  %v9491_v6 = vpop.f32.mrb[136].mxu0 }
 0x42f   :  { %v9492_v0 = vpop.f32.mrb[137].mxu0 }
 0x430   :  { %v6723_v26 = vmax.f32 %v6715_v52, 0.0  ;;  %v6660_v7 = vadd.f32 %v9696_v19, %v6555_v17  ;;  %v6701_v39 = vmax.f32 %v6685_v16, %v6693_v47  ;;  %v9493_v54 = vadd.f32 %v9492_v0, %v9491_v6 }
 0x432   :  { %6731 = vst [vmem:[%s16805_s6 + $0x8] sm:$0xff] %v6723_v26  ;;  %v6694_v15 = vmax.f32 %v16696_v45, %v6660_v7  ;;  %v6716_v28 = vadd.f32 %v16728_v11, %v6701_v39  ;;  %v9494_v56 = vpop.f32.mrb[138].mxu0  ;;  %v6560_v31 = vadd.f32 %v9493_v54, %v16716_v2 }
 0x433   :  { %v9495_v43 = vpop.f32.mrb[139].mxu0 }
 0x434   :  { %v6702_v30 = vmax.f32 %v17810_v62, %v6694_v15  ;;  %v6724_v1 = vmax.f32 %v6716_v28, 0.0  ;;  %v9496_v22 = vadd.f32 %v9495_v43, %v9494_v56  ;;  %v6665_v14 = vadd.f32 %v6664_v41, %v6560_v31 }
 0x436   :  { %v6717_v16 = vadd.f32 %v16728_v11, %v6702_v30  ;;  %6732 = vst [vmem:[%s16805_s6 + $0x10] sm:$0xff] %v6724_v1  ;;  %v6565_v45 = vadd.f32 %v9496_v22, %v16718_v36  ;;  %v6695_v25 = vmax.f32 %v16706_v40, %v6665_v14  ;;  %v9497_v51 = vpop.f32.mrb[140].mxu0 }
 0x437   :  { %v9498_v2 = vpop.f32.mrb[141].mxu0 }
 0x438   :  { %v6725_v19 = vmax.f32 %v6717_v16, 0.0  ;;  %v6670_v49 = vadd.f32 %v9699_v55, %v6565_v45  ;;  %v6703_v33 = vmax.f32 %v17811_v32, %v6695_v25  ;;  %v9499_v10 = vadd.f32 %v9498_v2, %v9497_v51 }
 0x43a   :  { %6733 = vst [vmem:[%s16805_s6 + $0x18] sm:$0xff] %v6725_v19  ;;  %v6696_v58 = vmax.f32 %v16704_v53, %v6670_v49  ;;  %v6718_v27 = vadd.f32 %v16728_v11, %v6703_v33  ;;  %v9500_v36 = vpop.f32.mrb[142].mxu0  ;;  %v6570_v40 = vadd.f32 %v9499_v10, %v16720_v63 }
 0x43b   :  { %v9501_v29 = vpop.f32.mrb[143].mxu0 }
 0x43c   :  { %v6704_v21 = vmax.f32 %v17812_v44, %v6696_v58  ;;  %v6726_v18 = vmax.f32 %v6718_v27, 0.0  ;;  %v9502_v8 = vadd.f32 %v9501_v29, %v9500_v36  ;;  %v6675_v20 = vadd.f32 %v6674_v38, %v6570_v40 }
 0x43e   :  { %v6719_v55 = vadd.f32 %v16728_v11, %v6704_v21  ;;  %6734 = vst [vmem:[%s16805_s6 + $0x20] sm:$0xff] %v6726_v18  ;;  %v6575_v53 = vadd.f32 %v9502_v8, %v16722_v23  ;;  %v6697_v41 = vmax.f32 %v16710_v61, %v6675_v20 }
 0x440   :  { %v6727_v34 = vmax.f32 %v6719_v55, 0.0  ;;  %v6680_v63 = vadd.f32 %v9702_v42, %v6575_v53  ;;  %v6705_v3 = vmax.f32 %v17813_v50, %v6697_v41 }
 0x442   :  { %6735 = vst [vmem:[%s16805_s6 + $0x28] sm:$0xff] %v6727_v34  ;;  %v6698_v35 = vmax.f32 %v16708_v59, %v6680_v63  ;;  %v6720_v4 = vadd.f32 %v16728_v11, %v6705_v3 }
 0x444   :  { %v6706_v23 = vmax.f32 %v17814_v37, %v6698_v35  ;;  %v6728_v9 = vmax.f32 %v6720_v4, 0.0 }
 0x446   :  { %v6721_v61 = vadd.f32 %v16728_v11, %v6706_v23  ;;  %6736 = vst [vmem:[%s16805_s6 + $0x30] sm:$0xff] %v6728_v9 }
 0x448   :  { %v6729_v48 = vmax.f32 %v6721_v61, 0.0 }
 0x44a   :  { %6737 = vst [vmem:[%s16805_s6 + $0x38] sm:$0xff] %v6729_v48 }

</bundles_post_ra>
